<compile_context>
chip_gen: v6e
topology: v6e:2x2x1
jax: 0.10.0
libtpu: 0.0.40
codegen_flags: <defaults>
</compile_context>

<pallas_src>
import jax
import jax.numpy as jnp
from jax.experimental import pallas as pl
from jax.experimental.pallas import tpu as pltpu

# ---- model hyper-params (efficientnet-b3 head) ----
C_FEAT = 1536        # n_channels_dict['efficientnet-b3']
INTER1 = 256
INTER2 = 256
N_BLOODS = 40        # len(temp_bloods.columns): bloods + age + gender + ethnicity + days_from_onset


def _head_kernel(feat_ref, bloods_ref,
                 w1_ref, b1_ref, w2_ref, b2_ref,
                 wfx_ref, wfy_ref, bf_ref,
                 out_ref):
    # feat_ref: [bm, C, HW]  (native NCHW view: C on sublanes, HW on lanes)
    feat = feat_ref[...].astype(jnp.float32)
    pooled = jnp.mean(feat, axis=-1)                                   # [bm, C]  AdaptiveAvgPool2d(1)

    # mini_model: Linear+ReLU(+Dropout=id), Linear+ReLU(+Dropout=id)
    bl = bloods_ref[...].astype(jnp.float32)                           # [bm, nb]
    h1 = jnp.dot(bl, w1_ref[...], preferred_element_type=jnp.float32) + b1_ref[...]
    h1 = jnp.maximum(h1, 0.0)
    h2 = jnp.dot(h1, w2_ref[...], preferred_element_type=jnp.float32) + b2_ref[...]
    h2 = jnp.maximum(h2, 0.0)

    # final_fc on concat([pooled, h2]): VPU multiply + lane reduce (avoid N=1 MXU matmul)
    out = (jnp.sum(pooled * wfx_ref[...], axis=-1, keepdims=True)
           + jnp.sum(h2 * wfy_ref[...], axis=-1, keepdims=True)
           + bf_ref[0])
    out_ref[...] = out.astype(out_ref.dtype)


def model_head(feat_nchw, bloods, params, *, bm=None):
    """feat_nchw: [B, C, Hf, Wf] backbone features (f32 or bf16); bloods: [B, N_BLOODS]."""
    B, C, Hf, Wf = feat_nchw.shape
    HW = Hf * Wf
    nb = bloods.shape[1]
    # Free view of the native NCHW layout -- no HBM transpose/rewrite of the feature map.
    feat = feat_nchw.reshape(B, C, HW)

    w1, b1, w2, b2, wf, bf = params
    # PyTorch Linear weights are [out, in]; pre-transpose to [in, out] for x @ W.
    w1_t = w1.T                                  # [nb, 256]
    w2_t = w2.T                                  # [256, 256]
    wfx = wf[:, :C]                              # [1, C]      lane-dense row
    wfy = wf[:, C:]                              # [1, INTER2] lane-dense row
    b1_r = b1.reshape(1, INTER1)
    b2_r = b2.reshape(1, INTER2)
    bf_s = bf.reshape(1)                         # scalar bias -> SMEM

    # Batch block: ~2-8 MiB bf16 feat tile (2 buffers fit v5e's 16 MiB scoped VMEM);
    # partial-batch blocks must be sublane (8) aligned.
    if bm is None:
        bm = 8
    if bm >= B:
        bm = B
    else:
        bm = max(8, (bm // 8) * 8)
    Bp = pl.cdiv(B, bm) * bm
    if Bp != B:
        pad = Bp - B
        feat = jnp.pad(feat, ((0, pad), (0, 0), (0, 0)))
        bloods = jnp.pad(bloods, ((0, pad), (0, 0)))

    def whole(shape):
        return pl.BlockSpec(shape, lambda i, _s=shape: (0,) * len(_s))

    out = pl.pallas_call(
        _head_kernel,
        out_shape=jax.ShapeDtypeStruct((Bp, 1), jnp.float32),
        grid=(Bp // bm,),
        in_specs=[
            pl.BlockSpec((bm, C, HW), lambda i: (i, 0, 0)),          # feat   (streamed, pipelined)
            pl.BlockSpec((bm, nb), lambda i: (i, 0)),                # bloods (streamed)
            whole((nb, INTER1)), whole((1, INTER1)),                 # w1, b1 (resident)
            whole((INTER1, INTER2)), whole((1, INTER2)),             # w2, b2
            whole((1, C)), whole((1, INTER2)),                       # wfx, wfy
            pl.BlockSpec(memory_space=pltpu.MemorySpace.SMEM),       # bf scalar
        ],
        out_specs=pl.BlockSpec((bm, 1), lambda i: (i, 0)),
        compiler_params=pltpu.CompilerParams(
            dimension_semantics=("parallel",)),                      # shard batch across v7x TCs
    )(feat, bloods, w1_t, b1_r, w2_t, b2_r, wfx, wfy, bf_s)
    return out[:B]


def init_params(key):
    ks = jax.random.split(key, 6)
    scale = 0.02
    w1 = scale * jax.random.normal(ks[0], (INTER1, N_BLOODS), jnp.float32)
    b1 = scale * jax.random.normal(ks[1], (INTER1,), jnp.float32)
    w2 = scale * jax.random.normal(ks[2], (INTER2, INTER1), jnp.float32)
    b2 = scale * jax.random.normal(ks[3], (INTER2,), jnp.float32)
    wf = scale * jax.random.normal(ks[4], (1, C_FEAT + INTER2), jnp.float32)
    bf = scale * jax.random.normal(ks[5], (1,), jnp.float32)
    return (w1, b1, w2, b2, wf, bf)


if __name__ == "__main__":
    key = jax.random.PRNGKey(0)
    k_feat, k_bloods, k_params = jax.random.split(key, 3)

    B, Hf, Wf = 2, 4, 4
    # Backbone feature-map stand-in (EfficientNet-b3 -> 1536 channels), fed in bf16.
    feat = jax.random.normal(k_feat, (B, C_FEAT, Hf, Wf), jnp.float32).astype(jnp.bfloat16)
    bloods = jax.random.normal(k_bloods, (B, N_BLOODS), jnp.float32)
    params = init_params(k_params)

    out = model_head(feat, bloods, params)
    out = jax.block_until_ready(out)

    # Reference check in plain JAX (eval mode: dropout = identity), same bf16 feat input.
    w1, b1, w2, b2, wf, bf = params
    pooled = jnp.mean(feat.astype(jnp.float32), axis=(2, 3))
    h = jnp.maximum(bloods @ w1.T + b1, 0.0)
    h = jnp.maximum(h @ w2.T + b2, 0.0)
    ref = jnp.concatenate([pooled, h], axis=1) @ wf.T + bf

    assert out.shape == (B, 1)
    assert jnp.allclose(out, ref, atol=1e-3, rtol=1e-3)

    print("KERNEL_OK")
</pallas_src>

<mosaic_0001>
module attributes {stable_mosaic.version = 11 : i64} {
  func.func @_head_kernel(%arg0: i32, %arg1: memref<2x1536x16xbf16, #tpu.memory_space<vmem>>, %arg2: memref<2x40xf32, #tpu.memory_space<vmem>>, %arg3: memref<40x256xf32, #tpu.memory_space<vmem>>, %arg4: memref<1x256xf32, #tpu.memory_space<vmem>>, %arg5: memref<256x256xf32, #tpu.memory_space<vmem>>, %arg6: memref<1x256xf32, #tpu.memory_space<vmem>>, %arg7: memref<1x1536xf32, #tpu.memory_space<vmem>>, %arg8: memref<1x256xf32, #tpu.memory_space<vmem>>, %arg9: memref<1xf32, #tpu.memory_space<smem>>, %arg10: memref<2x1xf32, #tpu.memory_space<vmem>>) attributes {dimension_semantics = [#tpu.dimension_semantics<parallel>], iteration_bounds = array<i64: 1>, scalar_prefetch = 0 : i64, scratch_operands = 0 : i64, tpu.core_type = #tpu.core_type<tc>, window_params = [{transform_indices = @transform_0, window_bounds = array<i64: 2, 1536, 16>}, {transform_indices = @transform_1, window_bounds = array<i64: 2, 40>}, {pipeline_mode = #tpu.pipeline_mode<synchronous>, transform_indices = @transform_2, window_bounds = array<i64: 40, 256>}, {pipeline_mode = #tpu.pipeline_mode<synchronous>, transform_indices = @transform_3, window_bounds = array<i64: 1, 256>}, {pipeline_mode = #tpu.pipeline_mode<synchronous>, transform_indices = @transform_4, window_bounds = array<i64: 256, 256>}, {pipeline_mode = #tpu.pipeline_mode<synchronous>, transform_indices = @transform_5, window_bounds = array<i64: 1, 256>}, {pipeline_mode = #tpu.pipeline_mode<synchronous>, transform_indices = @transform_6, window_bounds = array<i64: 1, 1536>}, {pipeline_mode = #tpu.pipeline_mode<synchronous>, transform_indices = @transform_7, window_bounds = array<i64: 1, 256>}, {transform_indices = @transform_8, window_bounds = array<i64: 1>}, {transform_indices = @transform_9, window_bounds = array<i64: 2, 1>}]} {
    %c0 = arith.constant 0 : index
    %c0_0 = arith.constant 0 : index
    %c0_1 = arith.constant 0 : index
    %0 = vector.load %arg1[%c0, %c0_0, %c0_1] : memref<2x1536x16xbf16, #tpu.memory_space<vmem>>, vector<2x1536x16xbf16>
    %1 = arith.extf %0 : vector<2x1536x16xbf16> to vector<2x1536x16xf32>
    %cst = arith.constant dense<0.000000e+00> : vector<2x1536xf32>
    %2 = vector.multi_reduction <add>, %1, %cst [2] : vector<2x1536x16xf32> to vector<2x1536xf32>
    %cst_2 = arith.constant 1.600000e+01 : f32
    %3 = vector.broadcast %cst_2 : f32 to vector<2x1536xf32>
    %4 = arith.divf %2, %3 : vector<2x1536xf32>
    %c0_3 = arith.constant 0 : index
    %c0_4 = arith.constant 0 : index
    %5 = vector.load %arg2[%c0_3, %c0_4] : memref<2x40xf32, #tpu.memory_space<vmem>>, vector<2x40xf32>
    %c0_5 = arith.constant 0 : index
    %c0_6 = arith.constant 0 : index
    %6 = vector.load %arg3[%c0_5, %c0_6] : memref<40x256xf32, #tpu.memory_space<vmem>>, vector<40x256xf32>
    %cst_7 = arith.constant dense<0.000000e+00> : vector<2x256xf32>
    %7 = tpu.matmul %5, %6, %cst_7 {dimension_numbers = #tpu.dot_dimension_numbers<[1], [0], [0], [1], [0, 0, 1, 1], [], []>} : vector<2x40xf32>, vector<40x256xf32>, vector<2x256xf32> -> vector<2x256xf32>
    %c0_8 = arith.constant 0 : index
    %c0_9 = arith.constant 0 : index
    %8 = vector.load %arg4[%c0_8, %c0_9] : memref<1x256xf32, #tpu.memory_space<vmem>>, vector<1x256xf32>
    %9 = vector.broadcast %8 : vector<1x256xf32> to vector<2x256xf32>
    %10 = arith.addf %7, %9 : vector<2x256xf32>
    %cst_10 = arith.constant 0.000000e+00 : f32
    %11 = vector.broadcast %cst_10 : f32 to vector<2x256xf32>
    %12 = arith.maximumf %10, %11 : vector<2x256xf32>
    %c0_11 = arith.constant 0 : index
    %c0_12 = arith.constant 0 : index
    %13 = vector.load %arg5[%c0_11, %c0_12] : memref<256x256xf32, #tpu.memory_space<vmem>>, vector<256x256xf32>
    %cst_13 = arith.constant dense<0.000000e+00> : vector<2x256xf32>
    %14 = tpu.matmul %12, %13, %cst_13 {dimension_numbers = #tpu.dot_dimension_numbers<[1], [0], [0], [1], [0, 0, 1, 1], [], []>} : vector<2x256xf32>, vector<256x256xf32>, vector<2x256xf32> -> vector<2x256xf32>
    %c0_14 = arith.constant 0 : index
    %c0_15 = arith.constant 0 : index
    %15 = vector.load %arg6[%c0_14, %c0_15] : memref<1x256xf32, #tpu.memory_space<vmem>>, vector<1x256xf32>
    %16 = vector.broadcast %15 : vector<1x256xf32> to vector<2x256xf32>
    %17 = arith.addf %14, %16 : vector<2x256xf32>
    %cst_16 = arith.constant 0.000000e+00 : f32
    %18 = vector.broadcast %cst_16 : f32 to vector<2x256xf32>
    %19 = arith.maximumf %17, %18 : vector<2x256xf32>
    %c0_17 = arith.constant 0 : index
    %c0_18 = arith.constant 0 : index
    %20 = vector.load %arg7[%c0_17, %c0_18] : memref<1x1536xf32, #tpu.memory_space<vmem>>, vector<1x1536xf32>
    %21 = vector.broadcast %20 : vector<1x1536xf32> to vector<2x1536xf32>
    %22 = arith.mulf %4, %21 : vector<2x1536xf32>
    %cst_19 = arith.constant dense<0.000000e+00> : vector<2xf32>
    %23 = vector.multi_reduction <add>, %22, %cst_19 [1] : vector<2x1536xf32> to vector<2xf32>
    %24 = vector.shape_cast %23 : vector<2xf32> to vector<2x1xf32>
    %c0_20 = arith.constant 0 : index
    %c0_21 = arith.constant 0 : index
    %25 = vector.load %arg8[%c0_20, %c0_21] : memref<1x256xf32, #tpu.memory_space<vmem>>, vector<1x256xf32>
    %26 = vector.broadcast %25 : vector<1x256xf32> to vector<2x256xf32>
    %27 = arith.mulf %19, %26 : vector<2x256xf32>
    %cst_22 = arith.constant dense<0.000000e+00> : vector<2xf32>
    %28 = vector.multi_reduction <add>, %27, %cst_22 [1] : vector<2x256xf32> to vector<2xf32>
    %29 = vector.shape_cast %28 : vector<2xf32> to vector<2x1xf32>
    %30 = arith.addf %24, %29 : vector<2x1xf32>
    %c0_23 = arith.constant 0 : index
    %31 = memref.load %arg9[%c0_23] : memref<1xf32, #tpu.memory_space<smem>>
    %32 = vector.broadcast %31 : f32 to vector<2x1xf32>
    %33 = arith.addf %30, %32 : vector<2x1xf32>
    %c0_24 = arith.constant 0 : index
    %c0_25 = arith.constant 0 : index
    %34 = vector.load %arg10[%c0_24, %c0_25] : memref<2x1xf32, #tpu.memory_space<vmem>>, vector<2x1xf32>
    tpu.vector_store %arg10[%c0_24, %c0_25], %33 {strides = array<i32>} : memref<2x1xf32, #tpu.memory_space<vmem>>, vector<2x1xf32>,
    return
  }
  func.func @transform_0(%arg0: i32) -> (i32, i32, i32) {
    %c0_i32 = arith.constant 0 : i32
    %c0_i32_0 = arith.constant 0 : i32
    %c0_i32_1 = arith.constant 0 : i32
    return %arg0, %c0_i32, %c0_i32_0 : i32, i32, i32
  }
  func.func @transform_1(%arg0: i32) -> (i32, i32) {
    %c0_i32 = arith.constant 0 : i32
    %c0_i32_0 = arith.constant 0 : i32
    return %arg0, %c0_i32 : i32, i32
  }
  func.func @transform_2(%arg0: i32) -> (i32, i32) {
    %c0_i32 = arith.constant 0 : i32
    %c0_i32_0 = arith.constant 0 : i32
    %c0_i32_1 = arith.constant 0 : i32
    return %c0_i32, %c0_i32_0 : i32, i32
  }
  func.func @transform_3(%arg0: i32) -> (i32, i32) {
    %c0_i32 = arith.constant 0 : i32
    %c0_i32_0 = arith.constant 0 : i32
    %c0_i32_1 = arith.constant 0 : i32
    return %c0_i32, %c0_i32_0 : i32, i32
  }
  func.func @transform_4(%arg0: i32) -> (i32, i32) {
    %c0_i32 = arith.constant 0 : i32
    %c0_i32_0 = arith.constant 0 : i32
    %c0_i32_1 = arith.constant 0 : i32
    return %c0_i32, %c0_i32_0 : i32, i32
  }
  func.func @transform_5(%arg0: i32) -> (i32, i32) {
    %c0_i32 = arith.constant 0 : i32
    %c0_i32_0 = arith.constant 0 : i32
    %c0_i32_1 = arith.constant 0 : i32
    return %c0_i32, %c0_i32_0 : i32, i32
  }
  func.func @transform_6(%arg0: i32) -> (i32, i32) {
    %c0_i32 = arith.constant 0 : i32
    %c0_i32_0 = arith.constant 0 : i32
    %c0_i32_1 = arith.constant 0 : i32
    return %c0_i32, %c0_i32_0 : i32, i32
  }
  func.func @transform_7(%arg0: i32) -> (i32, i32) {
    %c0_i32 = arith.constant 0 : i32
    %c0_i32_0 = arith.constant 0 : i32
    %c0_i32_1 = arith.constant 0 : i32
    return %c0_i32, %c0_i32_0 : i32, i32
  }
  func.func @transform_8(%arg0: i32) -> i32 {
    %c0_i32 = arith.constant 0 : i32
    %c0_i32_0 = arith.constant 0 : i32
    return %c0_i32 : i32
  }
  func.func @transform_9(%arg0: i32) -> (i32, i32) {
    %c0_i32 = arith.constant 0 : i32
    %c0_i32_0 = arith.constant 0 : i32
    return %arg0, %c0_i32 : i32, i32
  }
}

</mosaic_0001>

<bundles_post_ra>
// kernel: tpu_custom_call.1
= control target key start
LH: loop header
LB: loop body
LE: loop exit
PB: predicated region body
PF: predicated region fallthrough
CT: control target
= control target key end

     0   :  { %vm801_vm0 = vcmask 130048   ;;  %vm2362_vm1 = vcmask 326656   ;;  %vm5519_vm2 = vcmask 130112   ;;  %vm14220_vm3 = vcmask 195712   ;;  %s14008_s0 = inlined_call_operand.vmem [shape: bf16[2,1536,16], index: 0, kind: input, shape index: {}]   ;;  %s14009_s6 = inlined_call_operand.vmem [shape: f32[1,1536], index: 6, kind: input, shape index: {}]   ;;  %s14010_s2 = inlined_call_operand.vmem [shape: f32[40,256], index: 2, kind: input, shape index: {}]   ;;  %s14011_s1 = inlined_call_operand.vmem [shape: f32[2,40], index: 1, kind: input, shape index: {}]   ;;  %s14012_s4 = inlined_call_operand.vmem [shape: f32[256,256], index: 4, kind: input, shape index: {}]   ;;  %s14013_s3 = inlined_call_operand.vmem [shape: f32[1,256], index: 3, kind: input, shape index: {}]   ;;  %s14014_s5 = inlined_call_operand.vmem [shape: f32[1,256], index: 5, kind: input, shape index: {}]   ;;  %s14015_s7 = inlined_call_operand.vmem [shape: f32[1,256], index: 7, kind: input, shape index: {}]   ;;  %s14016_s8 = inlined_call_operand.<no memory space> [shape: f32[1], index: 8, kind: input, shape index: {}]   ;;  %s14017_s9 = inlined_call_operand.vmem [shape: f32[2,1], index: 9, kind: output, shape index: {}]  }
   0x1   :  { %v8285_v0 = vld [vmem:[%s14008_s0 + $0x8] sm:$0xff]   ;;  %v7518_v1 = vld [vmem:[%s14008_s0] sm:$0xff]   ;;  %v8286_v6 = vld [vmem:[%s14008_s0 + $0x10] sm:$0xff]   ;;  %vm14221_vm4 = vcmask 261312   ;;  %vm5540_vm5 = vcmask 326912   ;;  %vm14219_vm6 = vcmask 392512  }
   0x2   :  { %v7523_v2 = vunpack.c.l.bf16 %v8285_v0  ;;  %v7519_v3 = vunpack.c.l.bf16 %v7518_v1  ;;  %v7524_v4 = vunpack.c.h.bf16 %v8285_v0  ;;  %v7520_v5 = vunpack.c.h.bf16 %v7518_v1  ;;  %v8287_v13 = vld [vmem:[%s14008_s0 + $0x18] sm:$0xff]   ;;  %v8288_v18 = vld [vmem:[%s14008_s0 + $0x20] sm:$0xff]   ;;  %v8289_v23 = vld [vmem:[%s14008_s0 + $0x28] sm:$0xff]  }
   0x3   :  { %v7528_v11 = vunpack.c.h.bf16 %v8286_v6  ;;  %v7527_v12 = vunpack.c.l.bf16 %v8286_v6  ;;  %v7532_v16 = vunpack.c.h.bf16 %v8287_v13  ;;  %v7531_v17 = vunpack.c.l.bf16 %v8287_v13  ;;  %v8290_v28 = vld [vmem:[%s14008_s0 + $0x30] sm:$0xff]   ;;  %v8291_v33 = vld [vmem:[%s14008_s0 + $0x38] sm:$0xff]   ;;  %v8292_v38 = vld [vmem:[%s14008_s0 + $0x40] sm:$0xff]  }
   0x4   :  { %v808_v7 = vsel %vm801_vm0, %v7523_v2, 0.0  ;;  %v802_v8 = vsel %vm801_vm0, %v7519_v3, 0.0  ;;  %v811_v9 = vsel %vm801_vm0, %v7524_v4, 0.0  ;;  %v805_v10 = vsel %vm801_vm0, %v7520_v5, 0.0  ;;  %v8293_v43 = vld [vmem:[%s14008_s0 + $0x48] sm:$0xff]   ;;  %v8294_v48 = vld [vmem:[%s14008_s0 + $0x50] sm:$0xff]  }
   0x5   :  { %809 = vadd.xlane.f32.xlu1 %v808_v7  ;;  %803 = vadd.xlane.f32.xlu0 %v802_v8  ;;  %v817_v14 = vsel %vm801_vm0, %v7528_v11, 0.0  ;;  %v814_v15 = vsel %vm801_vm0, %v7527_v12, 0.0  ;;  %v823_v19 = vsel %vm801_vm0, %v7532_v16, 0.0  ;;  %v820_v20 = vsel %vm801_vm0, %v7531_v17, 0.0  ;;  %v8295_v53 = vld [vmem:[%s14008_s0 + $0x58] sm:$0xff]   ;;  %v8296_v58 = vld [vmem:[%s14008_s0 + $0x60] sm:$0xff]  }
   0x6   :  { %v7536_v21 = vunpack.c.h.bf16 %v8288_v18  ;;  %v7535_v22 = vunpack.c.l.bf16 %v8288_v18  ;;  %v7540_v26 = vunpack.c.h.bf16 %v8289_v23  ;;  %v7539_v27 = vunpack.c.l.bf16 %v8289_v23  ;;  %v8297_v63 = vld [vmem:[%s14008_s0 + $0x68] sm:$0xff]   ;;  %v8298_v4 = vld [vmem:[%s14008_s0 + $0x70] sm:$0xff]  }
   0x7   :  { %v7544_v31 = vunpack.c.h.bf16 %v8290_v28  ;;  %v7543_v32 = vunpack.c.l.bf16 %v8290_v28  ;;  %v7548_v36 = vunpack.c.h.bf16 %v8291_v33  ;;  %v7547_v37 = vunpack.c.l.bf16 %v8291_v33 }
   0x8   :  { %v829_v24 = vsel %vm801_vm0, %v7536_v21, 0.0  ;;  %v826_v25 = vsel %vm801_vm0, %v7535_v22, 0.0  ;;  %v835_v29 = vsel %vm801_vm0, %v7540_v26, 0.0  ;;  %v832_v30 = vsel %vm801_vm0, %v7539_v27, 0.0 }
   0x9   :  { %812 = vadd.xlane.f32.xlu1 %v811_v9  ;;  %806 = vadd.xlane.f32.xlu0 %v805_v10  ;;  %v841_v34 = vsel %vm801_vm0, %v7544_v31, 0.0  ;;  %v838_v35 = vsel %vm801_vm0, %v7543_v32, 0.0  ;;  %v847_v39 = vsel %vm801_vm0, %v7548_v36, 0.0  ;;  %v844_v40 = vsel %vm801_vm0, %v7547_v37, 0.0  ;;  %v8299_v9 = vld [vmem:[%s14008_s0 + $0x78] sm:$0xff]  }
   0xa   :  { %v7552_v41 = vunpack.c.h.bf16 %v8292_v38  ;;  %v7551_v42 = vunpack.c.l.bf16 %v8292_v38  ;;  %v7556_v46 = vunpack.c.h.bf16 %v8293_v43  ;;  %v7555_v47 = vunpack.c.l.bf16 %v8293_v43 }
   0xb   :  { %v7560_v51 = vunpack.c.h.bf16 %v8294_v48  ;;  %v7559_v52 = vunpack.c.l.bf16 %v8294_v48  ;;  %v7564_v56 = vunpack.c.h.bf16 %v8295_v53  ;;  %v7563_v57 = vunpack.c.l.bf16 %v8295_v53 }
   0xc   :  { %v853_v44 = vsel %vm801_vm0, %v7552_v41, 0.0  ;;  %v850_v45 = vsel %vm801_vm0, %v7551_v42, 0.0  ;;  %v859_v49 = vsel %vm801_vm0, %v7556_v46, 0.0  ;;  %v856_v50 = vsel %vm801_vm0, %v7555_v47, 0.0 }
   0xd   :  { %818 = vadd.xlane.f32.xlu1 %v817_v14  ;;  %815 = vadd.xlane.f32.xlu0 %v814_v15  ;;  %v865_v54 = vsel %vm801_vm0, %v7560_v51, 0.0  ;;  %v862_v55 = vsel %vm801_vm0, %v7559_v52, 0.0  ;;  %v871_v59 = vsel %vm801_vm0, %v7564_v56, 0.0  ;;  %v868_v60 = vsel %vm801_vm0, %v7563_v57, 0.0  ;;  %v8300_v14 = vld [vmem:[%s14008_s0 + $0x80] sm:$0xff]  }
   0xe   :  { %v7568_v61 = vunpack.c.h.bf16 %v8296_v58  ;;  %v7567_v62 = vunpack.c.l.bf16 %v8296_v58  ;;  %v7572_v2 = vunpack.c.h.bf16 %v8297_v63  ;;  %v7571_v3 = vunpack.c.l.bf16 %v8297_v63 }
   0xf   :  { %v7576_v7 = vunpack.c.h.bf16 %v8298_v4  ;;  %v7575_v8 = vunpack.c.l.bf16 %v8298_v4  ;;  %v7580_v12 = vunpack.c.h.bf16 %v8299_v9  ;;  %v7579_v13 = vunpack.c.l.bf16 %v8299_v9 }
  0x10   :  { %v877_v0 = vsel %vm801_vm0, %v7568_v61, 0.0  ;;  %v874_v1 = vsel %vm801_vm0, %v7567_v62, 0.0  ;;  %v883_v5 = vsel %vm801_vm0, %v7572_v2, 0.0  ;;  %v880_v6 = vsel %vm801_vm0, %v7571_v3, 0.0 }
  0x11   :  { %824 = vadd.xlane.f32.xlu1 %v823_v19  ;;  %821 = vadd.xlane.f32.xlu0 %v820_v20  ;;  %v889_v10 = vsel %vm801_vm0, %v7576_v7, 0.0  ;;  %v886_v11 = vsel %vm801_vm0, %v7575_v8, 0.0  ;;  %v895_v15 = vsel %vm801_vm0, %v7580_v12, 0.0  ;;  %v892_v16 = vsel %vm801_vm0, %v7579_v13, 0.0  ;;  %v8301_v19 = vld [vmem:[%s14008_s0 + $0x88] sm:$0xff]  }
  0x12   :  { %v7584_v17 = vunpack.c.h.bf16 %v8300_v14  ;;  %v7583_v18 = vunpack.c.l.bf16 %v8300_v14  ;;  %v7588_v22 = vunpack.c.h.bf16 %v8301_v19  ;;  %v7587_v23 = vunpack.c.l.bf16 %v8301_v19 }
  0x13   :  { %vm5554_vm7 = vcmask 458112   ;;  %vm5561_vm8 = vcmask 523712   ;;  %vm5568_vm9 = vcmask 589312   ;;  %vm5575_vm10 = vcmask 654912  }
  0x14   :  { %v901_v20 = vsel %vm801_vm0, %v7584_v17, 0.0  ;;  %v898_v21 = vsel %vm801_vm0, %v7583_v18, 0.0  ;;  %v904_v26 = vsel %vm801_vm0, %v7587_v23, 0.0  ;;  %vm5582_vm11 = vcmask 720512  }
  0x15   :  { %830 = vadd.xlane.f32.xlu1 %v829_v24  ;;  %827 = vadd.xlane.f32.xlu0 %v826_v25  ;;  %v8302_v24 = vld [vmem:[%s14008_s0 + $0x90] sm:$0xff]   ;;  %v907_v25 = vsel %vm801_vm0, %v7588_v22, 0.0  ;;  %vm5589_vm12 = vcmask 786112   ;;  %vm5596_vm13 = vcmask 851712   ;;  %vm5603_vm14 = vcmask 917312  }
  0x16   :  { %v7592_v27 = vunpack.c.h.bf16 %v8302_v24  ;;  %v7591_v28 = vunpack.c.l.bf16 %v8302_v24  ;;  %vm5610_vm15 = vcmask 982912  }
  0x18   :  { %v910_v31 = vsel %vm801_vm0, %v7591_v28, 0.0 }
  0x19   :  { %836 = vadd.xlane.f32.xlu1 %v835_v29  ;;  %833 = vadd.xlane.f32.xlu0 %v832_v30  ;;  %v8303_v29 = vld [vmem:[%s14008_s0 + $0x98] sm:$0xff]   ;;  %v913_v30 = vsel %vm801_vm0, %v7592_v27, 0.0 }
  0x1a   :  { %v7596_v32 = vunpack.c.h.bf16 %v8303_v29  ;;  %v7595_v33 = vunpack.c.l.bf16 %v8303_v29 }
  0x1c   :  { %v916_v36 = vsel %vm801_vm0, %v7595_v33, 0.0 }
  0x1d   :  { %842 = vadd.xlane.f32.xlu1 %v841_v34  ;;  %839 = vadd.xlane.f32.xlu0 %v838_v35  ;;  %v8304_v34 = vld [vmem:[%s14008_s0 + $0xa0] sm:$0xff]   ;;  %v919_v35 = vsel %vm801_vm0, %v7596_v32, 0.0 }
  0x1e   :  { %v7600_v37 = vunpack.c.h.bf16 %v8304_v34  ;;  %v7599_v38 = vunpack.c.l.bf16 %v8304_v34 }
  0x20   :  { %v922_v41 = vsel %vm801_vm0, %v7599_v38, 0.0 }
  0x21   :  { %848 = vadd.xlane.f32.xlu1 %v847_v39  ;;  %845 = vadd.xlane.f32.xlu0 %v844_v40  ;;  %v8305_v39 = vld [vmem:[%s14008_s0 + $0xa8] sm:$0xff]   ;;  %v925_v40 = vsel %vm801_vm0, %v7600_v37, 0.0 }
  0x22   :  { %v7604_v42 = vunpack.c.h.bf16 %v8305_v39  ;;  %v7603_v43 = vunpack.c.l.bf16 %v8305_v39 }
  0x24   :  { %v928_v46 = vsel %vm801_vm0, %v7603_v43, 0.0 }
  0x25   :  { %854 = vadd.xlane.f32.xlu1 %v853_v44  ;;  %851 = vadd.xlane.f32.xlu0 %v850_v45  ;;  %v8306_v44 = vld [vmem:[%s14008_s0 + $0xb0] sm:$0xff]   ;;  %v931_v45 = vsel %vm801_vm0, %v7604_v42, 0.0 }
  0x26   :  { %v7608_v47 = vunpack.c.h.bf16 %v8306_v44  ;;  %v7607_v48 = vunpack.c.l.bf16 %v8306_v44 }
  0x28   :  { %v934_v51 = vsel %vm801_vm0, %v7607_v48, 0.0 }
  0x29   :  { %860 = vadd.xlane.f32.xlu1 %v859_v49  ;;  %857 = vadd.xlane.f32.xlu0 %v856_v50  ;;  %v8307_v49 = vld [vmem:[%s14008_s0 + $0xb8] sm:$0xff]   ;;  %v937_v50 = vsel %vm801_vm0, %v7608_v47, 0.0 }
  0x2a   :  { %v7612_v52 = vunpack.c.h.bf16 %v8307_v49  ;;  %v7611_v53 = vunpack.c.l.bf16 %v8307_v49 }
  0x2c   :  { %v940_v56 = vsel %vm801_vm0, %v7611_v53, 0.0 }
  0x2d   :  { %866 = vadd.xlane.f32.xlu1 %v865_v54  ;;  %863 = vadd.xlane.f32.xlu0 %v862_v55  ;;  %v8308_v54 = vld [vmem:[%s14008_s0 + $0xc0] sm:$0xff]   ;;  %v943_v55 = vsel %vm801_vm0, %v7612_v52, 0.0 }
  0x2e   :  { %v7616_v57 = vunpack.c.h.bf16 %v8308_v54  ;;  %v7615_v58 = vunpack.c.l.bf16 %v8308_v54 }
  0x30   :  { %v946_v61 = vsel %vm801_vm0, %v7615_v58, 0.0 }
  0x31   :  { %872 = vadd.xlane.f32.xlu1 %v871_v59  ;;  %869 = vadd.xlane.f32.xlu0 %v868_v60  ;;  %v8309_v59 = vld [vmem:[%s14008_s0 + $0xc8] sm:$0xff]   ;;  %v949_v60 = vsel %vm801_vm0, %v7616_v57, 0.0 }
  0x32   :  { %v7620_v62 = vunpack.c.h.bf16 %v8309_v59  ;;  %v7619_v63 = vunpack.c.l.bf16 %v8309_v59  ;;  %v8321_v57 = vld [vmem:[%s14008_s0 + $0x128] sm:$0xff]  }
  0x34   :  { %v952_v2 = vsel %vm801_vm0, %v7619_v63, 0.0  ;;  %v7667_v63 = vunpack.c.l.bf16 %v8321_v57 }
  0x35   :  { %878 = vadd.xlane.f32.xlu1 %v877_v0  ;;  %875 = vadd.xlane.f32.xlu0 %v874_v1  ;;  %v8310_v0 = vld [vmem:[%s14008_s0 + $0xd0] sm:$0xff]   ;;  %v955_v1 = vsel %vm801_vm0, %v7620_v62, 0.0  ;;  %v7668_v62 = vunpack.c.h.bf16 %v8321_v57 }
  0x36   :  { %v7624_v3 = vunpack.c.h.bf16 %v8310_v0  ;;  %v7623_v4 = vunpack.c.l.bf16 %v8310_v0  ;;  %v8322_v0 = vld [vmem:[%s14008_s0 + $0x130] sm:$0xff]  }
  0x38   :  { %v958_v7 = vsel %vm801_vm0, %v7623_v4, 0.0  ;;  %v1024_v4 = vsel %vm801_vm0, %v7667_v63, 0.0 }
  0x39   :  { %884 = vadd.xlane.f32.xlu1 %v883_v5  ;;  %881 = vadd.xlane.f32.xlu0 %v880_v6  ;;  %v8311_v5 = vld [vmem:[%s14008_s0 + $0xd8] sm:$0xff]   ;;  %v961_v6 = vsel %vm801_vm0, %v7624_v3, 0.0  ;;  %v1027_v3 = vsel %vm801_vm0, %v7668_v62, 0.0 }
  0x3a   :  { %v7628_v8 = vunpack.c.h.bf16 %v8311_v5  ;;  %v7627_v9 = vunpack.c.l.bf16 %v8311_v5  ;;  %v7672_v5 = vunpack.c.h.bf16 %v8322_v0 }
  0x3c   :  { %v964_v12 = vsel %vm801_vm0, %v7627_v9, 0.0 }
  0x3d   :  { %890 = vadd.xlane.f32.xlu1 %v889_v10  ;;  %887 = vadd.xlane.f32.xlu0 %v886_v11  ;;  %v8312_v10 = vld [vmem:[%s14008_s0 + $0xe0] sm:$0xff]   ;;  %v967_v11 = vsel %vm801_vm0, %v7628_v8, 0.0 }
  0x3e   :  { %v7632_v13 = vunpack.c.h.bf16 %v8312_v10  ;;  %v7631_v14 = vunpack.c.l.bf16 %v8312_v10  ;;  %v1033_v10 = vsel %vm801_vm0, %v7672_v5, 0.0  ;;  %v8331_v5 = vld [vmem:[%s14008_s0 + $0x178] sm:$0xff]  }
  0x40   :  { %v970_v17 = vsel %vm801_vm0, %v7631_v14, 0.0  ;;  %v8324_v14 = vld [vmem:[%s14008_s0 + $0x140] sm:$0xff]  }
  0x41   :  { %896 = vadd.xlane.f32.xlu1 %v895_v15  ;;  %893 = vadd.xlane.f32.xlu0 %v892_v16  ;;  %v8313_v15 = vld [vmem:[%s14008_s0 + $0xe8] sm:$0xff]   ;;  %v973_v16 = vsel %vm801_vm0, %v7632_v13, 0.0 }
  0x42   :  { %v7636_v18 = vunpack.c.h.bf16 %v8313_v15  ;;  %v7635_v19 = vunpack.c.l.bf16 %v8313_v15 }
  0x44   :  { %v976_v22 = vsel %vm801_vm0, %v7635_v19, 0.0  ;;  %v7680_v19 = vunpack.c.h.bf16 %v8324_v14 }
  0x45   :  { %902 = vadd.xlane.f32.xlu1 %v901_v20  ;;  %899 = vadd.xlane.f32.xlu0 %v898_v21  ;;  %v8314_v20 = vld [vmem:[%s14008_s0 + $0xf0] sm:$0xff]   ;;  %v979_v21 = vsel %vm801_vm0, %v7636_v18, 0.0 }
  0x46   :  { %v7640_v23 = vunpack.c.h.bf16 %v8314_v20  ;;  %v7639_v24 = vunpack.c.l.bf16 %v8314_v20  ;;  %v7679_v20 = vunpack.c.l.bf16 %v8324_v14  ;;  %v8332_v14 = vld [vmem:[%s14008_s0 + $0x180] sm:$0xff]  }
  0x48   :  { %v982_v27 = vsel %vm801_vm0, %v7639_v24, 0.0  ;;  %v1045_v24 = vsel %vm801_vm0, %v7680_v19, 0.0 }
  0x49   :  { %908 = vadd.xlane.f32.xlu1 %v907_v25  ;;  %905 = vadd.xlane.f32.xlu0 %v904_v26  ;;  %v8315_v25 = vld [vmem:[%s14008_s0 + $0xf8] sm:$0xff]   ;;  %v985_v26 = vsel %vm801_vm0, %v7640_v23, 0.0 }
  0x4a   :  { %v7644_v28 = vunpack.c.h.bf16 %v8315_v25  ;;  %v7643_v29 = vunpack.c.l.bf16 %v8315_v25  ;;  %v1042_v25 = vsel %vm801_vm0, %v7679_v20, 0.0 }
  0x4c   :  { %v988_v32 = vsel %vm801_vm0, %v7643_v29, 0.0 }
  0x4d   :  { %914 = vadd.xlane.f32.xlu1 %v913_v30  ;;  %911 = vadd.xlane.f32.xlu0 %v910_v31  ;;  %v8316_v30 = vld [vmem:[%s14008_s0 + $0x100] sm:$0xff]   ;;  %v991_v31 = vsel %vm801_vm0, %v7644_v28, 0.0  ;;  %v8326_v28 = vld [vmem:[%s14008_s0 + $0x150] sm:$0xff]  }
  0x4e   :  { %v7648_v33 = vunpack.c.h.bf16 %v8316_v30  ;;  %v7647_v34 = vunpack.c.l.bf16 %v8316_v30 }
  0x50   :  { %v994_v37 = vsel %vm801_vm0, %v7647_v34, 0.0  ;;  %v7687_v34 = vunpack.c.l.bf16 %v8326_v28 }
  0x51   :  { %920 = vadd.xlane.f32.xlu1 %v919_v35  ;;  %917 = vadd.xlane.f32.xlu0 %v916_v36  ;;  %v8317_v35 = vld [vmem:[%s14008_s0 + $0x108] sm:$0xff]   ;;  %v997_v36 = vsel %vm801_vm0, %v7648_v33, 0.0  ;;  %v7688_v33 = vunpack.c.h.bf16 %v8326_v28 }
  0x52   :  { %v7652_v38 = vunpack.c.h.bf16 %v8317_v35  ;;  %v7651_v39 = vunpack.c.l.bf16 %v8317_v35  ;;  %v8327_v35 = vld [vmem:[%s14008_s0 + $0x158] sm:$0xff]  }
  0x54   :  { %v1000_v42 = vsel %vm801_vm0, %v7651_v39, 0.0  ;;  %v1054_v39 = vsel %vm801_vm0, %v7687_v34, 0.0  ;;  %v8334_v34 = vld [vmem:[%s14008_s0 + $0x190] sm:$0xff]  }
  0x55   :  { %926 = vadd.xlane.f32.xlu1 %v925_v40  ;;  %923 = vadd.xlane.f32.xlu0 %v922_v41  ;;  %v8318_v40 = vld [vmem:[%s14008_s0 + $0x110] sm:$0xff]   ;;  %v1003_v41 = vsel %vm801_vm0, %v7652_v38, 0.0  ;;  %v1057_v38 = vsel %vm801_vm0, %v7688_v33, 0.0 }
  0x56   :  { %v7656_v43 = vunpack.c.h.bf16 %v8318_v40  ;;  %v7655_v44 = vunpack.c.l.bf16 %v8318_v40  ;;  %v7692_v40 = vunpack.c.h.bf16 %v8327_v35 }
  0x58   :  { %v1006_v47 = vsel %vm801_vm0, %v7655_v44, 0.0 }
  0x59   :  { %932 = vadd.xlane.f32.xlu1 %v931_v45  ;;  %929 = vadd.xlane.f32.xlu0 %v928_v46  ;;  %v8319_v45 = vld [vmem:[%s14008_s0 + $0x118] sm:$0xff]   ;;  %v1009_v46 = vsel %vm801_vm0, %v7656_v43, 0.0 }
  0x5a   :  { %v7660_v48 = vunpack.c.h.bf16 %v8319_v45  ;;  %v7659_v49 = vunpack.c.l.bf16 %v8319_v45  ;;  %v1063_v45 = vsel %vm801_vm0, %v7692_v40, 0.0 }
  0x5c   :  { %v1015_v53 = vsel %vm801_vm0, %v7660_v48, 0.0  ;;  %v1012_v54 = vsel %vm801_vm0, %v7659_v49, 0.0  ;;  %v8329_v49 = vld [vmem:[%s14008_s0 + $0x168] sm:$0xff]  }
  0x5d   :  { %938 = vadd.xlane.f32.xlu1 %v937_v50  ;;  %935 = vadd.xlane.f32.xlu0 %v934_v51  ;;  %v8320_v50 = vld [vmem:[%s14008_s0 + $0x120] sm:$0xff]   ;;  %v7699_v57 = vunpack.c.l.bf16 %v8329_v49 }
  0x61   :  { %944 = vadd.xlane.f32.xlu1 %v943_v55  ;;  %941 = vadd.xlane.f32.xlu0 %v940_v56  ;;  %v7664_v55 = vunpack.c.h.bf16 %v8320_v50  ;;  %v7663_v56 = vunpack.c.l.bf16 %v8320_v50 }
  0x65   :  { %950 = vadd.xlane.f32.xlu1 %v949_v60  ;;  %947 = vadd.xlane.f32.xlu0 %v946_v61  ;;  %v1021_v60 = vsel %vm801_vm0, %v7664_v55, 0.0  ;;  %v1018_v61 = vsel %vm801_vm0, %v7663_v56, 0.0  ;;  %v7700_v56 = vunpack.c.h.bf16 %v8329_v49 }
  0x67   :  { %v1075_v63 = vsel %vm801_vm0, %v7700_v56, 0.0  ;;  %v8336_v56 = vld [vmem:[%s14008_s0 + $0x1a0] sm:$0xff]  }
  0x69   :  { %956 = vadd.xlane.f32.xlu1 %v955_v1  ;;  %953 = vadd.xlane.f32.xlu0 %v952_v2 }
  0x6d   :  { %962 = vadd.xlane.f32.xlu1 %v961_v6  ;;  %959 = vadd.xlane.f32.xlu0 %v958_v7  ;;  %v7671_v6 = vunpack.c.l.bf16 %v8322_v0  ;;  %v8323_v7 = vld [vmem:[%s14008_s0 + $0x138] sm:$0xff]   ;;  %v1072_v0 = vsel %vm801_vm0, %v7699_v57, 0.0 }
  0x6e   :  { %v7675_v13 = vunpack.c.l.bf16 %v8323_v7 }
  0x70   :  { %v1036_v18 = vsel %vm801_vm0, %v7675_v13, 0.0  ;;  %v7707_v13 = vunpack.c.l.bf16 %v8331_v5 }
  0x71   :  { %968 = vadd.xlane.f32.xlu1 %v967_v11  ;;  %965 = vadd.xlane.f32.xlu0 %v964_v12  ;;  %v1030_v11 = vsel %vm801_vm0, %v7671_v6, 0.0  ;;  %v7676_v12 = vunpack.c.h.bf16 %v8323_v7 }
  0x72   :  { %v1084_v20 = vsel %vm801_vm0, %v7707_v13, 0.0 }
  0x75   :  { %974 = vadd.xlane.f32.xlu1 %v973_v16  ;;  %971 = vadd.xlane.f32.xlu0 %v970_v17  ;;  %v1039_v17 = vsel %vm801_vm0, %v7676_v12, 0.0  ;;  %v7708_v12 = vunpack.c.h.bf16 %v8331_v5  ;;  %v8337_v5 = vld [vmem:[%s14008_s0 + $0x1a8] sm:$0xff]  }
  0x77   :  { %v1087_v19 = vsel %vm801_vm0, %v7708_v12, 0.0 }
  0x79   :  { %980 = vadd.xlane.f32.xlu1 %v979_v21  ;;  %977 = vadd.xlane.f32.xlu0 %v976_v22  ;;  %v8325_v21 = vld [vmem:[%s14008_s0 + $0x148] sm:$0xff]  }
  0x7d   :  { %986 = vadd.xlane.f32.xlu1 %v985_v26  ;;  %983 = vadd.xlane.f32.xlu0 %v982_v27  ;;  %v7684_v26 = vunpack.c.h.bf16 %v8325_v21  ;;  %v7683_v27 = vunpack.c.l.bf16 %v8325_v21  ;;  %v7712_v21 = vunpack.c.h.bf16 %v8332_v14 }
  0x7f   :  { %v1093_v28 = vsel %vm801_vm0, %v7712_v21, 0.0 }
  0x81   :  { %992 = vadd.xlane.f32.xlu1 %v991_v31  ;;  %989 = vadd.xlane.f32.xlu0 %v988_v32  ;;  %v1051_v31 = vsel %vm801_vm0, %v7684_v26, 0.0  ;;  %v1048_v32 = vsel %vm801_vm0, %v7683_v27, 0.0 }
  0x85   :  { %998 = vadd.xlane.f32.xlu1 %v997_v36  ;;  %995 = vadd.xlane.f32.xlu0 %v994_v37 }
  0x89   :  { %1004 = vadd.xlane.f32.xlu1 %v1003_v41  ;;  %1001 = vadd.xlane.f32.xlu0 %v1000_v42  ;;  %v7691_v41 = vunpack.c.l.bf16 %v8327_v35  ;;  %v8328_v42 = vld [vmem:[%s14008_s0 + $0x160] sm:$0xff]  }
  0x8a   :  { %v7695_v48 = vunpack.c.l.bf16 %v8328_v42 }
  0x8c   :  { %v1066_v55 = vsel %vm801_vm0, %v7695_v48, 0.0 }
  0x8d   :  { %1010 = vadd.xlane.f32.xlu1 %v1009_v46  ;;  %1007 = vadd.xlane.f32.xlu0 %v1006_v47  ;;  %v1060_v46 = vsel %vm801_vm0, %v7691_v41, 0.0  ;;  %v7696_v47 = vunpack.c.h.bf16 %v8328_v42  ;;  %v7720_v41 = vunpack.c.h.bf16 %v8334_v34  ;;  %v7719_v42 = vunpack.c.l.bf16 %v8334_v34 }
  0x8e   :  { %v8713_v51 = vpop.xlane.xlu1 %809  ;;  %v8715_v52 = vpop.xlane.xlu0 %803 }
  0x8f   :  { %v1105_v48 = vsel %vm801_vm0, %v7720_v41, 0.0  ;;  %v1102_v49 = vsel %vm801_vm0, %v7719_v42, 0.0 }
  0x91   :  { %1016 = vadd.xlane.f32.xlu1 %v1015_v53  ;;  %1013 = vadd.xlane.f32.xlu0 %v1012_v54  ;;  %v1069_v54 = vsel %vm801_vm0, %v7696_v47, 0.0 }
  0x92   :  { %v8722_v58 = vpop.xlane.xlu1 %812  ;;  %v8724_v59 = vpop.xlane.xlu0 %806 }
  0x95   :  { %1022 = vadd.xlane.f32.xlu1 %v1021_v60  ;;  %1019 = vadd.xlane.f32.xlu0 %v1018_v61  ;;  %v8330_v60 = vld [vmem:[%s14008_s0 + $0x170] sm:$0xff]  }
  0x96   :  { %v8731_v1 = vpop.xlane.xlu1 %818  ;;  %v8733_v2 = vpop.xlane.xlu0 %815 }
  0x99   :  { %1028 = vadd.xlane.f32.xlu1 %v1027_v3  ;;  %1025 = vadd.xlane.f32.xlu0 %v1024_v4  ;;  %v7704_v3 = vunpack.c.h.bf16 %v8330_v60  ;;  %v7703_v4 = vunpack.c.l.bf16 %v8330_v60 }
  0x9a   :  { %v8740_v8 = vpop.xlane.xlu1 %824  ;;  %v8742_v9 = vpop.xlane.xlu0 %821 }
  0x9d   :  { %1034 = vadd.xlane.f32.xlu1 %v1033_v10  ;;  %1031 = vadd.xlane.f32.xlu0 %v1030_v11  ;;  %v1081_v10 = vsel %vm801_vm0, %v7704_v3, 0.0  ;;  %v1078_v11 = vsel %vm801_vm0, %v7703_v4, 0.0  ;;  %v7728_v3 = vunpack.c.h.bf16 %v8336_v56  ;;  %v7727_v4 = vunpack.c.l.bf16 %v8336_v56 }
  0x9e   :  { %v8749_v15 = vpop.xlane.xlu1 %830  ;;  %v8751_v16 = vpop.xlane.xlu0 %827 }
  0x9f   :  { %v1117_v12 = vsel %vm801_vm0, %v7728_v3, 0.0  ;;  %v1114_v13 = vsel %vm801_vm0, %v7727_v4, 0.0  ;;  %v8341_v3 = vld [vmem:[%s14008_s0 + $0x1c8] sm:$0xff]  }
  0xa1   :  { %1040 = vadd.xlane.f32.xlu1 %v1039_v17  ;;  %1037 = vadd.xlane.f32.xlu0 %v1036_v18 }
  0xa2   :  { %v8758_v22 = vpop.xlane.xlu1 %836  ;;  %v8760_v23 = vpop.xlane.xlu0 %833 }
  0xa5   :  { %1046 = vadd.xlane.f32.xlu1 %v1045_v24  ;;  %1043 = vadd.xlane.f32.xlu0 %v1042_v25  ;;  %v7711_v24 = vunpack.c.l.bf16 %v8332_v14  ;;  %v8333_v25 = vld [vmem:[%s14008_s0 + $0x188] sm:$0xff]   ;;  %v7732_v14 = vunpack.c.h.bf16 %v8337_v5 }
  0xa6   :  { %v8767_v29 = vpop.xlane.xlu1 %842  ;;  %v8769_v30 = vpop.xlane.xlu0 %839  ;;  %v7715_v33 = vunpack.c.l.bf16 %v8333_v25 }
  0xa8   :  { %v1096_v40 = vsel %vm801_vm0, %v7715_v33, 0.0  ;;  %v8339_v33 = vld [vmem:[%s14008_s0 + $0x1b8] sm:$0xff]  }
  0xa9   :  { %1052 = vadd.xlane.f32.xlu1 %v1051_v31  ;;  %1049 = vadd.xlane.f32.xlu0 %v1048_v32  ;;  %v1090_v31 = vsel %vm801_vm0, %v7711_v24, 0.0  ;;  %v7716_v32 = vunpack.c.h.bf16 %v8333_v25  ;;  %v1123_v25 = vsel %vm801_vm0, %v7732_v14, 0.0  ;;  %v7740_v42 = vunpack.c.h.bf16 %v8339_v33 }
  0xaa   :  { %v8776_v36 = vpop.xlane.xlu1 %848  ;;  %v8778_v37 = vpop.xlane.xlu0 %845  ;;  %v7748_v14 = vunpack.c.h.bf16 %v8341_v3 }
  0xad   :  { %1058 = vadd.xlane.f32.xlu1 %v1057_v38  ;;  %1055 = vadd.xlane.f32.xlu0 %v1054_v39  ;;  %v1099_v39 = vsel %vm801_vm0, %v7716_v32, 0.0 }
  0xae   :  { %v8785_v43 = vpop.xlane.xlu1 %854  ;;  %v8787_v44 = vpop.xlane.xlu0 %851 }
  0xb1   :  { %1064 = vadd.xlane.f32.xlu1 %v1063_v45  ;;  %1061 = vadd.xlane.f32.xlu0 %v1060_v46  ;;  %v8335_v45 = vld [vmem:[%s14008_s0 + $0x198] sm:$0xff]  }
  0xb2   :  { %v8794_v50 = vpop.xlane.xlu1 %860  ;;  %v8796_v53 = vpop.xlane.xlu0 %857 }
  0xb5   :  { %1070 = vadd.xlane.f32.xlu1 %v1069_v54  ;;  %1067 = vadd.xlane.f32.xlu0 %v1066_v55  ;;  %v7724_v54 = vunpack.c.h.bf16 %v8335_v45  ;;  %v7723_v55 = vunpack.c.l.bf16 %v8335_v45  ;;  %v7739_v45 = vunpack.c.l.bf16 %v8339_v33 }
  0xb6   :  { %v8803_v61 = vpop.xlane.xlu1 %866  ;;  %v8805_v62 = vpop.xlane.xlu0 %863 }
  0xb7   :  { %v1132_v56 = vsel %vm801_vm0, %v7739_v45, 0.0 }
  0xb9   :  { %1076 = vadd.xlane.f32.xlu1 %v1075_v63  ;;  %1073 = vadd.xlane.f32.xlu0 %v1072_v0  ;;  %v1111_v63 = vsel %vm801_vm0, %v7724_v54, 0.0  ;;  %v1108_v0 = vsel %vm801_vm0, %v7723_v55, 0.0  ;;  %v1135_v55 = vsel %vm801_vm0, %v7740_v42, 0.0 }
  0xba   :  { %v8812_v6 = vpop.xlane.xlu1 %872  ;;  %v8814_v7 = vpop.xlane.xlu0 %869 }
  0xbd   :  { %1082 = vadd.xlane.f32.xlu1 %v1081_v10  ;;  %1079 = vadd.xlane.f32.xlu0 %v1078_v11 }
  0xbe   :  { %v8821_v17 = vpop.xlane.xlu1 %878  ;;  %v8823_v18 = vpop.xlane.xlu0 %875 }
  0xbf   :  { %14223 = vst [vmem:[#allocation3_spill] sm:$0xff] %v8823_v18 }
  0xc1   :  { %1088 = vadd.xlane.f32.xlu1 %v1087_v19  ;;  %1085 = vadd.xlane.f32.xlu0 %v1084_v20  ;;  %v7731_v19 = vunpack.c.l.bf16 %v8337_v5  ;;  %v8338_v20 = vld [vmem:[%s14008_s0 + $0x1b0] sm:$0xff]  }
  0xc2   :  { %v8830_v26 = vpop.xlane.xlu1 %884  ;;  %v8832_v27 = vpop.xlane.xlu0 %881  ;;  %v7735_v32 = vunpack.c.l.bf16 %v8338_v20 }
  0xc3   :  { %14224 = vst [vmem:[#allocation4_spill] sm:$0xff] %v8830_v26  ;;  %14225 = vst [vmem:[#allocation5_spill] sm:$0xff] %v8832_v27 }
  0xc4   :  { %v1126_v41 = vsel %vm801_vm0, %v7735_v32, 0.0 }
  0xc5   :  { %1094 = vadd.xlane.f32.xlu1 %v1093_v28  ;;  %1091 = vadd.xlane.f32.xlu0 %v1090_v31  ;;  %v1120_v28 = vsel %vm801_vm0, %v7731_v19, 0.0  ;;  %v7736_v31 = vunpack.c.h.bf16 %v8338_v20  ;;  %v7747_v19 = vunpack.c.l.bf16 %v8341_v3  ;;  %v8342_v20 = vld [vmem:[%s14008_s0 + $0x1d0] sm:$0xff]  }
  0xc6   :  { %v8839_v35 = vpop.xlane.xlu1 %890  ;;  %v8841_v38 = vpop.xlane.xlu0 %887  ;;  %v7752_v33 = vunpack.c.h.bf16 %v8342_v20 }
  0xc7   :  { %14226 = vst [vmem:[#allocation6_spill] sm:$0xff] %v8839_v35  ;;  %14227 = vst [vmem:[#allocation7_spill] sm:$0xff] %v8841_v38  ;;  %v1144_v32 = vsel %vm801_vm0, %v7747_v19, 0.0 }
  0xc9   :  { %1100 = vadd.xlane.f32.xlu1 %v1099_v39  ;;  %1097 = vadd.xlane.f32.xlu0 %v1096_v40  ;;  %v1129_v40 = vsel %vm801_vm0, %v7736_v31, 0.0  ;;  %v1147_v31 = vsel %vm801_vm0, %v7748_v14, 0.0 }
  0xca   :  { %v8848_v46 = vpop.xlane.xlu1 %896  ;;  %v8850_v47 = vpop.xlane.xlu0 %893 }
  0xcb   :  { %14228 = vst [vmem:[#allocation8_spill] sm:$0xff] %v8848_v46  ;;  %14229 = vst [vmem:[#allocation9_spill] sm:$0xff] %v8850_v47 }
  0xcd   :  { %1106 = vadd.xlane.f32.xlu1 %v1105_v48  ;;  %1103 = vadd.xlane.f32.xlu0 %v1102_v49  ;;  %v8340_v48 = vld [vmem:[%s14008_s0 + $0x1c0] sm:$0xff]  }
  0xce   :  { %v8857_v57 = vpop.xlane.xlu1 %902  ;;  %v8859_v60 = vpop.xlane.xlu0 %899 }
  0xcf   :  { %14230 = vst [vmem:[#allocation10_spill] sm:$0xff] %v8857_v57  ;;  %14231 = vst [vmem:[#allocation11_spill] sm:$0xff] %v8859_v60 }
  0xd1   :  { %1112 = vadd.xlane.f32.xlu1 %v1111_v63  ;;  %1109 = vadd.xlane.f32.xlu0 %v1108_v0  ;;  %v7744_v63 = vunpack.c.h.bf16 %v8340_v48  ;;  %v7743_v0 = vunpack.c.l.bf16 %v8340_v48  ;;  %v1153_v48 = vsel %vm801_vm0, %v7752_v33, 0.0 }
  0xd2   :  { %v8866_v10 = vpop.xlane.xlu1 %908  ;;  %v8868_v11 = vpop.xlane.xlu0 %905 }
  0xd3   :  { %14232 = vst [vmem:[#allocation12_spill] sm:$0xff] %v8866_v10  ;;  %14233 = vst [vmem:[#allocation13_spill] sm:$0xff] %v8868_v11 }
  0xd5   :  { %1118 = vadd.xlane.f32.xlu1 %v1117_v12  ;;  %1115 = vadd.xlane.f32.xlu0 %v1114_v13  ;;  %v1141_v12 = vsel %vm801_vm0, %v7744_v63, 0.0  ;;  %v1138_v13 = vsel %vm801_vm0, %v7743_v0, 0.0  ;;  %v8344_v0 = vld [vmem:[%s14008_s0 + $0x1e0] sm:$0xff]  }
  0xd6   :  { %v8875_v21 = vpop.xlane.xlu1 %914  ;;  %v8877_v24 = vpop.xlane.xlu0 %911  ;;  %v7760_v19 = vunpack.c.h.bf16 %v8344_v0 }
  0xd7   :  { %14234 = vst [vmem:[#allocation14_spill] sm:$0xff] %v8875_v21  ;;  %14235 = vst [vmem:[#allocation15_spill] sm:$0xff] %v8877_v24 }
  0xd9   :  { %1124 = vadd.xlane.f32.xlu1 %v1123_v25  ;;  %1121 = vadd.xlane.f32.xlu0 %v1120_v28 }
  0xda   :  { %v8884_v34 = vpop.xlane.xlu1 %920  ;;  %v8886_v39 = vpop.xlane.xlu0 %917 }
  0xdb   :  { %14236 = vst [vmem:[#allocation16_spill] sm:$0xff] %v8884_v34  ;;  %14237 = vst [vmem:[#allocation17_spill] sm:$0xff] %v8886_v39 }
  0xdd   :  { %1130 = vadd.xlane.f32.xlu1 %v1129_v40  ;;  %1127 = vadd.xlane.f32.xlu0 %v1126_v41  ;;  %v7751_v40 = vunpack.c.l.bf16 %v8342_v20  ;;  %v8343_v41 = vld [vmem:[%s14008_s0 + $0x1d8] sm:$0xff]   ;;  %v7759_v20 = vunpack.c.l.bf16 %v8344_v0 }
  0xde   :  { %v8893_v49 = vpop.xlane.xlu1 %926  ;;  %v8895_v54 = vpop.xlane.xlu0 %923  ;;  %v7755_v63 = vunpack.c.l.bf16 %v8343_v41 }
  0xdf   :  { %14238 = vst [vmem:[#allocation18_spill] sm:$0xff] %v8893_v49  ;;  %14239 = vst [vmem:[#allocation19_spill] sm:$0xff] %v8895_v54 }
  0xe0   :  { %v1156_v14 = vsel %vm801_vm0, %v7755_v63, 0.0 }
  0xe1   :  { %1136 = vadd.xlane.f32.xlu1 %v1135_v55  ;;  %1133 = vadd.xlane.f32.xlu0 %v1132_v56  ;;  %v1150_v55 = vsel %vm801_vm0, %v7751_v40, 0.0  ;;  %v7756_v56 = vunpack.c.h.bf16 %v8343_v41  ;;  %v1165_v40 = vsel %vm801_vm0, %v7760_v19, 0.0  ;;  %v1162_v41 = vsel %vm801_vm0, %v7759_v20, 0.0  ;;  %v8347_v20 = vld [vmem:[%s14008_s0 + $0x1f8] sm:$0xff]  }
  0xe2   :  { %v8902_v4 = vpop.xlane.xlu1 %932  ;;  %v8904_v5 = vpop.xlane.xlu0 %929 }
  0xe3   :  { %14240 = vst [vmem:[#allocation20_spill] sm:$0xff] %v8902_v4  ;;  %14241 = vst [vmem:[#allocation21_spill] sm:$0xff] %v8904_v5 }
  0xe5   :  { %1142 = vadd.xlane.f32.xlu1 %v1141_v12  ;;  %1139 = vadd.xlane.f32.xlu0 %v1138_v13  ;;  %v1159_v13 = vsel %vm801_vm0, %v7756_v56, 0.0  ;;  %v8346_v56 = vld [vmem:[%s14008_s0 + $0x1f0] sm:$0xff]  }
  0xe6   :  { %v8911_v25 = vpop.xlane.xlu1 %938  ;;  %v8913_v28 = vpop.xlane.xlu0 %935  ;;  %v7767_v19 = vunpack.c.l.bf16 %v8346_v56 }
  0xe7   :  { %14242 = vst [vmem:[#allocation22_spill] sm:$0xff] %v8911_v25  ;;  %14243 = vst [vmem:[#allocation23_spill] sm:$0xff] %v8913_v28 }
  0xe9   :  { %1148 = vadd.xlane.f32.xlu1 %v1147_v31  ;;  %1145 = vadd.xlane.f32.xlu0 %v1144_v32  ;;  %v8345_v31 = vld [vmem:[%s14008_s0 + $0x1e8] sm:$0xff]  }
  0xea   :  { %v8920_v42 = vpop.xlane.xlu1 %944  ;;  %v8922_v45 = vpop.xlane.xlu0 %941 }
  0xeb   :  { %14244 = vst [vmem:[#allocation24_spill] sm:$0xff] %v8920_v42  ;;  %14245 = vst [vmem:[#allocation25_spill] sm:$0xff] %v8922_v45 }
  0xed   :  { %1154 = vadd.xlane.f32.xlu1 %v1153_v48  ;;  %1151 = vadd.xlane.f32.xlu0 %v1150_v55  ;;  %v7764_v48 = vunpack.c.h.bf16 %v8345_v31  ;;  %v7763_v55 = vunpack.c.l.bf16 %v8345_v31 }
  0xee   :  { %v8929_v3 = vpop.xlane.xlu1 %950  ;;  %v8931_v12 = vpop.xlane.xlu0 %947 }
  0xef   :  { %14246 = vst [vmem:[#allocation26_spill] sm:$0xff] %v8929_v3  ;;  %14247 = vst [vmem:[#allocation27_spill] sm:$0xff] %v8931_v12 }
  0xf1   :  { %1160 = vadd.xlane.f32.xlu1 %v1159_v13  ;;  %1157 = vadd.xlane.f32.xlu0 %v1156_v14  ;;  %v1171_v13 = vsel %vm801_vm0, %v7764_v48, 0.0  ;;  %v1168_v14 = vsel %vm801_vm0, %v7763_v55, 0.0  ;;  %v7771_v48 = vunpack.c.l.bf16 %v8347_v20  ;;  %v8348_v55 = vld [vmem:[%s14008_s0 + $0x200] sm:$0xff]  }
  0xf2   :  { %v8938_v32 = vpop.xlane.xlu1 %956  ;;  %v8940_v33 = vpop.xlane.xlu0 %953 }
  0xf3   :  { %14248 = vst [vmem:[#allocation28_spill] sm:$0xff] %v8938_v32  ;;  %14249 = vst [vmem:[#allocation29_spill] sm:$0xff] %v8940_v33  ;;  %v7768_v33 = vunpack.c.h.bf16 %v8346_v56 }
  0xf5   :  { %1166 = vadd.xlane.f32.xlu1 %v1165_v40  ;;  %1163 = vadd.xlane.f32.xlu0 %v1162_v41  ;;  %v1177_v41 = vsel %vm801_vm0, %v7768_v33, 0.0  ;;  %v7775_v33 = vunpack.c.l.bf16 %v8348_v55 }
  0xf6   :  { %v8947_v63 = vpop.xlane.xlu1 %962  ;;  %v8949_v0 = vpop.xlane.xlu0 %959 }
  0xf7   :  { %14250 = vst [vmem:[#allocation30_spill] sm:$0xff] %v8947_v63  ;;  %14251 = vst [vmem:[#allocation31_spill] sm:$0xff] %v8949_v0  ;;  %v1174_v0 = vsel %vm801_vm0, %v7767_v19, 0.0  ;;  %v7772_v63 = vunpack.c.h.bf16 %v8347_v20  ;;  %v8349_v19 = vld [vmem:[%s14008_s0 + $0x208] sm:$0xff]  }
  0xf9   :  { %1172 = vadd.xlane.f32.xlu1 %v1171_v13  ;;  %1169 = vadd.xlane.f32.xlu0 %v1168_v14  ;;  %v1183_v14 = vsel %vm801_vm0, %v7772_v63, 0.0  ;;  %v7779_v63 = vunpack.c.l.bf16 %v8349_v19 }
  0xfa   :  { %v8956_v31 = vpop.xlane.xlu1 %968  ;;  %v8958_v40 = vpop.xlane.xlu0 %965 }
  0xfb   :  { %14252 = vst [vmem:[#allocation32_spill] sm:$0xff] %v8956_v31  ;;  %14253 = vst [vmem:[#allocation33_spill] sm:$0xff] %v8958_v40  ;;  %v1180_v40 = vsel %vm801_vm0, %v7771_v48, 0.0  ;;  %v7776_v31 = vunpack.c.h.bf16 %v8348_v55  ;;  %v8350_v48 = vld [vmem:[%s14008_s0 + $0x210] sm:$0xff]  }
  0xfd   :  { %1178 = vadd.xlane.f32.xlu1 %v1177_v41  ;;  %1175 = vadd.xlane.f32.xlu0 %v1174_v0  ;;  %v1189_v0 = vsel %vm801_vm0, %v7776_v31, 0.0  ;;  %v7783_v31 = vunpack.c.l.bf16 %v8350_v48 }
  0xfe   :  { %v8965_v56 = vpop.xlane.xlu1 %974  ;;  %v8967_v13 = vpop.xlane.xlu0 %971 }
  0xff   :  { %14254 = vst [vmem:[#allocation34_spill] sm:$0xff] %v8965_v56  ;;  %14255 = vst [vmem:[#allocation35_spill] sm:$0xff] %v8967_v13  ;;  %v1186_v13 = vsel %vm801_vm0, %v7775_v33, 0.0  ;;  %v7780_v56 = vunpack.c.h.bf16 %v8349_v19  ;;  %v8351_v33 = vld [vmem:[%s14008_s0 + $0x218] sm:$0xff]  }
 0x101   :  { %1184 = vadd.xlane.f32.xlu1 %v1183_v14  ;;  %1181 = vadd.xlane.f32.xlu0 %v1180_v40  ;;  %v1195_v40 = vsel %vm801_vm0, %v7780_v56, 0.0  ;;  %v7787_v56 = vunpack.c.l.bf16 %v8351_v33 }
 0x102   :  { %v8974_v20 = vpop.xlane.xlu1 %980  ;;  %v8976_v41 = vpop.xlane.xlu0 %977 }
 0x103   :  { %14256 = vst [vmem:[#allocation36_spill] sm:$0xff] %v8974_v20  ;;  %14257 = vst [vmem:[#allocation37_spill] sm:$0xff] %v8976_v41  ;;  %v1192_v41 = vsel %vm801_vm0, %v7779_v63, 0.0  ;;  %v7784_v20 = vunpack.c.h.bf16 %v8350_v48  ;;  %v8352_v63 = vld [vmem:[%s14008_s0 + $0x220] sm:$0xff]  }
 0x105   :  { %1190 = vadd.xlane.f32.xlu1 %v1189_v0  ;;  %1187 = vadd.xlane.f32.xlu0 %v1186_v13  ;;  %v1201_v13 = vsel %vm801_vm0, %v7784_v20, 0.0  ;;  %v7791_v20 = vunpack.c.l.bf16 %v8352_v63 }
 0x106   :  { %v8983_v55 = vpop.xlane.xlu1 %986  ;;  %v8985_v14 = vpop.xlane.xlu0 %983 }
 0x107   :  { %14258 = vst [vmem:[#allocation38_spill] sm:$0xff] %v8983_v55  ;;  %14259 = vst [vmem:[#allocation39_spill] sm:$0xff] %v8985_v14  ;;  %v1198_v14 = vsel %vm801_vm0, %v7783_v31, 0.0  ;;  %v7788_v55 = vunpack.c.h.bf16 %v8351_v33  ;;  %v8353_v31 = vld [vmem:[%s14008_s0 + $0x228] sm:$0xff]  }
 0x109   :  { %1196 = vadd.xlane.f32.xlu1 %v1195_v40  ;;  %1193 = vadd.xlane.f32.xlu0 %v1192_v41  ;;  %v1207_v41 = vsel %vm801_vm0, %v7788_v55, 0.0  ;;  %v7795_v55 = vunpack.c.l.bf16 %v8353_v31 }
 0x10a   :  { %v8992_v19 = vpop.xlane.xlu1 %992  ;;  %v8994_v0 = vpop.xlane.xlu0 %989 }
 0x10b   :  { %14260 = vst [vmem:[#allocation40_spill] sm:$0xff] %v8992_v19  ;;  %14261 = vst [vmem:[#allocation41_spill] sm:$0xff] %v8994_v0  ;;  %v1204_v0 = vsel %vm801_vm0, %v7787_v56, 0.0  ;;  %v7792_v19 = vunpack.c.h.bf16 %v8352_v63  ;;  %v8354_v56 = vld [vmem:[%s14008_s0 + $0x230] sm:$0xff]  }
 0x10d   :  { %1202 = vadd.xlane.f32.xlu1 %v1201_v13  ;;  %1199 = vadd.xlane.f32.xlu0 %v1198_v14  ;;  %v1213_v14 = vsel %vm801_vm0, %v7792_v19, 0.0  ;;  %v7799_v19 = vunpack.c.l.bf16 %v8354_v56 }
 0x10e   :  { %v9001_v48 = vpop.xlane.xlu1 %998  ;;  %v9003_v40 = vpop.xlane.xlu0 %995 }
 0x10f   :  { %14262 = vst [vmem:[#allocation42_spill] sm:$0xff] %v9001_v48  ;;  %14263 = vst [vmem:[#allocation43_spill] sm:$0xff] %v9003_v40  ;;  %v1210_v40 = vsel %vm801_vm0, %v7791_v20, 0.0  ;;  %v7796_v48 = vunpack.c.h.bf16 %v8353_v31  ;;  %v8355_v20 = vld [vmem:[%s14008_s0 + $0x238] sm:$0xff]  }
 0x111   :  { %1208 = vadd.xlane.f32.xlu1 %v1207_v41  ;;  %1205 = vadd.xlane.f32.xlu0 %v1204_v0  ;;  %v1219_v0 = vsel %vm801_vm0, %v7796_v48, 0.0  ;;  %v7803_v48 = vunpack.c.l.bf16 %v8355_v20 }
 0x112   :  { %v9010_v33 = vpop.xlane.xlu1 %1004  ;;  %v9012_v13 = vpop.xlane.xlu0 %1001 }
 0x113   :  { %14264 = vst [vmem:[#allocation44_spill] sm:$0xff] %v9010_v33  ;;  %14265 = vst [vmem:[#allocation45_spill] sm:$0xff] %v9012_v13  ;;  %v1216_v13 = vsel %vm801_vm0, %v7795_v55, 0.0  ;;  %v7800_v33 = vunpack.c.h.bf16 %v8354_v56  ;;  %v8356_v55 = vld [vmem:[%s14008_s0 + $0x240] sm:$0xff]  }
 0x115   :  { %1214 = vadd.xlane.f32.xlu1 %v1213_v14  ;;  %1211 = vadd.xlane.f32.xlu0 %v1210_v40  ;;  %v1225_v40 = vsel %vm801_vm0, %v7800_v33, 0.0  ;;  %v7807_v33 = vunpack.c.l.bf16 %v8356_v55 }
 0x116   :  { %v9019_v63 = vpop.xlane.xlu1 %1010  ;;  %v9021_v41 = vpop.xlane.xlu0 %1007 }
 0x117   :  { %14266 = vst [vmem:[#allocation46_spill] sm:$0xff] %v9019_v63  ;;  %14267 = vst [vmem:[#allocation47_spill] sm:$0xff] %v9021_v41  ;;  %v1222_v41 = vsel %vm801_vm0, %v7799_v19, 0.0  ;;  %v7804_v63 = vunpack.c.h.bf16 %v8355_v20  ;;  %v8357_v19 = vld [vmem:[%s14008_s0 + $0x248] sm:$0xff]  }
 0x119   :  { %1220 = vadd.xlane.f32.xlu1 %v1219_v0  ;;  %1217 = vadd.xlane.f32.xlu0 %v1216_v13  ;;  %v1231_v13 = vsel %vm801_vm0, %v7804_v63, 0.0  ;;  %v7811_v63 = vunpack.c.l.bf16 %v8357_v19 }
 0x11a   :  { %v9028_v31 = vpop.xlane.xlu1 %1016  ;;  %v9030_v14 = vpop.xlane.xlu0 %1013 }
 0x11b   :  { %14268 = vst [vmem:[#allocation48_spill] sm:$0xff] %v9028_v31  ;;  %14269 = vst [vmem:[#allocation49_spill] sm:$0xff] %v9030_v14  ;;  %v1228_v14 = vsel %vm801_vm0, %v7803_v48, 0.0  ;;  %v7808_v31 = vunpack.c.h.bf16 %v8356_v55  ;;  %v8358_v48 = vld [vmem:[%s14008_s0 + $0x250] sm:$0xff]  }
 0x11d   :  { %1226 = vadd.xlane.f32.xlu1 %v1225_v40  ;;  %1223 = vadd.xlane.f32.xlu0 %v1222_v41  ;;  %v1237_v41 = vsel %vm801_vm0, %v7808_v31, 0.0  ;;  %v7815_v31 = vunpack.c.l.bf16 %v8358_v48 }
 0x11e   :  { %v9037_v56 = vpop.xlane.xlu1 %1022  ;;  %v9039_v0 = vpop.xlane.xlu0 %1019 }
 0x11f   :  { %14270 = vst [vmem:[#allocation50_spill] sm:$0xff] %v9037_v56  ;;  %14271 = vst [vmem:[#allocation51_spill] sm:$0xff] %v9039_v0  ;;  %v1234_v0 = vsel %vm801_vm0, %v7807_v33, 0.0  ;;  %v7812_v56 = vunpack.c.h.bf16 %v8357_v19  ;;  %v8359_v33 = vld [vmem:[%s14008_s0 + $0x258] sm:$0xff]  }
 0x121   :  { %1232 = vadd.xlane.f32.xlu1 %v1231_v13  ;;  %1229 = vadd.xlane.f32.xlu0 %v1228_v14  ;;  %v1243_v14 = vsel %vm801_vm0, %v7812_v56, 0.0  ;;  %v7819_v56 = vunpack.c.l.bf16 %v8359_v33 }
 0x122   :  { %v9046_v20 = vpop.xlane.xlu1 %1028  ;;  %v9048_v40 = vpop.xlane.xlu0 %1025 }
 0x123   :  { %14272 = vst [vmem:[#allocation52_spill] sm:$0xff] %v9046_v20  ;;  %14273 = vst [vmem:[#allocation53_spill] sm:$0xff] %v9048_v40  ;;  %v1240_v40 = vsel %vm801_vm0, %v7811_v63, 0.0  ;;  %v7816_v20 = vunpack.c.h.bf16 %v8358_v48  ;;  %v8360_v63 = vld [vmem:[%s14008_s0 + $0x260] sm:$0xff]  }
 0x125   :  { %1238 = vadd.xlane.f32.xlu1 %v1237_v41  ;;  %1235 = vadd.xlane.f32.xlu0 %v1234_v0  ;;  %v1249_v0 = vsel %vm801_vm0, %v7816_v20, 0.0  ;;  %v7823_v20 = vunpack.c.l.bf16 %v8360_v63 }
 0x126   :  { %v9055_v55 = vpop.xlane.xlu1 %1034  ;;  %v9057_v13 = vpop.xlane.xlu0 %1031 }
 0x127   :  { %14274 = vst [vmem:[#allocation54_spill] sm:$0xff] %v9055_v55  ;;  %14275 = vst [vmem:[#allocation55_spill] sm:$0xff] %v9057_v13  ;;  %v1246_v13 = vsel %vm801_vm0, %v7815_v31, 0.0  ;;  %v7820_v55 = vunpack.c.h.bf16 %v8359_v33  ;;  %v8361_v31 = vld [vmem:[%s14008_s0 + $0x268] sm:$0xff]  }
 0x129   :  { %1244 = vadd.xlane.f32.xlu1 %v1243_v14  ;;  %1241 = vadd.xlane.f32.xlu0 %v1240_v40  ;;  %v1255_v40 = vsel %vm801_vm0, %v7820_v55, 0.0  ;;  %v7827_v55 = vunpack.c.l.bf16 %v8361_v31 }
 0x12a   :  { %v9064_v19 = vpop.xlane.xlu1 %1040  ;;  %v9066_v41 = vpop.xlane.xlu0 %1037 }
 0x12b   :  { %14276 = vst [vmem:[#allocation56_spill] sm:$0xff] %v9064_v19  ;;  %14277 = vst [vmem:[#allocation57_spill] sm:$0xff] %v9066_v41  ;;  %v1252_v41 = vsel %vm801_vm0, %v7819_v56, 0.0  ;;  %v7824_v19 = vunpack.c.h.bf16 %v8360_v63  ;;  %v8362_v56 = vld [vmem:[%s14008_s0 + $0x270] sm:$0xff]  }
 0x12d   :  { %1250 = vadd.xlane.f32.xlu1 %v1249_v0  ;;  %1247 = vadd.xlane.f32.xlu0 %v1246_v13  ;;  %v1261_v13 = vsel %vm801_vm0, %v7824_v19, 0.0  ;;  %v7831_v19 = vunpack.c.l.bf16 %v8362_v56 }
 0x12e   :  { %v9073_v48 = vpop.xlane.xlu1 %1046  ;;  %v9075_v14 = vpop.xlane.xlu0 %1043 }
 0x12f   :  { %14278 = vst [vmem:[#allocation58_spill] sm:$0xff] %v9073_v48  ;;  %14279 = vst [vmem:[#allocation59_spill] sm:$0xff] %v9075_v14  ;;  %v1258_v14 = vsel %vm801_vm0, %v7823_v20, 0.0  ;;  %v7828_v48 = vunpack.c.h.bf16 %v8361_v31  ;;  %v8363_v20 = vld [vmem:[%s14008_s0 + $0x278] sm:$0xff]  }
 0x131   :  { %1256 = vadd.xlane.f32.xlu1 %v1255_v40  ;;  %1253 = vadd.xlane.f32.xlu0 %v1252_v41  ;;  %v1267_v41 = vsel %vm801_vm0, %v7828_v48, 0.0  ;;  %v7835_v48 = vunpack.c.l.bf16 %v8363_v20 }
 0x132   :  { %v9082_v33 = vpop.xlane.xlu1 %1052  ;;  %v9084_v0 = vpop.xlane.xlu0 %1049 }
 0x133   :  { %14280 = vst [vmem:[#allocation60_spill] sm:$0xff] %v9082_v33  ;;  %14281 = vst [vmem:[#allocation61_spill] sm:$0xff] %v9084_v0  ;;  %v1264_v0 = vsel %vm801_vm0, %v7827_v55, 0.0  ;;  %v7832_v33 = vunpack.c.h.bf16 %v8362_v56  ;;  %v8364_v55 = vld [vmem:[%s14008_s0 + $0x280] sm:$0xff]  }
 0x135   :  { %1262 = vadd.xlane.f32.xlu1 %v1261_v13  ;;  %1259 = vadd.xlane.f32.xlu0 %v1258_v14  ;;  %v1273_v14 = vsel %vm801_vm0, %v7832_v33, 0.0  ;;  %v7839_v33 = vunpack.c.l.bf16 %v8364_v55 }
 0x136   :  { %v9091_v63 = vpop.xlane.xlu1 %1058  ;;  %v9093_v40 = vpop.xlane.xlu0 %1055 }
 0x137   :  { %14282 = vst [vmem:[#allocation62_spill] sm:$0xff] %v9091_v63  ;;  %14283 = vst [vmem:[#allocation63_spill] sm:$0xff] %v9093_v40  ;;  %v1270_v40 = vsel %vm801_vm0, %v7831_v19, 0.0  ;;  %v7836_v63 = vunpack.c.h.bf16 %v8363_v20  ;;  %v8365_v19 = vld [vmem:[%s14008_s0 + $0x288] sm:$0xff]  }
 0x139   :  { %1268 = vadd.xlane.f32.xlu1 %v1267_v41  ;;  %1265 = vadd.xlane.f32.xlu0 %v1264_v0  ;;  %v1279_v0 = vsel %vm801_vm0, %v7836_v63, 0.0  ;;  %v7843_v63 = vunpack.c.l.bf16 %v8365_v19 }
 0x13a   :  { %v9100_v31 = vpop.xlane.xlu1 %1064  ;;  %v9102_v13 = vpop.xlane.xlu0 %1061 }
 0x13b   :  { %14284 = vst [vmem:[#allocation64_spill] sm:$0xff] %v9100_v31  ;;  %14285 = vst [vmem:[#allocation65_spill] sm:$0xff] %v9102_v13  ;;  %v1276_v13 = vsel %vm801_vm0, %v7835_v48, 0.0  ;;  %v7840_v31 = vunpack.c.h.bf16 %v8364_v55  ;;  %v8366_v48 = vld [vmem:[%s14008_s0 + $0x290] sm:$0xff]  }
 0x13d   :  { %1274 = vadd.xlane.f32.xlu1 %v1273_v14  ;;  %1271 = vadd.xlane.f32.xlu0 %v1270_v40  ;;  %v1285_v40 = vsel %vm801_vm0, %v7840_v31, 0.0  ;;  %v7847_v31 = vunpack.c.l.bf16 %v8366_v48 }
 0x13e   :  { %v9109_v56 = vpop.xlane.xlu1 %1070  ;;  %v9111_v41 = vpop.xlane.xlu0 %1067 }
 0x13f   :  { %14286 = vst [vmem:[#allocation66_spill] sm:$0xff] %v9109_v56  ;;  %14287 = vst [vmem:[#allocation67_spill] sm:$0xff] %v9111_v41  ;;  %v1282_v41 = vsel %vm801_vm0, %v7839_v33, 0.0  ;;  %v7844_v56 = vunpack.c.h.bf16 %v8365_v19  ;;  %v8367_v33 = vld [vmem:[%s14008_s0 + $0x298] sm:$0xff]  }
 0x141   :  { %1280 = vadd.xlane.f32.xlu1 %v1279_v0  ;;  %1277 = vadd.xlane.f32.xlu0 %v1276_v13  ;;  %v1291_v13 = vsel %vm801_vm0, %v7844_v56, 0.0  ;;  %v7851_v56 = vunpack.c.l.bf16 %v8367_v33 }
 0x142   :  { %v9118_v20 = vpop.xlane.xlu1 %1076  ;;  %v9120_v14 = vpop.xlane.xlu0 %1073 }
 0x143   :  { %14288 = vst [vmem:[#allocation68_spill] sm:$0xff] %v9118_v20  ;;  %14289 = vst [vmem:[#allocation69_spill] sm:$0xff] %v9120_v14  ;;  %v1288_v14 = vsel %vm801_vm0, %v7843_v63, 0.0  ;;  %v7848_v20 = vunpack.c.h.bf16 %v8366_v48  ;;  %v8368_v63 = vld [vmem:[%s14008_s0 + $0x2a0] sm:$0xff]  }
 0x145   :  { %1286 = vadd.xlane.f32.xlu1 %v1285_v40  ;;  %1283 = vadd.xlane.f32.xlu0 %v1282_v41  ;;  %v1297_v41 = vsel %vm801_vm0, %v7848_v20, 0.0  ;;  %v7855_v20 = vunpack.c.l.bf16 %v8368_v63 }
 0x146   :  { %v9127_v55 = vpop.xlane.xlu1 %1082  ;;  %v9129_v0 = vpop.xlane.xlu0 %1079 }
 0x147   :  { %14290 = vst [vmem:[#allocation70_spill] sm:$0xff] %v9127_v55  ;;  %14291 = vst [vmem:[#allocation71_spill] sm:$0xff] %v9129_v0  ;;  %v1294_v0 = vsel %vm801_vm0, %v7847_v31, 0.0  ;;  %v7852_v55 = vunpack.c.h.bf16 %v8367_v33  ;;  %v8369_v31 = vld [vmem:[%s14008_s0 + $0x2a8] sm:$0xff]  }
 0x149   :  { %1292 = vadd.xlane.f32.xlu1 %v1291_v13  ;;  %1289 = vadd.xlane.f32.xlu0 %v1288_v14  ;;  %v1303_v14 = vsel %vm801_vm0, %v7852_v55, 0.0  ;;  %v7859_v55 = vunpack.c.l.bf16 %v8369_v31 }
 0x14a   :  { %v9136_v19 = vpop.xlane.xlu1 %1088  ;;  %v9138_v40 = vpop.xlane.xlu0 %1085 }
 0x14b   :  { %14292 = vst [vmem:[#allocation72_spill] sm:$0xff] %v9136_v19  ;;  %14293 = vst [vmem:[#allocation73_spill] sm:$0xff] %v9138_v40  ;;  %v1300_v40 = vsel %vm801_vm0, %v7851_v56, 0.0  ;;  %v7856_v19 = vunpack.c.h.bf16 %v8368_v63  ;;  %v8370_v56 = vld [vmem:[%s14008_s0 + $0x2b0] sm:$0xff]  }
 0x14d   :  { %1298 = vadd.xlane.f32.xlu1 %v1297_v41  ;;  %1295 = vadd.xlane.f32.xlu0 %v1294_v0  ;;  %v1309_v0 = vsel %vm801_vm0, %v7856_v19, 0.0  ;;  %v7863_v19 = vunpack.c.l.bf16 %v8370_v56 }
 0x14e   :  { %v9145_v48 = vpop.xlane.xlu1 %1094  ;;  %v9147_v13 = vpop.xlane.xlu0 %1091 }
 0x14f   :  { %14294 = vst [vmem:[#allocation74_spill] sm:$0xff] %v9145_v48  ;;  %14295 = vst [vmem:[#allocation75_spill] sm:$0xff] %v9147_v13  ;;  %v1306_v13 = vsel %vm801_vm0, %v7855_v20, 0.0  ;;  %v7860_v48 = vunpack.c.h.bf16 %v8369_v31  ;;  %v8371_v20 = vld [vmem:[%s14008_s0 + $0x2b8] sm:$0xff]  }
 0x151   :  { %1304 = vadd.xlane.f32.xlu1 %v1303_v14  ;;  %1301 = vadd.xlane.f32.xlu0 %v1300_v40  ;;  %v1315_v40 = vsel %vm801_vm0, %v7860_v48, 0.0  ;;  %v7867_v48 = vunpack.c.l.bf16 %v8371_v20 }
 0x152   :  { %v9154_v33 = vpop.xlane.xlu1 %1100  ;;  %v9156_v41 = vpop.xlane.xlu0 %1097 }
 0x153   :  { %14296 = vst [vmem:[#allocation76_spill] sm:$0xff] %v9154_v33  ;;  %14297 = vst [vmem:[#allocation77_spill] sm:$0xff] %v9156_v41  ;;  %v1312_v41 = vsel %vm801_vm0, %v7859_v55, 0.0  ;;  %v7864_v33 = vunpack.c.h.bf16 %v8370_v56  ;;  %v8372_v55 = vld [vmem:[%s14008_s0 + $0x2c0] sm:$0xff]  }
 0x155   :  { %1310 = vadd.xlane.f32.xlu1 %v1309_v0  ;;  %1307 = vadd.xlane.f32.xlu0 %v1306_v13  ;;  %v1321_v13 = vsel %vm801_vm0, %v7864_v33, 0.0  ;;  %v7871_v33 = vunpack.c.l.bf16 %v8372_v55 }
 0x156   :  { %v9163_v63 = vpop.xlane.xlu1 %1106  ;;  %v9165_v14 = vpop.xlane.xlu0 %1103 }
 0x157   :  { %14298 = vst [vmem:[#allocation78_spill] sm:$0xff] %v9163_v63  ;;  %14299 = vst [vmem:[#allocation79_spill] sm:$0xff] %v9165_v14  ;;  %v1318_v14 = vsel %vm801_vm0, %v7863_v19, 0.0  ;;  %v7868_v63 = vunpack.c.h.bf16 %v8371_v20  ;;  %v8373_v19 = vld [vmem:[%s14008_s0 + $0x2c8] sm:$0xff]  }
 0x159   :  { %1316 = vadd.xlane.f32.xlu1 %v1315_v40  ;;  %1313 = vadd.xlane.f32.xlu0 %v1312_v41  ;;  %v1327_v41 = vsel %vm801_vm0, %v7868_v63, 0.0  ;;  %v7875_v63 = vunpack.c.l.bf16 %v8373_v19 }
 0x15a   :  { %v9172_v31 = vpop.xlane.xlu1 %1112  ;;  %v9174_v0 = vpop.xlane.xlu0 %1109 }
 0x15b   :  { %14300 = vst [vmem:[#allocation80_spill] sm:$0xff] %v9172_v31  ;;  %14301 = vst [vmem:[#allocation81_spill] sm:$0xff] %v9174_v0  ;;  %v1324_v0 = vsel %vm801_vm0, %v7867_v48, 0.0  ;;  %v7872_v31 = vunpack.c.h.bf16 %v8372_v55  ;;  %v8374_v48 = vld [vmem:[%s14008_s0 + $0x2d0] sm:$0xff]  }
 0x15d   :  { %1322 = vadd.xlane.f32.xlu1 %v1321_v13  ;;  %1319 = vadd.xlane.f32.xlu0 %v1318_v14  ;;  %v1333_v14 = vsel %vm801_vm0, %v7872_v31, 0.0  ;;  %v7879_v31 = vunpack.c.l.bf16 %v8374_v48 }
 0x15e   :  { %v9181_v56 = vpop.xlane.xlu1 %1118  ;;  %v9183_v40 = vpop.xlane.xlu0 %1115 }
 0x15f   :  { %14302 = vst [vmem:[#allocation82_spill] sm:$0xff] %v9181_v56  ;;  %14303 = vst [vmem:[#allocation83_spill] sm:$0xff] %v9183_v40  ;;  %v1330_v40 = vsel %vm801_vm0, %v7871_v33, 0.0  ;;  %v7876_v56 = vunpack.c.h.bf16 %v8373_v19  ;;  %v8375_v33 = vld [vmem:[%s14008_s0 + $0x2d8] sm:$0xff]  }
 0x161   :  { %1328 = vadd.xlane.f32.xlu1 %v1327_v41  ;;  %1325 = vadd.xlane.f32.xlu0 %v1324_v0  ;;  %v1339_v0 = vsel %vm801_vm0, %v7876_v56, 0.0  ;;  %v7883_v56 = vunpack.c.l.bf16 %v8375_v33 }
 0x162   :  { %v9190_v20 = vpop.xlane.xlu1 %1124  ;;  %v9192_v13 = vpop.xlane.xlu0 %1121 }
 0x163   :  { %14304 = vst [vmem:[#allocation84_spill] sm:$0xff] %v9190_v20  ;;  %14305 = vst [vmem:[#allocation85_spill] sm:$0xff] %v9192_v13  ;;  %v1336_v13 = vsel %vm801_vm0, %v7875_v63, 0.0  ;;  %v7880_v20 = vunpack.c.h.bf16 %v8374_v48  ;;  %v8376_v63 = vld [vmem:[%s14008_s0 + $0x2e0] sm:$0xff]  }
 0x165   :  { %1334 = vadd.xlane.f32.xlu1 %v1333_v14  ;;  %1331 = vadd.xlane.f32.xlu0 %v1330_v40  ;;  %v1345_v40 = vsel %vm801_vm0, %v7880_v20, 0.0  ;;  %v7887_v20 = vunpack.c.l.bf16 %v8376_v63 }
 0x166   :  { %v9199_v55 = vpop.xlane.xlu1 %1130  ;;  %v9201_v41 = vpop.xlane.xlu0 %1127 }
 0x167   :  { %14306 = vst [vmem:[#allocation86_spill] sm:$0xff] %v9199_v55  ;;  %14307 = vst [vmem:[#allocation87_spill] sm:$0xff] %v9201_v41  ;;  %v1342_v41 = vsel %vm801_vm0, %v7879_v31, 0.0  ;;  %v7884_v55 = vunpack.c.h.bf16 %v8375_v33  ;;  %v8377_v31 = vld [vmem:[%s14008_s0 + $0x2e8] sm:$0xff]  }
 0x169   :  { %1340 = vadd.xlane.f32.xlu1 %v1339_v0  ;;  %1337 = vadd.xlane.f32.xlu0 %v1336_v13  ;;  %v1351_v13 = vsel %vm801_vm0, %v7884_v55, 0.0  ;;  %v7891_v55 = vunpack.c.l.bf16 %v8377_v31 }
 0x16a   :  { %v9208_v19 = vpop.xlane.xlu1 %1136  ;;  %v9210_v14 = vpop.xlane.xlu0 %1133 }
 0x16b   :  { %14308 = vst [vmem:[#allocation88_spill] sm:$0xff] %v9208_v19  ;;  %14309 = vst [vmem:[#allocation89_spill] sm:$0xff] %v9210_v14  ;;  %v1348_v14 = vsel %vm801_vm0, %v7883_v56, 0.0  ;;  %v7888_v19 = vunpack.c.h.bf16 %v8376_v63  ;;  %v8378_v56 = vld [vmem:[%s14008_s0 + $0x2f0] sm:$0xff]  }
 0x16d   :  { %1346 = vadd.xlane.f32.xlu1 %v1345_v40  ;;  %1343 = vadd.xlane.f32.xlu0 %v1342_v41  ;;  %v1357_v41 = vsel %vm801_vm0, %v7888_v19, 0.0  ;;  %v7895_v19 = vunpack.c.l.bf16 %v8378_v56 }
 0x16e   :  { %v9217_v48 = vpop.xlane.xlu1 %1142  ;;  %v9219_v0 = vpop.xlane.xlu0 %1139 }
 0x16f   :  { %14310 = vst [vmem:[#allocation90_spill] sm:$0xff] %v9217_v48  ;;  %14311 = vst [vmem:[#allocation91_spill] sm:$0xff] %v9219_v0  ;;  %v1354_v0 = vsel %vm801_vm0, %v7887_v20, 0.0  ;;  %v7892_v48 = vunpack.c.h.bf16 %v8377_v31  ;;  %v8379_v20 = vld [vmem:[%s14008_s0 + $0x2f8] sm:$0xff]  }
 0x171   :  { %1352 = vadd.xlane.f32.xlu1 %v1351_v13  ;;  %1349 = vadd.xlane.f32.xlu0 %v1348_v14  ;;  %v1363_v14 = vsel %vm801_vm0, %v7892_v48, 0.0  ;;  %v7899_v48 = vunpack.c.l.bf16 %v8379_v20 }
 0x172   :  { %v9226_v33 = vpop.xlane.xlu1 %1148  ;;  %v9228_v40 = vpop.xlane.xlu0 %1145 }
 0x173   :  { %14312 = vst [vmem:[#allocation92_spill] sm:$0xff] %v9226_v33  ;;  %14313 = vst [vmem:[#allocation93_spill] sm:$0xff] %v9228_v40  ;;  %v1360_v40 = vsel %vm801_vm0, %v7891_v55, 0.0  ;;  %v7896_v33 = vunpack.c.h.bf16 %v8378_v56  ;;  %v8380_v55 = vld [vmem:[%s14008_s0 + $0x300] sm:$0xff]  }
 0x175   :  { %1358 = vadd.xlane.f32.xlu1 %v1357_v41  ;;  %1355 = vadd.xlane.f32.xlu0 %v1354_v0  ;;  %v1369_v0 = vsel %vm801_vm0, %v7896_v33, 0.0  ;;  %v7903_v33 = vunpack.c.l.bf16 %v8380_v55 }
 0x176   :  { %v9235_v63 = vpop.xlane.xlu1 %1154  ;;  %v9237_v13 = vpop.xlane.xlu0 %1151 }
 0x177   :  { %14314 = vst [vmem:[#allocation94_spill] sm:$0xff] %v9235_v63  ;;  %14315 = vst [vmem:[#allocation95_spill] sm:$0xff] %v9237_v13  ;;  %v1366_v13 = vsel %vm801_vm0, %v7895_v19, 0.0  ;;  %v7900_v63 = vunpack.c.h.bf16 %v8379_v20  ;;  %v8381_v19 = vld [vmem:[%s14008_s0 + $0x308] sm:$0xff]  }
 0x179   :  { %1364 = vadd.xlane.f32.xlu1 %v1363_v14  ;;  %1361 = vadd.xlane.f32.xlu0 %v1360_v40  ;;  %v1375_v40 = vsel %vm801_vm0, %v7900_v63, 0.0  ;;  %v7907_v63 = vunpack.c.l.bf16 %v8381_v19 }
 0x17a   :  { %v9244_v31 = vpop.xlane.xlu1 %1160  ;;  %v9246_v41 = vpop.xlane.xlu0 %1157 }
 0x17b   :  { %14316 = vst [vmem:[#allocation96_spill] sm:$0xff] %v9244_v31  ;;  %14317 = vst [vmem:[#allocation97_spill] sm:$0xff] %v9246_v41  ;;  %v1372_v41 = vsel %vm801_vm0, %v7899_v48, 0.0  ;;  %v7904_v31 = vunpack.c.h.bf16 %v8380_v55  ;;  %v8382_v48 = vld [vmem:[%s14008_s0 + $0x310] sm:$0xff]  }
 0x17d   :  { %1370 = vadd.xlane.f32.xlu1 %v1369_v0  ;;  %1367 = vadd.xlane.f32.xlu0 %v1366_v13  ;;  %v1381_v13 = vsel %vm801_vm0, %v7904_v31, 0.0  ;;  %v7911_v31 = vunpack.c.l.bf16 %v8382_v48 }
 0x17e   :  { %v9253_v56 = vpop.xlane.xlu1 %1166  ;;  %v9255_v14 = vpop.xlane.xlu0 %1163 }
 0x17f   :  { %14318 = vst [vmem:[#allocation98_spill] sm:$0xff] %v9253_v56  ;;  %14319 = vst [vmem:[#allocation99_spill] sm:$0xff] %v9255_v14  ;;  %v1378_v14 = vsel %vm801_vm0, %v7903_v33, 0.0  ;;  %v7908_v56 = vunpack.c.h.bf16 %v8381_v19  ;;  %v8383_v33 = vld [vmem:[%s14008_s0 + $0x318] sm:$0xff]  }
 0x181   :  { %1376 = vadd.xlane.f32.xlu1 %v1375_v40  ;;  %1373 = vadd.xlane.f32.xlu0 %v1372_v41  ;;  %v1387_v41 = vsel %vm801_vm0, %v7908_v56, 0.0  ;;  %v7915_v56 = vunpack.c.l.bf16 %v8383_v33 }
 0x182   :  { %v9262_v20 = vpop.xlane.xlu1 %1172  ;;  %v9264_v0 = vpop.xlane.xlu0 %1169 }
 0x183   :  { %14320 = vst [vmem:[#allocation100_spill] sm:$0xff] %v9262_v20  ;;  %14321 = vst [vmem:[#allocation101_spill] sm:$0xff] %v9264_v0  ;;  %v1384_v0 = vsel %vm801_vm0, %v7907_v63, 0.0  ;;  %v7912_v20 = vunpack.c.h.bf16 %v8382_v48  ;;  %v8384_v63 = vld [vmem:[%s14008_s0 + $0x320] sm:$0xff]  }
 0x185   :  { %1382 = vadd.xlane.f32.xlu1 %v1381_v13  ;;  %1379 = vadd.xlane.f32.xlu0 %v1378_v14  ;;  %v1393_v14 = vsel %vm801_vm0, %v7912_v20, 0.0  ;;  %v7919_v20 = vunpack.c.l.bf16 %v8384_v63 }
 0x186   :  { %v9271_v55 = vpop.xlane.xlu1 %1178  ;;  %v9273_v40 = vpop.xlane.xlu0 %1175 }
 0x187   :  { %14322 = vst [vmem:[#allocation102_spill] sm:$0xff] %v9271_v55  ;;  %14323 = vst [vmem:[#allocation103_spill] sm:$0xff] %v9273_v40  ;;  %v1390_v40 = vsel %vm801_vm0, %v7911_v31, 0.0  ;;  %v7916_v55 = vunpack.c.h.bf16 %v8383_v33  ;;  %v8385_v31 = vld [vmem:[%s14008_s0 + $0x328] sm:$0xff]  }
 0x189   :  { %1388 = vadd.xlane.f32.xlu1 %v1387_v41  ;;  %1385 = vadd.xlane.f32.xlu0 %v1384_v0  ;;  %v1399_v0 = vsel %vm801_vm0, %v7916_v55, 0.0  ;;  %v7923_v55 = vunpack.c.l.bf16 %v8385_v31 }
 0x18a   :  { %v9280_v19 = vpop.xlane.xlu1 %1184  ;;  %v9282_v13 = vpop.xlane.xlu0 %1181 }
 0x18b   :  { %14324 = vst [vmem:[#allocation104_spill] sm:$0xff] %v9280_v19  ;;  %14325 = vst [vmem:[#allocation105_spill] sm:$0xff] %v9282_v13  ;;  %v1396_v13 = vsel %vm801_vm0, %v7915_v56, 0.0  ;;  %v7920_v19 = vunpack.c.h.bf16 %v8384_v63  ;;  %v8386_v56 = vld [vmem:[%s14008_s0 + $0x330] sm:$0xff]  }
 0x18d   :  { %1394 = vadd.xlane.f32.xlu1 %v1393_v14  ;;  %1391 = vadd.xlane.f32.xlu0 %v1390_v40  ;;  %v1405_v40 = vsel %vm801_vm0, %v7920_v19, 0.0  ;;  %v7927_v19 = vunpack.c.l.bf16 %v8386_v56 }
 0x18e   :  { %v9289_v48 = vpop.xlane.xlu1 %1190  ;;  %v9291_v41 = vpop.xlane.xlu0 %1187 }
 0x18f   :  { %14326 = vst [vmem:[#allocation106_spill] sm:$0xff] %v9289_v48  ;;  %14327 = vst [vmem:[#allocation107_spill] sm:$0xff] %v9291_v41  ;;  %v1402_v41 = vsel %vm801_vm0, %v7919_v20, 0.0  ;;  %v7924_v48 = vunpack.c.h.bf16 %v8385_v31  ;;  %v8387_v20 = vld [vmem:[%s14008_s0 + $0x338] sm:$0xff]  }
 0x191   :  { %1400 = vadd.xlane.f32.xlu1 %v1399_v0  ;;  %1397 = vadd.xlane.f32.xlu0 %v1396_v13  ;;  %v1411_v13 = vsel %vm801_vm0, %v7924_v48, 0.0  ;;  %v7931_v48 = vunpack.c.l.bf16 %v8387_v20 }
 0x192   :  { %v9298_v33 = vpop.xlane.xlu1 %1196  ;;  %v9300_v14 = vpop.xlane.xlu0 %1193 }
 0x193   :  { %14328 = vst [vmem:[#allocation108_spill] sm:$0xff] %v9298_v33  ;;  %14329 = vst [vmem:[#allocation109_spill] sm:$0xff] %v9300_v14  ;;  %v1408_v14 = vsel %vm801_vm0, %v7923_v55, 0.0  ;;  %v7928_v33 = vunpack.c.h.bf16 %v8386_v56  ;;  %v8388_v55 = vld [vmem:[%s14008_s0 + $0x340] sm:$0xff]  }
 0x195   :  { %1406 = vadd.xlane.f32.xlu1 %v1405_v40  ;;  %1403 = vadd.xlane.f32.xlu0 %v1402_v41  ;;  %v1417_v41 = vsel %vm801_vm0, %v7928_v33, 0.0  ;;  %v7935_v33 = vunpack.c.l.bf16 %v8388_v55 }
 0x196   :  { %v9307_v63 = vpop.xlane.xlu1 %1202  ;;  %v9309_v0 = vpop.xlane.xlu0 %1199 }
 0x197   :  { %14330 = vst [vmem:[#allocation110_spill] sm:$0xff] %v9307_v63  ;;  %14331 = vst [vmem:[#allocation111_spill] sm:$0xff] %v9309_v0  ;;  %v1414_v0 = vsel %vm801_vm0, %v7927_v19, 0.0  ;;  %v7932_v63 = vunpack.c.h.bf16 %v8387_v20  ;;  %v8389_v19 = vld [vmem:[%s14008_s0 + $0x348] sm:$0xff]  }
 0x199   :  { %1412 = vadd.xlane.f32.xlu1 %v1411_v13  ;;  %1409 = vadd.xlane.f32.xlu0 %v1408_v14  ;;  %v1423_v14 = vsel %vm801_vm0, %v7932_v63, 0.0  ;;  %v7939_v63 = vunpack.c.l.bf16 %v8389_v19 }
 0x19a   :  { %v9316_v31 = vpop.xlane.xlu1 %1208  ;;  %v9318_v40 = vpop.xlane.xlu0 %1205 }
 0x19b   :  { %14332 = vst [vmem:[#allocation112_spill] sm:$0xff] %v9316_v31  ;;  %14333 = vst [vmem:[#allocation113_spill] sm:$0xff] %v9318_v40  ;;  %v1420_v40 = vsel %vm801_vm0, %v7931_v48, 0.0  ;;  %v7936_v31 = vunpack.c.h.bf16 %v8388_v55  ;;  %v8390_v48 = vld [vmem:[%s14008_s0 + $0x350] sm:$0xff]  }
 0x19d   :  { %1418 = vadd.xlane.f32.xlu1 %v1417_v41  ;;  %1415 = vadd.xlane.f32.xlu0 %v1414_v0  ;;  %v1429_v0 = vsel %vm801_vm0, %v7936_v31, 0.0  ;;  %v7943_v31 = vunpack.c.l.bf16 %v8390_v48 }
 0x19e   :  { %v9325_v56 = vpop.xlane.xlu1 %1214  ;;  %v9327_v13 = vpop.xlane.xlu0 %1211 }
 0x19f   :  { %14334 = vst [vmem:[#allocation114_spill] sm:$0xff] %v9325_v56  ;;  %14335 = vst [vmem:[#allocation115_spill] sm:$0xff] %v9327_v13  ;;  %v1426_v13 = vsel %vm801_vm0, %v7935_v33, 0.0  ;;  %v7940_v56 = vunpack.c.h.bf16 %v8389_v19  ;;  %v8391_v33 = vld [vmem:[%s14008_s0 + $0x358] sm:$0xff]  }
 0x1a1   :  { %1424 = vadd.xlane.f32.xlu1 %v1423_v14  ;;  %1421 = vadd.xlane.f32.xlu0 %v1420_v40  ;;  %v1435_v40 = vsel %vm801_vm0, %v7940_v56, 0.0  ;;  %v7947_v56 = vunpack.c.l.bf16 %v8391_v33 }
 0x1a2   :  { %v9334_v20 = vpop.xlane.xlu1 %1220  ;;  %v9336_v41 = vpop.xlane.xlu0 %1217 }
 0x1a3   :  { %14336 = vst [vmem:[#allocation116_spill] sm:$0xff] %v9334_v20  ;;  %14337 = vst [vmem:[#allocation117_spill] sm:$0xff] %v9336_v41  ;;  %v1432_v41 = vsel %vm801_vm0, %v7939_v63, 0.0  ;;  %v7944_v20 = vunpack.c.h.bf16 %v8390_v48  ;;  %v8392_v63 = vld [vmem:[%s14008_s0 + $0x360] sm:$0xff]  }
 0x1a5   :  { %1430 = vadd.xlane.f32.xlu1 %v1429_v0  ;;  %1427 = vadd.xlane.f32.xlu0 %v1426_v13  ;;  %v1441_v13 = vsel %vm801_vm0, %v7944_v20, 0.0  ;;  %v7951_v20 = vunpack.c.l.bf16 %v8392_v63 }
 0x1a6   :  { %v9343_v55 = vpop.xlane.xlu1 %1226  ;;  %v9345_v14 = vpop.xlane.xlu0 %1223 }
 0x1a7   :  { %14338 = vst [vmem:[#allocation118_spill] sm:$0xff] %v9343_v55  ;;  %14339 = vst [vmem:[#allocation119_spill] sm:$0xff] %v9345_v14  ;;  %v1438_v14 = vsel %vm801_vm0, %v7943_v31, 0.0  ;;  %v7948_v55 = vunpack.c.h.bf16 %v8391_v33  ;;  %v8393_v31 = vld [vmem:[%s14008_s0 + $0x368] sm:$0xff]  }
 0x1a9   :  { %1436 = vadd.xlane.f32.xlu1 %v1435_v40  ;;  %1433 = vadd.xlane.f32.xlu0 %v1432_v41  ;;  %v1447_v41 = vsel %vm801_vm0, %v7948_v55, 0.0  ;;  %v7955_v55 = vunpack.c.l.bf16 %v8393_v31 }
 0x1aa   :  { %v9352_v19 = vpop.xlane.xlu1 %1232  ;;  %v9354_v0 = vpop.xlane.xlu0 %1229 }
 0x1ab   :  { %14340 = vst [vmem:[#allocation120_spill] sm:$0xff] %v9352_v19  ;;  %14341 = vst [vmem:[#allocation121_spill] sm:$0xff] %v9354_v0  ;;  %v1444_v0 = vsel %vm801_vm0, %v7947_v56, 0.0  ;;  %v7952_v19 = vunpack.c.h.bf16 %v8392_v63  ;;  %v8394_v56 = vld [vmem:[%s14008_s0 + $0x370] sm:$0xff]  }
 0x1ad   :  { %1442 = vadd.xlane.f32.xlu1 %v1441_v13  ;;  %1439 = vadd.xlane.f32.xlu0 %v1438_v14  ;;  %v1453_v14 = vsel %vm801_vm0, %v7952_v19, 0.0  ;;  %v7959_v19 = vunpack.c.l.bf16 %v8394_v56 }
 0x1ae   :  { %v9361_v48 = vpop.xlane.xlu1 %1238  ;;  %v9363_v40 = vpop.xlane.xlu0 %1235 }
 0x1af   :  { %14342 = vst [vmem:[#allocation122_spill] sm:$0xff] %v9361_v48  ;;  %14343 = vst [vmem:[#allocation123_spill] sm:$0xff] %v9363_v40  ;;  %v1450_v40 = vsel %vm801_vm0, %v7951_v20, 0.0  ;;  %v7956_v48 = vunpack.c.h.bf16 %v8393_v31  ;;  %v8395_v20 = vld [vmem:[%s14008_s0 + $0x378] sm:$0xff]  }
 0x1b1   :  { %1448 = vadd.xlane.f32.xlu1 %v1447_v41  ;;  %1445 = vadd.xlane.f32.xlu0 %v1444_v0  ;;  %v1459_v0 = vsel %vm801_vm0, %v7956_v48, 0.0  ;;  %v7963_v48 = vunpack.c.l.bf16 %v8395_v20 }
 0x1b2   :  { %v9370_v33 = vpop.xlane.xlu1 %1244  ;;  %v9372_v13 = vpop.xlane.xlu0 %1241 }
 0x1b3   :  { %14344 = vst [vmem:[#allocation124_spill] sm:$0xff] %v9370_v33  ;;  %14345 = vst [vmem:[#allocation125_spill] sm:$0xff] %v9372_v13  ;;  %v1456_v13 = vsel %vm801_vm0, %v7955_v55, 0.0  ;;  %v7960_v33 = vunpack.c.h.bf16 %v8394_v56  ;;  %v8396_v55 = vld [vmem:[%s14008_s0 + $0x380] sm:$0xff]  }
 0x1b5   :  { %1454 = vadd.xlane.f32.xlu1 %v1453_v14  ;;  %1451 = vadd.xlane.f32.xlu0 %v1450_v40  ;;  %v1465_v40 = vsel %vm801_vm0, %v7960_v33, 0.0  ;;  %v7967_v33 = vunpack.c.l.bf16 %v8396_v55 }
 0x1b6   :  { %v9379_v63 = vpop.xlane.xlu1 %1250  ;;  %v9381_v41 = vpop.xlane.xlu0 %1247 }
 0x1b7   :  { %14346 = vst [vmem:[#allocation126_spill] sm:$0xff] %v9379_v63  ;;  %14347 = vst [vmem:[#allocation127_spill] sm:$0xff] %v9381_v41  ;;  %v1462_v41 = vsel %vm801_vm0, %v7959_v19, 0.0  ;;  %v7964_v63 = vunpack.c.h.bf16 %v8395_v20  ;;  %v8397_v19 = vld [vmem:[%s14008_s0 + $0x388] sm:$0xff]  }
 0x1b9   :  { %1460 = vadd.xlane.f32.xlu1 %v1459_v0  ;;  %1457 = vadd.xlane.f32.xlu0 %v1456_v13  ;;  %v1471_v13 = vsel %vm801_vm0, %v7964_v63, 0.0  ;;  %v7971_v63 = vunpack.c.l.bf16 %v8397_v19 }
 0x1ba   :  { %v9388_v31 = vpop.xlane.xlu1 %1256  ;;  %v9390_v14 = vpop.xlane.xlu0 %1253 }
 0x1bb   :  { %14348 = vst [vmem:[#allocation128_spill] sm:$0xff] %v9388_v31  ;;  %14349 = vst [vmem:[#allocation129_spill] sm:$0xff] %v9390_v14  ;;  %v1468_v14 = vsel %vm801_vm0, %v7963_v48, 0.0  ;;  %v7968_v31 = vunpack.c.h.bf16 %v8396_v55  ;;  %v8398_v48 = vld [vmem:[%s14008_s0 + $0x390] sm:$0xff]  }
 0x1bd   :  { %1466 = vadd.xlane.f32.xlu1 %v1465_v40  ;;  %1463 = vadd.xlane.f32.xlu0 %v1462_v41  ;;  %v1477_v41 = vsel %vm801_vm0, %v7968_v31, 0.0  ;;  %v7975_v31 = vunpack.c.l.bf16 %v8398_v48 }
 0x1be   :  { %v9397_v56 = vpop.xlane.xlu1 %1262  ;;  %v9399_v0 = vpop.xlane.xlu0 %1259 }
 0x1bf   :  { %14350 = vst [vmem:[#allocation130_spill] sm:$0xff] %v9397_v56  ;;  %14351 = vst [vmem:[#allocation131_spill] sm:$0xff] %v9399_v0  ;;  %v1474_v0 = vsel %vm801_vm0, %v7967_v33, 0.0  ;;  %v7972_v56 = vunpack.c.h.bf16 %v8397_v19  ;;  %v8399_v33 = vld [vmem:[%s14008_s0 + $0x398] sm:$0xff]  }
 0x1c1   :  { %1472 = vadd.xlane.f32.xlu1 %v1471_v13  ;;  %1469 = vadd.xlane.f32.xlu0 %v1468_v14  ;;  %v1483_v14 = vsel %vm801_vm0, %v7972_v56, 0.0  ;;  %v7979_v56 = vunpack.c.l.bf16 %v8399_v33 }
 0x1c2   :  { %v9406_v20 = vpop.xlane.xlu1 %1268  ;;  %v9408_v40 = vpop.xlane.xlu0 %1265 }
 0x1c3   :  { %14352 = vst [vmem:[#allocation132_spill] sm:$0xff] %v9406_v20  ;;  %14353 = vst [vmem:[#allocation133_spill] sm:$0xff] %v9408_v40  ;;  %v1480_v40 = vsel %vm801_vm0, %v7971_v63, 0.0  ;;  %v7976_v20 = vunpack.c.h.bf16 %v8398_v48  ;;  %v8400_v63 = vld [vmem:[%s14008_s0 + $0x3a0] sm:$0xff]  }
 0x1c5   :  { %1478 = vadd.xlane.f32.xlu1 %v1477_v41  ;;  %1475 = vadd.xlane.f32.xlu0 %v1474_v0  ;;  %v1489_v0 = vsel %vm801_vm0, %v7976_v20, 0.0  ;;  %v7983_v20 = vunpack.c.l.bf16 %v8400_v63 }
 0x1c6   :  { %v9415_v55 = vpop.xlane.xlu1 %1274  ;;  %v9417_v13 = vpop.xlane.xlu0 %1271 }
 0x1c7   :  { %14354 = vst [vmem:[#allocation134_spill] sm:$0xff] %v9415_v55  ;;  %14355 = vst [vmem:[#allocation135_spill] sm:$0xff] %v9417_v13  ;;  %v1486_v13 = vsel %vm801_vm0, %v7975_v31, 0.0  ;;  %v7980_v55 = vunpack.c.h.bf16 %v8399_v33  ;;  %v8401_v31 = vld [vmem:[%s14008_s0 + $0x3a8] sm:$0xff]  }
 0x1c9   :  { %1484 = vadd.xlane.f32.xlu1 %v1483_v14  ;;  %1481 = vadd.xlane.f32.xlu0 %v1480_v40  ;;  %v1495_v40 = vsel %vm801_vm0, %v7980_v55, 0.0  ;;  %v7987_v55 = vunpack.c.l.bf16 %v8401_v31 }
 0x1ca   :  { %v9424_v19 = vpop.xlane.xlu1 %1280  ;;  %v9426_v41 = vpop.xlane.xlu0 %1277 }
 0x1cb   :  { %14356 = vst [vmem:[#allocation136_spill] sm:$0xff] %v9424_v19  ;;  %14357 = vst [vmem:[#allocation137_spill] sm:$0xff] %v9426_v41  ;;  %v1492_v41 = vsel %vm801_vm0, %v7979_v56, 0.0  ;;  %v7984_v19 = vunpack.c.h.bf16 %v8400_v63  ;;  %v8402_v56 = vld [vmem:[%s14008_s0 + $0x3b0] sm:$0xff]  }
 0x1cd   :  { %1490 = vadd.xlane.f32.xlu1 %v1489_v0  ;;  %1487 = vadd.xlane.f32.xlu0 %v1486_v13  ;;  %v1501_v13 = vsel %vm801_vm0, %v7984_v19, 0.0  ;;  %v7991_v19 = vunpack.c.l.bf16 %v8402_v56 }
 0x1ce   :  { %v9433_v48 = vpop.xlane.xlu1 %1286  ;;  %v9435_v14 = vpop.xlane.xlu0 %1283 }
 0x1cf   :  { %14358 = vst [vmem:[#allocation138_spill] sm:$0xff] %v9433_v48  ;;  %14359 = vst [vmem:[#allocation139_spill] sm:$0xff] %v9435_v14  ;;  %v1498_v14 = vsel %vm801_vm0, %v7983_v20, 0.0  ;;  %v7988_v48 = vunpack.c.h.bf16 %v8401_v31  ;;  %v8403_v20 = vld [vmem:[%s14008_s0 + $0x3b8] sm:$0xff]  }
 0x1d1   :  { %1496 = vadd.xlane.f32.xlu1 %v1495_v40  ;;  %1493 = vadd.xlane.f32.xlu0 %v1492_v41  ;;  %v1507_v41 = vsel %vm801_vm0, %v7988_v48, 0.0  ;;  %v7995_v48 = vunpack.c.l.bf16 %v8403_v20 }
 0x1d2   :  { %v9442_v33 = vpop.xlane.xlu1 %1292  ;;  %v9444_v0 = vpop.xlane.xlu0 %1289 }
 0x1d3   :  { %14360 = vst [vmem:[#allocation140_spill] sm:$0xff] %v9442_v33  ;;  %14361 = vst [vmem:[#allocation141_spill] sm:$0xff] %v9444_v0  ;;  %v1504_v0 = vsel %vm801_vm0, %v7987_v55, 0.0  ;;  %v7992_v33 = vunpack.c.h.bf16 %v8402_v56  ;;  %v8404_v55 = vld [vmem:[%s14008_s0 + $0x3c0] sm:$0xff]  }
 0x1d5   :  { %1502 = vadd.xlane.f32.xlu1 %v1501_v13  ;;  %1499 = vadd.xlane.f32.xlu0 %v1498_v14  ;;  %v1513_v14 = vsel %vm801_vm0, %v7992_v33, 0.0  ;;  %v7999_v33 = vunpack.c.l.bf16 %v8404_v55 }
 0x1d6   :  { %v9451_v63 = vpop.xlane.xlu1 %1298  ;;  %v9453_v40 = vpop.xlane.xlu0 %1295 }
 0x1d7   :  { %14362 = vst [vmem:[#allocation142_spill] sm:$0xff] %v9451_v63  ;;  %14363 = vst [vmem:[#allocation143_spill] sm:$0xff] %v9453_v40  ;;  %v1510_v40 = vsel %vm801_vm0, %v7991_v19, 0.0  ;;  %v7996_v63 = vunpack.c.h.bf16 %v8403_v20  ;;  %v8405_v19 = vld [vmem:[%s14008_s0 + $0x3c8] sm:$0xff]  }
 0x1d9   :  { %1508 = vadd.xlane.f32.xlu1 %v1507_v41  ;;  %1505 = vadd.xlane.f32.xlu0 %v1504_v0  ;;  %v1519_v0 = vsel %vm801_vm0, %v7996_v63, 0.0  ;;  %v8003_v63 = vunpack.c.l.bf16 %v8405_v19 }
 0x1da   :  { %v9460_v31 = vpop.xlane.xlu1 %1304  ;;  %v9462_v13 = vpop.xlane.xlu0 %1301 }
 0x1db   :  { %14364 = vst [vmem:[#allocation144_spill] sm:$0xff] %v9460_v31  ;;  %14365 = vst [vmem:[#allocation145_spill] sm:$0xff] %v9462_v13  ;;  %v1516_v13 = vsel %vm801_vm0, %v7995_v48, 0.0  ;;  %v8000_v31 = vunpack.c.h.bf16 %v8404_v55  ;;  %v8406_v48 = vld [vmem:[%s14008_s0 + $0x3d0] sm:$0xff]  }
 0x1dd   :  { %1514 = vadd.xlane.f32.xlu1 %v1513_v14  ;;  %1511 = vadd.xlane.f32.xlu0 %v1510_v40  ;;  %v1525_v40 = vsel %vm801_vm0, %v8000_v31, 0.0  ;;  %v8007_v31 = vunpack.c.l.bf16 %v8406_v48 }
 0x1de   :  { %v9469_v56 = vpop.xlane.xlu1 %1310  ;;  %v9471_v41 = vpop.xlane.xlu0 %1307 }
 0x1df   :  { %14366 = vst [vmem:[#allocation146_spill] sm:$0xff] %v9469_v56  ;;  %14367 = vst [vmem:[#allocation147_spill] sm:$0xff] %v9471_v41  ;;  %v1522_v41 = vsel %vm801_vm0, %v7999_v33, 0.0  ;;  %v8004_v56 = vunpack.c.h.bf16 %v8405_v19  ;;  %v8407_v33 = vld [vmem:[%s14008_s0 + $0x3d8] sm:$0xff]  }
 0x1e1   :  { %1520 = vadd.xlane.f32.xlu1 %v1519_v0  ;;  %1517 = vadd.xlane.f32.xlu0 %v1516_v13  ;;  %v1531_v13 = vsel %vm801_vm0, %v8004_v56, 0.0  ;;  %v8011_v56 = vunpack.c.l.bf16 %v8407_v33 }
 0x1e2   :  { %v9478_v20 = vpop.xlane.xlu1 %1316  ;;  %v9480_v14 = vpop.xlane.xlu0 %1313 }
 0x1e3   :  { %14368 = vst [vmem:[#allocation148_spill] sm:$0xff] %v9478_v20  ;;  %14369 = vst [vmem:[#allocation149_spill] sm:$0xff] %v9480_v14  ;;  %v1528_v14 = vsel %vm801_vm0, %v8003_v63, 0.0  ;;  %v8008_v20 = vunpack.c.h.bf16 %v8406_v48  ;;  %v8408_v63 = vld [vmem:[%s14008_s0 + $0x3e0] sm:$0xff]  }
 0x1e5   :  { %1526 = vadd.xlane.f32.xlu1 %v1525_v40  ;;  %1523 = vadd.xlane.f32.xlu0 %v1522_v41  ;;  %v1537_v41 = vsel %vm801_vm0, %v8008_v20, 0.0  ;;  %v8015_v20 = vunpack.c.l.bf16 %v8408_v63 }
 0x1e6   :  { %v9487_v55 = vpop.xlane.xlu1 %1322  ;;  %v9489_v0 = vpop.xlane.xlu0 %1319 }
 0x1e7   :  { %14370 = vst [vmem:[#allocation150_spill] sm:$0xff] %v9487_v55  ;;  %14371 = vst [vmem:[#allocation151_spill] sm:$0xff] %v9489_v0  ;;  %v1534_v0 = vsel %vm801_vm0, %v8007_v31, 0.0  ;;  %v8012_v55 = vunpack.c.h.bf16 %v8407_v33  ;;  %v8409_v31 = vld [vmem:[%s14008_s0 + $0x3e8] sm:$0xff]  }
 0x1e9   :  { %1532 = vadd.xlane.f32.xlu1 %v1531_v13  ;;  %1529 = vadd.xlane.f32.xlu0 %v1528_v14  ;;  %v1543_v14 = vsel %vm801_vm0, %v8012_v55, 0.0  ;;  %v8019_v55 = vunpack.c.l.bf16 %v8409_v31 }
 0x1ea   :  { %v9496_v19 = vpop.xlane.xlu1 %1328  ;;  %v9498_v40 = vpop.xlane.xlu0 %1325 }
 0x1eb   :  { %14372 = vst [vmem:[#allocation152_spill] sm:$0xff] %v9496_v19  ;;  %14373 = vst [vmem:[#allocation153_spill] sm:$0xff] %v9498_v40  ;;  %v1540_v40 = vsel %vm801_vm0, %v8011_v56, 0.0  ;;  %v8016_v19 = vunpack.c.h.bf16 %v8408_v63  ;;  %v8410_v56 = vld [vmem:[%s14008_s0 + $0x3f0] sm:$0xff]  }
 0x1ed   :  { %1538 = vadd.xlane.f32.xlu1 %v1537_v41  ;;  %1535 = vadd.xlane.f32.xlu0 %v1534_v0  ;;  %v1549_v0 = vsel %vm801_vm0, %v8016_v19, 0.0  ;;  %v8023_v19 = vunpack.c.l.bf16 %v8410_v56 }
 0x1ee   :  { %v9505_v48 = vpop.xlane.xlu1 %1334  ;;  %v9507_v13 = vpop.xlane.xlu0 %1331 }
 0x1ef   :  { %14374 = vst [vmem:[#allocation154_spill] sm:$0xff] %v9505_v48  ;;  %14375 = vst [vmem:[#allocation155_spill] sm:$0xff] %v9507_v13  ;;  %v1546_v13 = vsel %vm801_vm0, %v8015_v20, 0.0  ;;  %v8020_v48 = vunpack.c.h.bf16 %v8409_v31  ;;  %v8411_v20 = vld [vmem:[%s14008_s0 + $0x3f8] sm:$0xff]  }
 0x1f1   :  { %1544 = vadd.xlane.f32.xlu1 %v1543_v14  ;;  %1541 = vadd.xlane.f32.xlu0 %v1540_v40  ;;  %v1555_v40 = vsel %vm801_vm0, %v8020_v48, 0.0  ;;  %v8027_v48 = vunpack.c.l.bf16 %v8411_v20 }
 0x1f2   :  { %v9514_v33 = vpop.xlane.xlu1 %1340  ;;  %v9516_v41 = vpop.xlane.xlu0 %1337 }
 0x1f3   :  { %14376 = vst [vmem:[#allocation156_spill] sm:$0xff] %v9514_v33  ;;  %14377 = vst [vmem:[#allocation157_spill] sm:$0xff] %v9516_v41  ;;  %v1552_v41 = vsel %vm801_vm0, %v8019_v55, 0.0  ;;  %v8024_v33 = vunpack.c.h.bf16 %v8410_v56  ;;  %v8412_v55 = vld [vmem:[%s14008_s0 + $0x400] sm:$0xff]  }
 0x1f5   :  { %1550 = vadd.xlane.f32.xlu1 %v1549_v0  ;;  %1547 = vadd.xlane.f32.xlu0 %v1546_v13  ;;  %v1561_v13 = vsel %vm801_vm0, %v8024_v33, 0.0  ;;  %v8031_v33 = vunpack.c.l.bf16 %v8412_v55 }
 0x1f6   :  { %v9523_v63 = vpop.xlane.xlu1 %1346  ;;  %v9525_v14 = vpop.xlane.xlu0 %1343 }
 0x1f7   :  { %14378 = vst [vmem:[#allocation158_spill] sm:$0xff] %v9523_v63  ;;  %14379 = vst [vmem:[#allocation159_spill] sm:$0xff] %v9525_v14  ;;  %v1558_v14 = vsel %vm801_vm0, %v8023_v19, 0.0  ;;  %v8028_v63 = vunpack.c.h.bf16 %v8411_v20  ;;  %v8413_v19 = vld [vmem:[%s14008_s0 + $0x408] sm:$0xff]  }
 0x1f9   :  { %1556 = vadd.xlane.f32.xlu1 %v1555_v40  ;;  %1553 = vadd.xlane.f32.xlu0 %v1552_v41  ;;  %v1567_v41 = vsel %vm801_vm0, %v8028_v63, 0.0  ;;  %v8035_v63 = vunpack.c.l.bf16 %v8413_v19 }
 0x1fa   :  { %v9532_v31 = vpop.xlane.xlu1 %1352  ;;  %v9534_v0 = vpop.xlane.xlu0 %1349 }
 0x1fb   :  { %14380 = vst [vmem:[#allocation160_spill] sm:$0xff] %v9532_v31  ;;  %14381 = vst [vmem:[#allocation161_spill] sm:$0xff] %v9534_v0  ;;  %v1564_v0 = vsel %vm801_vm0, %v8027_v48, 0.0  ;;  %v8032_v31 = vunpack.c.h.bf16 %v8412_v55  ;;  %v8414_v48 = vld [vmem:[%s14008_s0 + $0x410] sm:$0xff]  }
 0x1fd   :  { %1562 = vadd.xlane.f32.xlu1 %v1561_v13  ;;  %1559 = vadd.xlane.f32.xlu0 %v1558_v14  ;;  %v1573_v14 = vsel %vm801_vm0, %v8032_v31, 0.0  ;;  %v8039_v31 = vunpack.c.l.bf16 %v8414_v48 }
 0x1fe   :  { %v9541_v56 = vpop.xlane.xlu1 %1358  ;;  %v9543_v40 = vpop.xlane.xlu0 %1355 }
 0x1ff   :  { %14382 = vst [vmem:[#allocation162_spill] sm:$0xff] %v9541_v56  ;;  %14383 = vst [vmem:[#allocation163_spill] sm:$0xff] %v9543_v40  ;;  %v1570_v40 = vsel %vm801_vm0, %v8031_v33, 0.0  ;;  %v8036_v56 = vunpack.c.h.bf16 %v8413_v19  ;;  %v8415_v33 = vld [vmem:[%s14008_s0 + $0x418] sm:$0xff]  }
 0x201   :  { %1568 = vadd.xlane.f32.xlu1 %v1567_v41  ;;  %1565 = vadd.xlane.f32.xlu0 %v1564_v0  ;;  %v1579_v0 = vsel %vm801_vm0, %v8036_v56, 0.0  ;;  %v8043_v56 = vunpack.c.l.bf16 %v8415_v33 }
 0x202   :  { %v9550_v20 = vpop.xlane.xlu1 %1364  ;;  %v9552_v13 = vpop.xlane.xlu0 %1361 }
 0x203   :  { %14384 = vst [vmem:[#allocation164_spill] sm:$0xff] %v9550_v20  ;;  %14385 = vst [vmem:[#allocation165_spill] sm:$0xff] %v9552_v13  ;;  %v1576_v13 = vsel %vm801_vm0, %v8035_v63, 0.0  ;;  %v8040_v20 = vunpack.c.h.bf16 %v8414_v48  ;;  %v8416_v63 = vld [vmem:[%s14008_s0 + $0x420] sm:$0xff]  }
 0x205   :  { %1574 = vadd.xlane.f32.xlu1 %v1573_v14  ;;  %1571 = vadd.xlane.f32.xlu0 %v1570_v40  ;;  %v1585_v40 = vsel %vm801_vm0, %v8040_v20, 0.0  ;;  %v8047_v20 = vunpack.c.l.bf16 %v8416_v63 }
 0x206   :  { %v9559_v55 = vpop.xlane.xlu1 %1370  ;;  %v9561_v41 = vpop.xlane.xlu0 %1367 }
 0x207   :  { %14386 = vst [vmem:[#allocation166_spill] sm:$0xff] %v9559_v55  ;;  %14387 = vst [vmem:[#allocation167_spill] sm:$0xff] %v9561_v41  ;;  %v1582_v41 = vsel %vm801_vm0, %v8039_v31, 0.0  ;;  %v8044_v55 = vunpack.c.h.bf16 %v8415_v33  ;;  %v8417_v31 = vld [vmem:[%s14008_s0 + $0x428] sm:$0xff]  }
 0x209   :  { %1580 = vadd.xlane.f32.xlu1 %v1579_v0  ;;  %1577 = vadd.xlane.f32.xlu0 %v1576_v13  ;;  %v1591_v13 = vsel %vm801_vm0, %v8044_v55, 0.0  ;;  %v8051_v55 = vunpack.c.l.bf16 %v8417_v31 }
 0x20a   :  { %v9568_v19 = vpop.xlane.xlu1 %1376  ;;  %v9570_v14 = vpop.xlane.xlu0 %1373 }
 0x20b   :  { %14388 = vst [vmem:[#allocation168_spill] sm:$0xff] %v9568_v19  ;;  %14389 = vst [vmem:[#allocation169_spill] sm:$0xff] %v9570_v14  ;;  %v1588_v14 = vsel %vm801_vm0, %v8043_v56, 0.0  ;;  %v8048_v19 = vunpack.c.h.bf16 %v8416_v63  ;;  %v8418_v56 = vld [vmem:[%s14008_s0 + $0x430] sm:$0xff]  }
 0x20d   :  { %1586 = vadd.xlane.f32.xlu1 %v1585_v40  ;;  %1583 = vadd.xlane.f32.xlu0 %v1582_v41  ;;  %v1597_v41 = vsel %vm801_vm0, %v8048_v19, 0.0  ;;  %v8055_v19 = vunpack.c.l.bf16 %v8418_v56 }
 0x20e   :  { %v9577_v48 = vpop.xlane.xlu1 %1382  ;;  %v9579_v0 = vpop.xlane.xlu0 %1379 }
 0x20f   :  { %14390 = vst [vmem:[#allocation170_spill] sm:$0xff] %v9577_v48  ;;  %14391 = vst [vmem:[#allocation171_spill] sm:$0xff] %v9579_v0  ;;  %v1594_v0 = vsel %vm801_vm0, %v8047_v20, 0.0  ;;  %v8052_v48 = vunpack.c.h.bf16 %v8417_v31  ;;  %v8419_v20 = vld [vmem:[%s14008_s0 + $0x438] sm:$0xff]  }
 0x211   :  { %1592 = vadd.xlane.f32.xlu1 %v1591_v13  ;;  %1589 = vadd.xlane.f32.xlu0 %v1588_v14  ;;  %v1603_v14 = vsel %vm801_vm0, %v8052_v48, 0.0  ;;  %v8059_v48 = vunpack.c.l.bf16 %v8419_v20 }
 0x212   :  { %v9586_v33 = vpop.xlane.xlu1 %1388  ;;  %v9588_v40 = vpop.xlane.xlu0 %1385 }
 0x213   :  { %14392 = vst [vmem:[#allocation172_spill] sm:$0xff] %v9586_v33  ;;  %14393 = vst [vmem:[#allocation173_spill] sm:$0xff] %v9588_v40  ;;  %v1600_v40 = vsel %vm801_vm0, %v8051_v55, 0.0  ;;  %v8056_v33 = vunpack.c.h.bf16 %v8418_v56  ;;  %v8420_v55 = vld [vmem:[%s14008_s0 + $0x440] sm:$0xff]  }
 0x215   :  { %1598 = vadd.xlane.f32.xlu1 %v1597_v41  ;;  %1595 = vadd.xlane.f32.xlu0 %v1594_v0  ;;  %v1609_v0 = vsel %vm801_vm0, %v8056_v33, 0.0  ;;  %v8063_v33 = vunpack.c.l.bf16 %v8420_v55 }
 0x216   :  { %v9595_v63 = vpop.xlane.xlu1 %1394  ;;  %v9597_v13 = vpop.xlane.xlu0 %1391 }
 0x217   :  { %14394 = vst [vmem:[#allocation174_spill] sm:$0xff] %v9595_v63  ;;  %14395 = vst [vmem:[#allocation175_spill] sm:$0xff] %v9597_v13  ;;  %v1606_v13 = vsel %vm801_vm0, %v8055_v19, 0.0  ;;  %v8060_v63 = vunpack.c.h.bf16 %v8419_v20  ;;  %v8421_v19 = vld [vmem:[%s14008_s0 + $0x448] sm:$0xff]  }
 0x219   :  { %1604 = vadd.xlane.f32.xlu1 %v1603_v14  ;;  %1601 = vadd.xlane.f32.xlu0 %v1600_v40  ;;  %v1615_v40 = vsel %vm801_vm0, %v8060_v63, 0.0  ;;  %v8067_v63 = vunpack.c.l.bf16 %v8421_v19 }
 0x21a   :  { %v9604_v31 = vpop.xlane.xlu1 %1400  ;;  %v9606_v41 = vpop.xlane.xlu0 %1397 }
 0x21b   :  { %14396 = vst [vmem:[#allocation176_spill] sm:$0xff] %v9604_v31  ;;  %14397 = vst [vmem:[#allocation177_spill] sm:$0xff] %v9606_v41  ;;  %v1612_v41 = vsel %vm801_vm0, %v8059_v48, 0.0  ;;  %v8064_v31 = vunpack.c.h.bf16 %v8420_v55  ;;  %v8422_v48 = vld [vmem:[%s14008_s0 + $0x450] sm:$0xff]  }
 0x21d   :  { %1610 = vadd.xlane.f32.xlu1 %v1609_v0  ;;  %1607 = vadd.xlane.f32.xlu0 %v1606_v13  ;;  %v1621_v13 = vsel %vm801_vm0, %v8064_v31, 0.0  ;;  %v8071_v31 = vunpack.c.l.bf16 %v8422_v48 }
 0x21e   :  { %v9613_v56 = vpop.xlane.xlu1 %1406  ;;  %v9615_v14 = vpop.xlane.xlu0 %1403 }
 0x21f   :  { %14398 = vst [vmem:[#allocation178_spill] sm:$0xff] %v9613_v56  ;;  %14399 = vst [vmem:[#allocation179_spill] sm:$0xff] %v9615_v14  ;;  %v1618_v14 = vsel %vm801_vm0, %v8063_v33, 0.0  ;;  %v8068_v56 = vunpack.c.h.bf16 %v8421_v19  ;;  %v8423_v33 = vld [vmem:[%s14008_s0 + $0x458] sm:$0xff]  }
 0x221   :  { %1616 = vadd.xlane.f32.xlu1 %v1615_v40  ;;  %1613 = vadd.xlane.f32.xlu0 %v1612_v41  ;;  %v1627_v41 = vsel %vm801_vm0, %v8068_v56, 0.0  ;;  %v8075_v56 = vunpack.c.l.bf16 %v8423_v33 }
 0x222   :  { %v9622_v20 = vpop.xlane.xlu1 %1412  ;;  %v9624_v0 = vpop.xlane.xlu0 %1409 }
 0x223   :  { %14400 = vst [vmem:[#allocation180_spill] sm:$0xff] %v9622_v20  ;;  %14401 = vst [vmem:[#allocation181_spill] sm:$0xff] %v9624_v0  ;;  %v1624_v0 = vsel %vm801_vm0, %v8067_v63, 0.0  ;;  %v8072_v20 = vunpack.c.h.bf16 %v8422_v48  ;;  %v8424_v63 = vld [vmem:[%s14008_s0 + $0x460] sm:$0xff]  }
 0x225   :  { %1622 = vadd.xlane.f32.xlu1 %v1621_v13  ;;  %1619 = vadd.xlane.f32.xlu0 %v1618_v14  ;;  %v1633_v14 = vsel %vm801_vm0, %v8072_v20, 0.0  ;;  %v8079_v20 = vunpack.c.l.bf16 %v8424_v63 }
 0x226   :  { %v9631_v55 = vpop.xlane.xlu1 %1418  ;;  %v9633_v40 = vpop.xlane.xlu0 %1415 }
 0x227   :  { %14402 = vst [vmem:[#allocation182_spill] sm:$0xff] %v9631_v55  ;;  %14403 = vst [vmem:[#allocation183_spill] sm:$0xff] %v9633_v40  ;;  %v1630_v40 = vsel %vm801_vm0, %v8071_v31, 0.0  ;;  %v8076_v55 = vunpack.c.h.bf16 %v8423_v33  ;;  %v8425_v31 = vld [vmem:[%s14008_s0 + $0x468] sm:$0xff]  }
 0x229   :  { %1628 = vadd.xlane.f32.xlu1 %v1627_v41  ;;  %1625 = vadd.xlane.f32.xlu0 %v1624_v0  ;;  %v1639_v0 = vsel %vm801_vm0, %v8076_v55, 0.0  ;;  %v8083_v55 = vunpack.c.l.bf16 %v8425_v31 }
 0x22a   :  { %v9640_v19 = vpop.xlane.xlu1 %1424  ;;  %v9642_v13 = vpop.xlane.xlu0 %1421 }
 0x22b   :  { %14404 = vst [vmem:[#allocation184_spill] sm:$0xff] %v9640_v19  ;;  %14405 = vst [vmem:[#allocation185_spill] sm:$0xff] %v9642_v13  ;;  %v1636_v13 = vsel %vm801_vm0, %v8075_v56, 0.0  ;;  %v8080_v19 = vunpack.c.h.bf16 %v8424_v63  ;;  %v8426_v56 = vld [vmem:[%s14008_s0 + $0x470] sm:$0xff]  }
 0x22d   :  { %1634 = vadd.xlane.f32.xlu1 %v1633_v14  ;;  %1631 = vadd.xlane.f32.xlu0 %v1630_v40  ;;  %v1645_v40 = vsel %vm801_vm0, %v8080_v19, 0.0  ;;  %v8087_v19 = vunpack.c.l.bf16 %v8426_v56 }
 0x22e   :  { %v9649_v48 = vpop.xlane.xlu1 %1430  ;;  %v9651_v41 = vpop.xlane.xlu0 %1427 }
 0x22f   :  { %14406 = vst [vmem:[#allocation186_spill] sm:$0xff] %v9649_v48  ;;  %14407 = vst [vmem:[#allocation187_spill] sm:$0xff] %v9651_v41  ;;  %v1642_v41 = vsel %vm801_vm0, %v8079_v20, 0.0  ;;  %v8084_v48 = vunpack.c.h.bf16 %v8425_v31  ;;  %v8427_v20 = vld [vmem:[%s14008_s0 + $0x478] sm:$0xff]  }
 0x231   :  { %1640 = vadd.xlane.f32.xlu1 %v1639_v0  ;;  %1637 = vadd.xlane.f32.xlu0 %v1636_v13  ;;  %v1651_v13 = vsel %vm801_vm0, %v8084_v48, 0.0  ;;  %v8091_v48 = vunpack.c.l.bf16 %v8427_v20 }
 0x232   :  { %v9658_v33 = vpop.xlane.xlu1 %1436  ;;  %v9660_v14 = vpop.xlane.xlu0 %1433 }
 0x233   :  { %14408 = vst [vmem:[#allocation188_spill] sm:$0xff] %v9658_v33  ;;  %14409 = vst [vmem:[#allocation189_spill] sm:$0xff] %v9660_v14  ;;  %v1648_v14 = vsel %vm801_vm0, %v8083_v55, 0.0  ;;  %v8088_v33 = vunpack.c.h.bf16 %v8426_v56  ;;  %v8428_v55 = vld [vmem:[%s14008_s0 + $0x480] sm:$0xff]  }
 0x235   :  { %1646 = vadd.xlane.f32.xlu1 %v1645_v40  ;;  %1643 = vadd.xlane.f32.xlu0 %v1642_v41  ;;  %v1657_v41 = vsel %vm801_vm0, %v8088_v33, 0.0  ;;  %v8095_v33 = vunpack.c.l.bf16 %v8428_v55 }
 0x236   :  { %v9667_v63 = vpop.xlane.xlu1 %1442  ;;  %v9669_v0 = vpop.xlane.xlu0 %1439 }
 0x237   :  { %14410 = vst [vmem:[#allocation190_spill] sm:$0xff] %v9667_v63  ;;  %14411 = vst [vmem:[#allocation191_spill] sm:$0xff] %v9669_v0  ;;  %v1654_v0 = vsel %vm801_vm0, %v8087_v19, 0.0  ;;  %v8092_v63 = vunpack.c.h.bf16 %v8427_v20  ;;  %v8429_v19 = vld [vmem:[%s14008_s0 + $0x488] sm:$0xff]  }
 0x239   :  { %1652 = vadd.xlane.f32.xlu1 %v1651_v13  ;;  %1649 = vadd.xlane.f32.xlu0 %v1648_v14  ;;  %v1663_v14 = vsel %vm801_vm0, %v8092_v63, 0.0  ;;  %v8099_v63 = vunpack.c.l.bf16 %v8429_v19 }
 0x23a   :  { %v9676_v31 = vpop.xlane.xlu1 %1448  ;;  %v9678_v40 = vpop.xlane.xlu0 %1445 }
 0x23b   :  { %14412 = vst [vmem:[#allocation192_spill] sm:$0xff] %v9676_v31  ;;  %14413 = vst [vmem:[#allocation193_spill] sm:$0xff] %v9678_v40  ;;  %v1660_v40 = vsel %vm801_vm0, %v8091_v48, 0.0  ;;  %v8096_v31 = vunpack.c.h.bf16 %v8428_v55  ;;  %v8430_v48 = vld [vmem:[%s14008_s0 + $0x490] sm:$0xff]  }
 0x23d   :  { %1658 = vadd.xlane.f32.xlu1 %v1657_v41  ;;  %1655 = vadd.xlane.f32.xlu0 %v1654_v0  ;;  %v1669_v0 = vsel %vm801_vm0, %v8096_v31, 0.0  ;;  %v8103_v31 = vunpack.c.l.bf16 %v8430_v48 }
 0x23e   :  { %v9685_v56 = vpop.xlane.xlu1 %1454  ;;  %v9687_v13 = vpop.xlane.xlu0 %1451 }
 0x23f   :  { %14414 = vst [vmem:[#allocation194_spill] sm:$0xff] %v9685_v56  ;;  %14415 = vst [vmem:[#allocation195_spill] sm:$0xff] %v9687_v13  ;;  %v1666_v13 = vsel %vm801_vm0, %v8095_v33, 0.0  ;;  %v8100_v56 = vunpack.c.h.bf16 %v8429_v19  ;;  %v8431_v33 = vld [vmem:[%s14008_s0 + $0x498] sm:$0xff]  }
 0x241   :  { %1664 = vadd.xlane.f32.xlu1 %v1663_v14  ;;  %1661 = vadd.xlane.f32.xlu0 %v1660_v40  ;;  %v1675_v40 = vsel %vm801_vm0, %v8100_v56, 0.0  ;;  %v8107_v56 = vunpack.c.l.bf16 %v8431_v33 }
 0x242   :  { %v9694_v20 = vpop.xlane.xlu1 %1460  ;;  %v9696_v41 = vpop.xlane.xlu0 %1457 }
 0x243   :  { %14416 = vst [vmem:[#allocation196_spill] sm:$0xff] %v9694_v20  ;;  %14417 = vst [vmem:[#allocation197_spill] sm:$0xff] %v9696_v41  ;;  %v1672_v41 = vsel %vm801_vm0, %v8099_v63, 0.0  ;;  %v8104_v20 = vunpack.c.h.bf16 %v8430_v48  ;;  %v8432_v63 = vld [vmem:[%s14008_s0 + $0x4a0] sm:$0xff]  }
 0x245   :  { %1670 = vadd.xlane.f32.xlu1 %v1669_v0  ;;  %1667 = vadd.xlane.f32.xlu0 %v1666_v13  ;;  %v1681_v13 = vsel %vm801_vm0, %v8104_v20, 0.0  ;;  %v8111_v20 = vunpack.c.l.bf16 %v8432_v63 }
 0x246   :  { %v9703_v55 = vpop.xlane.xlu1 %1466  ;;  %v9705_v14 = vpop.xlane.xlu0 %1463 }
 0x247   :  { %14418 = vst [vmem:[#allocation198_spill] sm:$0xff] %v9703_v55  ;;  %14419 = vst [vmem:[#allocation199_spill] sm:$0xff] %v9705_v14  ;;  %v1678_v14 = vsel %vm801_vm0, %v8103_v31, 0.0  ;;  %v8108_v55 = vunpack.c.h.bf16 %v8431_v33  ;;  %v8433_v31 = vld [vmem:[%s14008_s0 + $0x4a8] sm:$0xff]  }
 0x249   :  { %1676 = vadd.xlane.f32.xlu1 %v1675_v40  ;;  %1673 = vadd.xlane.f32.xlu0 %v1672_v41  ;;  %v1687_v41 = vsel %vm801_vm0, %v8108_v55, 0.0  ;;  %v8115_v55 = vunpack.c.l.bf16 %v8433_v31 }
 0x24a   :  { %v9712_v19 = vpop.xlane.xlu1 %1472  ;;  %v9714_v0 = vpop.xlane.xlu0 %1469 }
 0x24b   :  { %14420 = vst [vmem:[#allocation200_spill] sm:$0xff] %v9712_v19  ;;  %14421 = vst [vmem:[#allocation201_spill] sm:$0xff] %v9714_v0  ;;  %v1684_v0 = vsel %vm801_vm0, %v8107_v56, 0.0  ;;  %v8112_v19 = vunpack.c.h.bf16 %v8432_v63  ;;  %v8434_v56 = vld [vmem:[%s14008_s0 + $0x4b0] sm:$0xff]  }
 0x24d   :  { %1682 = vadd.xlane.f32.xlu1 %v1681_v13  ;;  %1679 = vadd.xlane.f32.xlu0 %v1678_v14  ;;  %v1693_v14 = vsel %vm801_vm0, %v8112_v19, 0.0  ;;  %v8119_v19 = vunpack.c.l.bf16 %v8434_v56 }
 0x24e   :  { %v9721_v48 = vpop.xlane.xlu1 %1478  ;;  %v9723_v40 = vpop.xlane.xlu0 %1475 }
 0x24f   :  { %14422 = vst [vmem:[#allocation202_spill] sm:$0xff] %v9721_v48  ;;  %14423 = vst [vmem:[#allocation203_spill] sm:$0xff] %v9723_v40  ;;  %v1690_v40 = vsel %vm801_vm0, %v8111_v20, 0.0  ;;  %v8116_v48 = vunpack.c.h.bf16 %v8433_v31  ;;  %v8435_v20 = vld [vmem:[%s14008_s0 + $0x4b8] sm:$0xff]  }
 0x251   :  { %1688 = vadd.xlane.f32.xlu1 %v1687_v41  ;;  %1685 = vadd.xlane.f32.xlu0 %v1684_v0  ;;  %v1699_v0 = vsel %vm801_vm0, %v8116_v48, 0.0  ;;  %v8123_v48 = vunpack.c.l.bf16 %v8435_v20 }
 0x252   :  { %v9730_v33 = vpop.xlane.xlu1 %1484  ;;  %v9732_v13 = vpop.xlane.xlu0 %1481 }
 0x253   :  { %14424 = vst [vmem:[#allocation204_spill] sm:$0xff] %v9730_v33  ;;  %14425 = vst [vmem:[#allocation205_spill] sm:$0xff] %v9732_v13  ;;  %v1696_v13 = vsel %vm801_vm0, %v8115_v55, 0.0  ;;  %v8120_v33 = vunpack.c.h.bf16 %v8434_v56  ;;  %v8436_v55 = vld [vmem:[%s14008_s0 + $0x4c0] sm:$0xff]  }
 0x255   :  { %1694 = vadd.xlane.f32.xlu1 %v1693_v14  ;;  %1691 = vadd.xlane.f32.xlu0 %v1690_v40  ;;  %v1705_v40 = vsel %vm801_vm0, %v8120_v33, 0.0  ;;  %v8127_v33 = vunpack.c.l.bf16 %v8436_v55 }
 0x256   :  { %v9739_v63 = vpop.xlane.xlu1 %1490  ;;  %v9741_v41 = vpop.xlane.xlu0 %1487 }
 0x257   :  { %14426 = vst [vmem:[#allocation206_spill] sm:$0xff] %v9739_v63  ;;  %14427 = vst [vmem:[#allocation207_spill] sm:$0xff] %v9741_v41  ;;  %v1702_v41 = vsel %vm801_vm0, %v8119_v19, 0.0  ;;  %v8124_v63 = vunpack.c.h.bf16 %v8435_v20  ;;  %v8437_v19 = vld [vmem:[%s14008_s0 + $0x4c8] sm:$0xff]  }
 0x259   :  { %1700 = vadd.xlane.f32.xlu1 %v1699_v0  ;;  %1697 = vadd.xlane.f32.xlu0 %v1696_v13  ;;  %v1711_v13 = vsel %vm801_vm0, %v8124_v63, 0.0  ;;  %v8131_v63 = vunpack.c.l.bf16 %v8437_v19 }
 0x25a   :  { %v9748_v31 = vpop.xlane.xlu1 %1496  ;;  %v9750_v14 = vpop.xlane.xlu0 %1493 }
 0x25b   :  { %14428 = vst [vmem:[#allocation208_spill] sm:$0xff] %v9748_v31  ;;  %14429 = vst [vmem:[#allocation209_spill] sm:$0xff] %v9750_v14  ;;  %v1708_v14 = vsel %vm801_vm0, %v8123_v48, 0.0  ;;  %v8128_v31 = vunpack.c.h.bf16 %v8436_v55  ;;  %v8438_v48 = vld [vmem:[%s14008_s0 + $0x4d0] sm:$0xff]  }
 0x25d   :  { %1706 = vadd.xlane.f32.xlu1 %v1705_v40  ;;  %1703 = vadd.xlane.f32.xlu0 %v1702_v41  ;;  %v1717_v41 = vsel %vm801_vm0, %v8128_v31, 0.0  ;;  %v8135_v31 = vunpack.c.l.bf16 %v8438_v48 }
 0x25e   :  { %v9757_v56 = vpop.xlane.xlu1 %1502  ;;  %v9759_v0 = vpop.xlane.xlu0 %1499 }
 0x25f   :  { %14430 = vst [vmem:[#allocation210_spill] sm:$0xff] %v9757_v56  ;;  %14431 = vst [vmem:[#allocation211_spill] sm:$0xff] %v9759_v0  ;;  %v1714_v0 = vsel %vm801_vm0, %v8127_v33, 0.0  ;;  %v8132_v56 = vunpack.c.h.bf16 %v8437_v19  ;;  %v8439_v33 = vld [vmem:[%s14008_s0 + $0x4d8] sm:$0xff]  }
 0x261   :  { %1712 = vadd.xlane.f32.xlu1 %v1711_v13  ;;  %1709 = vadd.xlane.f32.xlu0 %v1708_v14  ;;  %v1723_v14 = vsel %vm801_vm0, %v8132_v56, 0.0  ;;  %v8139_v56 = vunpack.c.l.bf16 %v8439_v33 }
 0x262   :  { %v9766_v20 = vpop.xlane.xlu1 %1508  ;;  %v9768_v40 = vpop.xlane.xlu0 %1505 }
 0x263   :  { %14432 = vst [vmem:[#allocation212_spill] sm:$0xff] %v9766_v20  ;;  %14433 = vst [vmem:[#allocation213_spill] sm:$0xff] %v9768_v40  ;;  %v1720_v40 = vsel %vm801_vm0, %v8131_v63, 0.0  ;;  %v8136_v20 = vunpack.c.h.bf16 %v8438_v48  ;;  %v8440_v63 = vld [vmem:[%s14008_s0 + $0x4e0] sm:$0xff]  }
 0x265   :  { %1718 = vadd.xlane.f32.xlu1 %v1717_v41  ;;  %1715 = vadd.xlane.f32.xlu0 %v1714_v0  ;;  %v1729_v0 = vsel %vm801_vm0, %v8136_v20, 0.0  ;;  %v8143_v20 = vunpack.c.l.bf16 %v8440_v63 }
 0x266   :  { %v9775_v55 = vpop.xlane.xlu1 %1514  ;;  %v9777_v13 = vpop.xlane.xlu0 %1511 }
 0x267   :  { %14434 = vst [vmem:[#allocation214_spill] sm:$0xff] %v9775_v55  ;;  %14435 = vst [vmem:[#allocation215_spill] sm:$0xff] %v9777_v13  ;;  %v1726_v13 = vsel %vm801_vm0, %v8135_v31, 0.0  ;;  %v8140_v55 = vunpack.c.h.bf16 %v8439_v33  ;;  %v8441_v31 = vld [vmem:[%s14008_s0 + $0x4e8] sm:$0xff]  }
 0x269   :  { %1724 = vadd.xlane.f32.xlu1 %v1723_v14  ;;  %1721 = vadd.xlane.f32.xlu0 %v1720_v40  ;;  %v1735_v40 = vsel %vm801_vm0, %v8140_v55, 0.0  ;;  %v8147_v55 = vunpack.c.l.bf16 %v8441_v31 }
 0x26a   :  { %v9784_v19 = vpop.xlane.xlu1 %1520  ;;  %v9786_v41 = vpop.xlane.xlu0 %1517 }
 0x26b   :  { %14436 = vst [vmem:[#allocation216_spill] sm:$0xff] %v9784_v19  ;;  %14437 = vst [vmem:[#allocation217_spill] sm:$0xff] %v9786_v41  ;;  %v1732_v41 = vsel %vm801_vm0, %v8139_v56, 0.0  ;;  %v8144_v19 = vunpack.c.h.bf16 %v8440_v63  ;;  %v8442_v56 = vld [vmem:[%s14008_s0 + $0x4f0] sm:$0xff]  }
 0x26d   :  { %1730 = vadd.xlane.f32.xlu1 %v1729_v0  ;;  %1727 = vadd.xlane.f32.xlu0 %v1726_v13  ;;  %v1741_v13 = vsel %vm801_vm0, %v8144_v19, 0.0  ;;  %v8151_v19 = vunpack.c.l.bf16 %v8442_v56 }
 0x26e   :  { %v9793_v48 = vpop.xlane.xlu1 %1526  ;;  %v9795_v14 = vpop.xlane.xlu0 %1523 }
 0x26f   :  { %14438 = vst [vmem:[#allocation218_spill] sm:$0xff] %v9793_v48  ;;  %14439 = vst [vmem:[#allocation219_spill] sm:$0xff] %v9795_v14  ;;  %v1738_v14 = vsel %vm801_vm0, %v8143_v20, 0.0  ;;  %v8148_v48 = vunpack.c.h.bf16 %v8441_v31  ;;  %v8443_v20 = vld [vmem:[%s14008_s0 + $0x4f8] sm:$0xff]  }
 0x271   :  { %1736 = vadd.xlane.f32.xlu1 %v1735_v40  ;;  %1733 = vadd.xlane.f32.xlu0 %v1732_v41  ;;  %v1747_v41 = vsel %vm801_vm0, %v8148_v48, 0.0  ;;  %v8155_v48 = vunpack.c.l.bf16 %v8443_v20 }
 0x272   :  { %v9802_v33 = vpop.xlane.xlu1 %1532  ;;  %v9804_v0 = vpop.xlane.xlu0 %1529 }
 0x273   :  { %14440 = vst [vmem:[#allocation220_spill] sm:$0xff] %v9802_v33  ;;  %14441 = vst [vmem:[#allocation221_spill] sm:$0xff] %v9804_v0  ;;  %v1744_v0 = vsel %vm801_vm0, %v8147_v55, 0.0  ;;  %v8152_v33 = vunpack.c.h.bf16 %v8442_v56  ;;  %v8444_v55 = vld [vmem:[%s14008_s0 + $0x500] sm:$0xff]  }
 0x275   :  { %1742 = vadd.xlane.f32.xlu1 %v1741_v13  ;;  %1739 = vadd.xlane.f32.xlu0 %v1738_v14  ;;  %v1753_v14 = vsel %vm801_vm0, %v8152_v33, 0.0  ;;  %v8159_v33 = vunpack.c.l.bf16 %v8444_v55 }
 0x276   :  { %v9811_v63 = vpop.xlane.xlu1 %1538  ;;  %v9813_v40 = vpop.xlane.xlu0 %1535 }
 0x277   :  { %14442 = vst [vmem:[#allocation222_spill] sm:$0xff] %v9811_v63  ;;  %14443 = vst [vmem:[#allocation223_spill] sm:$0xff] %v9813_v40  ;;  %v1750_v40 = vsel %vm801_vm0, %v8151_v19, 0.0  ;;  %v8156_v63 = vunpack.c.h.bf16 %v8443_v20  ;;  %v8445_v19 = vld [vmem:[%s14008_s0 + $0x508] sm:$0xff]  }
 0x279   :  { %1748 = vadd.xlane.f32.xlu1 %v1747_v41  ;;  %1745 = vadd.xlane.f32.xlu0 %v1744_v0  ;;  %v1759_v0 = vsel %vm801_vm0, %v8156_v63, 0.0  ;;  %v8163_v63 = vunpack.c.l.bf16 %v8445_v19 }
 0x27a   :  { %v9820_v31 = vpop.xlane.xlu1 %1544  ;;  %v9822_v13 = vpop.xlane.xlu0 %1541 }
 0x27b   :  { %14444 = vst [vmem:[#allocation224_spill] sm:$0xff] %v9820_v31  ;;  %14445 = vst [vmem:[#allocation225_spill] sm:$0xff] %v9822_v13  ;;  %v1756_v13 = vsel %vm801_vm0, %v8155_v48, 0.0  ;;  %v8160_v31 = vunpack.c.h.bf16 %v8444_v55  ;;  %v8446_v48 = vld [vmem:[%s14008_s0 + $0x510] sm:$0xff]  }
 0x27d   :  { %1754 = vadd.xlane.f32.xlu1 %v1753_v14  ;;  %1751 = vadd.xlane.f32.xlu0 %v1750_v40  ;;  %v1765_v40 = vsel %vm801_vm0, %v8160_v31, 0.0  ;;  %v8167_v31 = vunpack.c.l.bf16 %v8446_v48 }
 0x27e   :  { %v9829_v56 = vpop.xlane.xlu1 %1550  ;;  %v9831_v41 = vpop.xlane.xlu0 %1547 }
 0x27f   :  { %14446 = vst [vmem:[#allocation226_spill] sm:$0xff] %v9829_v56  ;;  %14447 = vst [vmem:[#allocation227_spill] sm:$0xff] %v9831_v41  ;;  %v1762_v41 = vsel %vm801_vm0, %v8159_v33, 0.0  ;;  %v8164_v56 = vunpack.c.h.bf16 %v8445_v19  ;;  %v8447_v33 = vld [vmem:[%s14008_s0 + $0x518] sm:$0xff]  }
 0x281   :  { %1760 = vadd.xlane.f32.xlu1 %v1759_v0  ;;  %1757 = vadd.xlane.f32.xlu0 %v1756_v13  ;;  %v1771_v13 = vsel %vm801_vm0, %v8164_v56, 0.0  ;;  %v8171_v56 = vunpack.c.l.bf16 %v8447_v33 }
 0x282   :  { %v9838_v20 = vpop.xlane.xlu1 %1556  ;;  %v9840_v14 = vpop.xlane.xlu0 %1553 }
 0x283   :  { %14448 = vst [vmem:[#allocation228_spill] sm:$0xff] %v9838_v20  ;;  %14449 = vst [vmem:[#allocation229_spill] sm:$0xff] %v9840_v14  ;;  %v1768_v14 = vsel %vm801_vm0, %v8163_v63, 0.0  ;;  %v8168_v20 = vunpack.c.h.bf16 %v8446_v48  ;;  %v8448_v63 = vld [vmem:[%s14008_s0 + $0x520] sm:$0xff]  }
 0x285   :  { %1766 = vadd.xlane.f32.xlu1 %v1765_v40  ;;  %1763 = vadd.xlane.f32.xlu0 %v1762_v41  ;;  %v1777_v41 = vsel %vm801_vm0, %v8168_v20, 0.0  ;;  %v8175_v20 = vunpack.c.l.bf16 %v8448_v63 }
 0x286   :  { %v9847_v55 = vpop.xlane.xlu1 %1562  ;;  %v9849_v0 = vpop.xlane.xlu0 %1559 }
 0x287   :  { %14450 = vst [vmem:[#allocation230_spill] sm:$0xff] %v9847_v55  ;;  %14451 = vst [vmem:[#allocation231_spill] sm:$0xff] %v9849_v0  ;;  %v1774_v0 = vsel %vm801_vm0, %v8167_v31, 0.0  ;;  %v8172_v55 = vunpack.c.h.bf16 %v8447_v33  ;;  %v8449_v31 = vld [vmem:[%s14008_s0 + $0x528] sm:$0xff]  }
 0x289   :  { %1772 = vadd.xlane.f32.xlu1 %v1771_v13  ;;  %1769 = vadd.xlane.f32.xlu0 %v1768_v14  ;;  %v1783_v14 = vsel %vm801_vm0, %v8172_v55, 0.0  ;;  %v8179_v55 = vunpack.c.l.bf16 %v8449_v31 }
 0x28a   :  { %v9856_v19 = vpop.xlane.xlu1 %1568  ;;  %v9858_v40 = vpop.xlane.xlu0 %1565 }
 0x28b   :  { %14452 = vst [vmem:[#allocation232_spill] sm:$0xff] %v9856_v19  ;;  %14453 = vst [vmem:[#allocation233_spill] sm:$0xff] %v9858_v40  ;;  %v1780_v40 = vsel %vm801_vm0, %v8171_v56, 0.0  ;;  %v8176_v19 = vunpack.c.h.bf16 %v8448_v63  ;;  %v8450_v56 = vld [vmem:[%s14008_s0 + $0x530] sm:$0xff]  }
 0x28d   :  { %1778 = vadd.xlane.f32.xlu1 %v1777_v41  ;;  %1775 = vadd.xlane.f32.xlu0 %v1774_v0  ;;  %v1789_v0 = vsel %vm801_vm0, %v8176_v19, 0.0  ;;  %v8183_v19 = vunpack.c.l.bf16 %v8450_v56 }
 0x28e   :  { %v9865_v48 = vpop.xlane.xlu1 %1574  ;;  %v9867_v13 = vpop.xlane.xlu0 %1571 }
 0x28f   :  { %14454 = vst [vmem:[#allocation234_spill] sm:$0xff] %v9865_v48  ;;  %14455 = vst [vmem:[#allocation235_spill] sm:$0xff] %v9867_v13  ;;  %v1786_v13 = vsel %vm801_vm0, %v8175_v20, 0.0  ;;  %v8180_v48 = vunpack.c.h.bf16 %v8449_v31  ;;  %v8451_v20 = vld [vmem:[%s14008_s0 + $0x538] sm:$0xff]  }
 0x291   :  { %1784 = vadd.xlane.f32.xlu1 %v1783_v14  ;;  %1781 = vadd.xlane.f32.xlu0 %v1780_v40  ;;  %v1795_v40 = vsel %vm801_vm0, %v8180_v48, 0.0  ;;  %v8187_v48 = vunpack.c.l.bf16 %v8451_v20 }
 0x292   :  { %v9874_v33 = vpop.xlane.xlu1 %1580  ;;  %v9876_v41 = vpop.xlane.xlu0 %1577 }
 0x293   :  { %14456 = vst [vmem:[#allocation236_spill] sm:$0xff] %v9874_v33  ;;  %14457 = vst [vmem:[#allocation237_spill] sm:$0xff] %v9876_v41  ;;  %v1792_v41 = vsel %vm801_vm0, %v8179_v55, 0.0  ;;  %v8184_v33 = vunpack.c.h.bf16 %v8450_v56  ;;  %v8452_v55 = vld [vmem:[%s14008_s0 + $0x540] sm:$0xff]  }
 0x295   :  { %1790 = vadd.xlane.f32.xlu1 %v1789_v0  ;;  %1787 = vadd.xlane.f32.xlu0 %v1786_v13  ;;  %v1801_v13 = vsel %vm801_vm0, %v8184_v33, 0.0  ;;  %v8191_v33 = vunpack.c.l.bf16 %v8452_v55 }
 0x296   :  { %v9883_v63 = vpop.xlane.xlu1 %1586  ;;  %v9885_v14 = vpop.xlane.xlu0 %1583 }
 0x297   :  { %14458 = vst [vmem:[#allocation238_spill] sm:$0xff] %v9883_v63  ;;  %14459 = vst [vmem:[#allocation239_spill] sm:$0xff] %v9885_v14  ;;  %v1798_v14 = vsel %vm801_vm0, %v8183_v19, 0.0  ;;  %v8188_v63 = vunpack.c.h.bf16 %v8451_v20  ;;  %v8453_v19 = vld [vmem:[%s14008_s0 + $0x548] sm:$0xff]  }
 0x299   :  { %1796 = vadd.xlane.f32.xlu1 %v1795_v40  ;;  %1793 = vadd.xlane.f32.xlu0 %v1792_v41  ;;  %v1807_v41 = vsel %vm801_vm0, %v8188_v63, 0.0  ;;  %v8195_v63 = vunpack.c.l.bf16 %v8453_v19 }
 0x29a   :  { %v9892_v31 = vpop.xlane.xlu1 %1592  ;;  %v9894_v0 = vpop.xlane.xlu0 %1589 }
 0x29b   :  { %14460 = vst [vmem:[#allocation240_spill] sm:$0xff] %v9892_v31  ;;  %14461 = vst [vmem:[#allocation241_spill] sm:$0xff] %v9894_v0  ;;  %v1804_v0 = vsel %vm801_vm0, %v8187_v48, 0.0  ;;  %v8192_v31 = vunpack.c.h.bf16 %v8452_v55  ;;  %v8454_v48 = vld [vmem:[%s14008_s0 + $0x550] sm:$0xff]  }
 0x29d   :  { %1802 = vadd.xlane.f32.xlu1 %v1801_v13  ;;  %1799 = vadd.xlane.f32.xlu0 %v1798_v14  ;;  %v1813_v14 = vsel %vm801_vm0, %v8192_v31, 0.0  ;;  %v8199_v31 = vunpack.c.l.bf16 %v8454_v48 }
 0x29e   :  { %v9901_v56 = vpop.xlane.xlu1 %1598  ;;  %v9903_v40 = vpop.xlane.xlu0 %1595 }
 0x29f   :  { %14462 = vst [vmem:[#allocation242_spill] sm:$0xff] %v9901_v56  ;;  %14463 = vst [vmem:[#allocation243_spill] sm:$0xff] %v9903_v40  ;;  %v1810_v40 = vsel %vm801_vm0, %v8191_v33, 0.0  ;;  %v8196_v56 = vunpack.c.h.bf16 %v8453_v19  ;;  %v8455_v33 = vld [vmem:[%s14008_s0 + $0x558] sm:$0xff]  }
 0x2a1   :  { %1808 = vadd.xlane.f32.xlu1 %v1807_v41  ;;  %1805 = vadd.xlane.f32.xlu0 %v1804_v0  ;;  %v1819_v0 = vsel %vm801_vm0, %v8196_v56, 0.0  ;;  %v8203_v56 = vunpack.c.l.bf16 %v8455_v33 }
 0x2a2   :  { %v9910_v20 = vpop.xlane.xlu1 %1604  ;;  %v9912_v13 = vpop.xlane.xlu0 %1601 }
 0x2a3   :  { %14464 = vst [vmem:[#allocation244_spill] sm:$0xff] %v9910_v20  ;;  %14465 = vst [vmem:[#allocation245_spill] sm:$0xff] %v9912_v13  ;;  %v1816_v13 = vsel %vm801_vm0, %v8195_v63, 0.0  ;;  %v8200_v20 = vunpack.c.h.bf16 %v8454_v48  ;;  %v8456_v63 = vld [vmem:[%s14008_s0 + $0x560] sm:$0xff]  }
 0x2a5   :  { %1814 = vadd.xlane.f32.xlu1 %v1813_v14  ;;  %1811 = vadd.xlane.f32.xlu0 %v1810_v40  ;;  %v1825_v40 = vsel %vm801_vm0, %v8200_v20, 0.0  ;;  %v8207_v20 = vunpack.c.l.bf16 %v8456_v63 }
 0x2a6   :  { %v9919_v55 = vpop.xlane.xlu1 %1610  ;;  %v9921_v41 = vpop.xlane.xlu0 %1607 }
 0x2a7   :  { %14466 = vst [vmem:[#allocation246_spill] sm:$0xff] %v9919_v55  ;;  %14467 = vst [vmem:[#allocation247_spill] sm:$0xff] %v9921_v41  ;;  %v1822_v41 = vsel %vm801_vm0, %v8199_v31, 0.0  ;;  %v8204_v55 = vunpack.c.h.bf16 %v8455_v33  ;;  %v8457_v31 = vld [vmem:[%s14008_s0 + $0x568] sm:$0xff]  }
 0x2a9   :  { %1820 = vadd.xlane.f32.xlu1 %v1819_v0  ;;  %1817 = vadd.xlane.f32.xlu0 %v1816_v13  ;;  %v1831_v13 = vsel %vm801_vm0, %v8204_v55, 0.0  ;;  %v8211_v55 = vunpack.c.l.bf16 %v8457_v31 }
 0x2aa   :  { %v9928_v19 = vpop.xlane.xlu1 %1616  ;;  %v9930_v14 = vpop.xlane.xlu0 %1613 }
 0x2ab   :  { %14468 = vst [vmem:[#allocation248_spill] sm:$0xff] %v9928_v19  ;;  %14469 = vst [vmem:[#allocation249_spill] sm:$0xff] %v9930_v14  ;;  %v1828_v14 = vsel %vm801_vm0, %v8203_v56, 0.0  ;;  %v8208_v19 = vunpack.c.h.bf16 %v8456_v63  ;;  %v8458_v56 = vld [vmem:[%s14008_s0 + $0x570] sm:$0xff]  }
 0x2ad   :  { %1826 = vadd.xlane.f32.xlu1 %v1825_v40  ;;  %1823 = vadd.xlane.f32.xlu0 %v1822_v41  ;;  %v1837_v41 = vsel %vm801_vm0, %v8208_v19, 0.0  ;;  %v8215_v19 = vunpack.c.l.bf16 %v8458_v56 }
 0x2ae   :  { %v9937_v48 = vpop.xlane.xlu1 %1622  ;;  %v9939_v0 = vpop.xlane.xlu0 %1619 }
 0x2af   :  { %14470 = vst [vmem:[#allocation250_spill] sm:$0xff] %v9937_v48  ;;  %14471 = vst [vmem:[#allocation251_spill] sm:$0xff] %v9939_v0  ;;  %v1834_v0 = vsel %vm801_vm0, %v8207_v20, 0.0  ;;  %v8212_v48 = vunpack.c.h.bf16 %v8457_v31  ;;  %v8459_v20 = vld [vmem:[%s14008_s0 + $0x578] sm:$0xff]  }
 0x2b1   :  { %1832 = vadd.xlane.f32.xlu1 %v1831_v13  ;;  %1829 = vadd.xlane.f32.xlu0 %v1828_v14  ;;  %v1843_v14 = vsel %vm801_vm0, %v8212_v48, 0.0  ;;  %v8219_v48 = vunpack.c.l.bf16 %v8459_v20 }
 0x2b2   :  { %v9946_v33 = vpop.xlane.xlu1 %1628  ;;  %v9948_v40 = vpop.xlane.xlu0 %1625 }
 0x2b3   :  { %14472 = vst [vmem:[#allocation252_spill] sm:$0xff] %v9946_v33  ;;  %14473 = vst [vmem:[#allocation253_spill] sm:$0xff] %v9948_v40  ;;  %v1840_v40 = vsel %vm801_vm0, %v8211_v55, 0.0  ;;  %v8216_v33 = vunpack.c.h.bf16 %v8458_v56  ;;  %v8460_v55 = vld [vmem:[%s14008_s0 + $0x580] sm:$0xff]  }
 0x2b5   :  { %1838 = vadd.xlane.f32.xlu1 %v1837_v41  ;;  %1835 = vadd.xlane.f32.xlu0 %v1834_v0  ;;  %v1849_v0 = vsel %vm801_vm0, %v8216_v33, 0.0  ;;  %v8223_v33 = vunpack.c.l.bf16 %v8460_v55 }
 0x2b6   :  { %v9955_v63 = vpop.xlane.xlu1 %1634  ;;  %v9957_v13 = vpop.xlane.xlu0 %1631 }
 0x2b7   :  { %14474 = vst [vmem:[#allocation254_spill] sm:$0xff] %v9955_v63  ;;  %14475 = vst [vmem:[#allocation255_spill] sm:$0xff] %v9957_v13  ;;  %v1846_v13 = vsel %vm801_vm0, %v8215_v19, 0.0  ;;  %v8220_v63 = vunpack.c.h.bf16 %v8459_v20  ;;  %v8461_v19 = vld [vmem:[%s14008_s0 + $0x588] sm:$0xff]  }
 0x2b9   :  { %1844 = vadd.xlane.f32.xlu1 %v1843_v14  ;;  %1841 = vadd.xlane.f32.xlu0 %v1840_v40  ;;  %v1855_v40 = vsel %vm801_vm0, %v8220_v63, 0.0  ;;  %v8227_v63 = vunpack.c.l.bf16 %v8461_v19 }
 0x2ba   :  { %v9964_v31 = vpop.xlane.xlu1 %1640  ;;  %v9966_v41 = vpop.xlane.xlu0 %1637 }
 0x2bb   :  { %14476 = vst [vmem:[#allocation256_spill] sm:$0xff] %v9964_v31  ;;  %14477 = vst [vmem:[#allocation257_spill] sm:$0xff] %v9966_v41  ;;  %v1852_v41 = vsel %vm801_vm0, %v8219_v48, 0.0  ;;  %v8224_v31 = vunpack.c.h.bf16 %v8460_v55  ;;  %v8462_v48 = vld [vmem:[%s14008_s0 + $0x590] sm:$0xff]  }
 0x2bd   :  { %1850 = vadd.xlane.f32.xlu1 %v1849_v0  ;;  %1847 = vadd.xlane.f32.xlu0 %v1846_v13  ;;  %v1861_v13 = vsel %vm801_vm0, %v8224_v31, 0.0  ;;  %v8231_v31 = vunpack.c.l.bf16 %v8462_v48 }
 0x2be   :  { %v9973_v56 = vpop.xlane.xlu1 %1646  ;;  %v9975_v14 = vpop.xlane.xlu0 %1643 }
 0x2bf   :  { %14478 = vst [vmem:[#allocation258_spill] sm:$0xff] %v9973_v56  ;;  %14479 = vst [vmem:[#allocation259_spill] sm:$0xff] %v9975_v14  ;;  %v1858_v14 = vsel %vm801_vm0, %v8223_v33, 0.0  ;;  %v8228_v56 = vunpack.c.h.bf16 %v8461_v19  ;;  %v8463_v33 = vld [vmem:[%s14008_s0 + $0x598] sm:$0xff]  }
 0x2c1   :  { %1856 = vadd.xlane.f32.xlu1 %v1855_v40  ;;  %1853 = vadd.xlane.f32.xlu0 %v1852_v41  ;;  %v1867_v41 = vsel %vm801_vm0, %v8228_v56, 0.0  ;;  %v8235_v56 = vunpack.c.l.bf16 %v8463_v33 }
 0x2c2   :  { %v9982_v20 = vpop.xlane.xlu1 %1652  ;;  %v9984_v0 = vpop.xlane.xlu0 %1649 }
 0x2c3   :  { %14480 = vst [vmem:[#allocation260_spill] sm:$0xff] %v9982_v20  ;;  %14481 = vst [vmem:[#allocation261_spill] sm:$0xff] %v9984_v0  ;;  %v1864_v0 = vsel %vm801_vm0, %v8227_v63, 0.0  ;;  %v8232_v20 = vunpack.c.h.bf16 %v8462_v48  ;;  %v8464_v63 = vld [vmem:[%s14008_s0 + $0x5a0] sm:$0xff]  }
 0x2c5   :  { %1862 = vadd.xlane.f32.xlu1 %v1861_v13  ;;  %1859 = vadd.xlane.f32.xlu0 %v1858_v14  ;;  %v1873_v14 = vsel %vm801_vm0, %v8232_v20, 0.0  ;;  %v8239_v20 = vunpack.c.l.bf16 %v8464_v63 }
 0x2c6   :  { %v9991_v55 = vpop.xlane.xlu1 %1658  ;;  %v9993_v40 = vpop.xlane.xlu0 %1655 }
 0x2c7   :  { %14482 = vst [vmem:[#allocation262_spill] sm:$0xff] %v9991_v55  ;;  %14483 = vst [vmem:[#allocation263_spill] sm:$0xff] %v9993_v40  ;;  %v1870_v40 = vsel %vm801_vm0, %v8231_v31, 0.0  ;;  %v8236_v55 = vunpack.c.h.bf16 %v8463_v33  ;;  %v8465_v31 = vld [vmem:[%s14008_s0 + $0x5a8] sm:$0xff]  }
 0x2c9   :  { %1868 = vadd.xlane.f32.xlu1 %v1867_v41  ;;  %1865 = vadd.xlane.f32.xlu0 %v1864_v0  ;;  %v1879_v0 = vsel %vm801_vm0, %v8236_v55, 0.0  ;;  %v8243_v55 = vunpack.c.l.bf16 %v8465_v31 }
 0x2ca   :  { %v10000_v19 = vpop.xlane.xlu1 %1664  ;;  %v10002_v13 = vpop.xlane.xlu0 %1661 }
 0x2cb   :  { %14484 = vst [vmem:[#allocation264_spill] sm:$0xff] %v10000_v19  ;;  %14485 = vst [vmem:[#allocation265_spill] sm:$0xff] %v10002_v13  ;;  %v1876_v13 = vsel %vm801_vm0, %v8235_v56, 0.0  ;;  %v8240_v19 = vunpack.c.h.bf16 %v8464_v63  ;;  %v8466_v56 = vld [vmem:[%s14008_s0 + $0x5b0] sm:$0xff]  }
 0x2cd   :  { %1874 = vadd.xlane.f32.xlu1 %v1873_v14  ;;  %1871 = vadd.xlane.f32.xlu0 %v1870_v40  ;;  %v1885_v40 = vsel %vm801_vm0, %v8240_v19, 0.0  ;;  %v8247_v19 = vunpack.c.l.bf16 %v8466_v56 }
 0x2ce   :  { %v10009_v48 = vpop.xlane.xlu1 %1670  ;;  %v10011_v41 = vpop.xlane.xlu0 %1667 }
 0x2cf   :  { %14486 = vst [vmem:[#allocation266_spill] sm:$0xff] %v10009_v48  ;;  %14487 = vst [vmem:[#allocation267_spill] sm:$0xff] %v10011_v41  ;;  %v1882_v41 = vsel %vm801_vm0, %v8239_v20, 0.0  ;;  %v8244_v48 = vunpack.c.h.bf16 %v8465_v31  ;;  %v8467_v20 = vld [vmem:[%s14008_s0 + $0x5b8] sm:$0xff]  }
 0x2d1   :  { %1880 = vadd.xlane.f32.xlu1 %v1879_v0  ;;  %1877 = vadd.xlane.f32.xlu0 %v1876_v13  ;;  %v1891_v13 = vsel %vm801_vm0, %v8244_v48, 0.0  ;;  %v8251_v48 = vunpack.c.l.bf16 %v8467_v20 }
 0x2d2   :  { %v10018_v33 = vpop.xlane.xlu1 %1676  ;;  %v10020_v14 = vpop.xlane.xlu0 %1673 }
 0x2d3   :  { %14488 = vst [vmem:[#allocation268_spill] sm:$0xff] %v10018_v33  ;;  %14489 = vst [vmem:[#allocation269_spill] sm:$0xff] %v10020_v14  ;;  %v1888_v14 = vsel %vm801_vm0, %v8243_v55, 0.0  ;;  %v8248_v33 = vunpack.c.h.bf16 %v8466_v56  ;;  %v8468_v55 = vld [vmem:[%s14008_s0 + $0x5c0] sm:$0xff]  }
 0x2d5   :  { %1886 = vadd.xlane.f32.xlu1 %v1885_v40  ;;  %1883 = vadd.xlane.f32.xlu0 %v1882_v41  ;;  %v1897_v41 = vsel %vm801_vm0, %v8248_v33, 0.0  ;;  %v8255_v33 = vunpack.c.l.bf16 %v8468_v55 }
 0x2d6   :  { %v10027_v63 = vpop.xlane.xlu1 %1682  ;;  %v10029_v0 = vpop.xlane.xlu0 %1679 }
 0x2d7   :  { %14490 = vst [vmem:[#allocation270_spill] sm:$0xff] %v10027_v63  ;;  %14491 = vst [vmem:[#allocation271_spill] sm:$0xff] %v10029_v0  ;;  %v1894_v0 = vsel %vm801_vm0, %v8247_v19, 0.0  ;;  %v8252_v63 = vunpack.c.h.bf16 %v8467_v20  ;;  %v8469_v19 = vld [vmem:[%s14008_s0 + $0x5c8] sm:$0xff]  }
 0x2d9   :  { %1892 = vadd.xlane.f32.xlu1 %v1891_v13  ;;  %1889 = vadd.xlane.f32.xlu0 %v1888_v14  ;;  %v1903_v14 = vsel %vm801_vm0, %v8252_v63, 0.0  ;;  %v8259_v63 = vunpack.c.l.bf16 %v8469_v19 }
 0x2da   :  { %v10036_v31 = vpop.xlane.xlu1 %1688  ;;  %v10038_v40 = vpop.xlane.xlu0 %1685 }
 0x2db   :  { %14492 = vst [vmem:[#allocation272_spill] sm:$0xff] %v10036_v31  ;;  %14493 = vst [vmem:[#allocation273_spill] sm:$0xff] %v10038_v40  ;;  %v1900_v40 = vsel %vm801_vm0, %v8251_v48, 0.0  ;;  %v8256_v31 = vunpack.c.h.bf16 %v8468_v55  ;;  %v8470_v48 = vld [vmem:[%s14008_s0 + $0x5d0] sm:$0xff]  }
 0x2dd   :  { %1898 = vadd.xlane.f32.xlu1 %v1897_v41  ;;  %1895 = vadd.xlane.f32.xlu0 %v1894_v0  ;;  %v1909_v0 = vsel %vm801_vm0, %v8256_v31, 0.0  ;;  %v8263_v31 = vunpack.c.l.bf16 %v8470_v48 }
 0x2de   :  { %v10045_v56 = vpop.xlane.xlu1 %1694  ;;  %v10047_v13 = vpop.xlane.xlu0 %1691 }
 0x2df   :  { %14494 = vst [vmem:[#allocation274_spill] sm:$0xff] %v10045_v56  ;;  %14495 = vst [vmem:[#allocation275_spill] sm:$0xff] %v10047_v13  ;;  %v1906_v13 = vsel %vm801_vm0, %v8255_v33, 0.0  ;;  %v8260_v56 = vunpack.c.h.bf16 %v8469_v19  ;;  %v8471_v33 = vld [vmem:[%s14008_s0 + $0x5d8] sm:$0xff]  }
 0x2e1   :  { %1904 = vadd.xlane.f32.xlu1 %v1903_v14  ;;  %1901 = vadd.xlane.f32.xlu0 %v1900_v40  ;;  %v1915_v40 = vsel %vm801_vm0, %v8260_v56, 0.0  ;;  %v8267_v56 = vunpack.c.l.bf16 %v8471_v33 }
 0x2e2   :  { %v10054_v20 = vpop.xlane.xlu1 %1700  ;;  %v10056_v41 = vpop.xlane.xlu0 %1697 }
 0x2e3   :  { %14496 = vst [vmem:[#allocation276_spill] sm:$0xff] %v10054_v20  ;;  %14497 = vst [vmem:[#allocation277_spill] sm:$0xff] %v10056_v41  ;;  %v1912_v41 = vsel %vm801_vm0, %v8259_v63, 0.0  ;;  %v8264_v20 = vunpack.c.h.bf16 %v8470_v48  ;;  %v8472_v63 = vld [vmem:[%s14008_s0 + $0x5e0] sm:$0xff]  }
 0x2e5   :  { %1910 = vadd.xlane.f32.xlu1 %v1909_v0  ;;  %1907 = vadd.xlane.f32.xlu0 %v1906_v13  ;;  %v1921_v13 = vsel %vm801_vm0, %v8264_v20, 0.0  ;;  %v8271_v20 = vunpack.c.l.bf16 %v8472_v63 }
 0x2e6   :  { %v10063_v55 = vpop.xlane.xlu1 %1706  ;;  %v10065_v14 = vpop.xlane.xlu0 %1703 }
 0x2e7   :  { %14498 = vst [vmem:[#allocation278_spill] sm:$0xff] %v10063_v55  ;;  %14499 = vst [vmem:[#allocation279_spill] sm:$0xff] %v10065_v14  ;;  %v1918_v14 = vsel %vm801_vm0, %v8263_v31, 0.0  ;;  %v8268_v55 = vunpack.c.h.bf16 %v8471_v33  ;;  %v8473_v31 = vld [vmem:[%s14008_s0 + $0x5e8] sm:$0xff]  }
 0x2e9   :  { %1916 = vadd.xlane.f32.xlu1 %v1915_v40  ;;  %1913 = vadd.xlane.f32.xlu0 %v1912_v41  ;;  %v1927_v41 = vsel %vm801_vm0, %v8268_v55, 0.0  ;;  %v8275_v55 = vunpack.c.l.bf16 %v8473_v31 }
 0x2ea   :  { %v10072_v19 = vpop.xlane.xlu1 %1712  ;;  %v10074_v0 = vpop.xlane.xlu0 %1709 }
 0x2eb   :  { %14500 = vst [vmem:[#allocation280_spill] sm:$0xff] %v10072_v19  ;;  %14501 = vst [vmem:[#allocation281_spill] sm:$0xff] %v10074_v0  ;;  %v1924_v0 = vsel %vm801_vm0, %v8267_v56, 0.0  ;;  %v8272_v19 = vunpack.c.h.bf16 %v8472_v63  ;;  %v8474_v56 = vld [vmem:[%s14008_s0 + $0x5f0] sm:$0xff]  }
 0x2ed   :  { %1922 = vadd.xlane.f32.xlu1 %v1921_v13  ;;  %1919 = vadd.xlane.f32.xlu0 %v1918_v14  ;;  %v1933_v14 = vsel %vm801_vm0, %v8272_v19, 0.0  ;;  %v8279_v19 = vunpack.c.l.bf16 %v8474_v56 }
 0x2ee   :  { %v10081_v48 = vpop.xlane.xlu1 %1718  ;;  %v10083_v40 = vpop.xlane.xlu0 %1715 }
 0x2ef   :  { %14502 = vst [vmem:[#allocation282_spill] sm:$0xff] %v10081_v48  ;;  %14503 = vst [vmem:[#allocation283_spill] sm:$0xff] %v10083_v40  ;;  %v1930_v40 = vsel %vm801_vm0, %v8271_v20, 0.0  ;;  %v8276_v48 = vunpack.c.h.bf16 %v8473_v31  ;;  %v8475_v20 = vld [vmem:[%s14008_s0 + $0x5f8] sm:$0xff]  }
 0x2f1   :  { %1928 = vadd.xlane.f32.xlu1 %v1927_v41  ;;  %1925 = vadd.xlane.f32.xlu0 %v1924_v0  ;;  %v1939_v0 = vsel %vm801_vm0, %v8276_v48, 0.0  ;;  %v8283_v48 = vunpack.c.l.bf16 %v8475_v20 }
 0x2f2   :  { %v10090_v33 = vpop.xlane.xlu1 %1724  ;;  %v10092_v13 = vpop.xlane.xlu0 %1721 }
 0x2f3   :  { %14504 = vst [vmem:[#allocation284_spill] sm:$0xff] %v10090_v33  ;;  %14505 = vst [vmem:[#allocation285_spill] sm:$0xff] %v10092_v13  ;;  %v1936_v13 = vsel %vm801_vm0, %v8275_v55, 0.0  ;;  %v8280_v33 = vunpack.c.h.bf16 %v8474_v56 }
 0x2f5   :  { %1934 = vadd.xlane.f32.xlu1 %v1933_v14  ;;  %1931 = vadd.xlane.f32.xlu0 %v1930_v40  ;;  %v1945_v40 = vsel %vm801_vm0, %v8280_v33, 0.0  ;;  %v14018_v33 = vlaneseq }
 0x2f6   :  { %v10099_v63 = vpop.xlane.xlu1 %1730  ;;  %v10101_v41 = vpop.xlane.xlu0 %1727 }
 0x2f7   :  { %14506 = vst [vmem:[#allocation286_spill] sm:$0xff] %v10099_v63  ;;  %14507 = vst [vmem:[#allocation287_spill] sm:$0xff] %v10101_v41  ;;  %v1942_v41 = vsel %vm801_vm0, %v8279_v19, 0.0  ;;  %v8284_v63 = vunpack.c.h.bf16 %v8475_v20 }
 0x2f9   :  { %1940 = vadd.xlane.f32.xlu1 %v1939_v0  ;;  %1937 = vadd.xlane.f32.xlu0 %v1936_v13  ;;  %v1951_v32 = vsel %vm801_vm0, %v8284_v63, 0.0  ;;  %v1948_v13 = vsel %vm801_vm0, %v8283_v48, 0.0  ;;  %vm5617_vm0 = vcmask 1048512  }
 0x2fa   :  { %v10108_v31 = vpop.xlane.xlu1 %1736  ;;  %v10110_v14 = vpop.xlane.xlu0 %1733 }
 0x2fb   :  { %14508 = vst [vmem:[#allocation288_spill] sm:$0xff] %v10108_v31  ;;  %14509 = vst [vmem:[#allocation289_spill] sm:$0xff] %v10110_v14 }
 0x2fd   :  { %1946 = vadd.xlane.f32.xlu1 %v1945_v40  ;;  %1943 = vadd.xlane.f32.xlu0 %v1942_v41  ;;  %v10129_v41 = vshrl.u32 %v14018_v33, 7 }
 0x2fe   :  { %v10114_v55 = vpop.xlane.xlu1 %1742  ;;  %v10116_v56 = vpop.xlane.xlu0 %1739 }
 0x2ff   :  { %14510 = vst [vmem:[#allocation290_spill] sm:$0xff] %v10114_v55  ;;  %14511 = vst [vmem:[#allocation291_spill] sm:$0xff] %v10116_v56  ;;  %v10136_v63 = vsub.s32 0, %v10129_v41  ;;  %v2614_v4 = vsub.s32 5, %v10129_v41 }
 0x300   :  { %14516 = vst [vmem:[#allocation296_spill] sm:$0xff] %v10129_v41 }
 0x301   :  { %1952 = vadd.xlane.f32.xlu1 %v1951_v32  ;;  %1949 = vadd.xlane.f32.xlu0 %v1948_v13  ;;  %14519 = vst [vmem:[#allocation299_spill] sm:$0xff] %v10136_v63  ;;  %v10141_v32 = vld [vmem:[%s14009_s6] sm:$0xff] }
 0x302   :  { %v10120_v0 = vpop.xlane.xlu1 %1748  ;;  %v10122_v14 = vpop.xlane.xlu0 %1745  ;;  %v2595_v33 = vrot.slane %v10141_v32, %v10136_v63  ;;  %v2615_v39 = vrot.slane %v10141_v32, %v2614_v4 }
 0x303   :  { %14512 = vst [vmem:[#allocation292_spill] sm:$0xff] %v10120_v0  ;;  %14513 = vst [vmem:[#allocation293_spill] sm:$0xff] %v10122_v14 }
 0x306   :  { %v10124_v19 = vpop.xlane.xlu1 %1754  ;;  %v10126_v20 = vpop.xlane.xlu0 %1751 }
 0x307   :  { %14514 = vst [vmem:[#allocation294_spill] sm:$0xff] %v10124_v19  ;;  %14515 = vst [vmem:[#allocation295_spill] sm:$0xff] %v10126_v20 }
 0x30a   :  { %v10131_v40 = vpop.xlane.xlu1 %1760  ;;  %v10133_v56 = vpop.xlane.xlu0 %1757 }
 0x30b   :  { %14517 = vst [vmem:[#allocation297_spill] sm:$0xff] %v10131_v40  ;;  %14518 = vst [vmem:[#allocation298_spill] sm:$0xff] %v10133_v56 }
 0x30e   :  { %v10143_v48 = vpop.xlane.xlu1 %1766  ;;  %v10145_v13 = vpop.xlane.xlu0 %1763 }
 0x30f   :  { %14520 = vst [vmem:[#allocation300_spill] sm:$0xff] %v10143_v48  ;;  %14521 = vst [vmem:[#allocation301_spill] sm:$0xff] %v10145_v13 }
 0x312   :  { %2645 = vbcast.lane.b32.xlu1 %v2595_v33, 264  ;;  %v10149_v20 = vpop.xlane.xlu1 %1772  ;;  %v10151_v40 = vpop.xlane.xlu0 %1769 }
 0x313   :  { %14522 = vst [vmem:[#allocation302_spill] sm:$0xff] %v10149_v20  ;;  %14523 = vst [vmem:[#allocation303_spill] sm:$0xff] %v10151_v40 }
 0x316   :  { %2649 = vbcast.lane.b32.xlu1 %v2595_v33, 272  ;;  %v10153_v56 = vpop.xlane.xlu1 %1778  ;;  %v10155_v19 = vpop.xlane.xlu0 %1775 }
 0x317   :  { %14524 = vst [vmem:[#allocation304_spill] sm:$0xff] %v10153_v56  ;;  %14525 = vst [vmem:[#allocation305_spill] sm:$0xff] %v10155_v19  ;;  %2641 = vbcast.lane.b32.xlu0 %v2595_v33, 256 }
 0x31a   :  { %2653 = vbcast.lane.b32.xlu1 %v2595_v33, 280  ;;  %v10157_v14 = vpop.xlane.xlu1 %1784  ;;  %v10159_v48 = vpop.xlane.xlu0 %1781 }
 0x31b   :  { %14526 = vst [vmem:[#allocation306_spill] sm:$0xff] %v10157_v14  ;;  %14527 = vst [vmem:[#allocation307_spill] sm:$0xff] %v10159_v48  ;;  %2657 = vbcast.lane.b32.xlu0 %v2595_v33, 288 }
 0x31e   :  { %2661 = vbcast.lane.b32.xlu1 %v2595_v33, 296  ;;  %v10161_v13 = vpop.xlane.xlu1 %1790  ;;  %v10163_v0 = vpop.xlane.xlu0 %1787 }
 0x31f   :  { %14528 = vst [vmem:[#allocation308_spill] sm:$0xff] %v10161_v13  ;;  %14529 = vst [vmem:[#allocation309_spill] sm:$0xff] %v10163_v0  ;;  %2665 = vbcast.lane.b32.xlu0 %v2595_v33, 304  ;;  %v10178_v0 = vsub.s32 1, %v10129_v41 }
 0x321   :  { %14536 = vst [vmem:[#allocation316_spill] sm:$0xff] %v10178_v0 }
 0x322   :  { %2669 = vbcast.lane.b32.xlu1 %v2595_v33, 312  ;;  %v10165_v40 = vpop.xlane.xlu1 %1796  ;;  %v10167_v20 = vpop.xlane.xlu0 %1793 }
 0x323   :  { %14530 = vst [vmem:[#allocation310_spill] sm:$0xff] %v10165_v40  ;;  %14531 = vst [vmem:[#allocation311_spill] sm:$0xff] %v10167_v20  ;;  %2673 = vbcast.lane.b32.xlu0 %v2595_v33, 320 }
 0x326   :  { %2677 = vbcast.lane.b32.xlu1 %v2595_v33, 328  ;;  %v10169_v19 = vpop.xlane.xlu1 %1802  ;;  %v10171_v56 = vpop.xlane.xlu0 %1799 }
 0x327   :  { %14532 = vst [vmem:[#allocation312_spill] sm:$0xff] %v10169_v19  ;;  %14533 = vst [vmem:[#allocation313_spill] sm:$0xff] %v10171_v56  ;;  %2681 = vbcast.lane.b32.xlu0 %v2595_v33, 336  ;;  %v2599_v19 = vrot.slane %v10141_v32, %v10178_v0 }
 0x32a   :  { %2685 = vbcast.lane.b32.xlu1 %v2595_v33, 344  ;;  %v10173_v48 = vpop.xlane.xlu1 %1808  ;;  %v10175_v14 = vpop.xlane.xlu0 %1805 }
 0x32b   :  { %14534 = vst [vmem:[#allocation314_spill] sm:$0xff] %v10173_v48  ;;  %14535 = vst [vmem:[#allocation315_spill] sm:$0xff] %v10175_v14  ;;  %2689 = vbcast.lane.b32.xlu0 %v2595_v33, 352 }
 0x32e   :  { %2693 = vbcast.lane.b32.xlu1 %v2595_v33, 360  ;;  %v10180_v40 = vpop.xlane.xlu1 %1814  ;;  %v10182_v20 = vpop.xlane.xlu0 %1811 }
 0x32f   :  { %14537 = vst [vmem:[#allocation317_spill] sm:$0xff] %v10180_v40  ;;  %14538 = vst [vmem:[#allocation318_spill] sm:$0xff] %v10182_v20  ;;  %2697 = vbcast.lane.b32.xlu0 %v2595_v33, 368 }
 0x332   :  { %2701 = vbcast.lane.b32.xlu1 %v2595_v33, 376  ;;  %v10186_v56 = vpop.xlane.xlu1 %1820  ;;  %v10188_v13 = vpop.xlane.xlu0 %1817 }
 0x333   :  { %14539 = vst [vmem:[#allocation319_spill] sm:$0xff] %v10186_v56  ;;  %14540 = vst [vmem:[#allocation320_spill] sm:$0xff] %v10188_v13  ;;  %2704 = vbcast.lane.b32.xlu0 %v2599_v19, 256 }
 0x336   :  { %2708 = vbcast.lane.b32.xlu1 %v2599_v19, 264  ;;  %v10190_v14 = vpop.xlane.xlu1 %1826  ;;  %v10192_v48 = vpop.xlane.xlu0 %1823 }
 0x337   :  { %14541 = vst [vmem:[#allocation321_spill] sm:$0xff] %v10190_v14  ;;  %14542 = vst [vmem:[#allocation322_spill] sm:$0xff] %v10192_v48  ;;  %2712 = vbcast.lane.b32.xlu0 %v2599_v19, 272 }
 0x33a   :  { %2716 = vbcast.lane.b32.xlu1 %v2599_v19, 280  ;;  %v10194_v40 = vpop.xlane.xlu1 %1832  ;;  %v10196_v20 = vpop.xlane.xlu0 %1829 }
 0x33b   :  { %14543 = vst [vmem:[#allocation323_spill] sm:$0xff] %v10194_v40  ;;  %14544 = vst [vmem:[#allocation324_spill] sm:$0xff] %v10196_v20  ;;  %2720 = vbcast.lane.b32.xlu0 %v2599_v19, 288 }
 0x33e   :  { %2724 = vbcast.lane.b32.xlu1 %v2599_v19, 296  ;;  %v10198_v55 = vpop.xlane.xlu1 %1838  ;;  %v10200_v33 = vpop.xlane.xlu0 %1835 }
 0x33f   :  { %14545 = vst [vmem:[#allocation325_spill] sm:$0xff] %v10198_v55  ;;  %14546 = vst [vmem:[#allocation326_spill] sm:$0xff] %v10200_v33  ;;  %2728 = vbcast.lane.b32.xlu0 %v2599_v19, 304  ;;  %v14019_v33 = vsub.s32 2, %v10129_v41 }
 0x342   :  { %2732 = vbcast.lane.b32.xlu1 %v2599_v19, 312  ;;  %v10202_v13 = vpop.xlane.xlu1 %1844  ;;  %v10204_v56 = vpop.xlane.xlu0 %1841 }
 0x343   :  { %14547 = vst [vmem:[#allocation327_spill] sm:$0xff] %v10202_v13  ;;  %14548 = vst [vmem:[#allocation328_spill] sm:$0xff] %v10204_v56  ;;  %2736 = vbcast.lane.b32.xlu0 %v2599_v19, 320 }
 0x346   :  { %2740 = vbcast.lane.b32.xlu1 %v2599_v19, 328  ;;  %v10206_v48 = vpop.xlane.xlu1 %1850  ;;  %v10208_v14 = vpop.xlane.xlu0 %1847 }
 0x347   :  { %14549 = vst [vmem:[#allocation329_spill] sm:$0xff] %v10206_v48  ;;  %14550 = vst [vmem:[#allocation330_spill] sm:$0xff] %v10208_v14  ;;  %2744 = vbcast.lane.b32.xlu0 %v2599_v19, 336  ;;  %v2603_v48 = vrot.slane %v10141_v32, %v14019_v33 }
 0x34a   :  { %2748 = vbcast.lane.b32.xlu1 %v2599_v19, 344  ;;  %v10210_v20 = vpop.xlane.xlu1 %1856  ;;  %v10212_v40 = vpop.xlane.xlu0 %1853 }
 0x34b   :  { %14551 = vst [vmem:[#allocation331_spill] sm:$0xff] %v10210_v20  ;;  %14552 = vst [vmem:[#allocation332_spill] sm:$0xff] %v10212_v40  ;;  %2752 = vbcast.lane.b32.xlu0 %v2599_v19, 352 }
 0x34e   :  { %2756 = vbcast.lane.b32.xlu1 %v2599_v19, 360  ;;  %v10215_v55 = vpop.xlane.xlu1 %1862  ;;  %v10217_v13 = vpop.xlane.xlu0 %1859 }
 0x34f   :  { %14553 = vst [vmem:[#allocation333_spill] sm:$0xff] %v10215_v55  ;;  %14554 = vst [vmem:[#allocation334_spill] sm:$0xff] %v10217_v13  ;;  %2760 = vbcast.lane.b32.xlu0 %v2599_v19, 368 }
 0x352   :  { %2764 = vbcast.lane.b32.xlu1 %v2599_v19, 376  ;;  %v10222_v14 = vpop.xlane.xlu1 %1868  ;;  %v10224_v56 = vpop.xlane.xlu0 %1865 }
 0x353   :  { %14555 = vst [vmem:[#allocation335_spill] sm:$0xff] %v10222_v14  ;;  %14556 = vst [vmem:[#allocation336_spill] sm:$0xff] %v10224_v56  ;;  %2767 = vbcast.lane.b32.xlu0 %v2603_v48, 256 }
 0x356   :  { %2771 = vbcast.lane.b32.xlu1 %v2603_v48, 264  ;;  %v10226_v40 = vpop.xlane.xlu1 %1874  ;;  %v10228_v20 = vpop.xlane.xlu0 %1871 }
 0x357   :  { %14557 = vst [vmem:[#allocation337_spill] sm:$0xff] %v10226_v40  ;;  %14558 = vst [vmem:[#allocation338_spill] sm:$0xff] %v10228_v20  ;;  %2775 = vbcast.lane.b32.xlu0 %v2603_v48, 272 }
 0x35a   :  { %2779 = vbcast.lane.b32.xlu1 %v2603_v48, 280  ;;  %v10230_v55 = vpop.xlane.xlu1 %1880  ;;  %v10232_v13 = vpop.xlane.xlu0 %1877 }
 0x35b   :  { %14559 = vst [vmem:[#allocation339_spill] sm:$0xff] %v10230_v55  ;;  %14560 = vst [vmem:[#allocation340_spill] sm:$0xff] %v10232_v13  ;;  %2783 = vbcast.lane.b32.xlu0 %v2603_v48, 288 }
 0x35e   :  { %2787 = vbcast.lane.b32.xlu1 %v2603_v48, 296  ;;  %v10234_v33 = vpop.xlane.xlu1 %1886  ;;  %v10236_v19 = vpop.xlane.xlu0 %1883 }
 0x35f   :  { %14561 = vst [vmem:[#allocation341_spill] sm:$0xff] %v10234_v33  ;;  %14562 = vst [vmem:[#allocation342_spill] sm:$0xff] %v10236_v19  ;;  %2791 = vbcast.lane.b32.xlu0 %v2603_v48, 304  ;;  %v14020_v19 = vsub.s32 3, %v10129_v41 }
 0x362   :  { %2795 = vbcast.lane.b32.xlu1 %v2603_v48, 312  ;;  %v10238_v56 = vpop.xlane.xlu1 %1892  ;;  %v10240_v14 = vpop.xlane.xlu0 %1889 }
 0x363   :  { %14563 = vst [vmem:[#allocation343_spill] sm:$0xff] %v10238_v56  ;;  %14564 = vst [vmem:[#allocation344_spill] sm:$0xff] %v10240_v14  ;;  %2799 = vbcast.lane.b32.xlu0 %v2603_v48, 320 }
 0x366   :  { %2803 = vbcast.lane.b32.xlu1 %v2603_v48, 328  ;;  %v10242_v20 = vpop.xlane.xlu1 %1898  ;;  %v10244_v40 = vpop.xlane.xlu0 %1895 }
 0x367   :  { %14565 = vst [vmem:[#allocation345_spill] sm:$0xff] %v10242_v20  ;;  %14566 = vst [vmem:[#allocation346_spill] sm:$0xff] %v10244_v40  ;;  %2807 = vbcast.lane.b32.xlu0 %v2603_v48, 336  ;;  %v2607_v20 = vrot.slane %v10141_v32, %v14020_v19 }
 0x36a   :  { %2811 = vbcast.lane.b32.xlu1 %v2603_v48, 344  ;;  %v10246_v13 = vpop.xlane.xlu1 %1904  ;;  %v10248_v55 = vpop.xlane.xlu0 %1901 }
 0x36b   :  { %14567 = vst [vmem:[#allocation347_spill] sm:$0xff] %v10246_v13  ;;  %14568 = vst [vmem:[#allocation348_spill] sm:$0xff] %v10248_v55  ;;  %2815 = vbcast.lane.b32.xlu0 %v2603_v48, 352 }
 0x36e   :  { %2819 = vbcast.lane.b32.xlu1 %v2603_v48, 360  ;;  %v10251_v33 = vpop.xlane.xlu1 %1910  ;;  %v10253_v56 = vpop.xlane.xlu0 %1907 }
 0x36f   :  { %14569 = vst [vmem:[#allocation349_spill] sm:$0xff] %v10251_v33  ;;  %14570 = vst [vmem:[#allocation350_spill] sm:$0xff] %v10253_v56  ;;  %2823 = vbcast.lane.b32.xlu0 %v2603_v48, 368 }
 0x372   :  { %2827 = vbcast.lane.b32.xlu1 %v2603_v48, 376  ;;  %v10258_v40 = vpop.xlane.xlu1 %1916  ;;  %v10260_v14 = vpop.xlane.xlu0 %1913 }
 0x373   :  { %14571 = vst [vmem:[#allocation351_spill] sm:$0xff] %v10258_v40  ;;  %14572 = vst [vmem:[#allocation352_spill] sm:$0xff] %v10260_v14  ;;  %2830 = vbcast.lane.b32.xlu0 %v2607_v20, 256 }
 0x376   :  { %2834 = vbcast.lane.b32.xlu1 %v2607_v20, 264  ;;  %v10262_v55 = vpop.xlane.xlu1 %1922  ;;  %v10264_v13 = vpop.xlane.xlu0 %1919 }
 0x377   :  { %14573 = vst [vmem:[#allocation353_spill] sm:$0xff] %v10262_v55  ;;  %14574 = vst [vmem:[#allocation354_spill] sm:$0xff] %v10264_v13  ;;  %2838 = vbcast.lane.b32.xlu0 %v2607_v20, 272 }
 0x37a   :  { %2842 = vbcast.lane.b32.xlu1 %v2607_v20, 280  ;;  %v10266_v33 = vpop.xlane.xlu1 %1928  ;;  %v10268_v56 = vpop.xlane.xlu0 %1925 }
 0x37b   :  { %14575 = vst [vmem:[#allocation355_spill] sm:$0xff] %v10266_v33  ;;  %14576 = vst [vmem:[#allocation356_spill] sm:$0xff] %v10268_v56  ;;  %2846 = vbcast.lane.b32.xlu0 %v2607_v20, 288 }
 0x37e   :  { %2850 = vbcast.lane.b32.xlu1 %v2607_v20, 296  ;;  %v10270_v19 = vpop.xlane.xlu1 %1934  ;;  %v10272_v48 = vpop.xlane.xlu0 %1931 }
 0x37f   :  { %14577 = vst [vmem:[#allocation357_spill] sm:$0xff] %v10270_v19  ;;  %14578 = vst [vmem:[#allocation358_spill] sm:$0xff] %v10272_v48  ;;  %2854 = vbcast.lane.b32.xlu0 %v2607_v20, 304  ;;  %v2610_v48 = vsub.s32 4, %v10129_v41 }
 0x382   :  { %2858 = vbcast.lane.b32.xlu1 %v2607_v20, 312  ;;  %v10274_v14 = vpop.xlane.xlu1 %1940  ;;  %v10276_v40 = vpop.xlane.xlu0 %1937 }
 0x383   :  { %14579 = vst [vmem:[#allocation359_spill] sm:$0xff] %v10274_v14  ;;  %14580 = vst [vmem:[#allocation360_spill] sm:$0xff] %v10276_v40  ;;  %2862 = vbcast.lane.b32.xlu0 %v2607_v20, 320  ;;  %v2611_v40 = vrot.slane %v10141_v32, %v2610_v48 }
 0x386   :  { %2866 = vbcast.lane.b32.xlu1 %v2607_v20, 328  ;;  %v10278_v13 = vpop.xlane.xlu1 %1946  ;;  %v10280_v55 = vpop.xlane.xlu0 %1943 }
 0x387   :  { %14581 = vst [vmem:[#allocation361_spill] sm:$0xff] %v10278_v13  ;;  %14582 = vst [vmem:[#allocation362_spill] sm:$0xff] %v10280_v55  ;;  %2870 = vbcast.lane.b32.xlu0 %v2607_v20, 336 }
 0x38a   :  { %2874 = vbcast.lane.b32.xlu1 %v2607_v20, 344  ;;  %v10282_v56 = vpop.xlane.xlu1 %1952  ;;  %v10284_v33 = vpop.xlane.xlu0 %1949 }
 0x38b   :  { %14583 = vst [vmem:[#allocation363_spill] sm:$0xff] %v10282_v56  ;;  %14584 = vst [vmem:[#allocation364_spill] sm:$0xff] %v10284_v33  ;;  %2878 = vbcast.lane.b32.xlu0 %v2607_v20, 352 }
 0x38e   :  { %2882 = vbcast.lane.b32.xlu1 %v2607_v20, 360  ;;  %v10287_v19 = vpop.permute.xlu1 %2645  ;;  %v10289_v14 = vpop.permute.xlu0 %2641 }
 0x38f   :  { %14585 = vst [vmem:[#allocation365_spill] sm:$0xff] %v10287_v19  ;;  %14586 = vst [vmem:[#allocation366_spill] sm:$0xff] %v10289_v14  ;;  %2886 = vbcast.lane.b32.xlu0 %v2607_v20, 368 }
 0x392   :  { %2890 = vbcast.lane.b32.xlu1 %v2607_v20, 376  ;;  %v10292_v13 = vpop.permute.xlu1 %2649  ;;  %v10294_v55 = vpop.permute.xlu0 %2657 }
 0x393   :  { %14587 = vst [vmem:[#allocation367_spill] sm:$0xff] %v10292_v13  ;;  %14588 = vst [vmem:[#allocation368_spill] sm:$0xff] %v10294_v55  ;;  %2893 = vbcast.lane.b32.xlu0 %v2611_v40, 256 }
 0x396   :  { %2897 = vbcast.lane.b32.xlu1 %v2611_v40, 264  ;;  %v10296_v56 = vpop.permute.xlu1 %2653  ;;  %v10298_v33 = vpop.permute.xlu0 %2665 }
 0x397   :  { %14589 = vst [vmem:[#allocation369_spill] sm:$0xff] %v10296_v56  ;;  %14590 = vst [vmem:[#allocation370_spill] sm:$0xff] %v10298_v33  ;;  %2901 = vbcast.lane.b32.xlu0 %v2611_v40, 272 }
 0x39a   :  { %2905 = vbcast.lane.b32.xlu1 %v2611_v40, 280  ;;  %v10300_v31 = vpop.permute.xlu1 %2661  ;;  %v10302_v12 = vpop.permute.xlu0 %2673 }
 0x39b   :  { %14591 = vst [vmem:[#allocation371_spill] sm:$0xff] %v10300_v31  ;;  %14592 = vst [vmem:[#allocation372_spill] sm:$0xff] %v10302_v12  ;;  %2909 = vbcast.lane.b32.xlu0 %v2611_v40, 288 }
 0x39e   :  { %2913 = vbcast.lane.b32.xlu1 %v2611_v40, 296  ;;  %v10304_v48 = vpop.permute.xlu1 %2669  ;;  %v10306_v20 = vpop.permute.xlu0 %2681 }
 0x39f   :  { %14593 = vst [vmem:[#allocation373_spill] sm:$0xff] %v10304_v48  ;;  %14594 = vst [vmem:[#allocation374_spill] sm:$0xff] %v10306_v20  ;;  %2917 = vbcast.lane.b32.xlu0 %v2611_v40, 304 }
 0x3a2   :  { %2921 = vbcast.lane.b32.xlu1 %v2611_v40, 312  ;;  %v10308_v3 = vpop.permute.xlu1 %2677  ;;  %v10310_v45 = vpop.permute.xlu0 %2689 }
 0x3a3   :  { %14595 = vst [vmem:[#allocation375_spill] sm:$0xff] %v10308_v3  ;;  %14596 = vst [vmem:[#allocation376_spill] sm:$0xff] %v10310_v45  ;;  %2925 = vbcast.lane.b32.xlu0 %v2611_v40, 320 }
 0x3a6   :  { %2929 = vbcast.lane.b32.xlu1 %v2611_v40, 328  ;;  %v10312_v42 = vpop.permute.xlu1 %2685  ;;  %v10314_v28 = vpop.permute.xlu0 %2697 }
 0x3a7   :  { %14597 = vst [vmem:[#allocation377_spill] sm:$0xff] %v10312_v42  ;;  %14598 = vst [vmem:[#allocation378_spill] sm:$0xff] %v10314_v28  ;;  %2933 = vbcast.lane.b32.xlu0 %v2611_v40, 336 }
 0x3aa   :  { %2937 = vbcast.lane.b32.xlu1 %v2611_v40, 344  ;;  %v10316_v25 = vpop.permute.xlu1 %2693  ;;  %v10318_v5 = vpop.permute.xlu0 %2704 }
 0x3ab   :  { %14599 = vst [vmem:[#allocation379_spill] sm:$0xff] %v10316_v25  ;;  %14600 = vst [vmem:[#allocation380_spill] sm:$0xff] %v10318_v5  ;;  %2941 = vbcast.lane.b32.xlu0 %v2611_v40, 352 }
 0x3ae   :  { %2945 = vbcast.lane.b32.xlu1 %v2611_v40, 360  ;;  %v10321_v54 = vpop.permute.xlu1 %2701  ;;  %v10323_v49 = vpop.permute.xlu0 %2712 }
 0x3af   :  { %14601 = vst [vmem:[#allocation381_spill] sm:$0xff] %v10321_v54  ;;  %14602 = vst [vmem:[#allocation382_spill] sm:$0xff] %v10323_v49  ;;  %2949 = vbcast.lane.b32.xlu0 %v2611_v40, 368 }
 0x3b2   :  { %2953 = vbcast.lane.b32.xlu1 %v2611_v40, 376  ;;  %v10326_v34 = vpop.permute.xlu1 %2708  ;;  %v10328_v24 = vpop.permute.xlu0 %2720 }
 0x3b3   :  { %14603 = vst [vmem:[#allocation383_spill] sm:$0xff] %v10326_v34  ;;  %14604 = vst [vmem:[#allocation384_spill] sm:$0xff] %v10328_v24  ;;  %2956 = vbcast.lane.b32.xlu0 %v2615_v39, 256 }
 0x3b6   :  { %2960 = vbcast.lane.b32.xlu1 %v2615_v39, 264  ;;  %v10330_v21 = vpop.permute.xlu1 %2716  ;;  %v10332_v11 = vpop.permute.xlu0 %2728 }
 0x3b7   :  { %14605 = vst [vmem:[#allocation385_spill] sm:$0xff] %v10330_v21  ;;  %14606 = vst [vmem:[#allocation386_spill] sm:$0xff] %v10332_v11  ;;  %2964 = vbcast.lane.b32.xlu0 %v2615_v39, 272 }
 0x3ba   :  { %2968 = vbcast.lane.b32.xlu1 %v2615_v39, 280  ;;  %v10334_v10 = vpop.permute.xlu1 %2724  ;;  %v10336_v60 = vpop.permute.xlu0 %2736 }
 0x3bb   :  { %14607 = vst [vmem:[#allocation387_spill] sm:$0xff] %v10334_v10  ;;  %14608 = vst [vmem:[#allocation388_spill] sm:$0xff] %v10336_v60  ;;  %2972 = vbcast.lane.b32.xlu0 %v2615_v39, 288 }
 0x3be   :  { %2976 = vbcast.lane.b32.xlu1 %v2615_v39, 296  ;;  %v10338_v4 = vpop.permute.xlu1 %2732  ;;  %v10340_v40 = vpop.permute.xlu0 %2744 }
 0x3bf   :  { %14609 = vst [vmem:[#allocation389_spill] sm:$0xff] %v10338_v4  ;;  %14610 = vst [vmem:[#allocation390_spill] sm:$0xff] %v10340_v40  ;;  %2980 = vbcast.lane.b32.xlu0 %v2615_v39, 304  ;;  %v2618_v40 = vsub.s32 6, %v10129_v41 }
 0x3c2   :  { %2984 = vbcast.lane.b32.xlu1 %v2615_v39, 312  ;;  %v10342_v57 = vpop.permute.xlu1 %2740  ;;  %v10344_v47 = vpop.permute.xlu0 %2752 }
 0x3c3   :  { %14611 = vst [vmem:[#allocation391_spill] sm:$0xff] %v10342_v57  ;;  %14612 = vst [vmem:[#allocation392_spill] sm:$0xff] %v10344_v47  ;;  %2988 = vbcast.lane.b32.xlu0 %v2615_v39, 320  ;;  %v2619_v47 = vrot.slane %v10141_v32, %v2618_v40 }
 0x3c6   :  { %2992 = vbcast.lane.b32.xlu1 %v2615_v39, 328  ;;  %v10346_v46 = vpop.permute.xlu1 %2748  ;;  %v10348_v38 = vpop.permute.xlu0 %2760 }
 0x3c7   :  { %14613 = vst [vmem:[#allocation393_spill] sm:$0xff] %v10346_v46  ;;  %14614 = vst [vmem:[#allocation394_spill] sm:$0xff] %v10348_v38  ;;  %2996 = vbcast.lane.b32.xlu0 %v2615_v39, 336 }
 0x3ca   :  { %3000 = vbcast.lane.b32.xlu1 %v2615_v39, 344  ;;  %v10350_v35 = vpop.permute.xlu1 %2756  ;;  %v10352_v27 = vpop.permute.xlu0 %2767 }
 0x3cb   :  { %14615 = vst [vmem:[#allocation395_spill] sm:$0xff] %v10350_v35  ;;  %14616 = vst [vmem:[#allocation396_spill] sm:$0xff] %v10352_v27  ;;  %3004 = vbcast.lane.b32.xlu0 %v2615_v39, 352 }
 0x3ce   :  { %3008 = vbcast.lane.b32.xlu1 %v2615_v39, 360  ;;  %v10355_v60 = vpop.permute.xlu1 %2764  ;;  %v10357_v26 = vpop.permute.xlu0 %2775 }
 0x3cf   :  { %14617 = vst [vmem:[#allocation397_spill] sm:$0xff] %v10355_v60  ;;  %14618 = vst [vmem:[#allocation398_spill] sm:$0xff] %v10357_v26  ;;  %3012 = vbcast.lane.b32.xlu0 %v2615_v39, 368 }
 0x3d2   :  { %3016 = vbcast.lane.b32.xlu1 %v2615_v39, 376  ;;  %v10360_v46 = vpop.permute.xlu1 %2771  ;;  %v10362_v38 = vpop.permute.xlu0 %2783 }
 0x3d3   :  { %14619 = vst [vmem:[#allocation399_spill] sm:$0xff] %v10360_v46  ;;  %14620 = vst [vmem:[#allocation400_spill] sm:$0xff] %v10362_v38  ;;  %3019 = vbcast.lane.b32.xlu0 %v2619_v47, 256 }
 0x3d6   :  { %3023 = vbcast.lane.b32.xlu1 %v2619_v47, 264  ;;  %v10364_v35 = vpop.permute.xlu1 %2779  ;;  %v10366_v27 = vpop.permute.xlu0 %2791 }
 0x3d7   :  { %14621 = vst [vmem:[#allocation401_spill] sm:$0xff] %v10364_v35  ;;  %14622 = vst [vmem:[#allocation402_spill] sm:$0xff] %v10366_v27  ;;  %3027 = vbcast.lane.b32.xlu0 %v2619_v47, 272 }
 0x3da   :  { %3031 = vbcast.lane.b32.xlu1 %v2619_v47, 280  ;;  %v10368_v18 = vpop.permute.xlu1 %2787  ;;  %v10370_v60 = vpop.permute.xlu0 %2799 }
 0x3db   :  { %14623 = vst [vmem:[#allocation403_spill] sm:$0xff] %v10368_v18  ;;  %14624 = vst [vmem:[#allocation404_spill] sm:$0xff] %v10370_v60  ;;  %3035 = vbcast.lane.b32.xlu0 %v2619_v47, 288 }
 0x3de   :  { %3039 = vbcast.lane.b32.xlu1 %v2619_v47, 296  ;;  %v10372_v40 = vpop.permute.xlu1 %2795  ;;  %v10374_v39 = vpop.permute.xlu0 %2807 }
 0x3df   :  { %14625 = vst [vmem:[#allocation405_spill] sm:$0xff] %v10372_v40  ;;  %14626 = vst [vmem:[#allocation406_spill] sm:$0xff] %v10374_v39  ;;  %3043 = vbcast.lane.b32.xlu0 %v2619_v47, 304  ;;  %v2622_v39 = vsub.s32 7, %v10129_v41 }
 0x3e2   :  { %3047 = vbcast.lane.b32.xlu1 %v2619_v47, 312  ;;  %v10376_v38 = vpop.permute.xlu1 %2803  ;;  %v10378_v26 = vpop.permute.xlu0 %2815 }
 0x3e3   :  { %14627 = vst [vmem:[#allocation407_spill] sm:$0xff] %v10376_v38  ;;  %14628 = vst [vmem:[#allocation408_spill] sm:$0xff] %v10378_v26  ;;  %3051 = vbcast.lane.b32.xlu0 %v2619_v47, 320  ;;  %v2623_v26 = vrot.slane %v10141_v32, %v2622_v39 }
 0x3e6   :  { %3055 = vbcast.lane.b32.xlu1 %v2619_v47, 328  ;;  %v10380_v27 = vpop.permute.xlu1 %2811  ;;  %v10382_v35 = vpop.permute.xlu0 %2823 }
 0x3e7   :  { %14629 = vst [vmem:[#allocation409_spill] sm:$0xff] %v10380_v27  ;;  %14630 = vst [vmem:[#allocation410_spill] sm:$0xff] %v10382_v35  ;;  %3059 = vbcast.lane.b32.xlu0 %v2619_v47, 336 }
 0x3ea   :  { %3063 = vbcast.lane.b32.xlu1 %v2619_v47, 344  ;;  %v10384_v60 = vpop.permute.xlu1 %2819  ;;  %v10386_v18 = vpop.permute.xlu0 %2830 }
 0x3eb   :  { %14631 = vst [vmem:[#allocation411_spill] sm:$0xff] %v10384_v60  ;;  %14632 = vst [vmem:[#allocation412_spill] sm:$0xff] %v10386_v18  ;;  %3067 = vbcast.lane.b32.xlu0 %v2619_v47, 352 }
 0x3ee   :  { %3071 = vbcast.lane.b32.xlu1 %v2619_v47, 360  ;;  %v10389_v40 = vpop.permute.xlu1 %2827  ;;  %v10391_v38 = vpop.permute.xlu0 %2838 }
 0x3ef   :  { %14633 = vst [vmem:[#allocation413_spill] sm:$0xff] %v10389_v40  ;;  %14634 = vst [vmem:[#allocation414_spill] sm:$0xff] %v10391_v38  ;;  %3075 = vbcast.lane.b32.xlu0 %v2619_v47, 368 }
 0x3f2   :  { %3079 = vbcast.lane.b32.xlu1 %v2619_v47, 376  ;;  %v10394_v27 = vpop.permute.xlu1 %2834  ;;  %v10396_v35 = vpop.permute.xlu0 %2846 }
 0x3f3   :  { %14635 = vst [vmem:[#allocation415_spill] sm:$0xff] %v10394_v27  ;;  %14636 = vst [vmem:[#allocation416_spill] sm:$0xff] %v10396_v35  ;;  %3082 = vbcast.lane.b32.xlu0 %v2623_v26, 256 }
 0x3f6   :  { %3086 = vbcast.lane.b32.xlu1 %v2623_v26, 264  ;;  %v10398_v60 = vpop.permute.xlu1 %2842  ;;  %v10400_v18 = vpop.permute.xlu0 %2854 }
 0x3f7   :  { %14637 = vst [vmem:[#allocation417_spill] sm:$0xff] %v10398_v60  ;;  %14638 = vst [vmem:[#allocation418_spill] sm:$0xff] %v10400_v18  ;;  %3090 = vbcast.lane.b32.xlu0 %v2623_v26, 272 }
 0x3fa   :  { %3094 = vbcast.lane.b32.xlu1 %v2623_v26, 280  ;;  %v10402_v46 = vpop.permute.xlu1 %2850  ;;  %v10404_v40 = vpop.permute.xlu0 %2862 }
 0x3fb   :  { %14639 = vst [vmem:[#allocation419_spill] sm:$0xff] %v10402_v46  ;;  %14640 = vst [vmem:[#allocation420_spill] sm:$0xff] %v10404_v40  ;;  %3098 = vbcast.lane.b32.xlu0 %v2623_v26, 288 }
 0x3fe   :  { %3102 = vbcast.lane.b32.xlu1 %v2623_v26, 296  ;;  %v10406_v32 = vpop.permute.xlu1 %2858  ;;  %v10408_v47 = vpop.permute.xlu0 %2870 }
 0x3ff   :  { %14641 = vst [vmem:[#allocation421_spill] sm:$0xff] %v10406_v32  ;;  %14642 = vst [vmem:[#allocation422_spill] sm:$0xff] %v10408_v47  ;;  %3106 = vbcast.lane.b32.xlu0 %v2623_v26, 304  ;;  %v10425_v47 = vld [vmem:[%s14009_s6 + $0x8] sm:$0xf] }
 0x402   :  { %3110 = vbcast.lane.b32.xlu1 %v2623_v26, 312  ;;  %v10410_v39 = vpop.permute.xlu1 %2866  ;;  %v10412_v35 = vpop.permute.xlu0 %2878 }
 0x403   :  { %14643 = vst [vmem:[#allocation423_spill] sm:$0xff] %v10410_v39  ;;  %14644 = vst [vmem:[#allocation424_spill] sm:$0xff] %v10412_v35  ;;  %3114 = vbcast.lane.b32.xlu0 %v2623_v26, 320 }
 0x406   :  { %3118 = vbcast.lane.b32.xlu1 %v2623_v26, 328  ;;  %v10414_v18 = vpop.permute.xlu1 %2874  ;;  %v10416_v38 = vpop.permute.xlu0 %2886 }
 0x407   :  { %14645 = vst [vmem:[#allocation425_spill] sm:$0xff] %v10414_v18  ;;  %14646 = vst [vmem:[#allocation426_spill] sm:$0xff] %v10416_v38  ;;  %3122 = vbcast.lane.b32.xlu0 %v2623_v26, 336  ;;  %v2627_v38 = vrot.slane %v10425_v47, %v10136_v63  ;;  %v8480_v18 = vmov 0  }
 0x408   :  { %8478 = vset.pattern.permute.xlu0 %v8480_v18  ;;  %8479 = vset.pattern.permute.xlu1 %v8480_v18 }
 0x40a   :  { %3126 = vbcast.lane.b32.xlu1 %v2623_v26, 344  ;;  %v10418_v40 = vpop.permute.xlu1 %2882  ;;  %v10420_v46 = vpop.permute.xlu0 %2893 }
 0x40b   :  { %14647 = vst [vmem:[#allocation427_spill] sm:$0xff] %v10418_v40  ;;  %14648 = vst [vmem:[#allocation428_spill] sm:$0xff] %v10420_v46  ;;  %3130 = vbcast.lane.b32.xlu0 %v2623_v26, 352 }
 0x40e   :  { %3134 = vbcast.lane.b32.xlu1 %v2623_v26, 360  ;;  %v10427_v35 = vpop.permute.xlu1 %2890  ;;  %v10429_v39 = vpop.permute.xlu0 %2901 }
 0x40f   :  { %14649 = vst [vmem:[#allocation429_spill] sm:$0xff] %v10427_v35  ;;  %14650 = vst [vmem:[#allocation430_spill] sm:$0xff] %v10429_v39  ;;  %3138 = vbcast.lane.b32.xlu0 %v2623_v26, 368 }
 0x412   :  { %3142 = vbcast.lane.b32.xlu1 %v2623_v26, 376  ;;  %v10433_v46 = vpop.permute.xlu1 %2897  ;;  %v10435_v40 = vpop.permute.xlu0 %2909 }
 0x413   :  { %14651 = vst [vmem:[#allocation431_spill] sm:$0xff] %v10433_v46  ;;  %14652 = vst [vmem:[#allocation432_spill] sm:$0xff] %v10435_v40  ;;  %3145 = vbcast.lane.b32.xlu0 %v2627_v38, 256 }
 0x416   :  { %3149 = vbcast.lane.b32.xlu1 %v2627_v38, 264  ;;  %v10437_v32 = vpop.permute.xlu1 %2905  ;;  %v10439_v60 = vpop.permute.xlu0 %2917 }
 0x417   :  { %14653 = vst [vmem:[#allocation433_spill] sm:$0xff] %v10437_v32  ;;  %14654 = vst [vmem:[#allocation434_spill] sm:$0xff] %v10439_v60  ;;  %3153 = vbcast.lane.b32.xlu0 %v2627_v38, 272 }
 0x41a   :  { %3157 = vbcast.lane.b32.xlu1 %v2627_v38, 280  ;;  %v10441_v39 = vpop.permute.xlu1 %2913  ;;  %v10443_v35 = vpop.permute.xlu0 %2925 }
 0x41b   :  { %14655 = vst [vmem:[#allocation435_spill] sm:$0xff] %v10441_v39  ;;  %14656 = vst [vmem:[#allocation436_spill] sm:$0xff] %v10443_v35  ;;  %3161 = vbcast.lane.b32.xlu0 %v2627_v38, 288 }
 0x41e   :  { %3165 = vbcast.lane.b32.xlu1 %v2627_v38, 296  ;;  %v10445_v18 = vpop.permute.xlu1 %2921  ;;  %v10447_v26 = vpop.permute.xlu0 %2933 }
 0x41f   :  { %14657 = vst [vmem:[#allocation437_spill] sm:$0xff] %v10445_v18  ;;  %14658 = vst [vmem:[#allocation438_spill] sm:$0xff] %v10447_v26  ;;  %3169 = vbcast.lane.b32.xlu0 %v2627_v38, 304 }
 0x422   :  { %3173 = vbcast.lane.b32.xlu1 %v2627_v38, 312  ;;  %v10449_v63 = vpop.permute.xlu1 %2929  ;;  %v10451_v40 = vpop.permute.xlu0 %2941 }
 0x423   :  { %14659 = vst [vmem:[#allocation439_spill] sm:$0xff] %v10449_v63  ;;  %14660 = vst [vmem:[#allocation440_spill] sm:$0xff] %v10451_v40  ;;  %3177 = vbcast.lane.b32.xlu0 %v2627_v38, 320  ;;  %v2631_v40 = vrot.slane %v10425_v47, %v10178_v0 }
 0x426   :  { %3181 = vbcast.lane.b32.xlu1 %v2627_v38, 328  ;;  %v10453_v60 = vpop.permute.xlu1 %2937  ;;  %v10455_v32 = vpop.permute.xlu0 %2949 }
 0x427   :  { %14661 = vst [vmem:[#allocation441_spill] sm:$0xff] %v10453_v60  ;;  %14662 = vst [vmem:[#allocation442_spill] sm:$0xff] %v10455_v32  ;;  %3185 = vbcast.lane.b32.xlu0 %v2627_v38, 336 }
 0x42a   :  { %3189 = vbcast.lane.b32.xlu1 %v2627_v38, 344  ;;  %v10457_v35 = vpop.permute.xlu1 %2945  ;;  %v10459_v39 = vpop.permute.xlu0 %2956 }
 0x42b   :  { %14663 = vst [vmem:[#allocation443_spill] sm:$0xff] %v10457_v35  ;;  %14664 = vst [vmem:[#allocation444_spill] sm:$0xff] %v10459_v39  ;;  %3193 = vbcast.lane.b32.xlu0 %v2627_v38, 352 }
 0x42e   :  { %3197 = vbcast.lane.b32.xlu1 %v2627_v38, 360  ;;  %v10461_v26 = vpop.permute.xlu1 %2953  ;;  %v10463_v18 = vpop.permute.xlu0 %2964 }
 0x42f   :  { %14665 = vst [vmem:[#allocation445_spill] sm:$0xff] %v10461_v26  ;;  %14666 = vst [vmem:[#allocation446_spill] sm:$0xff] %v10463_v18  ;;  %3201 = vbcast.lane.b32.xlu0 %v2627_v38, 368 }
 0x432   :  { %3205 = vbcast.lane.b32.xlu1 %v2627_v38, 376  ;;  %v10467_v60 = vpop.permute.xlu1 %2960  ;;  %v10469_v32 = vpop.permute.xlu0 %2972 }
 0x433   :  { %14667 = vst [vmem:[#allocation447_spill] sm:$0xff] %v10467_v60  ;;  %14668 = vst [vmem:[#allocation448_spill] sm:$0xff] %v10469_v32  ;;  %3208 = vbcast.lane.b32.xlu0 %v2631_v40, 256 }
 0x436   :  { %3212 = vbcast.lane.b32.xlu1 %v2631_v40, 264  ;;  %v10471_v35 = vpop.permute.xlu1 %2968  ;;  %v10473_v39 = vpop.permute.xlu0 %2980 }
 0x437   :  { %14669 = vst [vmem:[#allocation449_spill] sm:$0xff] %v10471_v35  ;;  %14670 = vst [vmem:[#allocation450_spill] sm:$0xff] %v10473_v39  ;;  %3216 = vbcast.lane.b32.xlu0 %v2631_v40, 272 }
 0x43a   :  { %3220 = vbcast.lane.b32.xlu1 %v2631_v40, 280  ;;  %v10475_v26 = vpop.permute.xlu1 %2976  ;;  %v10477_v18 = vpop.permute.xlu0 %2988 }
 0x43b   :  { %14671 = vst [vmem:[#allocation451_spill] sm:$0xff] %v10475_v26  ;;  %14672 = vst [vmem:[#allocation452_spill] sm:$0xff] %v10477_v18  ;;  %3224 = vbcast.lane.b32.xlu0 %v2631_v40, 288 }
 0x43e   :  { %3228 = vbcast.lane.b32.xlu1 %v2631_v40, 296  ;;  %v10479_v0 = vpop.permute.xlu1 %2984  ;;  %v10481_v38 = vpop.permute.xlu0 %2996 }
 0x43f   :  { %14673 = vst [vmem:[#allocation453_spill] sm:$0xff] %v10479_v0  ;;  %14674 = vst [vmem:[#allocation454_spill] sm:$0xff] %v10481_v38  ;;  %3232 = vbcast.lane.b32.xlu0 %v2631_v40, 304 }
 0x442   :  { %3236 = vbcast.lane.b32.xlu1 %v2631_v40, 312  ;;  %v10483_v32 = vpop.permute.xlu1 %2992  ;;  %v10485_v60 = vpop.permute.xlu0 %3004 }
 0x443   :  { %14675 = vst [vmem:[#allocation455_spill] sm:$0xff] %v10483_v32  ;;  %14676 = vst [vmem:[#allocation456_spill] sm:$0xff] %v10485_v60  ;;  %3240 = vbcast.lane.b32.xlu0 %v2631_v40, 320  ;;  %v14683_v60 = vsub.s32 2, %v10129_v41 }
 0x445   :  { %v2635_v32 = vrot.slane %v10425_v47, %v14683_v60 }
 0x446   :  { %3244 = vbcast.lane.b32.xlu1 %v2631_v40, 328  ;;  %v10487_v39 = vpop.permute.xlu1 %3000  ;;  %v10489_v35 = vpop.permute.xlu0 %3012 }
 0x447   :  { %14677 = vst [vmem:[#allocation457_spill] sm:$0xff] %v10487_v39  ;;  %14678 = vst [vmem:[#allocation458_spill] sm:$0xff] %v10489_v35  ;;  %3248 = vbcast.lane.b32.xlu0 %v2631_v40, 336 }
 0x44a   :  { %3252 = vbcast.lane.b32.xlu1 %v2631_v40, 344  ;;  %v10491_v18 = vpop.permute.xlu1 %3008  ;;  %v10493_v26 = vpop.permute.xlu0 %3019 }
 0x44b   :  { %14679 = vst [vmem:[#allocation459_spill] sm:$0xff] %v10491_v18  ;;  %14680 = vst [vmem:[#allocation460_spill] sm:$0xff] %v10493_v26  ;;  %3256 = vbcast.lane.b32.xlu0 %v2631_v40, 352 }
 0x44e   :  { %3260 = vbcast.lane.b32.xlu1 %v2631_v40, 360  ;;  %v10495_v38 = vpop.permute.xlu1 %3016  ;;  %v10497_v0 = vpop.permute.xlu0 %3027 }
 0x44f   :  { %14681 = vst [vmem:[#allocation461_spill] sm:$0xff] %v10495_v38  ;;  %14682 = vst [vmem:[#allocation462_spill] sm:$0xff] %v10497_v0  ;;  %3264 = vbcast.lane.b32.xlu0 %v2631_v40, 368 }
 0x452   :  { %3268 = vbcast.lane.b32.xlu1 %v2631_v40, 376  ;;  %v10502_v39 = vpop.permute.xlu1 %3023  ;;  %v10504_v35 = vpop.permute.xlu0 %3035 }
 0x453   :  { %14684 = vst [vmem:[#allocation463_spill] sm:$0xff] %v10502_v39  ;;  %14685 = vst [vmem:[#allocation464_spill] sm:$0xff] %v10504_v35  ;;  %3271 = vbcast.lane.b32.xlu0 %v2635_v32, 256 }
 0x456   :  { %3275 = vbcast.lane.b32.xlu1 %v2635_v32, 264  ;;  %v10506_v18 = vpop.permute.xlu1 %3031  ;;  %v10508_v26 = vpop.permute.xlu0 %3043 }
 0x457   :  { %14686 = vst [vmem:[#allocation465_spill] sm:$0xff] %v10506_v18  ;;  %14687 = vst [vmem:[#allocation466_spill] sm:$0xff] %v10508_v26  ;;  %3279 = vbcast.lane.b32.xlu0 %v2635_v32, 272 }
 0x45a   :  { %3283 = vbcast.lane.b32.xlu1 %v2635_v32, 280  ;;  %v10510_v38 = vpop.permute.xlu1 %3039  ;;  %v10512_v0 = vpop.permute.xlu0 %3051 }
 0x45b   :  { %14688 = vst [vmem:[#allocation467_spill] sm:$0xff] %v10510_v38  ;;  %14689 = vst [vmem:[#allocation468_spill] sm:$0xff] %v10512_v0  ;;  %3287 = vbcast.lane.b32.xlu0 %v2635_v32, 288 }
 0x45e   :  { %3291 = vbcast.lane.b32.xlu1 %v2635_v32, 296  ;;  %v10514_v60 = vpop.permute.xlu1 %3047  ;;  %v10516_v40 = vpop.permute.xlu0 %3059 }
 0x45f   :  { %14690 = vst [vmem:[#allocation469_spill] sm:$0xff] %v10514_v60  ;;  %14691 = vst [vmem:[#allocation470_spill] sm:$0xff] %v10516_v40  ;;  %3295 = vbcast.lane.b32.xlu0 %v2635_v32, 304 }
 0x462   :  { %3299 = vbcast.lane.b32.xlu1 %v2635_v32, 312  ;;  %v10518_v35 = vpop.permute.xlu1 %3055  ;;  %v10520_v39 = vpop.permute.xlu0 %3067 }
 0x463   :  { %14692 = vst [vmem:[#allocation471_spill] sm:$0xff] %v10518_v35  ;;  %14693 = vst [vmem:[#allocation472_spill] sm:$0xff] %v10520_v39  ;;  %3303 = vbcast.lane.b32.xlu0 %v2635_v32, 320  ;;  %v14700_v39 = vsub.s32 3, %v10129_v41 }
 0x465   :  { %v2639_v35 = vrot.slane %v10425_v47, %v14700_v39 }
 0x466   :  { %3307 = vbcast.lane.b32.xlu1 %v2635_v32, 328  ;;  %v10522_v26 = vpop.permute.xlu1 %3063  ;;  %v10524_v18 = vpop.permute.xlu0 %3075 }
 0x467   :  { %14694 = vst [vmem:[#allocation473_spill] sm:$0xff] %v10522_v26  ;;  %14695 = vst [vmem:[#allocation474_spill] sm:$0xff] %v10524_v18  ;;  %3311 = vbcast.lane.b32.xlu0 %v2635_v32, 336 }
 0x46a   :  { %3315 = vbcast.lane.b32.xlu1 %v2635_v32, 344  ;;  %v10526_v0 = vpop.permute.xlu1 %3071  ;;  %v10528_v38 = vpop.permute.xlu0 %3082 }
 0x46b   :  { %14696 = vst [vmem:[#allocation475_spill] sm:$0xff] %v10526_v0  ;;  %14697 = vst [vmem:[#allocation476_spill] sm:$0xff] %v10528_v38  ;;  %3319 = vbcast.lane.b32.xlu0 %v2635_v32, 352 }
 0x46e   :  { %3323 = vbcast.lane.b32.xlu1 %v2635_v32, 360  ;;  %v10530_v40 = vpop.permute.xlu1 %3079  ;;  %v10532_v60 = vpop.permute.xlu0 %3090 }
 0x46f   :  { %14698 = vst [vmem:[#allocation477_spill] sm:$0xff] %v10530_v40  ;;  %14699 = vst [vmem:[#allocation478_spill] sm:$0xff] %v10532_v60  ;;  %3327 = vbcast.lane.b32.xlu0 %v2635_v32, 368 }
 0x472   :  { %3331 = vbcast.lane.b32.xlu1 %v2635_v32, 376  ;;  %v10537_v26 = vpop.permute.xlu1 %3086  ;;  %v10539_v18 = vpop.permute.xlu0 %3098 }
 0x473   :  { %14701 = vst [vmem:[#allocation479_spill] sm:$0xff] %v10537_v26  ;;  %14702 = vst [vmem:[#allocation480_spill] sm:$0xff] %v10539_v18  ;;  %3334 = vbcast.lane.b32.xlu0 %v2639_v35, 256 }
 0x476   :  { %3338 = vbcast.lane.b32.xlu1 %v2639_v35, 264  ;;  %v10541_v0 = vpop.permute.xlu1 %3094  ;;  %v10543_v38 = vpop.permute.xlu0 %3106 }
 0x477   :  { %14703 = vst [vmem:[#allocation481_spill] sm:$0xff] %v10541_v0  ;;  %14704 = vst [vmem:[#allocation482_spill] sm:$0xff] %v10543_v38  ;;  %3342 = vbcast.lane.b32.xlu0 %v2639_v35, 272 }
 0x47a   :  { %3346 = vbcast.lane.b32.xlu1 %v2639_v35, 280  ;;  %v10545_v40 = vpop.permute.xlu1 %3102  ;;  %v10547_v60 = vpop.permute.xlu0 %3114 }
 0x47b   :  { %14705 = vst [vmem:[#allocation483_spill] sm:$0xff] %v10545_v40  ;;  %14706 = vst [vmem:[#allocation484_spill] sm:$0xff] %v10547_v60  ;;  %3350 = vbcast.lane.b32.xlu0 %v2639_v35, 288 }
 0x47e   :  { %3354 = vbcast.lane.b32.xlu1 %v2639_v35, 296  ;;  %v10549_v47 = vpop.permute.xlu1 %3110  ;;  %v10551_v32 = vpop.permute.xlu0 %3122 }
 0x47f   :  { %14707 = vst [vmem:[#allocation485_spill] sm:$0xff] %v10549_v47  ;;  %14708 = vst [vmem:[#allocation486_spill] sm:$0xff] %v10551_v32  ;;  %3358 = vbcast.lane.b32.xlu0 %v2639_v35, 304 }
 0x482   :  { %3362 = vbcast.lane.b32.xlu1 %v2639_v35, 312  ;;  %v10553_v39 = vpop.permute.xlu1 %3118  ;;  %v10555_v41 = vpop.permute.xlu0 %3130 }
 0x483   :  { %14709 = vst [vmem:[#allocation487_spill] sm:$0xff] %v10553_v39  ;;  %14710 = vst [vmem:[#allocation488_spill] sm:$0xff] %v10555_v41  ;;  %3366 = vbcast.lane.b32.xlu0 %v2639_v35, 320  ;;  %v1955_v41 = vmul.f32 0.0625, %v8715_v52 }
 0x485   :  { %v3588_v39 = vmul.f32 %v10289_v14, %v1955_v41 }
 0x486   :  { %3370 = vbcast.lane.b32.xlu1 %v2639_v35, 328  ;;  %v10557_v38 = vpop.permute.xlu1 %3126  ;;  %v10559_v18 = vpop.permute.xlu0 %3138 }
 0x487   :  { %14711 = vst [vmem:[#allocation489_spill] sm:$0xff] %v10557_v38  ;;  %14712 = vst [vmem:[#allocation490_spill] sm:$0xff] %v10559_v18  ;;  %3374 = vbcast.lane.b32.xlu0 %v2639_v35, 336  ;;  %v1956_v38 = vmul.f32 0.0625, %v8724_v59  ;;  %v1960_v59 = vmul.f32 0.0625, %v8731_v1  ;;  %v1961_v1 = vmul.f32 0.0625, %v8742_v9 }
 0x488   :  { %v1966_v9 = vmul.f32 0.0625, %v8758_v22  ;;  %v1967_v22 = vmul.f32 0.0625, %v8769_v30  ;;  %v1972_v30 = vmul.f32 0.0625, %v8785_v43  ;;  %v1973_v43 = vmul.f32 0.0625, %v8796_v53 }
 0x489   :  { %v3593_v14 = vmul.f32 %v10300_v31, %v1960_v59  ;;  %v3594_v59 = vmul.f32 %v10298_v33, %v1961_v1  ;;  %v1978_v53 = vmul.f32 0.0625, %v8812_v6  ;;  %v14732_v6 = vld [vmem:[#allocation3_spill] sm:$0xff] }
 0x48a   :  { %3378 = vbcast.lane.b32.xlu1 %v2639_v35, 344  ;;  %v10561_v60 = vpop.permute.xlu1 %3134  ;;  %v10563_v40 = vpop.permute.xlu0 %3145 }
 0x48b   :  { %14713 = vst [vmem:[#allocation491_spill] sm:$0xff] %v10561_v60  ;;  %14714 = vst [vmem:[#allocation492_spill] sm:$0xff] %v10563_v40  ;;  %3382 = vbcast.lane.b32.xlu0 %v2639_v35, 352  ;;  %v1958_v40 = vmul.f32 0.0625, %v8722_v58  ;;  %v3589_v60 = vmul.f32 %v10287_v19, %v1956_v38  ;;  %v1959_v58 = vmul.f32 0.0625, %v8733_v2  ;;  %v1964_v2 = vmul.f32 0.0625, %v8749_v15 }
 0x48c   :  { %v1965_v15 = vmul.f32 0.0625, %v8760_v23  ;;  %v1970_v23 = vmul.f32 0.0625, %v8776_v36  ;;  %v1971_v36 = vmul.f32 0.0625, %v8787_v44  ;;  %v1976_v44 = vmul.f32 0.0625, %v8803_v61 }
 0x48d   :  { %v1977_v61 = vmul.f32 0.0625, %v8814_v7  ;;  %v14735_v7 = vld [vmem:[#allocation4_spill] sm:$0xff] }
 0x48e   :  { %3386 = vbcast.lane.b32.xlu1 %v2639_v35, 360  ;;  %v10565_v32 = vpop.permute.xlu1 %3142  ;;  %v10567_v47 = vpop.permute.xlu0 %3153 }
 0x48f   :  { %14715 = vst [vmem:[#allocation493_spill] sm:$0xff] %v10565_v32  ;;  %14716 = vst [vmem:[#allocation494_spill] sm:$0xff] %v10567_v47  ;;  %3390 = vbcast.lane.b32.xlu0 %v2639_v35, 368  ;;  %v3591_v32 = vmul.f32 %v10296_v56, %v1958_v40  ;;  %v1957_v47 = vmul.f32 0.0625, %v8713_v51  ;;  %v1962_v51 = vmul.f32 0.0625, %v8740_v8  ;;  %v1963_v8 = vmul.f32 0.0625, %v8751_v16 }
 0x490   :  { %v1968_v16 = vmul.f32 0.0625, %v8767_v29  ;;  %v1969_v29 = vmul.f32 0.0625, %v8778_v37  ;;  %v1974_v37 = vmul.f32 0.0625, %v8794_v50  ;;  %v1975_v50 = vmul.f32 0.0625, %v8805_v62 }
 0x491   :  { %v3595_v40 = vmul.f32 %v10304_v48, %v1962_v51  ;;  %v3596_v51 = vmul.f32 %v10302_v12, %v1963_v8  ;;  %v1980_v62 = vmul.f32 0.0625, %v8821_v17  ;;  %v14738_v17 = vld [vmem:[#allocation5_spill] sm:$0xff] }
 0x492   :  { %3394 = vbcast.lane.b32.xlu1 %v2639_v35, 376  ;;  %v10572_v18 = vpop.permute.xlu1 %3149  ;;  %v10574_v0 = vpop.permute.xlu0 %3161  ;;  %v3590_v35 = vmul.f32 %v10292_v13, %v1957_v47 }
 0x493   :  { %14717 = vst [vmem:[#allocation495_spill] sm:$0xff] %v10572_v18  ;;  %4357 = vperm.xlu0 %8478, %v3588_v39  }
 0x496   :  { %v10580_v52 = vpop.permute.xlu1 %3157  ;;  %4360 = vperm.xlu1 %8479, %v3589_v60   ;;  %v10582_v41 = vpop.permute.xlu0 %3169  ;;  %v3592_v60 = vmul.f32 %v10294_v55, %v1959_v58 }
 0x497   :  { %4366 = vperm.xlu0 %8478, %v3591_v32  }
 0x49a   :  { %v10588_v39 = vpop.permute.xlu1 %3165  ;;  %4363 = vperm.xlu1 %8479, %v3590_v35   ;;  %v10590_v38 = vpop.permute.xlu0 %3177  ;;  %v3597_v35 = vmul.f32 %v10308_v3, %v1964_v2  ;;  %v3598_v2 = vmul.f32 %v10306_v20, %v1965_v15 }
 0x49b   :  { %4372 = vperm.xlu0 %8478, %v3593_v14  }
 0x49e   :  { %v10596_v32 = vpop.permute.xlu1 %3173  ;;  %4369 = vperm.xlu1 %8479, %v3592_v60   ;;  %v10598_v47 = vpop.permute.xlu0 %3185  ;;  %v3599_v60 = vmul.f32 %v10312_v42, %v1966_v9  ;;  %v3600_v9 = vmul.f32 %v10310_v45, %v1967_v22 }
 0x49f   :  { %4378 = vperm.xlu0 %8478, %v3595_v40  }
 0x4a2   :  { %v10604_v14 = vpop.permute.xlu1 %3181  ;;  %4375 = vperm.xlu1 %8479, %v3594_v59   ;;  %v10606_v58 = vpop.permute.xlu0 %3193  ;;  %v3601_v59 = vmul.f32 %v10316_v25, %v1968_v16  ;;  %v3602_v16 = vmul.f32 %v10314_v28, %v1969_v29 }
 0x4a3   :  { %4384 = vperm.xlu0 %8478, %v3597_v35  }
 0x4a6   :  { %v10612_v40 = vpop.permute.xlu1 %3189  ;;  %4381 = vperm.xlu1 %8479, %v3596_v51   ;;  %v10614_v1 = vpop.permute.xlu0 %3201  ;;  %v3603_v51 = vmul.f32 %v10321_v54, %v1970_v23  ;;  %v3604_v23 = vmul.f32 %v10318_v5, %v1971_v36 }
 0x4a7   :  { %14718 = vst [vmem:[#allocation496_spill] sm:$0xff] %v10612_v40  ;;  %14719 = vst [vmem:[#allocation497_spill] sm:$0xff] %v10614_v1  ;;  %4390 = vperm.xlu0 %8478, %v3599_v60  }
 0x4aa   :  { %v10620_v35 = vpop.permute.xlu1 %3197  ;;  %4387 = vperm.xlu1 %8479, %v3598_v2   ;;  %v10622_v8 = vpop.permute.xlu0 %3208  ;;  %v3605_v2 = vmul.f32 %v10326_v34, %v1972_v30  ;;  %v3606_v30 = vmul.f32 %v10323_v49, %v1973_v43 }
 0x4ab   :  { %14720 = vst [vmem:[#allocation498_spill] sm:$0xff] %v10620_v35  ;;  %14721 = vst [vmem:[#allocation499_spill] sm:$0xff] %v10622_v8  ;;  %4396 = vperm.xlu0 %8478, %v3601_v59  }
 0x4ae   :  { %v10628_v60 = vpop.permute.xlu1 %3205  ;;  %4393 = vperm.xlu1 %8479, %v3600_v9   ;;  %v10630_v15 = vpop.permute.xlu0 %3216  ;;  %v3607_v9 = vmul.f32 %v10330_v21, %v1974_v37  ;;  %v3608_v37 = vmul.f32 %v10328_v24, %v1975_v50  ;;  %v14737_v24 = vld [vmem:[#allocation393_spill] sm:$0xff] }
 0x4af   :  { %14722 = vst [vmem:[#allocation500_spill] sm:$0xff] %v10628_v60  ;;  %14723 = vst [vmem:[#allocation501_spill] sm:$0xff] %v10630_v15  ;;  %4402 = vperm.xlu0 %8478, %v3603_v51  }
 0x4b2   :  { %v10636_v59 = vpop.permute.xlu1 %3212  ;;  %4399 = vperm.xlu1 %8479, %v3602_v16   ;;  %v10638_v22 = vpop.permute.xlu0 %3224  ;;  %v3609_v16 = vmul.f32 %v10334_v10, %v1976_v44  ;;  %v3610_v44 = vmul.f32 %v10332_v11, %v1977_v61  ;;  %v14743_v11 = vld [vmem:[#allocation395_spill] sm:$0xff] }
 0x4b3   :  { %14724 = vst [vmem:[#allocation502_spill] sm:$0xff] %v10636_v59  ;;  %14725 = vst [vmem:[#allocation503_spill] sm:$0xff] %v10638_v22  ;;  %4408 = vperm.xlu0 %8478, %v3605_v2  }
 0x4b6   :  { %v10644_v51 = vpop.permute.xlu1 %3220  ;;  %4405 = vperm.xlu1 %8479, %v3604_v23   ;;  %v10646_v29 = vpop.permute.xlu0 %3232  ;;  %v3611_v23 = vmul.f32 %v10338_v4, %v1978_v53  ;;  %v1982_v53 = vmul.f32 0.0625, %v14735_v7  ;;  %v14744_v7 = vld [vmem:[#allocation7_spill] sm:$0xff] }
 0x4b7   :  { %14726 = vst [vmem:[#allocation504_spill] sm:$0xff] %v10644_v51  ;;  %14727 = vst [vmem:[#allocation505_spill] sm:$0xff] %v10646_v29  ;;  %4414 = vperm.xlu0 %8478, %v3607_v9  }
 0x4b8   :  { %v3615_v49 = vmul.f32 %v14737_v24, %v1982_v53  ;;  %v14747_v53 = vld [vmem:[#allocation8_spill] sm:$0xff] }
 0x4ba   :  { %v10652_v2 = vpop.permute.xlu1 %3228  ;;  %4411 = vperm.xlu1 %8479, %v3606_v30   ;;  %v10654_v36 = vpop.permute.xlu0 %3240  ;;  %v3613_v30 = vmul.f32 %v10342_v57, %v1980_v62  ;;  %v14741_v62 = vld [vmem:[#allocation6_spill] sm:$0xff] }
 0x4bb   :  { %14728 = vst [vmem:[#allocation506_spill] sm:$0xff] %v10652_v2  ;;  %14729 = vst [vmem:[#allocation507_spill] sm:$0xff] %v10654_v36  ;;  %4420 = vperm.xlu0 %8478, %v3609_v16   ;;  %v1979_v16 = vmul.f32 0.0625, %v14732_v6  ;;  %v1984_v6 = vmul.f32 0.0625, %v14741_v62  ;;  %v14750_v62 = vld [vmem:[#allocation9_spill] sm:$0xff] }
 0x4bd   :  { %v3617_v5 = vmul.f32 %v14743_v11, %v1984_v6  ;;  %v14753_v6 = vld [vmem:[#allocation10_spill] sm:$0xff] }
 0x4be   :  { %v10660_v9 = vpop.permute.xlu1 %3236  ;;  %4417 = vperm.xlu1 %8479, %v3608_v37   ;;  %v10662_v43 = vpop.permute.xlu0 %3248  ;;  %v14736_v37 = vld [vmem:[#allocation388_spill] sm:$0xff] }
 0x4bf   :  { %14730 = vst [vmem:[#allocation508_spill] sm:$0xff] %v10660_v9  ;;  %14731 = vst [vmem:[#allocation509_spill] sm:$0xff] %v10662_v43  ;;  %4426 = vperm.xlu0 %8478, %v3611_v23   ;;  %v3612_v4 = vmul.f32 %v14736_v37, %v1979_v16  ;;  %v1981_v23 = vmul.f32 0.0625, %v14738_v17  ;;  %v1986_v17 = vmul.f32 0.0625, %v14747_v53  ;;  %v14749_v37 = vld [vmem:[#allocation397_spill] sm:$0xff]  ;;  %v14756_v53 = vld [vmem:[#allocation11_spill] sm:$0xff] }
 0x4c1   :  { %v3619_v28 = vmul.f32 %v14749_v37, %v1986_v17  ;;  %v14759_v17 = vld [vmem:[#allocation12_spill] sm:$0xff] }
 0x4c2   :  { %v10668_v10 = vpop.permute.xlu1 %3244  ;;  %4423 = vperm.xlu1 %8479, %v3610_v44   ;;  %v10670_v50 = vpop.permute.xlu0 %3256  ;;  %v14742_v44 = vld [vmem:[#allocation390_spill] sm:$0xff] }
 0x4c3   :  { %14733 = vst [vmem:[#allocation3_spill] sm:$0xff] %v10668_v10  ;;  %14734 = vst [vmem:[#allocation510_spill] sm:$0xff] %v10670_v50  ;;  %4432 = vperm.xlu0 %8478, %v3613_v30   ;;  %v3614_v57 = vmul.f32 %v14742_v44, %v1981_v23  ;;  %v1983_v30 = vmul.f32 0.0625, %v14744_v7  ;;  %v1988_v7 = vmul.f32 0.0625, %v14753_v6  ;;  %v14755_v44 = vld [vmem:[#allocation399_spill] sm:$0xff]  ;;  %v14762_v6 = vld [vmem:[#allocation13_spill] sm:$0xff] }
 0x4c5   :  { %v3621_v45 = vmul.f32 %v14755_v44, %v1988_v7  ;;  %v14765_v7 = vld [vmem:[#allocation14_spill] sm:$0xff] }
 0x4c6   :  { %v10676_v21 = vpop.permute.xlu1 %3252  ;;  %4429 = vperm.xlu1 %8479, %v3612_v4   ;;  %v10678_v61 = vpop.permute.xlu0 %3264  ;;  %v14748_v4 = vld [vmem:[#allocation392_spill] sm:$0xff] }
 0x4c7   :  { %14739 = vst [vmem:[#allocation4_spill] sm:$0xff] %v10676_v21  ;;  %14740 = vst [vmem:[#allocation5_spill] sm:$0xff] %v10678_v61  ;;  %4438 = vperm.xlu0 %8478, %v3615_v49   ;;  %v3616_v24 = vmul.f32 %v14748_v4, %v1983_v30  ;;  %v1985_v49 = vmul.f32 0.0625, %v14750_v62  ;;  %v1990_v62 = vmul.f32 0.0625, %v14759_v17  ;;  %v14761_v4 = vld [vmem:[#allocation401_spill] sm:$0xff]  ;;  %v14768_v17 = vld [vmem:[#allocation15_spill] sm:$0xff] }
 0x4c9   :  { %v3623_v20 = vmul.f32 %v14761_v4, %v1990_v62  ;;  %v14771_v62 = vld [vmem:[#allocation16_spill] sm:$0xff] }
 0x4ca   :  { %v10684_v34 = vpop.permute.xlu1 %3260  ;;  %4435 = vperm.xlu1 %8479, %v3614_v57   ;;  %v10686_v16 = vpop.permute.xlu0 %3271  ;;  %v14754_v57 = vld [vmem:[#allocation394_spill] sm:$0xff] }
 0x4cb   :  { %14745 = vst [vmem:[#allocation6_spill] sm:$0xff] %v10684_v34  ;;  %14746 = vst [vmem:[#allocation7_spill] sm:$0xff] %v10686_v16  ;;  %4444 = vperm.xlu0 %8478, %v3617_v5   ;;  %v3618_v11 = vmul.f32 %v14754_v57, %v1985_v49  ;;  %v1987_v5 = vmul.f32 0.0625, %v14756_v53  ;;  %v1992_v53 = vmul.f32 0.0625, %v14765_v7  ;;  %v14767_v57 = vld [vmem:[#allocation403_spill] sm:$0xff]  ;;  %v14774_v7 = vld [vmem:[#allocation17_spill] sm:$0xff] }
 0x4cd   :  { %v3625_v12 = vmul.f32 %v14767_v57, %v1992_v53  ;;  %v14777_v53 = vld [vmem:[#allocation18_spill] sm:$0xff] }
 0x4ce   :  { %v10692_v54 = vpop.permute.xlu1 %3268  ;;  %4441 = vperm.xlu1 %8479, %v3616_v24   ;;  %v10694_v23 = vpop.permute.xlu0 %3279  ;;  %v14760_v24 = vld [vmem:[#allocation396_spill] sm:$0xff] }
 0x4cf   :  { %14751 = vst [vmem:[#allocation8_spill] sm:$0xff] %v10692_v54  ;;  %14752 = vst [vmem:[#allocation9_spill] sm:$0xff] %v10694_v23  ;;  %4450 = vperm.xlu0 %8478, %v3619_v28   ;;  %v3620_v37 = vmul.f32 %v14760_v24, %v1987_v5  ;;  %v1989_v28 = vmul.f32 0.0625, %v14762_v6  ;;  %v1994_v6 = vmul.f32 0.0625, %v14771_v62  ;;  %v14773_v24 = vld [vmem:[#allocation405_spill] sm:$0xff]  ;;  %v14780_v62 = vld [vmem:[#allocation19_spill] sm:$0xff] }
 0x4d1   :  { %v3627_v33 = vmul.f32 %v14773_v24, %v1994_v6  ;;  %v14783_v6 = vld [vmem:[#allocation20_spill] sm:$0xff] }
 0x4d2   :  { %v10700_v25 = vpop.permute.xlu1 %3275  ;;  %4447 = vperm.xlu1 %8479, %v3618_v11   ;;  %v10702_v30 = vpop.permute.xlu0 %3287  ;;  %v14766_v11 = vld [vmem:[#allocation398_spill] sm:$0xff] }
 0x4d3   :  { %14757 = vst [vmem:[#allocation10_spill] sm:$0xff] %v10700_v25  ;;  %14758 = vst [vmem:[#allocation11_spill] sm:$0xff] %v10702_v30  ;;  %4456 = vperm.xlu0 %8478, %v3621_v45   ;;  %v3622_v44 = vmul.f32 %v14766_v11, %v1989_v28  ;;  %v1991_v45 = vmul.f32 0.0625, %v14768_v17  ;;  %v1996_v17 = vmul.f32 0.0625, %v14777_v53  ;;  %v14779_v11 = vld [vmem:[#allocation407_spill] sm:$0xff]  ;;  %v14786_v53 = vld [vmem:[#allocation21_spill] sm:$0xff] }
 0x4d5   :  { %v3629_v55 = vmul.f32 %v14779_v11, %v1996_v17  ;;  %v14789_v17 = vld [vmem:[#allocation22_spill] sm:$0xff] }
 0x4d6   :  { %v10708_v42 = vpop.permute.xlu1 %3283  ;;  %4453 = vperm.xlu1 %8479, %v3620_v37   ;;  %v10710_v49 = vpop.permute.xlu0 %3295  ;;  %v14772_v37 = vld [vmem:[#allocation400_spill] sm:$0xff] }
 0x4d7   :  { %14763 = vst [vmem:[#allocation12_spill] sm:$0xff] %v10708_v42  ;;  %14764 = vst [vmem:[#allocation13_spill] sm:$0xff] %v10710_v49  ;;  %4462 = vperm.xlu0 %8478, %v3623_v20   ;;  %v3624_v4 = vmul.f32 %v14772_v37, %v1991_v45  ;;  %v1993_v20 = vmul.f32 0.0625, %v14774_v7  ;;  %v1998_v7 = vmul.f32 0.0625, %v14783_v6  ;;  %v14785_v37 = vld [vmem:[#allocation409_spill] sm:$0xff]  ;;  %v14792_v6 = vld [vmem:[#allocation23_spill] sm:$0xff] }
 0x4d9   :  { %v3631_v13 = vmul.f32 %v14785_v37, %v1998_v7  ;;  %v14795_v7 = vld [vmem:[#allocation24_spill] sm:$0xff] }
 0x4da   :  { %v10716_v3 = vpop.permute.xlu1 %3291  ;;  %4459 = vperm.xlu1 %8479, %v3622_v44   ;;  %v10718_v5 = vpop.permute.xlu0 %3303  ;;  %v14778_v44 = vld [vmem:[#allocation402_spill] sm:$0xff] }
 0x4db   :  { %14769 = vst [vmem:[#allocation14_spill] sm:$0xff] %v10716_v3  ;;  %14770 = vst [vmem:[#allocation15_spill] sm:$0xff] %v10718_v5  ;;  %4468 = vperm.xlu0 %8478, %v3625_v12   ;;  %v3626_v57 = vmul.f32 %v14778_v44, %v1993_v20  ;;  %v1995_v12 = vmul.f32 0.0625, %v14780_v62  ;;  %v2000_v62 = vmul.f32 0.0625, %v14789_v17  ;;  %v14791_v44 = vld [vmem:[#allocation411_spill] sm:$0xff]  ;;  %v14798_v17 = vld [vmem:[#allocation25_spill] sm:$0xff] }
 0x4dd   :  { %v3633_v19 = vmul.f32 %v14791_v44, %v2000_v62  ;;  %v14801_v62 = vld [vmem:[#allocation26_spill] sm:$0xff] }
 0x4de   :  { %v10724_v48 = vpop.permute.xlu1 %3299  ;;  %4465 = vperm.xlu1 %8479, %v3624_v4   ;;  %v10726_v28 = vpop.permute.xlu0 %3311  ;;  %v14784_v4 = vld [vmem:[#allocation404_spill] sm:$0xff] }
 0x4df   :  { %14775 = vst [vmem:[#allocation16_spill] sm:$0xff] %v10724_v48  ;;  %14776 = vst [vmem:[#allocation17_spill] sm:$0xff] %v10726_v28  ;;  %4474 = vperm.xlu0 %8478, %v3627_v33   ;;  %v3628_v24 = vmul.f32 %v14784_v4, %v1995_v12  ;;  %v1997_v33 = vmul.f32 0.0625, %v14786_v53  ;;  %v2002_v53 = vmul.f32 0.0625, %v14795_v7  ;;  %v14797_v4 = vld [vmem:[#allocation413_spill] sm:$0xff]  ;;  %v14803_v7 = vld [vmem:[#allocation27_spill] sm:$0xff] }
 0x4e2   :  { %v10732_v31 = vpop.permute.xlu1 %3307  ;;  %4471 = vperm.xlu1 %8479, %v3626_v57   ;;  %v10734_v45 = vpop.permute.xlu0 %3319  ;;  %v14790_v57 = vld [vmem:[#allocation406_spill] sm:$0xff] }
 0x4e3   :  { %14781 = vst [vmem:[#allocation18_spill] sm:$0xff] %v10732_v31  ;;  %14782 = vst [vmem:[#allocation19_spill] sm:$0xff] %v10734_v45  ;;  %4480 = vperm.xlu0 %8478, %v3629_v55   ;;  %v3630_v11 = vmul.f32 %v14790_v57, %v1997_v33  ;;  %v1999_v55 = vmul.f32 0.0625, %v14792_v6  ;;  %v2004_v6 = vmul.f32 0.0625, %v14801_v62  ;;  %v14809_v62 = vld [vmem:[#allocation29_spill] sm:$0xff] }
 0x4e5   :  { %v3637_v57 = vmul.f32 %v10394_v27, %v2004_v6  ;;  %v14812_v6 = vld [vmem:[#allocation30_spill] sm:$0xff] }
 0x4e6   :  { %v10740_v56 = vpop.permute.xlu1 %3315  ;;  %4477 = vperm.xlu1 %8479, %v3628_v24   ;;  %v10742_v20 = vpop.permute.xlu0 %3327  ;;  %v14796_v24 = vld [vmem:[#allocation408_spill] sm:$0xff] }
 0x4e7   :  { %14787 = vst [vmem:[#allocation20_spill] sm:$0xff] %v10740_v56  ;;  %14788 = vst [vmem:[#allocation21_spill] sm:$0xff] %v10742_v20  ;;  %4486 = vperm.xlu0 %8478, %v3631_v13   ;;  %v3632_v37 = vmul.f32 %v14796_v24, %v1999_v55  ;;  %v3635_v20 = vmul.f32 %v14797_v4, %v2002_v53  ;;  %v2001_v13 = vmul.f32 0.0625, %v14798_v17  ;;  %v14806_v53 = vld [vmem:[#allocation28_spill] sm:$0xff]  ;;  %v14808_v24 = vld [vmem:[#allocation417_spill] sm:$0xff] }
 0x4e8   :  { %v2006_v17 = vmul.f32 0.0625, %v14806_v53  ;;  %v14815_v53 = vld [vmem:[#allocation31_spill] sm:$0xff] }
 0x4ea   :  { %v10748_v45 = vpop.permute.xlu1 %3323  ;;  %4483 = vperm.xlu1 %8479, %v3630_v11   ;;  %v10750_v12 = vpop.permute.xlu0 %3334  ;;  %v14802_v11 = vld [vmem:[#allocation410_spill] sm:$0xff] }
 0x4eb   :  { %14793 = vst [vmem:[#allocation22_spill] sm:$0xff] %v10748_v45  ;;  %14794 = vst [vmem:[#allocation23_spill] sm:$0xff] %v10750_v12  ;;  %4492 = vperm.xlu0 %8478, %v3633_v19   ;;  %v3634_v44 = vmul.f32 %v14802_v11, %v2001_v13  ;;  %v2003_v19 = vmul.f32 0.0625, %v14803_v7  ;;  %v2008_v7 = vmul.f32 0.0625, %v14812_v6  ;;  %v14814_v11 = vld [vmem:[#allocation419_spill] sm:$0xff]  ;;  %v14821_v6 = vld [vmem:[#allocation33_spill] sm:$0xff] }
 0x4ee   :  { %v10756_v28 = vpop.permute.xlu1 %3331  ;;  %4489 = vperm.xlu1 %8479, %v3632_v37   ;;  %v10758_v33 = vpop.permute.xlu0 %3342  ;;  %v14807_v37 = vld [vmem:[#allocation412_spill] sm:$0xff] }
 0x4ef   :  { %14799 = vst [vmem:[#allocation24_spill] sm:$0xff] %v10756_v28  ;;  %14800 = vst [vmem:[#allocation25_spill] sm:$0xff] %v10758_v33  ;;  %4498 = vperm.xlu0 %8478, %v3635_v20   ;;  %v3636_v4 = vmul.f32 %v14807_v37, %v2003_v19  ;;  %v3639_v33 = vmul.f32 %v14808_v24, %v2006_v17  ;;  %v2005_v20 = vmul.f32 0.0625, %v14809_v62  ;;  %v14818_v17 = vld [vmem:[#allocation32_spill] sm:$0xff]  ;;  %v14820_v37 = vld [vmem:[#allocation421_spill] sm:$0xff] }
 0x4f0   :  { %v2010_v62 = vmul.f32 0.0625, %v14818_v17  ;;  %v14827_v17 = vld [vmem:[#allocation35_spill] sm:$0xff] }
 0x4f2   :  { %v10764_v12 = vpop.permute.xlu1 %3338  ;;  %4495 = vperm.xlu1 %8479, %v3634_v44   ;;  %v10766_v55 = vpop.permute.xlu0 %3350  ;;  %v14813_v44 = vld [vmem:[#allocation414_spill] sm:$0xff] }
 0x4f3   :  { %14804 = vst [vmem:[#allocation26_spill] sm:$0xff] %v10764_v12  ;;  %14805 = vst [vmem:[#allocation27_spill] sm:$0xff] %v10766_v55  ;;  %4504 = vperm.xlu0 %8478, %v3637_v57   ;;  %v3638_v27 = vmul.f32 %v14813_v44, %v2005_v20  ;;  %v3641_v55 = vmul.f32 %v14814_v11, %v2008_v7  ;;  %v2007_v57 = vmul.f32 0.0625, %v14815_v53  ;;  %v14824_v7 = vld [vmem:[#allocation34_spill] sm:$0xff]  ;;  %v14826_v44 = vld [vmem:[#allocation423_spill] sm:$0xff] }
 0x4f4   :  { %v2012_v53 = vmul.f32 0.0625, %v14824_v7  ;;  %v14833_v7 = vld [vmem:[#allocation37_spill] sm:$0xff] }
 0x4f6   :  { %v10772_v28 = vpop.permute.xlu1 %3346  ;;  %4501 = vperm.xlu1 %8479, %v3636_v4   ;;  %v10774_v13 = vpop.permute.xlu0 %3358  ;;  %v14819_v4 = vld [vmem:[#allocation416_spill] sm:$0xff] }
 0x4f7   :  { %14810 = vst [vmem:[#allocation28_spill] sm:$0xff] %v10772_v28  ;;  %14811 = vst [vmem:[#allocation29_spill] sm:$0xff] %v10774_v13  ;;  %4510 = vperm.xlu0 %8478, %v3639_v33   ;;  %v3640_v24 = vmul.f32 %v14819_v4, %v2007_v57  ;;  %v3643_v13 = vmul.f32 %v14820_v37, %v2010_v62  ;;  %v2009_v33 = vmul.f32 0.0625, %v14821_v6  ;;  %v14829_v57 = vld [vmem:[#allocation36_spill] sm:$0xff]  ;;  %v14832_v4 = vld [vmem:[#allocation425_spill] sm:$0xff] }
 0x4f8   :  { %v2014_v62 = vmul.f32 0.0625, %v14829_v57  ;;  %v14830_v6 = vld [vmem:[#allocation420_spill] sm:$0xff]  ;;  %v14838_v57 = vld [vmem:[#allocation39_spill] sm:$0xff] }
 0x4fa   :  { %v10780_v12 = vpop.permute.xlu1 %3354  ;;  %4507 = vperm.xlu1 %8479, %v3638_v27   ;;  %v10782_v19 = vpop.permute.xlu0 %3366  ;;  %v14825_v27 = vld [vmem:[#allocation418_spill] sm:$0xff] }
 0x4fb   :  { %14816 = vst [vmem:[#allocation30_spill] sm:$0xff] %v10780_v12  ;;  %14817 = vst [vmem:[#allocation31_spill] sm:$0xff] %v10782_v19  ;;  %4516 = vperm.xlu0 %8478, %v3641_v55   ;;  %v3642_v11 = vmul.f32 %v14825_v27, %v2009_v33  ;;  %v3645_v19 = vmul.f32 %v14826_v44, %v2012_v53  ;;  %v2011_v55 = vmul.f32 0.0625, %v14827_v17  ;;  %v14835_v33 = vld [vmem:[#allocation38_spill] sm:$0xff] }
 0x4fc   :  { %v2016_v53 = vmul.f32 0.0625, %v14835_v33  ;;  %v14836_v17 = vld [vmem:[#allocation422_spill] sm:$0xff]  ;;  %v14844_v33 = vld [vmem:[#allocation41_spill] sm:$0xff] }
 0x4fd   :  { %v3644_v37 = vmul.f32 %v14830_v6, %v2011_v55 }
 0x4fe   :  { %v10788_v28 = vpop.permute.xlu1 %3362  ;;  %4513 = vperm.xlu1 %8479, %v3640_v24   ;;  %v10790_v20 = vpop.permute.xlu0 %3374 }
 0x4ff   :  { %14822 = vst [vmem:[#allocation32_spill] sm:$0xff] %v10788_v28  ;;  %14823 = vst [vmem:[#allocation33_spill] sm:$0xff] %v10790_v20  ;;  %4522 = vperm.xlu0 %8478, %v3643_v13   ;;  %v3647_v20 = vmul.f32 %v14832_v4, %v2014_v62  ;;  %v2013_v13 = vmul.f32 0.0625, %v14833_v7  ;;  %v14841_v62 = vld [vmem:[#allocation40_spill] sm:$0xff] }
 0x500   :  { %v2018_v4 = vmul.f32 0.0625, %v14841_v62  ;;  %v14842_v7 = vld [vmem:[#allocation424_spill] sm:$0xff]  ;;  %v14849_v62 = vld [vmem:[#allocation43_spill] sm:$0xff] }
 0x501   :  { %v3646_v44 = vmul.f32 %v14836_v17, %v2013_v13 }
 0x502   :  { %v10796_v12 = vpop.permute.xlu1 %3370  ;;  %4519 = vperm.xlu1 %8479, %v3642_v11   ;;  %v10800_v24 = vpop.permute.xlu0 %3382  ;;  %v14837_v11 = vld [vmem:[#allocation427_spill] sm:$0xff] }
 0x503   :  { %14828 = vst [vmem:[#allocation34_spill] sm:$0xff] %v10796_v12  ;;  %4528 = vperm.xlu0 %8478, %v3645_v19   ;;  %14831 = vst [vmem:[#allocation35_spill] sm:$0xff] %v10800_v24  ;;  %v3649_v27 = vmul.f32 %v14837_v11, %v2016_v53  ;;  %v2015_v19 = vmul.f32 0.0625, %v14838_v57  ;;  %v14847_v53 = vld [vmem:[#allocation42_spill] sm:$0xff] }
 0x504   :  { %v2020_v57 = vmul.f32 0.0625, %v14847_v53  ;;  %v14848_v11 = vld [vmem:[#allocation426_spill] sm:$0xff]  ;;  %v14855_v53 = vld [vmem:[#allocation45_spill] sm:$0xff] }
 0x505   :  { %v3648_v6 = vmul.f32 %v14842_v7, %v2015_v19  ;;  %v14852_v19 = vld [vmem:[#allocation44_spill] sm:$0xff] }
 0x506   :  { %v10804_v28 = vpop.permute.xlu1 %3378  ;;  %4525 = vperm.xlu1 %8479, %v3644_v37   ;;  %v10810_v12 = vpop.permute.xlu0 %3390  ;;  %v14843_v37 = vld [vmem:[#allocation429_spill] sm:$0xff] }
 0x507   :  { %14834 = vst [vmem:[#allocation36_spill] sm:$0xff] %v10804_v28  ;;  %4534 = vperm.xlu0 %8478, %v3647_v20   ;;  %14839 = vst [vmem:[#allocation37_spill] sm:$0xff] %v10810_v12  ;;  %v3651_v24 = vmul.f32 %v14843_v37, %v2018_v4  ;;  %v2017_v20 = vmul.f32 0.0625, %v14844_v33  ;;  %v2022_v33 = vmul.f32 0.0625, %v14852_v19  ;;  %v14861_v19 = vld [vmem:[#allocation47_spill] sm:$0xff] }
 0x509   :  { %v3650_v17 = vmul.f32 %v14848_v11, %v2017_v20 }
 0x50a   :  { %v10812_v55 = vpop.permute.xlu1 %3386  ;;  %4531 = vperm.xlu1 %8479, %v3646_v44   ;;  %v3653_v44 = vmul.f32 %v10433_v46, %v2020_v57  ;;  %v14858_v57 = vld [vmem:[#allocation46_spill] sm:$0xff] }
 0x50b   :  { %14840 = vst [vmem:[#allocation38_spill] sm:$0xff] %v10812_v55  ;;  %4540 = vperm.xlu0 %8478, %v3649_v27   ;;  %v2019_v27 = vmul.f32 0.0625, %v14849_v62  ;;  %v2024_v62 = vmul.f32 0.0625, %v14858_v57  ;;  %v14867_v57 = vld [vmem:[#allocation49_spill] sm:$0xff] }
 0x50e   :  { %v10818_v28 = vpop.permute.xlu1 %3394  ;;  %4537 = vperm.xlu1 %8479, %v3648_v6   ;;  %v10820_v13 = vpop.permute.xlu0 %4357  ;;  %v14853_v6 = vld [vmem:[#allocation428_spill] sm:$0xff] }
 0x50f   :  { %14845 = vst [vmem:[#allocation39_spill] sm:$0xff] %v10818_v28  ;;  %14846 = vst [vmem:[#allocation40_spill] sm:$0xff] %v10820_v13  ;;  %4546 = vperm.xlu0 %8478, %v3651_v24   ;;  %v3652_v37 = vmul.f32 %v14853_v6, %v2019_v27  ;;  %v14854_v13 = vld [vmem:[#allocation433_spill] sm:$0xff]  ;;  %v2021_v24 = vmul.f32 0.0625, %v14855_v53 }
 0x510   :  { %v3655_v7 = vmul.f32 %v14854_v13, %v2022_v33  ;;  %v14864_v33 = vld [vmem:[#allocation48_spill] sm:$0xff] }
 0x511   :  { %v2026_v53 = vmul.f32 0.0625, %v14864_v33  ;;  %v14872_v33 = vld [vmem:[#allocation51_spill] sm:$0xff] }
 0x512   :  { %v10826_v12 = vpop.permute.xlu1 %4360  ;;  %4543 = vperm.xlu1 %8479, %v3650_v17   ;;  %v10828_v4 = vpop.permute.xlu0 %4366  ;;  %v14859_v17 = vld [vmem:[#allocation430_spill] sm:$0xff] }
 0x513   :  { %14850 = vst [vmem:[#allocation41_spill] sm:$0xff] %v10826_v12  ;;  %14851 = vst [vmem:[#allocation42_spill] sm:$0xff] %v10828_v4  ;;  %4552 = vperm.xlu0 %8478, %v3653_v44   ;;  %v3654_v12 = vmul.f32 %v14859_v17, %v2021_v24  ;;  %v14860_v4 = vld [vmem:[#allocation435_spill] sm:$0xff]  ;;  %v2023_v44 = vmul.f32 0.0625, %v14861_v19 }
 0x514   :  { %v3657_v46 = vmul.f32 %v14860_v4, %v2024_v62  ;;  %v14870_v62 = vld [vmem:[#allocation50_spill] sm:$0xff] }
 0x515   :  { %v2028_v19 = vmul.f32 0.0625, %v14870_v62  ;;  %v14878_v62 = vld [vmem:[#allocation53_spill] sm:$0xff] }
 0x516   :  { %v10834_v28 = vpop.permute.xlu1 %4363  ;;  %4549 = vperm.xlu1 %8479, %v3652_v37   ;;  %v10836_v20 = vpop.permute.xlu0 %4372  ;;  %v14865_v37 = vld [vmem:[#allocation432_spill] sm:$0xff] }
 0x517   :  { %14856 = vst [vmem:[#allocation43_spill] sm:$0xff] %v10834_v28  ;;  %14857 = vst [vmem:[#allocation44_spill] sm:$0xff] %v10836_v20  ;;  %4558 = vperm.xlu0 %8478, %v3655_v7   ;;  %v3656_v28 = vmul.f32 %v14865_v37, %v2023_v44  ;;  %v14866_v20 = vld [vmem:[#allocation437_spill] sm:$0xff]  ;;  %v2025_v7 = vmul.f32 0.0625, %v14867_v57 }
 0x518   :  { %v3659_v13 = vmul.f32 %v14866_v20, %v2026_v53  ;;  %v14875_v53 = vld [vmem:[#allocation52_spill] sm:$0xff] }
 0x519   :  { %v2030_v57 = vmul.f32 0.0625, %v14875_v53  ;;  %v14884_v53 = vld [vmem:[#allocation55_spill] sm:$0xff] }
 0x51a   :  { %v10842_v11 = vpop.permute.xlu1 %4369  ;;  %4555 = vperm.xlu1 %8479, %v3654_v12   ;;  %v10844_v27 = vpop.permute.xlu0 %4378  ;;  %v14871_v12 = vld [vmem:[#allocation434_spill] sm:$0xff] }
 0x51b   :  { %14862 = vst [vmem:[#allocation45_spill] sm:$0xff] %v10842_v11  ;;  %14863 = vst [vmem:[#allocation46_spill] sm:$0xff] %v10844_v27  ;;  %4564 = vperm.xlu0 %8478, %v3657_v46   ;;  %v3658_v11 = vmul.f32 %v14871_v12, %v2025_v7  ;;  %v3661_v27 = vmul.f32 %v10449_v63, %v2028_v19  ;;  %v2027_v46 = vmul.f32 0.0625, %v14872_v33  ;;  %v14881_v19 = vld [vmem:[#allocation54_spill] sm:$0xff] }
 0x51c   :  { %v2032_v33 = vmul.f32 0.0625, %v14881_v19  ;;  %v14890_v19 = vld [vmem:[#allocation57_spill] sm:$0xff] }
 0x51e   :  { %v10850_v6 = vpop.permute.xlu1 %4375  ;;  %4561 = vperm.xlu1 %8479, %v3656_v28   ;;  %v10852_v24 = vpop.permute.xlu0 %4384  ;;  %v14876_v28 = vld [vmem:[#allocation436_spill] sm:$0xff] }
 0x51f   :  { %14868 = vst [vmem:[#allocation430_spill] sm:$0xff] %v10850_v6  ;;  %14869 = vst [vmem:[#allocation47_spill] sm:$0xff] %v10852_v24  ;;  %4570 = vperm.xlu0 %8478, %v3659_v13   ;;  %v3660_v6 = vmul.f32 %v14876_v28, %v2027_v46  ;;  %v14877_v24 = vld [vmem:[#allocation441_spill] sm:$0xff]  ;;  %v2029_v13 = vmul.f32 0.0625, %v14878_v62 }
 0x520   :  { %v3663_v20 = vmul.f32 %v14877_v24, %v2030_v57  ;;  %v14887_v57 = vld [vmem:[#allocation56_spill] sm:$0xff] }
 0x521   :  { %v2034_v62 = vmul.f32 0.0625, %v14887_v57  ;;  %v14896_v57 = vld [vmem:[#allocation59_spill] sm:$0xff] }
 0x522   :  { %v10858_v4 = vpop.permute.xlu1 %4381  ;;  %4567 = vperm.xlu1 %8479, %v3658_v11   ;;  %v10860_v44 = vpop.permute.xlu0 %4390  ;;  %v14882_v11 = vld [vmem:[#allocation438_spill] sm:$0xff] }
 0x523   :  { %14873 = vst [vmem:[#allocation48_spill] sm:$0xff] %v10858_v4  ;;  %14874 = vst [vmem:[#allocation49_spill] sm:$0xff] %v10860_v44  ;;  %4576 = vperm.xlu0 %8478, %v3661_v27   ;;  %v3662_v4 = vmul.f32 %v14882_v11, %v2029_v13  ;;  %v14883_v44 = vld [vmem:[#allocation443_spill] sm:$0xff]  ;;  %v2031_v27 = vmul.f32 0.0625, %v14884_v53 }
 0x524   :  { %v3665_v63 = vmul.f32 %v14883_v44, %v2032_v33  ;;  %v14893_v33 = vld [vmem:[#allocation58_spill] sm:$0xff] }
 0x525   :  { %v2036_v53 = vmul.f32 0.0625, %v14893_v33  ;;  %v14902_v33 = vld [vmem:[#allocation61_spill] sm:$0xff] }
 0x526   :  { %v10866_v37 = vpop.permute.xlu1 %4387  ;;  %4573 = vperm.xlu1 %8479, %v3660_v6   ;;  %v10868_v7 = vpop.permute.xlu0 %4396  ;;  %v14888_v6 = vld [vmem:[#allocation440_spill] sm:$0xff] }
 0x527   :  { %14879 = vst [vmem:[#allocation50_spill] sm:$0xff] %v10866_v37  ;;  %14880 = vst [vmem:[#allocation51_spill] sm:$0xff] %v10868_v7  ;;  %4582 = vperm.xlu0 %8478, %v3663_v20   ;;  %v3664_v37 = vmul.f32 %v14888_v6, %v2031_v27  ;;  %v14889_v7 = vld [vmem:[#allocation445_spill] sm:$0xff]  ;;  %v2033_v20 = vmul.f32 0.0625, %v14890_v19 }
 0x528   :  { %v3667_v24 = vmul.f32 %v14889_v7, %v2034_v62  ;;  %v14899_v62 = vld [vmem:[#allocation60_spill] sm:$0xff] }
 0x529   :  { %v2038_v19 = vmul.f32 0.0625, %v14899_v62  ;;  %v14908_v62 = vld [vmem:[#allocation63_spill] sm:$0xff] }
 0x52a   :  { %v10874_v12 = vpop.permute.xlu1 %4393  ;;  %4579 = vperm.xlu1 %8479, %v3662_v4   ;;  %v10876_v46 = vpop.permute.xlu0 %4402  ;;  %v14894_v4 = vld [vmem:[#allocation442_spill] sm:$0xff] }
 0x52b   :  { %14885 = vst [vmem:[#allocation52_spill] sm:$0xff] %v10874_v12  ;;  %14886 = vst [vmem:[#allocation53_spill] sm:$0xff] %v10876_v46  ;;  %4588 = vperm.xlu0 %8478, %v3665_v63   ;;  %v3666_v12 = vmul.f32 %v14894_v4, %v2033_v20  ;;  %v14895_v46 = vld [vmem:[#allocation447_spill] sm:$0xff]  ;;  %v2035_v63 = vmul.f32 0.0625, %v14896_v57 }
 0x52c   :  { %v3669_v44 = vmul.f32 %v14895_v46, %v2036_v53  ;;  %v14905_v53 = vld [vmem:[#allocation62_spill] sm:$0xff] }
 0x52d   :  { %v2040_v57 = vmul.f32 0.0625, %v14905_v53  ;;  %v14914_v53 = vld [vmem:[#allocation65_spill] sm:$0xff] }
 0x52e   :  { %v10882_v28 = vpop.permute.xlu1 %4399  ;;  %4585 = vperm.xlu1 %8479, %v3664_v37   ;;  %v10884_v13 = vpop.permute.xlu0 %4408  ;;  %v14900_v37 = vld [vmem:[#allocation444_spill] sm:$0xff] }
 0x52f   :  { %14891 = vst [vmem:[#allocation54_spill] sm:$0xff] %v10882_v28  ;;  %14892 = vst [vmem:[#allocation55_spill] sm:$0xff] %v10884_v13  ;;  %4594 = vperm.xlu0 %8478, %v3667_v24   ;;  %v3668_v28 = vmul.f32 %v14900_v37, %v2035_v63  ;;  %v14901_v13 = vld [vmem:[#allocation449_spill] sm:$0xff]  ;;  %v2037_v24 = vmul.f32 0.0625, %v14902_v33 }
 0x530   :  { %v3671_v7 = vmul.f32 %v14901_v13, %v2038_v19  ;;  %v14911_v19 = vld [vmem:[#allocation64_spill] sm:$0xff] }
 0x531   :  { %v2042_v33 = vmul.f32 0.0625, %v14911_v19  ;;  %v14920_v19 = vld [vmem:[#allocation67_spill] sm:$0xff] }
 0x532   :  { %v10890_v11 = vpop.permute.xlu1 %4405  ;;  %4591 = vperm.xlu1 %8479, %v3666_v12   ;;  %v10892_v27 = vpop.permute.xlu0 %4414  ;;  %v14906_v12 = vld [vmem:[#allocation446_spill] sm:$0xff] }
 0x533   :  { %14897 = vst [vmem:[#allocation56_spill] sm:$0xff] %v10890_v11  ;;  %14898 = vst [vmem:[#allocation57_spill] sm:$0xff] %v10892_v27  ;;  %4600 = vperm.xlu0 %8478, %v3669_v44   ;;  %v3670_v11 = vmul.f32 %v14906_v12, %v2037_v24  ;;  %v14907_v27 = vld [vmem:[#allocation451_spill] sm:$0xff]  ;;  %v2039_v44 = vmul.f32 0.0625, %v14908_v62 }
 0x534   :  { %v3673_v46 = vmul.f32 %v14907_v27, %v2040_v57  ;;  %v14917_v57 = vld [vmem:[#allocation66_spill] sm:$0xff] }
 0x535   :  { %v2044_v62 = vmul.f32 0.0625, %v14917_v57  ;;  %v14926_v57 = vld [vmem:[#allocation69_spill] sm:$0xff] }
 0x536   :  { %v10898_v6 = vpop.permute.xlu1 %4411  ;;  %4597 = vperm.xlu1 %8479, %v3668_v28   ;;  %v10900_v20 = vpop.permute.xlu0 %4420  ;;  %v14912_v28 = vld [vmem:[#allocation448_spill] sm:$0xff] }
 0x537   :  { %14903 = vst [vmem:[#allocation58_spill] sm:$0xff] %v10898_v6  ;;  %14904 = vst [vmem:[#allocation59_spill] sm:$0xff] %v10900_v20  ;;  %4606 = vperm.xlu0 %8478, %v3671_v7   ;;  %v3672_v6 = vmul.f32 %v14912_v28, %v2039_v44  ;;  %v14913_v20 = vld [vmem:[#allocation453_spill] sm:$0xff]  ;;  %v2041_v7 = vmul.f32 0.0625, %v14914_v53 }
 0x538   :  { %v3675_v13 = vmul.f32 %v14913_v20, %v2042_v33  ;;  %v14923_v33 = vld [vmem:[#allocation68_spill] sm:$0xff] }
 0x539   :  { %v2046_v53 = vmul.f32 0.0625, %v14923_v33  ;;  %v14932_v33 = vld [vmem:[#allocation71_spill] sm:$0xff] }
 0x53a   :  { %v10906_v4 = vpop.permute.xlu1 %4417  ;;  %4603 = vperm.xlu1 %8479, %v3670_v11   ;;  %v10908_v63 = vpop.permute.xlu0 %4426  ;;  %v14918_v11 = vld [vmem:[#allocation450_spill] sm:$0xff] }
 0x53b   :  { %14909 = vst [vmem:[#allocation60_spill] sm:$0xff] %v10906_v4  ;;  %14910 = vst [vmem:[#allocation61_spill] sm:$0xff] %v10908_v63  ;;  %4612 = vperm.xlu0 %8478, %v3673_v46   ;;  %v3674_v4 = vmul.f32 %v14918_v11, %v2041_v7  ;;  %v14919_v63 = vld [vmem:[#allocation455_spill] sm:$0xff]  ;;  %v2043_v46 = vmul.f32 0.0625, %v14920_v19 }
 0x53c   :  { %v3677_v27 = vmul.f32 %v14919_v63, %v2044_v62  ;;  %v14929_v62 = vld [vmem:[#allocation70_spill] sm:$0xff] }
 0x53d   :  { %v2048_v19 = vmul.f32 0.0625, %v14929_v62  ;;  %v14938_v62 = vld [vmem:[#allocation73_spill] sm:$0xff] }
 0x53e   :  { %v10914_v37 = vpop.permute.xlu1 %4423  ;;  %4609 = vperm.xlu1 %8479, %v3672_v6   ;;  %v10916_v24 = vpop.permute.xlu0 %4432  ;;  %v14924_v6 = vld [vmem:[#allocation452_spill] sm:$0xff] }
 0x53f   :  { %14915 = vst [vmem:[#allocation62_spill] sm:$0xff] %v10914_v37  ;;  %14916 = vst [vmem:[#allocation63_spill] sm:$0xff] %v10916_v24  ;;  %4618 = vperm.xlu0 %8478, %v3675_v13   ;;  %v3676_v37 = vmul.f32 %v14924_v6, %v2043_v46  ;;  %v14925_v24 = vld [vmem:[#allocation457_spill] sm:$0xff]  ;;  %v2045_v13 = vmul.f32 0.0625, %v14926_v57 }
 0x540   :  { %v3679_v20 = vmul.f32 %v14925_v24, %v2046_v53  ;;  %v14935_v53 = vld [vmem:[#allocation72_spill] sm:$0xff] }
 0x541   :  { %v2050_v57 = vmul.f32 0.0625, %v14935_v53  ;;  %v14944_v53 = vld [vmem:[#allocation75_spill] sm:$0xff] }
 0x542   :  { %v10922_v12 = vpop.permute.xlu1 %4429  ;;  %4615 = vperm.xlu1 %8479, %v3674_v4   ;;  %v10924_v44 = vpop.permute.xlu0 %4438  ;;  %v14930_v4 = vld [vmem:[#allocation454_spill] sm:$0xff] }
 0x543   :  { %14921 = vst [vmem:[#allocation64_spill] sm:$0xff] %v10922_v12  ;;  %14922 = vst [vmem:[#allocation65_spill] sm:$0xff] %v10924_v44  ;;  %4624 = vperm.xlu0 %8478, %v3677_v27   ;;  %v3678_v12 = vmul.f32 %v14930_v4, %v2045_v13  ;;  %v14931_v44 = vld [vmem:[#allocation459_spill] sm:$0xff]  ;;  %v2047_v27 = vmul.f32 0.0625, %v14932_v33 }
 0x544   :  { %v3681_v63 = vmul.f32 %v14931_v44, %v2048_v19  ;;  %v14941_v19 = vld [vmem:[#allocation74_spill] sm:$0xff] }
 0x545   :  { %v2052_v33 = vmul.f32 0.0625, %v14941_v19  ;;  %v14950_v19 = vld [vmem:[#allocation77_spill] sm:$0xff] }
 0x546   :  { %v10930_v28 = vpop.permute.xlu1 %4435  ;;  %4621 = vperm.xlu1 %8479, %v3676_v37   ;;  %v10932_v7 = vpop.permute.xlu0 %4444  ;;  %v14936_v37 = vld [vmem:[#allocation456_spill] sm:$0xff] }
 0x547   :  { %14927 = vst [vmem:[#allocation66_spill] sm:$0xff] %v10930_v28  ;;  %14928 = vst [vmem:[#allocation67_spill] sm:$0xff] %v10932_v7  ;;  %4630 = vperm.xlu0 %8478, %v3679_v20   ;;  %v3680_v28 = vmul.f32 %v14936_v37, %v2047_v27  ;;  %v14937_v7 = vld [vmem:[#allocation461_spill] sm:$0xff]  ;;  %v2049_v20 = vmul.f32 0.0625, %v14938_v62 }
 0x548   :  { %v3683_v24 = vmul.f32 %v14937_v7, %v2050_v57  ;;  %v14947_v57 = vld [vmem:[#allocation76_spill] sm:$0xff] }
 0x549   :  { %v2054_v62 = vmul.f32 0.0625, %v14947_v57  ;;  %v14956_v57 = vld [vmem:[#allocation79_spill] sm:$0xff] }
 0x54a   :  { %v10938_v11 = vpop.permute.xlu1 %4441  ;;  %4627 = vperm.xlu1 %8479, %v3678_v12   ;;  %v10940_v46 = vpop.permute.xlu0 %4450  ;;  %v14942_v12 = vld [vmem:[#allocation458_spill] sm:$0xff] }
 0x54b   :  { %14933 = vst [vmem:[#allocation68_spill] sm:$0xff] %v10938_v11  ;;  %14934 = vst [vmem:[#allocation69_spill] sm:$0xff] %v10940_v46  ;;  %4636 = vperm.xlu0 %8478, %v3681_v63   ;;  %v3682_v11 = vmul.f32 %v14942_v12, %v2049_v20  ;;  %v14943_v46 = vld [vmem:[#allocation463_spill] sm:$0xff]  ;;  %v2051_v63 = vmul.f32 0.0625, %v14944_v53 }
 0x54c   :  { %v3685_v44 = vmul.f32 %v14943_v46, %v2052_v33  ;;  %v14953_v33 = vld [vmem:[#allocation78_spill] sm:$0xff] }
 0x54d   :  { %v2056_v53 = vmul.f32 0.0625, %v14953_v33  ;;  %v14962_v33 = vld [vmem:[#allocation81_spill] sm:$0xff] }
 0x54e   :  { %v10946_v6 = vpop.permute.xlu1 %4447  ;;  %4633 = vperm.xlu1 %8479, %v3680_v28   ;;  %v10948_v13 = vpop.permute.xlu0 %4456  ;;  %v14948_v28 = vld [vmem:[#allocation460_spill] sm:$0xff] }
 0x54f   :  { %14939 = vst [vmem:[#allocation70_spill] sm:$0xff] %v10946_v6  ;;  %14940 = vst [vmem:[#allocation71_spill] sm:$0xff] %v10948_v13  ;;  %4642 = vperm.xlu0 %8478, %v3683_v24   ;;  %v3684_v6 = vmul.f32 %v14948_v28, %v2051_v63  ;;  %v14949_v13 = vld [vmem:[#allocation465_spill] sm:$0xff]  ;;  %v2053_v24 = vmul.f32 0.0625, %v14950_v19 }
 0x550   :  { %v3687_v7 = vmul.f32 %v14949_v13, %v2054_v62  ;;  %v14959_v62 = vld [vmem:[#allocation80_spill] sm:$0xff] }
 0x551   :  { %v2058_v19 = vmul.f32 0.0625, %v14959_v62  ;;  %v14968_v62 = vld [vmem:[#allocation83_spill] sm:$0xff] }
 0x552   :  { %v10954_v4 = vpop.permute.xlu1 %4453  ;;  %4639 = vperm.xlu1 %8479, %v3682_v11   ;;  %v10956_v27 = vpop.permute.xlu0 %4462  ;;  %v14954_v11 = vld [vmem:[#allocation462_spill] sm:$0xff] }
 0x553   :  { %14945 = vst [vmem:[#allocation72_spill] sm:$0xff] %v10954_v4  ;;  %14946 = vst [vmem:[#allocation73_spill] sm:$0xff] %v10956_v27  ;;  %4648 = vperm.xlu0 %8478, %v3685_v44   ;;  %v3686_v4 = vmul.f32 %v14954_v11, %v2053_v24  ;;  %v14955_v27 = vld [vmem:[#allocation467_spill] sm:$0xff]  ;;  %v2055_v44 = vmul.f32 0.0625, %v14956_v57 }
 0x554   :  { %v3689_v46 = vmul.f32 %v14955_v27, %v2056_v53  ;;  %v14965_v53 = vld [vmem:[#allocation82_spill] sm:$0xff] }
 0x555   :  { %v2060_v57 = vmul.f32 0.0625, %v14965_v53  ;;  %v14974_v53 = vld [vmem:[#allocation85_spill] sm:$0xff] }
 0x556   :  { %v10962_v37 = vpop.permute.xlu1 %4459  ;;  %4645 = vperm.xlu1 %8479, %v3684_v6   ;;  %v10964_v20 = vpop.permute.xlu0 %4468  ;;  %v14960_v6 = vld [vmem:[#allocation464_spill] sm:$0xff] }
 0x557   :  { %14951 = vst [vmem:[#allocation74_spill] sm:$0xff] %v10962_v37  ;;  %14952 = vst [vmem:[#allocation75_spill] sm:$0xff] %v10964_v20  ;;  %4654 = vperm.xlu0 %8478, %v3687_v7   ;;  %v3688_v37 = vmul.f32 %v14960_v6, %v2055_v44  ;;  %v14961_v20 = vld [vmem:[#allocation469_spill] sm:$0xff]  ;;  %v2057_v7 = vmul.f32 0.0625, %v14962_v33 }
 0x558   :  { %v3691_v13 = vmul.f32 %v14961_v20, %v2058_v19  ;;  %v14971_v19 = vld [vmem:[#allocation84_spill] sm:$0xff] }
 0x559   :  { %v2062_v33 = vmul.f32 0.0625, %v14971_v19  ;;  %v14980_v19 = vld [vmem:[#allocation87_spill] sm:$0xff] }
 0x55a   :  { %v10970_v12 = vpop.permute.xlu1 %4465  ;;  %4651 = vperm.xlu1 %8479, %v3686_v4   ;;  %v10972_v63 = vpop.permute.xlu0 %4474  ;;  %v14966_v4 = vld [vmem:[#allocation466_spill] sm:$0xff] }
 0x55b   :  { %14957 = vst [vmem:[#allocation76_spill] sm:$0xff] %v10970_v12  ;;  %14958 = vst [vmem:[#allocation77_spill] sm:$0xff] %v10972_v63  ;;  %4660 = vperm.xlu0 %8478, %v3689_v46   ;;  %v3690_v12 = vmul.f32 %v14966_v4, %v2057_v7  ;;  %v14967_v63 = vld [vmem:[#allocation471_spill] sm:$0xff]  ;;  %v2059_v46 = vmul.f32 0.0625, %v14968_v62 }
 0x55c   :  { %v3693_v27 = vmul.f32 %v14967_v63, %v2060_v57  ;;  %v14977_v57 = vld [vmem:[#allocation86_spill] sm:$0xff] }
 0x55d   :  { %v2064_v62 = vmul.f32 0.0625, %v14977_v57  ;;  %v14986_v57 = vld [vmem:[#allocation89_spill] sm:$0xff] }
 0x55e   :  { %v10978_v28 = vpop.permute.xlu1 %4471  ;;  %4657 = vperm.xlu1 %8479, %v3688_v37   ;;  %v10980_v24 = vpop.permute.xlu0 %4480  ;;  %v14972_v37 = vld [vmem:[#allocation468_spill] sm:$0xff] }
 0x55f   :  { %14963 = vst [vmem:[#allocation78_spill] sm:$0xff] %v10978_v28  ;;  %14964 = vst [vmem:[#allocation79_spill] sm:$0xff] %v10980_v24  ;;  %4666 = vperm.xlu0 %8478, %v3691_v13   ;;  %v3692_v28 = vmul.f32 %v14972_v37, %v2059_v46  ;;  %v14973_v24 = vld [vmem:[#allocation473_spill] sm:$0xff]  ;;  %v2061_v13 = vmul.f32 0.0625, %v14974_v53 }
 0x560   :  { %v3695_v20 = vmul.f32 %v14973_v24, %v2062_v33  ;;  %v14983_v33 = vld [vmem:[#allocation88_spill] sm:$0xff] }
 0x561   :  { %v2066_v53 = vmul.f32 0.0625, %v14983_v33  ;;  %v14991_v33 = vld [vmem:[#allocation91_spill] sm:$0xff] }
 0x562   :  { %v10986_v11 = vpop.permute.xlu1 %4477  ;;  %4663 = vperm.xlu1 %8479, %v3690_v12   ;;  %v10988_v44 = vpop.permute.xlu0 %4486  ;;  %v14978_v12 = vld [vmem:[#allocation470_spill] sm:$0xff] }
 0x563   :  { %14969 = vst [vmem:[#allocation80_spill] sm:$0xff] %v10986_v11  ;;  %14970 = vst [vmem:[#allocation81_spill] sm:$0xff] %v10988_v44  ;;  %4672 = vperm.xlu0 %8478, %v3693_v27   ;;  %v3694_v11 = vmul.f32 %v14978_v12, %v2061_v13  ;;  %v14979_v44 = vld [vmem:[#allocation475_spill] sm:$0xff]  ;;  %v2063_v27 = vmul.f32 0.0625, %v14980_v19 }
 0x564   :  { %v3697_v63 = vmul.f32 %v14979_v44, %v2064_v62  ;;  %v14989_v62 = vld [vmem:[#allocation90_spill] sm:$0xff] }
 0x565   :  { %v2068_v19 = vmul.f32 0.0625, %v14989_v62  ;;  %v14997_v62 = vld [vmem:[#allocation93_spill] sm:$0xff] }
 0x566   :  { %v10994_v6 = vpop.permute.xlu1 %4483  ;;  %4669 = vperm.xlu1 %8479, %v3692_v28   ;;  %v10996_v7 = vpop.permute.xlu0 %4492  ;;  %v14984_v28 = vld [vmem:[#allocation472_spill] sm:$0xff] }
 0x567   :  { %14975 = vst [vmem:[#allocation82_spill] sm:$0xff] %v10994_v6  ;;  %14976 = vst [vmem:[#allocation83_spill] sm:$0xff] %v10996_v7  ;;  %4678 = vperm.xlu0 %8478, %v3695_v20   ;;  %v3696_v6 = vmul.f32 %v14984_v28, %v2063_v27  ;;  %v14985_v7 = vld [vmem:[#allocation477_spill] sm:$0xff]  ;;  %v2065_v20 = vmul.f32 0.0625, %v14986_v57 }
 0x568   :  { %v3699_v24 = vmul.f32 %v14985_v7, %v2066_v53  ;;  %v14994_v53 = vld [vmem:[#allocation92_spill] sm:$0xff] }
 0x569   :  { %v2070_v57 = vmul.f32 0.0625, %v14994_v53  ;;  %v15003_v53 = vld [vmem:[#allocation95_spill] sm:$0xff] }
 0x56a   :  { %v11002_v4 = vpop.permute.xlu1 %4489  ;;  %4675 = vperm.xlu1 %8479, %v3694_v11   ;;  %v11004_v46 = vpop.permute.xlu0 %4498  ;;  %v14990_v11 = vld [vmem:[#allocation474_spill] sm:$0xff] }
 0x56b   :  { %14981 = vst [vmem:[#allocation84_spill] sm:$0xff] %v11002_v4  ;;  %14982 = vst [vmem:[#allocation85_spill] sm:$0xff] %v11004_v46  ;;  %4684 = vperm.xlu0 %8478, %v3697_v63   ;;  %v3698_v4 = vmul.f32 %v14990_v11, %v2065_v20  ;;  %v3701_v46 = vmul.f32 %v10537_v26, %v2068_v19  ;;  %v2067_v63 = vmul.f32 0.0625, %v14991_v33  ;;  %v15000_v19 = vld [vmem:[#allocation94_spill] sm:$0xff] }
 0x56c   :  { %v2072_v33 = vmul.f32 0.0625, %v15000_v19  ;;  %v15009_v19 = vld [vmem:[#allocation97_spill] sm:$0xff] }
 0x56e   :  { %v11010_v37 = vpop.permute.xlu1 %4495  ;;  %4681 = vperm.xlu1 %8479, %v3696_v6   ;;  %v11012_v13 = vpop.permute.xlu0 %4504  ;;  %v14995_v6 = vld [vmem:[#allocation476_spill] sm:$0xff] }
 0x56f   :  { %14987 = vst [vmem:[#allocation86_spill] sm:$0xff] %v11010_v37  ;;  %14988 = vst [vmem:[#allocation470_spill] sm:$0xff] %v11012_v13  ;;  %4690 = vperm.xlu0 %8478, %v3699_v24   ;;  %v3700_v37 = vmul.f32 %v14995_v6, %v2067_v63  ;;  %v14996_v13 = vld [vmem:[#allocation481_spill] sm:$0xff]  ;;  %v2069_v24 = vmul.f32 0.0625, %v14997_v62 }
 0x570   :  { %v3703_v7 = vmul.f32 %v14996_v13, %v2070_v57  ;;  %v15006_v57 = vld [vmem:[#allocation96_spill] sm:$0xff] }
 0x571   :  { %v2074_v62 = vmul.f32 0.0625, %v15006_v57  ;;  %v15015_v57 = vld [vmem:[#allocation99_spill] sm:$0xff] }
 0x572   :  { %v11018_v44 = vpop.permute.xlu1 %4501  ;;  %4687 = vperm.xlu1 %8479, %v3698_v4   ;;  %v11020_v27 = vpop.permute.xlu0 %4510  ;;  %v15001_v4 = vld [vmem:[#allocation478_spill] sm:$0xff] }
 0x573   :  { %14992 = vst [vmem:[#allocation87_spill] sm:$0xff] %v11018_v44  ;;  %14993 = vst [vmem:[#allocation88_spill] sm:$0xff] %v11020_v27  ;;  %4696 = vperm.xlu0 %8478, %v3701_v46   ;;  %v3702_v44 = vmul.f32 %v15001_v4, %v2069_v24  ;;  %v15002_v27 = vld [vmem:[#allocation483_spill] sm:$0xff]  ;;  %v2071_v46 = vmul.f32 0.0625, %v15003_v53 }
 0x574   :  { %v3705_v26 = vmul.f32 %v15002_v27, %v2072_v33  ;;  %v15012_v33 = vld [vmem:[#allocation98_spill] sm:$0xff] }
 0x575   :  { %v2076_v53 = vmul.f32 0.0625, %v15012_v33  ;;  %v15021_v33 = vld [vmem:[#allocation101_spill] sm:$0xff] }
 0x576   :  { %v11026_v28 = vpop.permute.xlu1 %4507  ;;  %4693 = vperm.xlu1 %8479, %v3700_v37   ;;  %v11028_v20 = vpop.permute.xlu0 %4516  ;;  %v15007_v37 = vld [vmem:[#allocation480_spill] sm:$0xff] }
 0x577   :  { %14998 = vst [vmem:[#allocation89_spill] sm:$0xff] %v11026_v28  ;;  %14999 = vst [vmem:[#allocation90_spill] sm:$0xff] %v11028_v20  ;;  %4702 = vperm.xlu0 %8478, %v3703_v7   ;;  %v3704_v28 = vmul.f32 %v15007_v37, %v2071_v46  ;;  %v15008_v20 = vld [vmem:[#allocation485_spill] sm:$0xff]  ;;  %v2073_v7 = vmul.f32 0.0625, %v15009_v19 }
 0x578   :  { %v3707_v13 = vmul.f32 %v15008_v20, %v2074_v62  ;;  %v15018_v62 = vld [vmem:[#allocation100_spill] sm:$0xff] }
 0x579   :  { %v2078_v19 = vmul.f32 0.0625, %v15018_v62  ;;  %v15027_v62 = vld [vmem:[#allocation103_spill] sm:$0xff] }
 0x57a   :  { %v11034_v11 = vpop.permute.xlu1 %4513  ;;  %4699 = vperm.xlu1 %8479, %v3702_v44   ;;  %v11036_v63 = vpop.permute.xlu0 %4522  ;;  %v15013_v44 = vld [vmem:[#allocation482_spill] sm:$0xff] }
 0x57b   :  { %15004 = vst [vmem:[#allocation91_spill] sm:$0xff] %v11034_v11  ;;  %15005 = vst [vmem:[#allocation92_spill] sm:$0xff] %v11036_v63  ;;  %4708 = vperm.xlu0 %8478, %v3705_v26   ;;  %v3706_v11 = vmul.f32 %v15013_v44, %v2073_v7  ;;  %v15014_v63 = vld [vmem:[#allocation487_spill] sm:$0xff]  ;;  %v2075_v26 = vmul.f32 0.0625, %v15015_v57 }
 0x57c   :  { %v3709_v27 = vmul.f32 %v15014_v63, %v2076_v53  ;;  %v15024_v53 = vld [vmem:[#allocation102_spill] sm:$0xff] }
 0x57d   :  { %v2080_v57 = vmul.f32 0.0625, %v15024_v53  ;;  %v15033_v53 = vld [vmem:[#allocation105_spill] sm:$0xff] }
 0x57e   :  { %v11042_v6 = vpop.permute.xlu1 %4519  ;;  %4705 = vperm.xlu1 %8479, %v3704_v28   ;;  %v11044_v24 = vpop.permute.xlu0 %4528  ;;  %v15019_v28 = vld [vmem:[#allocation484_spill] sm:$0xff] }
 0x57f   :  { %15010 = vst [vmem:[#allocation93_spill] sm:$0xff] %v11042_v6  ;;  %15011 = vst [vmem:[#allocation94_spill] sm:$0xff] %v11044_v24  ;;  %4714 = vperm.xlu0 %8478, %v3707_v13   ;;  %v3708_v6 = vmul.f32 %v15019_v28, %v2075_v26  ;;  %v15020_v24 = vld [vmem:[#allocation489_spill] sm:$0xff]  ;;  %v2077_v13 = vmul.f32 0.0625, %v15021_v33 }
 0x580   :  { %v3711_v20 = vmul.f32 %v15020_v24, %v2078_v19  ;;  %v15030_v19 = vld [vmem:[#allocation104_spill] sm:$0xff] }
 0x581   :  { %v2082_v33 = vmul.f32 0.0625, %v15030_v19  ;;  %v15038_v19 = vld [vmem:[#allocation107_spill] sm:$0xff] }
 0x582   :  { %v11050_v4 = vpop.permute.xlu1 %4525  ;;  %4711 = vperm.xlu1 %8479, %v3706_v11   ;;  %v11052_v46 = vpop.permute.xlu0 %4534  ;;  %v15025_v11 = vld [vmem:[#allocation486_spill] sm:$0xff] }
 0x583   :  { %15016 = vst [vmem:[#allocation95_spill] sm:$0xff] %v11050_v4  ;;  %15017 = vst [vmem:[#allocation96_spill] sm:$0xff] %v11052_v46  ;;  %4720 = vperm.xlu0 %8478, %v3709_v27   ;;  %v3710_v4 = vmul.f32 %v15025_v11, %v2077_v13  ;;  %v15026_v46 = vld [vmem:[#allocation491_spill] sm:$0xff]  ;;  %v2079_v27 = vmul.f32 0.0625, %v15027_v62 }
 0x584   :  { %v3713_v63 = vmul.f32 %v15026_v46, %v2080_v57  ;;  %v15036_v57 = vld [vmem:[#allocation106_spill] sm:$0xff] }
 0x585   :  { %v2084_v62 = vmul.f32 0.0625, %v15036_v57  ;;  %v15043_v57 = vld [vmem:[#allocation109_spill] sm:$0xff] }
 0x586   :  { %v11058_v37 = vpop.permute.xlu1 %4531  ;;  %4717 = vperm.xlu1 %8479, %v3708_v6   ;;  %v11060_v7 = vpop.permute.xlu0 %4540  ;;  %v15031_v6 = vld [vmem:[#allocation488_spill] sm:$0xff] }
 0x587   :  { %15022 = vst [vmem:[#allocation97_spill] sm:$0xff] %v11058_v37  ;;  %15023 = vst [vmem:[#allocation98_spill] sm:$0xff] %v11060_v7  ;;  %4726 = vperm.xlu0 %8478, %v3711_v20   ;;  %v3712_v37 = vmul.f32 %v15031_v6, %v2079_v27  ;;  %v15032_v7 = vld [vmem:[#allocation493_spill] sm:$0xff]  ;;  %v2081_v20 = vmul.f32 0.0625, %v15033_v53 }
 0x588   :  { %v3715_v24 = vmul.f32 %v15032_v7, %v2082_v33  ;;  %v15041_v33 = vld [vmem:[#allocation108_spill] sm:$0xff] }
 0x589   :  { %v2086_v53 = vmul.f32 0.0625, %v15041_v33  ;;  %v15048_v33 = vld [vmem:[#allocation111_spill] sm:$0xff] }
 0x58a   :  { %v11066_v44 = vpop.permute.xlu1 %4537  ;;  %4723 = vperm.xlu1 %8479, %v3710_v4   ;;  %v11068_v26 = vpop.permute.xlu0 %4546  ;;  %v15037_v4 = vld [vmem:[#allocation490_spill] sm:$0xff] }
 0x58b   :  { %15028 = vst [vmem:[#allocation99_spill] sm:$0xff] %v11066_v44  ;;  %15029 = vst [vmem:[#allocation100_spill] sm:$0xff] %v11068_v26  ;;  %4732 = vperm.xlu0 %8478, %v3713_v63   ;;  %v3714_v44 = vmul.f32 %v15037_v4, %v2081_v20  ;;  %v3717_v26 = vmul.f32 %v10572_v18, %v2084_v62  ;;  %v2083_v63 = vmul.f32 0.0625, %v15038_v19  ;;  %v15046_v62 = vld [vmem:[#allocation110_spill] sm:$0xff] }
 0x58c   :  { %v2088_v19 = vmul.f32 0.0625, %v15046_v62  ;;  %v15052_v62 = vld [vmem:[#allocation113_spill] sm:$0xff] }
 0x58e   :  { %v11074_v28 = vpop.permute.xlu1 %4543  ;;  %4729 = vperm.xlu1 %8479, %v3712_v37   ;;  %v11076_v13 = vpop.permute.xlu0 %4552  ;;  %v15042_v37 = vld [vmem:[#allocation492_spill] sm:$0xff] }
 0x58f   :  { %15034 = vst [vmem:[#allocation101_spill] sm:$0xff] %v11074_v28  ;;  %15035 = vst [vmem:[#allocation102_spill] sm:$0xff] %v11076_v13  ;;  %4738 = vperm.xlu0 %8478, %v3715_v24   ;;  %v3716_v28 = vmul.f32 %v15042_v37, %v2083_v63  ;;  %v3719_v13 = vmul.f32 %v10580_v52, %v2086_v53  ;;  %v2085_v24 = vmul.f32 0.0625, %v15043_v57  ;;  %v15051_v53 = vld [vmem:[#allocation112_spill] sm:$0xff] }
 0x590   :  { %v2090_v57 = vmul.f32 0.0625, %v15051_v53  ;;  %v15056_v53 = vld [vmem:[#allocation115_spill] sm:$0xff] }
 0x592   :  { %v11082_v46 = vpop.permute.xlu1 %4549  ;;  %4735 = vperm.xlu1 %8479, %v3714_v44   ;;  %v11084_v27 = vpop.permute.xlu0 %4558  ;;  %v15047_v44 = vld [vmem:[#allocation494_spill] sm:$0xff] }
 0x593   :  { %15039 = vst [vmem:[#allocation486_spill] sm:$0xff] %v11082_v46  ;;  %15040 = vst [vmem:[#allocation103_spill] sm:$0xff] %v11084_v27  ;;  %4744 = vperm.xlu0 %8478, %v3717_v26   ;;  %v3718_v46 = vmul.f32 %v15047_v44, %v2085_v24  ;;  %v3721_v27 = vmul.f32 %v10588_v39, %v2088_v19  ;;  %v2087_v26 = vmul.f32 0.0625, %v15048_v33  ;;  %v15055_v19 = vld [vmem:[#allocation114_spill] sm:$0xff] }
 0x594   :  { %v2092_v33 = vmul.f32 0.0625, %v15055_v19  ;;  %v15060_v19 = vld [vmem:[#allocation117_spill] sm:$0xff] }
 0x596   :  { %v11090_v7 = vpop.permute.xlu1 %4555  ;;  %4741 = vperm.xlu1 %8479, %v3716_v28   ;;  %v11092_v20 = vpop.permute.xlu0 %4564  ;;  %v3720_v28 = vmul.f32 %v10574_v0, %v2087_v26 }
 0x597   :  { %15044 = vst [vmem:[#allocation104_spill] sm:$0xff] %v11090_v7  ;;  %15045 = vst [vmem:[#allocation488_spill] sm:$0xff] %v11092_v20  ;;  %4750 = vperm.xlu0 %8478, %v3719_v13   ;;  %v3723_v20 = vmul.f32 %v10596_v32, %v2090_v57  ;;  %v2089_v13 = vmul.f32 0.0625, %v15052_v62  ;;  %v15059_v57 = vld [vmem:[#allocation116_spill] sm:$0xff] }
 0x598   :  { %v2094_v62 = vmul.f32 0.0625, %v15059_v57  ;;  %v15064_v57 = vld [vmem:[#allocation119_spill] sm:$0xff] }
 0x59a   :  { %v11098_v18 = vpop.permute.xlu1 %4561  ;;  %4747 = vperm.xlu1 %8479, %v3718_v46   ;;  %v11100_v63 = vpop.permute.xlu0 %4570  ;;  %v3722_v46 = vmul.f32 %v10582_v41, %v2089_v13 }
 0x59b   :  { %15049 = vst [vmem:[#allocation105_spill] sm:$0xff] %v11098_v18  ;;  %15050 = vst [vmem:[#allocation106_spill] sm:$0xff] %v11100_v63  ;;  %4756 = vperm.xlu0 %8478, %v3721_v27   ;;  %v3725_v63 = vmul.f32 %v10604_v14, %v2092_v33  ;;  %v2091_v27 = vmul.f32 0.0625, %v15056_v53  ;;  %v15063_v33 = vld [vmem:[#allocation118_spill] sm:$0xff] }
 0x59c   :  { %v2096_v53 = vmul.f32 0.0625, %v15063_v33  ;;  %v15068_v33 = vld [vmem:[#allocation121_spill] sm:$0xff] }
 0x59e   :  { %v11106_v7 = vpop.permute.xlu1 %4567  ;;  %4753 = vperm.xlu1 %8479, %v3720_v28   ;;  %v11108_v24 = vpop.permute.xlu0 %4576  ;;  %v3724_v28 = vmul.f32 %v10590_v38, %v2091_v27 }
 0x59f   :  { %15053 = vst [vmem:[#allocation490_spill] sm:$0xff] %v11106_v7  ;;  %15054 = vst [vmem:[#allocation107_spill] sm:$0xff] %v11108_v24  ;;  %4762 = vperm.xlu0 %8478, %v3723_v20   ;;  %v3727_v24 = vmul.f32 %v10612_v40, %v2094_v62  ;;  %v2093_v20 = vmul.f32 0.0625, %v15060_v19  ;;  %v15067_v62 = vld [vmem:[#allocation120_spill] sm:$0xff] }
 0x5a0   :  { %v2098_v19 = vmul.f32 0.0625, %v15067_v62  ;;  %v15072_v62 = vld [vmem:[#allocation123_spill] sm:$0xff] }
 0x5a2   :  { %v11114_v18 = vpop.permute.xlu1 %4573  ;;  %4759 = vperm.xlu1 %8479, %v3722_v46   ;;  %v11116_v26 = vpop.permute.xlu0 %4582  ;;  %v3726_v46 = vmul.f32 %v10598_v47, %v2093_v20 }
 0x5a3   :  { %15057 = vst [vmem:[#allocation108_spill] sm:$0xff] %v11114_v18  ;;  %15058 = vst [vmem:[#allocation492_spill] sm:$0xff] %v11116_v26  ;;  %4768 = vperm.xlu0 %8478, %v3725_v63   ;;  %v3729_v26 = vmul.f32 %v10620_v35, %v2096_v53  ;;  %v2095_v63 = vmul.f32 0.0625, %v15064_v57  ;;  %v15071_v53 = vld [vmem:[#allocation122_spill] sm:$0xff] }
 0x5a4   :  { %v2100_v57 = vmul.f32 0.0625, %v15071_v53  ;;  %v15076_v53 = vld [vmem:[#allocation125_spill] sm:$0xff] }
 0x5a6   :  { %v11122_v7 = vpop.permute.xlu1 %4579  ;;  %4765 = vperm.xlu1 %8479, %v3724_v28   ;;  %v11124_v13 = vpop.permute.xlu0 %4588  ;;  %v3728_v28 = vmul.f32 %v10606_v58, %v2095_v63 }
 0x5a7   :  { %15061 = vst [vmem:[#allocation109_spill] sm:$0xff] %v11122_v7  ;;  %15062 = vst [vmem:[#allocation110_spill] sm:$0xff] %v11124_v13  ;;  %4774 = vperm.xlu0 %8478, %v3727_v24   ;;  %v3731_v13 = vmul.f32 %v10628_v60, %v2098_v19  ;;  %v2097_v24 = vmul.f32 0.0625, %v15068_v33  ;;  %v15075_v19 = vld [vmem:[#allocation124_spill] sm:$0xff] }
 0x5a8   :  { %v2102_v33 = vmul.f32 0.0625, %v15075_v19  ;;  %v15080_v19 = vld [vmem:[#allocation127_spill] sm:$0xff] }
 0x5aa   :  { %v11130_v18 = vpop.permute.xlu1 %4585  ;;  %4771 = vperm.xlu1 %8479, %v3726_v46   ;;  %v11132_v27 = vpop.permute.xlu0 %4594  ;;  %v3730_v46 = vmul.f32 %v10614_v1, %v2097_v24  ;;  %v15551_v1 = vld [vmem:[#allocation318_spill] sm:$0xff] }
 0x5ab   :  { %15065 = vst [vmem:[#allocation494_spill] sm:$0xff] %v11130_v18  ;;  %15066 = vst [vmem:[#allocation111_spill] sm:$0xff] %v11132_v27  ;;  %4780 = vperm.xlu0 %8478, %v3729_v26   ;;  %v3733_v27 = vmul.f32 %v10636_v59, %v2100_v57  ;;  %v2099_v26 = vmul.f32 0.0625, %v15072_v62  ;;  %v15079_v57 = vld [vmem:[#allocation126_spill] sm:$0xff] }
 0x5ac   :  { %v2104_v62 = vmul.f32 0.0625, %v15079_v57  ;;  %v15084_v57 = vld [vmem:[#allocation129_spill] sm:$0xff]  ;;  %v15538_v59 = vld [vmem:[#allocation310_spill] sm:$0xff] }
 0x5ae   :  { %v11138_v7 = vpop.permute.xlu1 %4591  ;;  %4777 = vperm.xlu1 %8479, %v3728_v28   ;;  %v11140_v20 = vpop.permute.xlu0 %4600  ;;  %v3732_v28 = vmul.f32 %v10622_v8, %v2099_v26 }
 0x5af   :  { %15069 = vst [vmem:[#allocation112_spill] sm:$0xff] %v11138_v7  ;;  %15070 = vst [vmem:[#allocation113_spill] sm:$0xff] %v11140_v20  ;;  %4786 = vperm.xlu0 %8478, %v3731_v13   ;;  %v3735_v7 = vmul.f32 %v10644_v51, %v2102_v33  ;;  %v2101_v13 = vmul.f32 0.0625, %v15076_v53  ;;  %v15083_v33 = vld [vmem:[#allocation128_spill] sm:$0xff] }
 0x5b0   :  { %v2106_v53 = vmul.f32 0.0625, %v15083_v33  ;;  %v15088_v33 = vld [vmem:[#allocation131_spill] sm:$0xff] }
 0x5b2   :  { %v11146_v18 = vpop.permute.xlu1 %4597  ;;  %4783 = vperm.xlu1 %8479, %v3730_v46   ;;  %v11148_v63 = vpop.permute.xlu0 %4606  ;;  %v3734_v46 = vmul.f32 %v10630_v15, %v2101_v13  ;;  %v12081_v15 = vmul.f32 0.0625, %v15538_v59 }
 0x5b3   :  { %15073 = vst [vmem:[#allocation114_spill] sm:$0xff] %v11146_v18  ;;  %15074 = vst [vmem:[#allocation115_spill] sm:$0xff] %v11148_v63  ;;  %4792 = vperm.xlu0 %8478, %v3733_v27   ;;  %v3737_v63 = vmul.f32 %v10652_v2, %v2104_v62  ;;  %v2103_v27 = vmul.f32 0.0625, %v15080_v19  ;;  %v15087_v62 = vld [vmem:[#allocation130_spill] sm:$0xff] }
 0x5b4   :  { %v2108_v19 = vmul.f32 0.0625, %v15087_v62  ;;  %v15092_v62 = vld [vmem:[#allocation133_spill] sm:$0xff] }
 0x5b6   :  { %v11154_v20 = vpop.permute.xlu1 %4603  ;;  %4789 = vperm.xlu1 %8479, %v3732_v28   ;;  %v11156_v24 = vpop.permute.xlu0 %4612  ;;  %v3736_v28 = vmul.f32 %v10638_v22, %v2103_v27 }
 0x5b7   :  { %15077 = vst [vmem:[#allocation116_spill] sm:$0xff] %v11154_v20  ;;  %15078 = vst [vmem:[#allocation117_spill] sm:$0xff] %v11156_v24  ;;  %4798 = vperm.xlu0 %8478, %v3735_v7   ;;  %v3739_v24 = vmul.f32 %v10660_v9, %v2106_v53  ;;  %v2105_v7 = vmul.f32 0.0625, %v15084_v57  ;;  %v15091_v53 = vld [vmem:[#allocation132_spill] sm:$0xff] }
 0x5b8   :  { %v2110_v57 = vmul.f32 0.0625, %v15091_v53  ;;  %v15096_v53 = vld [vmem:[#allocation135_spill] sm:$0xff] }
 0x5ba   :  { %v11162_v18 = vpop.permute.xlu1 %4609  ;;  %4795 = vperm.xlu1 %8479, %v3734_v46   ;;  %v11164_v26 = vpop.permute.xlu0 %4618  ;;  %v3738_v46 = vmul.f32 %v10646_v29, %v2105_v7 }
 0x5bb   :  { %15081 = vst [vmem:[#allocation118_spill] sm:$0xff] %v11162_v18  ;;  %15082 = vst [vmem:[#allocation119_spill] sm:$0xff] %v11164_v26  ;;  %4804 = vperm.xlu0 %8478, %v3737_v63   ;;  %v3741_v26 = vmul.f32 %v10668_v10, %v2108_v19  ;;  %v2107_v63 = vmul.f32 0.0625, %v15088_v33  ;;  %v15095_v19 = vld [vmem:[#allocation134_spill] sm:$0xff] }
 0x5bc   :  { %v2112_v33 = vmul.f32 0.0625, %v15095_v19  ;;  %v15100_v19 = vld [vmem:[#allocation137_spill] sm:$0xff] }
 0x5be   :  { %v11170_v20 = vpop.permute.xlu1 %4615  ;;  %4801 = vperm.xlu1 %8479, %v3736_v28   ;;  %v11172_v13 = vpop.permute.xlu0 %4624  ;;  %v3740_v28 = vmul.f32 %v10654_v36, %v2107_v63 }
 0x5bf   :  { %15085 = vst [vmem:[#allocation120_spill] sm:$0xff] %v11170_v20  ;;  %15086 = vst [vmem:[#allocation121_spill] sm:$0xff] %v11172_v13  ;;  %4810 = vperm.xlu0 %8478, %v3739_v24   ;;  %v3743_v13 = vmul.f32 %v10676_v21, %v2110_v57  ;;  %v2109_v24 = vmul.f32 0.0625, %v15092_v62  ;;  %v15099_v57 = vld [vmem:[#allocation136_spill] sm:$0xff] }
 0x5c0   :  { %v2114_v62 = vmul.f32 0.0625, %v15099_v57  ;;  %v15104_v57 = vld [vmem:[#allocation139_spill] sm:$0xff] }
 0x5c2   :  { %v11178_v18 = vpop.permute.xlu1 %4621  ;;  %4807 = vperm.xlu1 %8479, %v3738_v46   ;;  %v11180_v27 = vpop.permute.xlu0 %4630  ;;  %v3742_v46 = vmul.f32 %v10662_v43, %v2109_v24  ;;  %v15529_v43 = vld [vmem:[#allocation303_spill] sm:$0xff] }
 0x5c3   :  { %15089 = vst [vmem:[#allocation122_spill] sm:$0xff] %v11178_v18  ;;  %15090 = vst [vmem:[#allocation123_spill] sm:$0xff] %v11180_v27  ;;  %4816 = vperm.xlu0 %8478, %v3741_v26   ;;  %v3745_v27 = vmul.f32 %v10684_v34, %v2112_v33  ;;  %v2111_v26 = vmul.f32 0.0625, %v15096_v53  ;;  %v15103_v33 = vld [vmem:[#allocation138_spill] sm:$0xff] }
 0x5c4   :  { %v2116_v53 = vmul.f32 0.0625, %v15103_v33  ;;  %v15108_v33 = vld [vmem:[#allocation141_spill] sm:$0xff]  ;;  %v15520_v34 = vld [vmem:[#allocation294_spill] sm:$0xff] }
 0x5c6   :  { %v11186_v20 = vpop.permute.xlu1 %4627  ;;  %4813 = vperm.xlu1 %8479, %v3740_v28   ;;  %v11188_v7 = vpop.permute.xlu0 %4636  ;;  %v3744_v28 = vmul.f32 %v10670_v50, %v2111_v26 }
 0x5c7   :  { %15093 = vst [vmem:[#allocation124_spill] sm:$0xff] %v11186_v20  ;;  %15094 = vst [vmem:[#allocation125_spill] sm:$0xff] %v11188_v7  ;;  %4822 = vperm.xlu0 %8478, %v3743_v13   ;;  %v3747_v7 = vmul.f32 %v10692_v54, %v2114_v62  ;;  %v2113_v13 = vmul.f32 0.0625, %v15100_v19  ;;  %v15107_v62 = vld [vmem:[#allocation140_spill] sm:$0xff] }
 0x5c8   :  { %v2118_v19 = vmul.f32 0.0625, %v15107_v62  ;;  %v15112_v62 = vld [vmem:[#allocation143_spill] sm:$0xff] }
 0x5ca   :  { %v11194_v18 = vpop.permute.xlu1 %4633  ;;  %4819 = vperm.xlu1 %8479, %v3742_v46   ;;  %v11196_v63 = vpop.permute.xlu0 %4642  ;;  %v3746_v46 = vmul.f32 %v10678_v61, %v2113_v13  ;;  %v12033_v61 = vmul.f32 0.0625, %v15520_v34 }
 0x5cb   :  { %15097 = vst [vmem:[#allocation126_spill] sm:$0xff] %v11194_v18  ;;  %15098 = vst [vmem:[#allocation127_spill] sm:$0xff] %v11196_v63  ;;  %4828 = vperm.xlu0 %8478, %v3745_v27   ;;  %v3749_v63 = vmul.f32 %v10700_v25, %v2116_v53  ;;  %v2115_v27 = vmul.f32 0.0625, %v15104_v57  ;;  %v15111_v53 = vld [vmem:[#allocation142_spill] sm:$0xff] }
 0x5cc   :  { %v2120_v57 = vmul.f32 0.0625, %v15111_v53  ;;  %v15116_v53 = vld [vmem:[#allocation145_spill] sm:$0xff] }
 0x5ce   :  { %v11202_v20 = vpop.permute.xlu1 %4639  ;;  %4825 = vperm.xlu1 %8479, %v3744_v28   ;;  %v11204_v24 = vpop.permute.xlu0 %4648  ;;  %v3748_v28 = vmul.f32 %v10686_v16, %v2115_v27 }
 0x5cf   :  { %15101 = vst [vmem:[#allocation128_spill] sm:$0xff] %v11202_v20  ;;  %15102 = vst [vmem:[#allocation129_spill] sm:$0xff] %v11204_v24  ;;  %4834 = vperm.xlu0 %8478, %v3747_v7   ;;  %v3751_v20 = vmul.f32 %v10708_v42, %v2118_v19  ;;  %v2117_v7 = vmul.f32 0.0625, %v15108_v33  ;;  %v15115_v19 = vld [vmem:[#allocation144_spill] sm:$0xff] }
 0x5d0   :  { %v2122_v33 = vmul.f32 0.0625, %v15115_v19  ;;  %v15120_v19 = vld [vmem:[#allocation147_spill] sm:$0xff] }
 0x5d2   :  { %v11210_v18 = vpop.permute.xlu1 %4645  ;;  %4831 = vperm.xlu1 %8479, %v3746_v46   ;;  %v11212_v26 = vpop.permute.xlu0 %4654  ;;  %v3750_v46 = vmul.f32 %v10694_v23, %v2117_v7 }
 0x5d3   :  { %15105 = vst [vmem:[#allocation130_spill] sm:$0xff] %v11210_v18  ;;  %15106 = vst [vmem:[#allocation131_spill] sm:$0xff] %v11212_v26  ;;  %4840 = vperm.xlu0 %8478, %v3749_v63   ;;  %v3753_v26 = vmul.f32 %v10716_v3, %v2120_v57  ;;  %v2119_v63 = vmul.f32 0.0625, %v15112_v62  ;;  %v15119_v57 = vld [vmem:[#allocation146_spill] sm:$0xff] }
 0x5d4   :  { %v2124_v62 = vmul.f32 0.0625, %v15119_v57  ;;  %v15124_v57 = vld [vmem:[#allocation149_spill] sm:$0xff] }
 0x5d6   :  { %v11218_v24 = vpop.permute.xlu1 %4651  ;;  %4837 = vperm.xlu1 %8479, %v3748_v28   ;;  %v11220_v13 = vpop.permute.xlu0 %4660  ;;  %v3752_v28 = vmul.f32 %v10702_v30, %v2119_v63 }
 0x5d7   :  { %15109 = vst [vmem:[#allocation132_spill] sm:$0xff] %v11218_v24  ;;  %15110 = vst [vmem:[#allocation133_spill] sm:$0xff] %v11220_v13  ;;  %4846 = vperm.xlu0 %8478, %v3751_v20   ;;  %v3755_v13 = vmul.f32 %v10724_v48, %v2122_v33  ;;  %v2121_v20 = vmul.f32 0.0625, %v15116_v53  ;;  %v15123_v33 = vld [vmem:[#allocation148_spill] sm:$0xff] }
 0x5d8   :  { %v2126_v53 = vmul.f32 0.0625, %v15123_v33  ;;  %v15129_v33 = vld [vmem:[#allocation151_spill] sm:$0xff] }
 0x5da   :  { %v11226_v18 = vpop.permute.xlu1 %4657  ;;  %4843 = vperm.xlu1 %8479, %v3750_v46   ;;  %v11228_v27 = vpop.permute.xlu0 %4666  ;;  %v3754_v46 = vmul.f32 %v10710_v49, %v2121_v20  ;;  %v15511_v49 = vld [vmem:[#allocation287_spill] sm:$0xff] }
 0x5db   :  { %15113 = vst [vmem:[#allocation134_spill] sm:$0xff] %v11226_v18  ;;  %15114 = vst [vmem:[#allocation135_spill] sm:$0xff] %v11228_v27  ;;  %4852 = vperm.xlu0 %8478, %v3753_v26   ;;  %v3757_v27 = vmul.f32 %v10732_v31, %v2124_v62  ;;  %v2123_v26 = vmul.f32 0.0625, %v15120_v19  ;;  %v15127_v62 = vld [vmem:[#allocation150_spill] sm:$0xff] }
 0x5dc   :  { %v2128_v19 = vmul.f32 0.0625, %v15127_v62  ;;  %v15135_v62 = vld [vmem:[#allocation153_spill] sm:$0xff] }
 0x5de   :  { %v11234_v24 = vpop.permute.xlu1 %4663  ;;  %4849 = vperm.xlu1 %8479, %v3752_v28   ;;  %v11236_v7 = vpop.permute.xlu0 %4672  ;;  %v3756_v28 = vmul.f32 %v10718_v5, %v2123_v26  ;;  %v15502_v5 = vld [vmem:[#allocation280_spill] sm:$0xff] }
 0x5df   :  { %15117 = vst [vmem:[#allocation136_spill] sm:$0xff] %v11234_v24  ;;  %15118 = vst [vmem:[#allocation137_spill] sm:$0xff] %v11236_v7  ;;  %4858 = vperm.xlu0 %8478, %v3755_v13   ;;  %v3759_v7 = vmul.f32 %v10740_v56, %v2126_v53  ;;  %v2125_v13 = vmul.f32 0.0625, %v15124_v57  ;;  %v15132_v53 = vld [vmem:[#allocation152_spill] sm:$0xff] }
 0x5e0   :  { %v2130_v57 = vmul.f32 0.0625, %v15132_v53  ;;  %v15141_v53 = vld [vmem:[#allocation155_spill] sm:$0xff] }
 0x5e2   :  { %v11242_v18 = vpop.permute.xlu1 %4669  ;;  %4855 = vperm.xlu1 %8479, %v3754_v46   ;;  %v11244_v63 = vpop.permute.xlu0 %4678  ;;  %v15128_v46 = vld [vmem:[#allocation17_spill] sm:$0xff] }
 0x5e3   :  { %15121 = vst [vmem:[#allocation138_spill] sm:$0xff] %v11242_v18  ;;  %15122 = vst [vmem:[#allocation139_spill] sm:$0xff] %v11244_v63  ;;  %4864 = vperm.xlu0 %8478, %v3757_v27   ;;  %v3758_v18 = vmul.f32 %v15128_v46, %v2125_v13  ;;  %v3761_v63 = vmul.f32 %v10748_v45, %v2128_v19  ;;  %v2127_v27 = vmul.f32 0.0625, %v15129_v33  ;;  %v15138_v19 = vld [vmem:[#allocation154_spill] sm:$0xff] }
 0x5e4   :  { %v2132_v33 = vmul.f32 0.0625, %v15138_v19  ;;  %v15145_v19 = vld [vmem:[#allocation23_spill] sm:$0xff] }
 0x5e6   :  { %v11250_v24 = vpop.permute.xlu1 %4675  ;;  %4861 = vperm.xlu1 %8479, %v3756_v28   ;;  %v11252_v20 = vpop.permute.xlu0 %4684  ;;  %v15133_v28 = vld [vmem:[#allocation19_spill] sm:$0xff] }
 0x5e7   :  { %15125 = vst [vmem:[#allocation140_spill] sm:$0xff] %v11250_v24  ;;  %15126 = vst [vmem:[#allocation141_spill] sm:$0xff] %v11252_v20  ;;  %4870 = vperm.xlu0 %8478, %v3759_v7   ;;  %v3760_v24 = vmul.f32 %v15133_v28, %v2127_v27  ;;  %v15134_v20 = vld [vmem:[#allocation24_spill] sm:$0xff]  ;;  %v2129_v7 = vmul.f32 0.0625, %v15135_v62 }
 0x5e8   :  { %v3763_v56 = vmul.f32 %v15134_v20, %v2130_v57  ;;  %v15144_v57 = vld [vmem:[#allocation156_spill] sm:$0xff] }
 0x5e9   :  { %v2134_v62 = vmul.f32 0.0625, %v15144_v57  ;;  %v15147_v57 = vld [vmem:[#allocation157_spill] sm:$0xff] }
 0x5ea   :  { %v11258_v31 = vpop.permute.xlu1 %4681  ;;  %4867 = vperm.xlu1 %8479, %v3758_v18   ;;  %v11260_v26 = vpop.permute.xlu0 %4690  ;;  %v15139_v18 = vld [vmem:[#allocation21_spill] sm:$0xff] }
 0x5eb   :  { %15130 = vst [vmem:[#allocation142_spill] sm:$0xff] %v11258_v31  ;;  %15131 = vst [vmem:[#allocation143_spill] sm:$0xff] %v11260_v26  ;;  %4876 = vperm.xlu0 %8478, %v3761_v63   ;;  %v3762_v31 = vmul.f32 %v15139_v18, %v2129_v7  ;;  %v15140_v26 = vld [vmem:[#allocation26_spill] sm:$0xff]  ;;  %v2131_v63 = vmul.f32 0.0625, %v15141_v53  ;;  %v2348_v7 = vld [vmem:[%s14010_s2 + $0x40] sm:$0xff] }
 0x5ec   :  { %v3765_v45 = vmul.f32 %v15140_v26, %v2132_v33  ;;  %v15146_v33 = vld [vmem:[#allocation28_spill] sm:$0xff]  ;;  %v15165_v26 = vld [vmem:[#allocation163_spill] sm:$0xff] }
 0x5ed   :  { %v3767_v53 = vmul.f32 %v15146_v33, %v2134_v62  ;;  %v2345_v62 = vld [vmem:[%s14010_s2 + $0x28] sm:$0xff] }
 0x5ee   :  { %v11266_v48 = vpop.permute.xlu1 %4687  ;;  %4873 = vperm.xlu1 %8479, %v3760_v24   ;;  %v11268_v13 = vpop.permute.xlu0 %4696  ;;  %v2349_v24 = vld [vmem:[%s14010_s2 + $0x48] sm:$0xff] }
 0x5ef   :  { %15136 = vst [vmem:[#allocation144_spill] sm:$0xff] %v11266_v48  ;;  %15137 = vst [vmem:[#allocation145_spill] sm:$0xff] %v11268_v13  ;;  %4882 = vperm.xlu0 %8478, %v3763_v56   ;;  %v3764_v56 = vmul.f32 %v15145_v19, %v2131_v63  ;;  %2388 = vmatprep.subr.mxu0 %v2349_v24  ;;  %v2346_v63 = vld [vmem:[%s14010_s2 + $0x30] sm:$0xff]  ;;  %v15150_v24 = vld [vmem:[#allocation158_spill] sm:$0xff] }
 0x5f0   :  { %2389 = vmatpush1.msra.mxu0 %v2348_v7  ;;  %v2136_v13 = vmul.f32 0.0625, %v15150_v24  ;;  %v15151_v7 = vld [vmem:[#allocation25_spill] sm:$0xff]  ;;  %v2343_v24 = vld [vmem:[%s14010_s2 + $0x18] sm:$0xff] }
 0x5f2   :  { %v11274_v46 = vpop.permute.xlu1 %4693  ;;  %4879 = vperm.xlu1 %8479, %v3762_v31   ;;  %v11276_v27 = vpop.permute.xlu0 %4702  ;;  %v2347_v31 = vld [vmem:[%s14010_s2 + $0x38] sm:$0xff] }
 0x5f3   :  { %15142 = vst [vmem:[#allocation146_spill] sm:$0xff] %v11274_v46  ;;  %15143 = vst [vmem:[#allocation147_spill] sm:$0xff] %v11276_v27  ;;  %4888 = vperm.xlu0 %8478, %v3765_v45   ;;  %v2133_v45 = vmul.f32 0.0625, %v15147_v57  ;;  %2390 = vmatprep.subr.mxu0 %v2347_v31  ;;  %v15152_v31 = vld [vmem:[#allocation30_spill] sm:$0xff] }
 0x5f4   :  { %2391 = vmatpush1.msra.mxu0 %v2346_v63 }
 0x5f5   :  { %v3766_v57 = vmul.f32 %v15151_v7, %v2133_v45  ;;  %2392 = vmatprep.subr.mxu0 %v2345_v62  ;;  %v2342_v45 = vld [vmem:[%s14010_s2 + $0x10] sm:$0xff]  ;;  %v15156_v62 = vld [vmem:[#allocation160_spill] sm:$0xff]  ;;  %v2139_v7 = vmul.f32 0.0625, %v15165_v26  ;;  %v15174_v26 = vld [vmem:[#allocation166_spill] sm:$0xff] }
 0x5f6   :  { %v11291_v48 = vpop.permute.xlu1 %4699  ;;  %4885 = vperm.xlu1 %8479, %v3764_v56   ;;  %v11293_v27 = vpop.permute.xlu0 %4708  ;;  %v2344_v56 = vld [vmem:[%s14010_s2 + $0x20] sm:$0xff]  ;;  %v2138_v33 = vmul.f32 0.0625, %v15156_v62 }
 0x5f7   :  { %15148 = vst [vmem:[#allocation148_spill] sm:$0xff] %v11291_v48  ;;  %15149 = vst [vmem:[#allocation149_spill] sm:$0xff] %v11293_v27  ;;  %4894 = vperm.xlu0 %8478, %v3767_v53   ;;  %v3769_v27 = vmul.f32 %v15152_v31, %v2136_v13  ;;  %2393 = vmatpush1.msra.mxu0 %v2344_v56  ;;  %v15153_v53 = vld [vmem:[#allocation159_spill] sm:$0xff]  ;;  %v2341_v13 = vld [vmem:[%s14010_s2 + $0x8] sm:$0xff] }
 0x5f8   :  { %v2135_v63 = vmul.f32 0.0625, %v15153_v53  ;;  %2394 = vmatprep.subr.mxu0 %v2343_v24  ;;  %v15157_v56 = vld [vmem:[#allocation27_spill] sm:$0xff]  ;;  %v15158_v24 = vld [vmem:[#allocation32_spill] sm:$0xff] }
 0x5f9   :  { %2395 = vmatpush1.msra.mxu0 %v2342_v45  ;;  %v15159_v45 = vld [vmem:[#allocation161_spill] sm:$0xff] }
 0x5fa   :  { %v11311_v48 = vpop.permute.xlu1 %4705  ;;  %4891 = vperm.xlu1 %8479, %v3766_v57   ;;  %v11313_v46 = vpop.permute.xlu0 %4714  ;;  %v3768_v53 = vmul.f32 %v15157_v56, %v2135_v63  ;;  %2396 = vmatprep.subr.mxu0 %v2341_v13  ;;  %v2340_v57 = vld [vmem:[%s14010_s2] sm:$0xff]  ;;  %v2137_v62 = vmul.f32 0.0625, %v15159_v45  ;;  %v15162_v13 = vld [vmem:[#allocation162_spill] sm:$0xff]  ;;  %v15168_v45 = vld [vmem:[#allocation164_spill] sm:$0xff] }
 0x5fb   :  { %15154 = vst [vmem:[#allocation150_spill] sm:$0xff] %v11311_v48  ;;  %15155 = vst [vmem:[#allocation151_spill] sm:$0xff] %v11313_v46  ;;  %4900 = vperm.xlu0 %8478, %v3769_v27   ;;  %v3771_v46 = vmul.f32 %v15158_v24, %v2138_v33  ;;  %2397 = vmatpush1.msra.mxu0 %v2340_v57  ;;  %v8481_v48 = vmov 0.0   ;;  %v2339_v27 = vld [vmem:[%s14011_s1] sm:$0x3]  ;;  %v2140_v56 = vmul.f32 0.0625, %v15162_v13 }
 0x5fc   :  { %2430 = vmatprep.mubr.f32.mxu0 %v8481_v48  ;;  %v15163_v33 = vld [vmem:[#allocation29_spill] sm:$0xff]  ;;  %v15164_v24 = vld [vmem:[#allocation34_spill] sm:$0xff] }
 0x5fd   :  { %7516 = vmatmul.mubr.msk.f32.vlgmr.msra.gmra.mxu0 %vm2362_vm1, %v2339_v27  ;;  %v3770_v57 = vmul.f32 %v15163_v33, %v2137_v62  ;;  %v3773_v48 = vmul.f32 %v15164_v24, %v2140_v56  ;;  %v15170_v27 = vld [vmem:[#allocation36_spill] sm:$0xff]  ;;  %v15171_v13 = vld [vmem:[#allocation165_spill] sm:$0xff]  ;;  %v2144_v62 = vmul.f32 0.0625, %v15174_v26  ;;  %vm7436_vm1 = vcmask 1041409  }
 0x5fe   :  { %v11331_v31 = vpop.permute.xlu1 %4711  ;;  %4897 = vperm.xlu1 %8479, %v3768_v53   ;;  %v11333_v63 = vpop.permute.xlu0 %4720  ;;  %v15169_v53 = vld [vmem:[#allocation31_spill] sm:$0xff]  ;;  %v15182_v26 = vld [vmem:[#allocation169_spill] sm:$0xff] }
 0x5ff   :  { %15160 = vst [vmem:[#allocation152_spill] sm:$0xff] %v11331_v31  ;;  %15161 = vst [vmem:[#allocation153_spill] sm:$0xff] %v11333_v63  ;;  %4906 = vperm.xlu0 %8478, %v3771_v46   ;;  %v2142_v31 = vmul.f32 0.0625, %v15168_v45  ;;  %v3772_v63 = vmul.f32 %v15169_v53, %v2139_v7  ;;  %v2141_v46 = vmul.f32 0.0625, %v15171_v13  ;;  %v15176_v45 = vld [vmem:[#allocation167_spill] sm:$0xff] }
 0x601   :  { %v3775_v18 = vmul.f32 %v15170_v27, %v2142_v31  ;;  %v15179_v31 = vld [vmem:[#allocation168_spill] sm:$0xff] }
 0x602   :  { %v11339_v20 = vpop.permute.xlu1 %4717  ;;  %4903 = vperm.xlu1 %8479, %v3770_v57   ;;  %v11341_v19 = vpop.permute.xlu0 %4726  ;;  %v15175_v57 = vld [vmem:[#allocation33_spill] sm:$0xff]  ;;  %v2146_v13 = vmul.f32 0.0625, %v15179_v31  ;;  %v15188_v31 = vld [vmem:[#allocation171_spill] sm:$0xff] }
 0x603   :  { %15166 = vst [vmem:[#allocation154_spill] sm:$0xff] %v11339_v20  ;;  %15167 = vst [vmem:[#allocation155_spill] sm:$0xff] %v11341_v19  ;;  %4912 = vperm.xlu0 %8478, %v3773_v48   ;;  %v3774_v20 = vmul.f32 %v15175_v57, %v2141_v46  ;;  %v3777_v19 = vmul.f32 %v10812_v55, %v2144_v62  ;;  %v2143_v48 = vmul.f32 0.0625, %v15176_v45  ;;  %v15185_v62 = vld [vmem:[#allocation170_spill] sm:$0xff] }
 0x604   :  { %v2148_v45 = vmul.f32 0.0625, %v15185_v62  ;;  %v15194_v62 = vld [vmem:[#allocation173_spill] sm:$0xff] }
 0x606   :  { %v11347_v28 = vpop.permute.xlu1 %4723  ;;  %4909 = vperm.xlu1 %8479, %v3772_v63   ;;  %v11349_v56 = vpop.permute.xlu0 %4732  ;;  %v15180_v63 = vld [vmem:[#allocation35_spill] sm:$0xff] }
 0x607   :  { %15172 = vst [vmem:[#allocation156_spill] sm:$0xff] %v11347_v28  ;;  %15173 = vst [vmem:[#allocation157_spill] sm:$0xff] %v11349_v56  ;;  %4918 = vperm.xlu0 %8478, %v3775_v18   ;;  %v3776_v28 = vmul.f32 %v15180_v63, %v2143_v48  ;;  %v15181_v56 = vld [vmem:[#allocation39_spill] sm:$0xff]  ;;  %v2145_v18 = vmul.f32 0.0625, %v15182_v26 }
 0x608   :  { %v3779_v27 = vmul.f32 %v15181_v56, %v2146_v13  ;;  %v15191_v13 = vld [vmem:[#allocation172_spill] sm:$0xff] }
 0x609   :  { %v2150_v26 = vmul.f32 0.0625, %v15191_v13  ;;  %v15200_v13 = vld [vmem:[#allocation175_spill] sm:$0xff] }
 0x60a   :  { %v11355_v24 = vpop.permute.xlu1 %4729  ;;  %4915 = vperm.xlu1 %8479, %v3774_v20   ;;  %v11357_v7 = vpop.permute.xlu0 %4738  ;;  %v15186_v20 = vld [vmem:[#allocation37_spill] sm:$0xff] }
 0x60b   :  { %15177 = vst [vmem:[#allocation158_spill] sm:$0xff] %v11355_v24  ;;  %15178 = vst [vmem:[#allocation159_spill] sm:$0xff] %v11357_v7  ;;  %4924 = vperm.xlu0 %8478, %v3777_v19   ;;  %v3778_v24 = vmul.f32 %v15186_v20, %v2145_v18  ;;  %v15187_v7 = vld [vmem:[#allocation365_spill] sm:$0xff]  ;;  %v2147_v19 = vmul.f32 0.0625, %v15188_v31  ;;  %v15197_v18 = vld [vmem:[#allocation174_spill] sm:$0xff] }
 0x60c   :  { %v3781_v55 = vmul.f32 %v15187_v7, %v2148_v45  ;;  %v2152_v45 = vmul.f32 0.0625, %v15197_v18  ;;  %v15206_v18 = vld [vmem:[#allocation177_spill] sm:$0xff] }
 0x60e   :  { %v11363_v53 = vpop.permute.xlu1 %4735  ;;  %4921 = vperm.xlu1 %8479, %v3776_v28   ;;  %v11365_v46 = vpop.permute.xlu0 %4744  ;;  %v15192_v28 = vld [vmem:[#allocation366_spill] sm:$0xff] }
 0x60f   :  { %15183 = vst [vmem:[#allocation160_spill] sm:$0xff] %v11363_v53  ;;  %15184 = vst [vmem:[#allocation161_spill] sm:$0xff] %v11365_v46  ;;  %4930 = vperm.xlu0 %8478, %v3779_v27   ;;  %v3780_v56 = vmul.f32 %v15192_v28, %v2147_v19  ;;  %v15193_v46 = vld [vmem:[#allocation369_spill] sm:$0xff]  ;;  %v2149_v27 = vmul.f32 0.0625, %v15194_v62  ;;  %v15203_v19 = vld [vmem:[#allocation176_spill] sm:$0xff] }
 0x610   :  { %v3783_v53 = vmul.f32 %v15193_v46, %v2150_v26  ;;  %v2154_v26 = vmul.f32 0.0625, %v15203_v19  ;;  %v15205_v62 = vld [vmem:[#allocation373_spill] sm:$0xff]  ;;  %v15212_v19 = vld [vmem:[#allocation179_spill] sm:$0xff] }
 0x612   :  { %v11371_v57 = vpop.permute.xlu1 %4741  ;;  %4927 = vperm.xlu1 %8479, %v3778_v24   ;;  %v11373_v48 = vpop.permute.xlu0 %4750  ;;  %v15198_v24 = vld [vmem:[#allocation367_spill] sm:$0xff] }
 0x613   :  { %15189 = vst [vmem:[#allocation162_spill] sm:$0xff] %v11371_v57  ;;  %15190 = vst [vmem:[#allocation163_spill] sm:$0xff] %v11373_v48  ;;  %4936 = vperm.xlu0 %8478, %v3781_v55   ;;  %v3782_v31 = vmul.f32 %v15198_v24, %v2149_v27  ;;  %v15199_v48 = vld [vmem:[#allocation371_spill] sm:$0xff]  ;;  %v2151_v55 = vmul.f32 0.0625, %v15200_v13  ;;  %v15209_v27 = vld [vmem:[#allocation178_spill] sm:$0xff] }
 0x614   :  { %v3785_v57 = vmul.f32 %v15199_v48, %v2152_v45  ;;  %v2156_v45 = vmul.f32 0.0625, %v15209_v27  ;;  %v15210_v24 = vld [vmem:[#allocation370_spill] sm:$0xff]  ;;  %v15211_v13 = vld [vmem:[#allocation375_spill] sm:$0xff]  ;;  %v15218_v27 = vld [vmem:[#allocation181_spill] sm:$0xff] }
 0x616   :  { %v11379_v63 = vpop.permute.xlu1 %4747  ;;  %4933 = vperm.xlu1 %8479, %v3780_v56   ;;  %v11381_v7 = vpop.permute.xlu0 %4756  ;;  %v15204_v56 = vld [vmem:[#allocation368_spill] sm:$0xff] }
 0x617   :  { %15195 = vst [vmem:[#allocation164_spill] sm:$0xff] %v11379_v63  ;;  %15196 = vst [vmem:[#allocation165_spill] sm:$0xff] %v11381_v7  ;;  %4942 = vperm.xlu0 %8478, %v3783_v53   ;;  %v3784_v28 = vmul.f32 %v15204_v56, %v2151_v55  ;;  %v3787_v7 = vmul.f32 %v15205_v62, %v2154_v26  ;;  %v2153_v53 = vmul.f32 0.0625, %v15206_v18  ;;  %v15215_v26 = vld [vmem:[#allocation180_spill] sm:$0xff]  ;;  %v15217_v18 = vld [vmem:[#allocation377_spill] sm:$0xff] }
 0x618   :  { %v2158_v56 = vmul.f32 0.0625, %v15215_v26  ;;  %v15224_v26 = vld [vmem:[#allocation183_spill] sm:$0xff] }
 0x61a   :  { %v11387_v20 = vpop.permute.xlu1 %4753  ;;  %4939 = vperm.xlu1 %8479, %v3782_v31   ;;  %v11389_v46 = vpop.permute.xlu0 %4762  ;;  %v3786_v31 = vmul.f32 %v15210_v24, %v2153_v53 }
 0x61b   :  { %15201 = vst [vmem:[#allocation166_spill] sm:$0xff] %v11387_v20  ;;  %15202 = vst [vmem:[#allocation167_spill] sm:$0xff] %v11389_v46  ;;  %4948 = vperm.xlu0 %8478, %v3785_v57   ;;  %v3789_v46 = vmul.f32 %v15211_v13, %v2156_v45  ;;  %v2155_v57 = vmul.f32 0.0625, %v15212_v19  ;;  %v15221_v45 = vld [vmem:[#allocation182_spill] sm:$0xff]  ;;  %v15223_v19 = vld [vmem:[#allocation379_spill] sm:$0xff] }
 0x61c   :  { %v2160_v24 = vmul.f32 0.0625, %v15221_v45  ;;  %v15230_v45 = vld [vmem:[#allocation185_spill] sm:$0xff] }
 0x61e   :  { %v11395_v63 = vpop.permute.xlu1 %4759  ;;  %4945 = vperm.xlu1 %8479, %v3784_v28   ;;  %v11397_v48 = vpop.permute.xlu0 %4768  ;;  %v15216_v28 = vld [vmem:[#allocation372_spill] sm:$0xff] }
 0x61f   :  { %15207 = vst [vmem:[#allocation168_spill] sm:$0xff] %v11395_v63  ;;  %15208 = vst [vmem:[#allocation169_spill] sm:$0xff] %v11397_v48  ;;  %4954 = vperm.xlu0 %8478, %v3787_v7   ;;  %v3788_v62 = vmul.f32 %v15216_v28, %v2155_v57  ;;  %v3791_v48 = vmul.f32 %v15217_v18, %v2158_v56  ;;  %v2157_v7 = vmul.f32 0.0625, %v15218_v27  ;;  %v15227_v56 = vld [vmem:[#allocation184_spill] sm:$0xff]  ;;  %v15229_v27 = vld [vmem:[#allocation381_spill] sm:$0xff] }
 0x620   :  { %v2162_v28 = vmul.f32 0.0625, %v15227_v56  ;;  %v15236_v56 = vld [vmem:[#allocation187_spill] sm:$0xff] }
 0x622   :  { %v11403_v20 = vpop.permute.xlu1 %4765  ;;  %4951 = vperm.xlu1 %8479, %v3786_v31   ;;  %v11405_v55 = vpop.permute.xlu0 %4774  ;;  %v15222_v31 = vld [vmem:[#allocation374_spill] sm:$0xff] }
 0x623   :  { %15213 = vst [vmem:[#allocation170_spill] sm:$0xff] %v11403_v20  ;;  %15214 = vst [vmem:[#allocation365_spill] sm:$0xff] %v11405_v55  ;;  %4960 = vperm.xlu0 %8478, %v3789_v46   ;;  %v3790_v13 = vmul.f32 %v15222_v31, %v2157_v7  ;;  %v3793_v55 = vmul.f32 %v15223_v19, %v2160_v24  ;;  %v2159_v46 = vmul.f32 0.0625, %v15224_v26  ;;  %v15233_v24 = vld [vmem:[#allocation186_spill] sm:$0xff]  ;;  %v15235_v26 = vld [vmem:[#allocation383_spill] sm:$0xff] }
 0x624   :  { %v2164_v31 = vmul.f32 0.0625, %v15233_v24  ;;  %v15242_v24 = vld [vmem:[#allocation189_spill] sm:$0xff] }
 0x626   :  { %v11411_v63 = vpop.permute.xlu1 %4771  ;;  %4957 = vperm.xlu1 %8479, %v3788_v62   ;;  %v11413_v53 = vpop.permute.xlu0 %4780  ;;  %v15228_v62 = vld [vmem:[#allocation376_spill] sm:$0xff] }
 0x627   :  { %15219 = vst [vmem:[#allocation171_spill] sm:$0xff] %v11411_v63  ;;  %15220 = vst [vmem:[#allocation172_spill] sm:$0xff] %v11413_v53  ;;  %4966 = vperm.xlu0 %8478, %v3791_v48   ;;  %v3792_v18 = vmul.f32 %v15228_v62, %v2159_v46  ;;  %v3795_v53 = vmul.f32 %v15229_v27, %v2162_v28  ;;  %v2161_v48 = vmul.f32 0.0625, %v15230_v45  ;;  %v15239_v28 = vld [vmem:[#allocation188_spill] sm:$0xff]  ;;  %v15241_v45 = vld [vmem:[#allocation385_spill] sm:$0xff] }
 0x628   :  { %v2166_v62 = vmul.f32 0.0625, %v15239_v28  ;;  %v15248_v28 = vld [vmem:[#allocation191_spill] sm:$0xff] }
 0x62a   :  { %v11419_v20 = vpop.permute.xlu1 %4777  ;;  %4963 = vperm.xlu1 %8479, %v3790_v13   ;;  %v11421_v57 = vpop.permute.xlu0 %4786  ;;  %v15234_v13 = vld [vmem:[#allocation378_spill] sm:$0xff] }
 0x62b   :  { %15225 = vst [vmem:[#allocation366_spill] sm:$0xff] %v11419_v20  ;;  %15226 = vst [vmem:[#allocation369_spill] sm:$0xff] %v11421_v57  ;;  %4972 = vperm.xlu0 %8478, %v3793_v55   ;;  %v3794_v19 = vmul.f32 %v15234_v13, %v2161_v48  ;;  %v3797_v57 = vmul.f32 %v15235_v26, %v2164_v31  ;;  %v2163_v55 = vmul.f32 0.0625, %v15236_v56  ;;  %v15245_v31 = vld [vmem:[#allocation190_spill] sm:$0xff]  ;;  %v15247_v56 = vld [vmem:[#allocation387_spill] sm:$0xff] }
 0x62c   :  { %v2168_v13 = vmul.f32 0.0625, %v15245_v31  ;;  %v15254_v31 = vld [vmem:[#allocation193_spill] sm:$0xff] }
 0x62e   :  { %v11427_v63 = vpop.permute.xlu1 %4783  ;;  %4969 = vperm.xlu1 %8479, %v3792_v18   ;;  %v11429_v7 = vpop.permute.xlu0 %4792  ;;  %v15240_v18 = vld [vmem:[#allocation380_spill] sm:$0xff] }
 0x62f   :  { %15231 = vst [vmem:[#allocation173_spill] sm:$0xff] %v11427_v63  ;;  %15232 = vst [vmem:[#allocation174_spill] sm:$0xff] %v11429_v7  ;;  %4978 = vperm.xlu0 %8478, %v3795_v53   ;;  %v3796_v27 = vmul.f32 %v15240_v18, %v2163_v55  ;;  %v3799_v7 = vmul.f32 %v15241_v45, %v2166_v62  ;;  %v2165_v53 = vmul.f32 0.0625, %v15242_v24  ;;  %v15251_v62 = vld [vmem:[#allocation192_spill] sm:$0xff]  ;;  %v15253_v24 = vld [vmem:[#allocation389_spill] sm:$0xff] }
 0x630   :  { %v2170_v18 = vmul.f32 0.0625, %v15251_v62  ;;  %v15260_v62 = vld [vmem:[#allocation195_spill] sm:$0xff] }
 0x632   :  { %v11435_v20 = vpop.permute.xlu1 %4789  ;;  %4975 = vperm.xlu1 %8479, %v3794_v19   ;;  %v11437_v46 = vpop.permute.xlu0 %4798  ;;  %v15246_v19 = vld [vmem:[#allocation382_spill] sm:$0xff] }
 0x633   :  { %15237 = vst [vmem:[#allocation367_spill] sm:$0xff] %v11435_v20  ;;  %15238 = vst [vmem:[#allocation371_spill] sm:$0xff] %v11437_v46  ;;  %4984 = vperm.xlu0 %8478, %v3797_v57   ;;  %v3798_v26 = vmul.f32 %v15246_v19, %v2165_v53  ;;  %v3801_v46 = vmul.f32 %v15247_v56, %v2168_v13  ;;  %v2167_v57 = vmul.f32 0.0625, %v15248_v28  ;;  %v15257_v13 = vld [vmem:[#allocation194_spill] sm:$0xff]  ;;  %v15259_v28 = vld [vmem:[#allocation391_spill] sm:$0xff] }
 0x634   :  { %v2172_v19 = vmul.f32 0.0625, %v15257_v13  ;;  %v15266_v13 = vld [vmem:[#allocation197_spill] sm:$0xff] }
 0x636   :  { %v11443_v63 = vpop.permute.xlu1 %4795  ;;  %4981 = vperm.xlu1 %8479, %v3796_v27   ;;  %v11445_v48 = vpop.permute.xlu0 %4804  ;;  %v15252_v27 = vld [vmem:[#allocation384_spill] sm:$0xff] }
 0x637   :  { %15243 = vst [vmem:[#allocation175_spill] sm:$0xff] %v11443_v63  ;;  %15244 = vst [vmem:[#allocation176_spill] sm:$0xff] %v11445_v48  ;;  %4990 = vperm.xlu0 %8478, %v3799_v7   ;;  %v3800_v45 = vmul.f32 %v15252_v27, %v2167_v57  ;;  %v3803_v48 = vmul.f32 %v15253_v24, %v2170_v18  ;;  %v2169_v7 = vmul.f32 0.0625, %v15254_v31  ;;  %v15263_v18 = vld [vmem:[#allocation196_spill] sm:$0xff]  ;;  %v15265_v31 = vld [vmem:[#allocation393_spill] sm:$0xff] }
 0x638   :  { %v2174_v27 = vmul.f32 0.0625, %v15263_v18  ;;  %v15272_v18 = vld [vmem:[#allocation199_spill] sm:$0xff] }
 0x63a   :  { %v11451_v20 = vpop.permute.xlu1 %4801  ;;  %4987 = vperm.xlu1 %8479, %v3798_v26   ;;  %v11453_v55 = vpop.permute.xlu0 %4810  ;;  %v15258_v26 = vld [vmem:[#allocation386_spill] sm:$0xff] }
 0x63b   :  { %15249 = vst [vmem:[#allocation368_spill] sm:$0xff] %v11451_v20  ;;  %15250 = vst [vmem:[#allocation373_spill] sm:$0xff] %v11453_v55  ;;  %4996 = vperm.xlu0 %8478, %v3801_v46   ;;  %v3802_v56 = vmul.f32 %v15258_v26, %v2169_v7  ;;  %v3805_v55 = vmul.f32 %v15259_v28, %v2172_v19  ;;  %v2171_v46 = vmul.f32 0.0625, %v15260_v62  ;;  %v15269_v19 = vld [vmem:[#allocation198_spill] sm:$0xff]  ;;  %v15271_v62 = vld [vmem:[#allocation395_spill] sm:$0xff] }
 0x63c   :  { %v2176_v26 = vmul.f32 0.0625, %v15269_v19  ;;  %v15278_v19 = vld [vmem:[#allocation201_spill] sm:$0xff] }
 0x63e   :  { %v11459_v63 = vpop.permute.xlu1 %4807  ;;  %4993 = vperm.xlu1 %8479, %v3800_v45   ;;  %v11461_v53 = vpop.permute.xlu0 %4816  ;;  %v15264_v45 = vld [vmem:[#allocation388_spill] sm:$0xff] }
 0x63f   :  { %15255 = vst [vmem:[#allocation177_spill] sm:$0xff] %v11459_v63  ;;  %15256 = vst [vmem:[#allocation178_spill] sm:$0xff] %v11461_v53  ;;  %5002 = vperm.xlu0 %8478, %v3803_v48   ;;  %v3804_v24 = vmul.f32 %v15264_v45, %v2171_v46  ;;  %v3807_v53 = vmul.f32 %v15265_v31, %v2174_v27  ;;  %v2173_v48 = vmul.f32 0.0625, %v15266_v13  ;;  %v15275_v27 = vld [vmem:[#allocation200_spill] sm:$0xff]  ;;  %v15277_v13 = vld [vmem:[#allocation397_spill] sm:$0xff] }
 0x640   :  { %v2178_v45 = vmul.f32 0.0625, %v15275_v27  ;;  %v15284_v27 = vld [vmem:[#allocation203_spill] sm:$0xff] }
 0x642   :  { %v11467_v20 = vpop.permute.xlu1 %4813  ;;  %4999 = vperm.xlu1 %8479, %v3802_v56   ;;  %v11469_v57 = vpop.permute.xlu0 %4822  ;;  %v15270_v56 = vld [vmem:[#allocation390_spill] sm:$0xff] }
 0x643   :  { %15261 = vst [vmem:[#allocation370_spill] sm:$0xff] %v11467_v20  ;;  %15262 = vst [vmem:[#allocation375_spill] sm:$0xff] %v11469_v57  ;;  %5008 = vperm.xlu0 %8478, %v3805_v55   ;;  %v3806_v28 = vmul.f32 %v15270_v56, %v2173_v48  ;;  %v3809_v57 = vmul.f32 %v15271_v62, %v2176_v26  ;;  %v2175_v55 = vmul.f32 0.0625, %v15272_v18  ;;  %v15281_v26 = vld [vmem:[#allocation202_spill] sm:$0xff]  ;;  %v15283_v18 = vld [vmem:[#allocation399_spill] sm:$0xff] }
 0x644   :  { %v2180_v56 = vmul.f32 0.0625, %v15281_v26  ;;  %v15290_v26 = vld [vmem:[#allocation205_spill] sm:$0xff] }
 0x646   :  { %v11475_v63 = vpop.permute.xlu1 %4819  ;;  %5005 = vperm.xlu1 %8479, %v3804_v24   ;;  %v11477_v7 = vpop.permute.xlu0 %4828  ;;  %v15276_v24 = vld [vmem:[#allocation392_spill] sm:$0xff] }
 0x647   :  { %15267 = vst [vmem:[#allocation179_spill] sm:$0xff] %v11475_v63  ;;  %15268 = vst [vmem:[#allocation180_spill] sm:$0xff] %v11477_v7  ;;  %5014 = vperm.xlu0 %8478, %v3807_v53   ;;  %v3808_v31 = vmul.f32 %v15276_v24, %v2175_v55  ;;  %v3811_v7 = vmul.f32 %v15277_v13, %v2178_v45  ;;  %v2177_v53 = vmul.f32 0.0625, %v15278_v19  ;;  %v15287_v45 = vld [vmem:[#allocation204_spill] sm:$0xff]  ;;  %v15289_v19 = vld [vmem:[#allocation401_spill] sm:$0xff] }
 0x648   :  { %v2182_v24 = vmul.f32 0.0625, %v15287_v45  ;;  %v15296_v45 = vld [vmem:[#allocation207_spill] sm:$0xff] }
 0x64a   :  { %v11483_v20 = vpop.permute.xlu1 %4825  ;;  %5011 = vperm.xlu1 %8479, %v3806_v28   ;;  %v11485_v46 = vpop.permute.xlu0 %4834  ;;  %v15282_v28 = vld [vmem:[#allocation394_spill] sm:$0xff] }
 0x64b   :  { %15273 = vst [vmem:[#allocation372_spill] sm:$0xff] %v11483_v20  ;;  %15274 = vst [vmem:[#allocation377_spill] sm:$0xff] %v11485_v46  ;;  %5020 = vperm.xlu0 %8478, %v3809_v57   ;;  %v3810_v62 = vmul.f32 %v15282_v28, %v2177_v53  ;;  %v3813_v46 = vmul.f32 %v15283_v18, %v2180_v56  ;;  %v2179_v57 = vmul.f32 0.0625, %v15284_v27  ;;  %v15293_v56 = vld [vmem:[#allocation206_spill] sm:$0xff]  ;;  %v15295_v27 = vld [vmem:[#allocation403_spill] sm:$0xff] }
 0x64c   :  { %v2184_v28 = vmul.f32 0.0625, %v15293_v56  ;;  %v15302_v56 = vld [vmem:[#allocation209_spill] sm:$0xff] }
 0x64e   :  { %v11491_v63 = vpop.permute.xlu1 %4831  ;;  %5017 = vperm.xlu1 %8479, %v3808_v31   ;;  %v11493_v48 = vpop.permute.xlu0 %4840  ;;  %v15288_v31 = vld [vmem:[#allocation396_spill] sm:$0xff] }
 0x64f   :  { %15279 = vst [vmem:[#allocation181_spill] sm:$0xff] %v11491_v63  ;;  %15280 = vst [vmem:[#allocation182_spill] sm:$0xff] %v11493_v48  ;;  %5026 = vperm.xlu0 %8478, %v3811_v7   ;;  %v3812_v13 = vmul.f32 %v15288_v31, %v2179_v57  ;;  %v3815_v63 = vmul.f32 %v15289_v19, %v2182_v24  ;;  %v2181_v7 = vmul.f32 0.0625, %v15290_v26  ;;  %v15299_v24 = vld [vmem:[#allocation208_spill] sm:$0xff]  ;;  %v15301_v26 = vld [vmem:[#allocation405_spill] sm:$0xff] }
 0x650   :  { %v2186_v31 = vmul.f32 0.0625, %v15299_v24  ;;  %v15308_v24 = vld [vmem:[#allocation211_spill] sm:$0xff] }
 0x652   :  { %v11499_v20 = vpop.permute.xlu1 %4837  ;;  %5023 = vperm.xlu1 %8479, %v3810_v62   ;;  %v11501_v55 = vpop.permute.xlu0 %4846  ;;  %v15294_v62 = vld [vmem:[#allocation398_spill] sm:$0xff] }
 0x653   :  { %15285 = vst [vmem:[#allocation374_spill] sm:$0xff] %v11499_v20  ;;  %15286 = vst [vmem:[#allocation379_spill] sm:$0xff] %v11501_v55  ;;  %5032 = vperm.xlu0 %8478, %v3813_v46   ;;  %v3814_v18 = vmul.f32 %v15294_v62, %v2181_v7  ;;  %v3817_v55 = vmul.f32 %v15295_v27, %v2184_v28  ;;  %v2183_v46 = vmul.f32 0.0625, %v15296_v45  ;;  %v15305_v28 = vld [vmem:[#allocation210_spill] sm:$0xff]  ;;  %v15307_v45 = vld [vmem:[#allocation407_spill] sm:$0xff] }
 0x654   :  { %v2188_v62 = vmul.f32 0.0625, %v15305_v28  ;;  %v15314_v28 = vld [vmem:[#allocation213_spill] sm:$0xff] }
 0x656   :  { %v11507_v48 = vpop.permute.xlu1 %4843  ;;  %5029 = vperm.xlu1 %8479, %v3812_v13   ;;  %v11509_v53 = vpop.permute.xlu0 %4852  ;;  %v15300_v13 = vld [vmem:[#allocation400_spill] sm:$0xff] }
 0x657   :  { %15291 = vst [vmem:[#allocation183_spill] sm:$0xff] %v11507_v48  ;;  %15292 = vst [vmem:[#allocation184_spill] sm:$0xff] %v11509_v53  ;;  %5038 = vperm.xlu0 %8478, %v3815_v63   ;;  %v3816_v19 = vmul.f32 %v15300_v13, %v2183_v46  ;;  %v3819_v53 = vmul.f32 %v15301_v26, %v2186_v31  ;;  %v2185_v63 = vmul.f32 0.0625, %v15302_v56  ;;  %v15311_v31 = vld [vmem:[#allocation212_spill] sm:$0xff]  ;;  %v15313_v56 = vld [vmem:[#allocation409_spill] sm:$0xff] }
 0x658   :  { %v2190_v13 = vmul.f32 0.0625, %v15311_v31  ;;  %v15320_v31 = vld [vmem:[#allocation215_spill] sm:$0xff] }
 0x65a   :  { %v11515_v20 = vpop.permute.xlu1 %4849  ;;  %5035 = vperm.xlu1 %8479, %v3814_v18   ;;  %v11517_v57 = vpop.permute.xlu0 %4858  ;;  %v15306_v18 = vld [vmem:[#allocation402_spill] sm:$0xff] }
 0x65b   :  { %15297 = vst [vmem:[#allocation376_spill] sm:$0xff] %v11515_v20  ;;  %15298 = vst [vmem:[#allocation381_spill] sm:$0xff] %v11517_v57  ;;  %5044 = vperm.xlu0 %8478, %v3817_v55   ;;  %v3818_v27 = vmul.f32 %v15306_v18, %v2185_v63  ;;  %v3821_v57 = vmul.f32 %v15307_v45, %v2188_v62  ;;  %v2187_v55 = vmul.f32 0.0625, %v15308_v24  ;;  %v15317_v62 = vld [vmem:[#allocation214_spill] sm:$0xff]  ;;  %v15319_v24 = vld [vmem:[#allocation411_spill] sm:$0xff] }
 0x65c   :  { %v2192_v18 = vmul.f32 0.0625, %v15317_v62  ;;  %v15326_v62 = vld [vmem:[#allocation217_spill] sm:$0xff] }
 0x65e   :  { %v11523_v48 = vpop.permute.xlu1 %4855  ;;  %5041 = vperm.xlu1 %8479, %v3816_v19   ;;  %v11525_v7 = vpop.permute.xlu0 %4864  ;;  %v15312_v19 = vld [vmem:[#allocation404_spill] sm:$0xff] }
 0x65f   :  { %15303 = vst [vmem:[#allocation185_spill] sm:$0xff] %v11523_v48  ;;  %15304 = vst [vmem:[#allocation186_spill] sm:$0xff] %v11525_v7  ;;  %5050 = vperm.xlu0 %8478, %v3819_v53   ;;  %v3820_v26 = vmul.f32 %v15312_v19, %v2187_v55  ;;  %v3823_v7 = vmul.f32 %v15313_v56, %v2190_v13  ;;  %v2189_v53 = vmul.f32 0.0625, %v15314_v28  ;;  %v15323_v13 = vld [vmem:[#allocation216_spill] sm:$0xff]  ;;  %v15325_v28 = vld [vmem:[#allocation413_spill] sm:$0xff] }
 0x660   :  { %v2194_v19 = vmul.f32 0.0625, %v15323_v13  ;;  %v15332_v13 = vld [vmem:[#allocation219_spill] sm:$0xff] }
 0x662   :  { %v11531_v20 = vpop.permute.xlu1 %4861  ;;  %5047 = vperm.xlu1 %8479, %v3818_v27   ;;  %v11533_v46 = vpop.permute.xlu0 %4870  ;;  %v15318_v27 = vld [vmem:[#allocation406_spill] sm:$0xff] }
 0x663   :  { %15309 = vst [vmem:[#allocation378_spill] sm:$0xff] %v11531_v20  ;;  %15310 = vst [vmem:[#allocation383_spill] sm:$0xff] %v11533_v46  ;;  %5056 = vperm.xlu0 %8478, %v3821_v57   ;;  %v3822_v45 = vmul.f32 %v15318_v27, %v2189_v53  ;;  %v3825_v46 = vmul.f32 %v15319_v24, %v2192_v18  ;;  %v2191_v57 = vmul.f32 0.0625, %v15320_v31  ;;  %v15329_v18 = vld [vmem:[#allocation218_spill] sm:$0xff]  ;;  %v15331_v31 = vld [vmem:[#allocation415_spill] sm:$0xff] }
 0x664   :  { %v2196_v27 = vmul.f32 0.0625, %v15329_v18  ;;  %v15338_v18 = vld [vmem:[#allocation221_spill] sm:$0xff] }
 0x666   :  { %v11539_v48 = vpop.permute.xlu1 %4867  ;;  %5053 = vperm.xlu1 %8479, %v3820_v26   ;;  %v11541_v63 = vpop.permute.xlu0 %4876  ;;  %v15324_v26 = vld [vmem:[#allocation408_spill] sm:$0xff] }
 0x667   :  { %15315 = vst [vmem:[#allocation187_spill] sm:$0xff] %v11539_v48  ;;  %15316 = vst [vmem:[#allocation188_spill] sm:$0xff] %v11541_v63  ;;  %5062 = vperm.xlu0 %8478, %v3823_v7   ;;  %v3824_v56 = vmul.f32 %v15324_v26, %v2191_v57  ;;  %v3827_v63 = vmul.f32 %v15325_v28, %v2194_v19  ;;  %v2193_v7 = vmul.f32 0.0625, %v15326_v62  ;;  %v15335_v19 = vld [vmem:[#allocation220_spill] sm:$0xff]  ;;  %v15337_v62 = vld [vmem:[#allocation417_spill] sm:$0xff] }
 0x668   :  { %v2198_v26 = vmul.f32 0.0625, %v15335_v19  ;;  %v15344_v19 = vld [vmem:[#allocation223_spill] sm:$0xff] }
 0x66a   :  { %v11547_v20 = vpop.permute.xlu1 %4873  ;;  %5059 = vperm.xlu1 %8479, %v3822_v45   ;;  %v11549_v55 = vpop.permute.xlu0 %4882  ;;  %v15330_v45 = vld [vmem:[#allocation410_spill] sm:$0xff] }
 0x66b   :  { %15321 = vst [vmem:[#allocation380_spill] sm:$0xff] %v11547_v20  ;;  %15322 = vst [vmem:[#allocation385_spill] sm:$0xff] %v11549_v55  ;;  %5068 = vperm.xlu0 %8478, %v3825_v46   ;;  %v3826_v24 = vmul.f32 %v15330_v45, %v2193_v7  ;;  %v3829_v55 = vmul.f32 %v15331_v31, %v2196_v27  ;;  %v2195_v46 = vmul.f32 0.0625, %v15332_v13  ;;  %v15341_v27 = vld [vmem:[#allocation222_spill] sm:$0xff]  ;;  %v15343_v13 = vld [vmem:[#allocation419_spill] sm:$0xff] }
 0x66c   :  { %v2200_v45 = vmul.f32 0.0625, %v15341_v27  ;;  %v15350_v27 = vld [vmem:[#allocation225_spill] sm:$0xff] }
 0x66e   :  { %v11555_v48 = vpop.permute.xlu1 %4879  ;;  %5065 = vperm.xlu1 %8479, %v3824_v56   ;;  %v11557_v53 = vpop.permute.xlu0 %4888  ;;  %v15336_v56 = vld [vmem:[#allocation412_spill] sm:$0xff] }
 0x66f   :  { %15327 = vst [vmem:[#allocation189_spill] sm:$0xff] %v11555_v48  ;;  %15328 = vst [vmem:[#allocation190_spill] sm:$0xff] %v11557_v53  ;;  %5074 = vperm.xlu0 %8478, %v3827_v63   ;;  %v3828_v28 = vmul.f32 %v15336_v56, %v2195_v46  ;;  %v3831_v48 = vmul.f32 %v15337_v62, %v2198_v26  ;;  %v2197_v63 = vmul.f32 0.0625, %v15338_v18  ;;  %v15347_v26 = vld [vmem:[#allocation224_spill] sm:$0xff]  ;;  %v15349_v18 = vld [vmem:[#allocation421_spill] sm:$0xff] }
 0x670   :  { %v2202_v56 = vmul.f32 0.0625, %v15347_v26  ;;  %v15356_v26 = vld [vmem:[#allocation227_spill] sm:$0xff] }
 0x672   :  { %v11563_v20 = vpop.permute.xlu1 %4885  ;;  %5071 = vperm.xlu1 %8479, %v3826_v24   ;;  %v11565_v57 = vpop.permute.xlu0 %4894  ;;  %v15342_v24 = vld [vmem:[#allocation414_spill] sm:$0xff] }
 0x673   :  { %15333 = vst [vmem:[#allocation382_spill] sm:$0xff] %v11563_v20  ;;  %15334 = vst [vmem:[#allocation387_spill] sm:$0xff] %v11565_v57  ;;  %5080 = vperm.xlu0 %8478, %v3829_v55   ;;  %v3830_v31 = vmul.f32 %v15342_v24, %v2197_v63  ;;  %v3833_v57 = vmul.f32 %v15343_v13, %v2200_v45  ;;  %v2199_v55 = vmul.f32 0.0625, %v15344_v19  ;;  %v15353_v45 = vld [vmem:[#allocation226_spill] sm:$0xff]  ;;  %v15355_v19 = vld [vmem:[#allocation423_spill] sm:$0xff] }
 0x674   :  { %v2204_v24 = vmul.f32 0.0625, %v15353_v45 }
 0x676   :  { %v11571_v53 = vpop.permute.xlu1 %4891  ;;  %5077 = vperm.xlu1 %8479, %v3828_v28   ;;  %v11573_v7 = vpop.permute.xlu0 %4900  ;;  %v15348_v28 = vld [vmem:[#allocation416_spill] sm:$0xff] }
 0x677   :  { %15339 = vst [vmem:[#allocation191_spill] sm:$0xff] %v11571_v53  ;;  %15340 = vst [vmem:[#allocation192_spill] sm:$0xff] %v11573_v7  ;;  %5086 = vperm.xlu0 %8478, %v3831_v48   ;;  %v3832_v62 = vmul.f32 %v15348_v28, %v2199_v55  ;;  %v3835_v7 = vmul.f32 %v15349_v18, %v2202_v56  ;;  %v2201_v48 = vmul.f32 0.0625, %v15350_v27  ;;  %v15359_v56 = vld [vmem:[#allocation228_spill] sm:$0xff]  ;;  %v15361_v27 = vld [vmem:[#allocation425_spill] sm:$0xff] }
 0x678   :  { %v2206_v28 = vmul.f32 0.0625, %v15359_v56 }
 0x67a   :  { %v11579_v20 = vpop.permute.xlu1 %4897  ;;  %5083 = vperm.xlu1 %8479, %v3830_v31   ;;  %v11581_v46 = vpop.permute.xlu0 %4906  ;;  %v15354_v31 = vld [vmem:[#allocation418_spill] sm:$0xff] }
 0x67b   :  { %15345 = vst [vmem:[#allocation384_spill] sm:$0xff] %v11579_v20  ;;  %15346 = vst [vmem:[#allocation389_spill] sm:$0xff] %v11581_v46  ;;  %5092 = vperm.xlu0 %8478, %v3833_v57   ;;  %v3834_v13 = vmul.f32 %v15354_v31, %v2201_v48  ;;  %v3837_v46 = vmul.f32 %v15355_v19, %v2204_v24  ;;  %v2203_v57 = vmul.f32 0.0625, %v15356_v26  ;;  %v15362_v48 = vld [vmem:[#allocation229_spill] sm:$0xff]  ;;  %v2468_v26 = vld [vmem:[%s14012_s4 + $0xe8] sm:$0xff] }
 0x67c   :  { %v2205_v45 = vmul.f32 0.0625, %v15362_v48 }
 0x67e   :  { %v11587_v53 = vpop.permute.xlu1 %4903  ;;  %5089 = vperm.xlu1 %8479, %v3832_v62   ;;  %v11589_v63 = vpop.permute.xlu0 %4912  ;;  %v15360_v62 = vld [vmem:[#allocation420_spill] sm:$0xff] }
 0x67f   :  { %15351 = vst [vmem:[#allocation193_spill] sm:$0xff] %v11587_v53  ;;  %15352 = vst [vmem:[#allocation194_spill] sm:$0xff] %v11589_v63  ;;  %5098 = vperm.xlu0 %8478, %v3835_v7   ;;  %v3836_v18 = vmul.f32 %v15360_v62, %v2203_v57  ;;  %v3839_v63 = vmul.f32 %v15361_v27, %v2206_v28  ;;  %v2470_v7 = vld [vmem:[%s14012_s4 + $0xf8] sm:$0xff]  ;;  %v2467_v28 = vld [vmem:[%s14012_s4 + $0xe0] sm:$0xff] }
 0x680   :  { %2515 = vmatprep.subr.mxu1 %v2470_v7  ;;  %v15366_v57 = vld [vmem:[#allocation422_spill] sm:$0xff]  ;;  %v15367_v62 = vld [vmem:[#allocation427_spill] sm:$0xff] }
 0x681   :  { %v3838_v56 = vmul.f32 %v15366_v57, %v2205_v45  ;;  %v2466_v27 = vld [vmem:[%s14012_s4 + $0xd8] sm:$0xff]  ;;  %v2465_v45 = vld [vmem:[%s14012_s4 + $0xd0] sm:$0xff]  ;;  %v15372_v57 = vld [vmem:[#allocation424_spill] sm:$0xff] }
 0x682   :  { %v11595_v20 = vpop.permute.xlu1 %4909  ;;  %5095 = vperm.xlu1 %8479, %v3834_v13   ;;  %v11597_v55 = vpop.permute.xlu0 %4918  ;;  %v15365_v13 = vld [vmem:[#allocation230_spill] sm:$0xff] }
 0x683   :  { %15357 = vst [vmem:[#allocation386_spill] sm:$0xff] %v11595_v20  ;;  %15358 = vst [vmem:[#allocation391_spill] sm:$0xff] %v11597_v55  ;;  %5104 = vperm.xlu0 %8478, %v3837_v46   ;;  %v2469_v46 = vld [vmem:[%s14012_s4 + $0xf0] sm:$0xff]  ;;  %v2208_v19 = vmul.f32 0.0625, %v15365_v13  ;;  %v15371_v13 = vld [vmem:[#allocation232_spill] sm:$0xff] }
 0x684   :  { %2516 = vmatpush1.msra.mxu1 %v2469_v46 }
 0x685   :  { %2517 = vmatprep.subr.mxu1 %v2468_v26  ;;  %v2210_v26 = vmul.f32 0.0625, %v15371_v13 }
 0x686   :  { %v11606_v24 = vpop.permute.xlu1 %4915  ;;  %5101 = vperm.xlu1 %8479, %v3836_v18   ;;  %v11608_v31 = vpop.permute.xlu0 %4924  ;;  %v3841_v18 = vmul.f32 %v15367_v62, %v2208_v19  ;;  %2518 = vmatpush1.msra.mxu1 %v2467_v28  ;;  %v2464_v19 = vld [vmem:[%s14012_s4 + $0xc8] sm:$0xff]  ;;  %v15373_v62 = vld [vmem:[#allocation429_spill] sm:$0xff] }
 0x687   :  { %15363 = vst [vmem:[#allocation195_spill] sm:$0xff] %v11606_v24  ;;  %15364 = vst [vmem:[#allocation196_spill] sm:$0xff] %v11608_v31  ;;  %5110 = vperm.xlu0 %8478, %v3839_v63   ;;  %v15368_v63 = vld [vmem:[#allocation231_spill] sm:$0xff]  ;;  %2519 = vmatprep.subr.mxu1 %v2466_v27  ;;  %v3843_v27 = vmul.f32 %v15373_v62, %v2210_v26  ;;  %v2460_v26 = vld [vmem:[%s14012_s4 + $0xa8] sm:$0xff] }
 0x688   :  { %v2207_v7 = vmul.f32 0.0625, %v15368_v63  ;;  %2520 = vmatpush1.msra.mxu1 %v2465_v45  ;;  %v2462_v63 = vld [vmem:[%s14012_s4 + $0xb8] sm:$0xff] }
 0x689   :  { %2521 = vmatprep.subr.mxu1 %v2464_v19  ;;  %v15377_v19 = vld [vmem:[#allocation234_spill] sm:$0xff] }
 0x68a   :  { %v11626_v48 = vpop.permute.xlu1 %4921  ;;  %5107 = vperm.xlu1 %8479, %v3838_v56   ;;  %v11628_v46 = vpop.permute.xlu0 %4930  ;;  %v3840_v28 = vmul.f32 %v15372_v57, %v2207_v7  ;;  %v2463_v56 = vld [vmem:[%s14012_s4 + $0xc0] sm:$0xff]  ;;  %v2461_v7 = vld [vmem:[%s14012_s4 + $0xb0] sm:$0xff]  ;;  %v2212_v57 = vmul.f32 0.0625, %v15377_v19  ;;  %v2458_v19 = vld [vmem:[%s14012_s4 + $0x98] sm:$0xff] }
 0x68b   :  { %15369 = vst [vmem:[#allocation388_spill] sm:$0xff] %v11626_v48  ;;  %15370 = vst [vmem:[#allocation393_spill] sm:$0xff] %v11628_v46  ;;  %5116 = vperm.xlu0 %8478, %v3841_v18   ;;  %2522 = vmatpush1.msra.mxu1 %v2463_v56  ;;  %v15374_v18 = vld [vmem:[#allocation233_spill] sm:$0xff]  ;;  %v15378_v56 = vld [vmem:[#allocation426_spill] sm:$0xff] }
 0x68c   :  { %v2209_v45 = vmul.f32 0.0625, %v15374_v18  ;;  %2523 = vmatprep.subr.mxu1 %v2462_v63  ;;  %v15379_v63 = vld [vmem:[#allocation431_spill] sm:$0xff] }
 0x68d   :  { %2524 = vmatpush1.msra.mxu1 %v2461_v7  ;;  %v3845_v18 = vmul.f32 %v15379_v63, %v2212_v57  ;;  %v2456_v57 = vld [vmem:[%s14012_s4 + $0x88] sm:$0xff] }
 0x68e   :  { %5113 = vperm.xlu1 %8479, %v3840_v28   ;;  %v11646_v13 = vpop.permute.xlu1 %4927  ;;  %v11648_v46 = vpop.permute.xlu0 %4936  ;;  %v3842_v62 = vmul.f32 %v15378_v56, %v2209_v45  ;;  %2525 = vmatprep.subr.mxu1 %v2460_v26  ;;  %v2459_v28 = vld [vmem:[%s14012_s4 + $0xa0] sm:$0xff]  ;;  %v2457_v45 = vld [vmem:[%s14012_s4 + $0x90] sm:$0xff]  ;;  %v15383_v26 = vld [vmem:[#allocation236_spill] sm:$0xff] }
 0x68f   :  { %15375 = vst [vmem:[#allocation197_spill] sm:$0xff] %v11646_v13  ;;  %15376 = vst [vmem:[#allocation198_spill] sm:$0xff] %v11648_v46  ;;  %5122 = vperm.xlu0 %8478, %v3843_v27   ;;  %2526 = vmatpush1.msra.mxu1 %v2459_v28  ;;  %v15380_v27 = vld [vmem:[#allocation235_spill] sm:$0xff]  ;;  %v2214_v56 = vmul.f32 0.0625, %v15383_v26  ;;  %v15384_v28 = vld [vmem:[#allocation428_spill] sm:$0xff] }
 0x690   :  { %v2211_v7 = vmul.f32 0.0625, %v15380_v27  ;;  %2527 = vmatprep.subr.mxu1 %v2458_v19  ;;  %v15385_v19 = vld [vmem:[#allocation433_spill] sm:$0xff]  ;;  %v2454_v26 = vld [vmem:[%s14012_s4 + $0x78] sm:$0xff] }
 0x691   :  { %2528 = vmatpush1.msra.mxu1 %v2457_v45  ;;  %v3847_v27 = vmul.f32 %v15385_v19, %v2214_v56  ;;  %v2452_v56 = vld [vmem:[%s14012_s4 + $0x68] sm:$0xff]  ;;  %v15390_v19 = vld [vmem:[#allocation435_spill] sm:$0xff] }
 0x692   :  { %5119 = vperm.xlu1 %8479, %v3842_v62   ;;  %v11666_v31 = vpop.permute.xlu1 %4933  ;;  %v11668_v13 = vpop.permute.xlu0 %4942  ;;  %v3844_v63 = vmul.f32 %v15384_v28, %v2211_v7  ;;  %2529 = vmatprep.subr.mxu1 %v2456_v57  ;;  %v2455_v62 = vld [vmem:[%s14012_s4 + $0x80] sm:$0xff]  ;;  %v2453_v7 = vld [vmem:[%s14012_s4 + $0x70] sm:$0xff]  ;;  %v15389_v57 = vld [vmem:[#allocation238_spill] sm:$0xff] }
 0x693   :  { %15381 = vst [vmem:[#allocation390_spill] sm:$0xff] %v11666_v31  ;;  %15382 = vst [vmem:[#allocation395_spill] sm:$0xff] %v11668_v13  ;;  %5128 = vperm.xlu0 %8478, %v3845_v18   ;;  %2530 = vmatpush1.msra.mxu1 %v2455_v62  ;;  %v15386_v18 = vld [vmem:[#allocation237_spill] sm:$0xff]  ;;  %v2216_v28 = vmul.f32 0.0625, %v15389_v57 }
 0x694   :  { %v2213_v45 = vmul.f32 0.0625, %v15386_v18  ;;  %2531 = vmatprep.subr.mxu1 %v2454_v26  ;;  %v2450_v18 = vld [vmem:[%s14012_s4 + $0x58] sm:$0xff] }
 0x695   :  { %2532 = vmatpush1.msra.mxu1 %v2453_v7  ;;  %v3849_v26 = vmul.f32 %v15390_v19, %v2216_v28  ;;  %v2448_v28 = vld [vmem:[%s14012_s4 + $0x48] sm:$0xff] }
 0x696   :  { %5125 = vperm.xlu1 %8479, %v3844_v63   ;;  %v11686_v48 = vpop.permute.xlu1 %4939  ;;  %v11688_v55 = vpop.permute.xlu0 %4948  ;;  %v3846_v62 = vmul.f32 %v14859_v17, %v2213_v45  ;;  %2533 = vmatprep.subr.mxu1 %v2452_v56  ;;  %v2451_v63 = vld [vmem:[%s14012_s4 + $0x60] sm:$0xff]  ;;  %v2449_v17 = vld [vmem:[%s14012_s4 + $0x50] sm:$0xff]  ;;  %v15394_v45 = vld [vmem:[#allocation240_spill] sm:$0xff] }
 0x697   :  { %15387 = vst [vmem:[#allocation199_spill] sm:$0xff] %v11686_v48  ;;  %15388 = vst [vmem:[#allocation200_spill] sm:$0xff] %v11688_v55  ;;  %5134 = vperm.xlu0 %8478, %v3847_v27   ;;  %2534 = vmatpush1.msra.mxu1 %v2451_v63  ;;  %v15391_v27 = vld [vmem:[#allocation239_spill] sm:$0xff]  ;;  %v2218_v56 = vmul.f32 0.0625, %v15394_v45  ;;  %v15395_v63 = vld [vmem:[#allocation432_spill] sm:$0xff] }
 0x698   :  { %v2215_v7 = vmul.f32 0.0625, %v15391_v27  ;;  %2535 = vmatprep.subr.mxu1 %v2450_v18  ;;  %v15396_v18 = vld [vmem:[#allocation437_spill] sm:$0xff]  ;;  %v2446_v45 = vld [vmem:[%s14012_s4 + $0x38] sm:$0xff] }
 0x699   :  { %2536 = vmatpush1.msra.mxu1 %v2449_v17  ;;  %v3851_v27 = vmul.f32 %v15396_v18, %v2218_v56  ;;  %v2444_v56 = vld [vmem:[%s14012_s4 + $0x28] sm:$0xff] }
 0x69a   :  { %5131 = vperm.xlu1 %8479, %v3846_v62   ;;  %v11706_v57 = vpop.permute.xlu1 %4945  ;;  %v11708_v24 = vpop.permute.xlu0 %4954  ;;  %v3848_v19 = vmul.f32 %v15395_v63, %v2215_v7  ;;  %2537 = vmatprep.subr.mxu1 %v2448_v28  ;;  %v2447_v62 = vld [vmem:[%s14012_s4 + $0x40] sm:$0xff]  ;;  %v2445_v7 = vld [vmem:[%s14012_s4 + $0x30] sm:$0xff]  ;;  %v15400_v28 = vld [vmem:[#allocation242_spill] sm:$0xff] }
 0x69b   :  { %15392 = vst [vmem:[#allocation392_spill] sm:$0xff] %v11706_v57  ;;  %15393 = vst [vmem:[#allocation397_spill] sm:$0xff] %v11708_v24  ;;  %5140 = vperm.xlu0 %8478, %v3849_v26   ;;  %2538 = vmatpush1.msra.mxu1 %v2447_v62  ;;  %v15397_v26 = vld [vmem:[#allocation241_spill] sm:$0xff]  ;;  %v2220_v63 = vmul.f32 0.0625, %v15400_v28  ;;  %v15401_v62 = vld [vmem:[#allocation434_spill] sm:$0xff] }
 0x69c   :  { %v2217_v17 = vmul.f32 0.0625, %v15397_v26  ;;  %2539 = vmatprep.subr.mxu1 %v2446_v45  ;;  %v15402_v45 = vld [vmem:[#allocation439_spill] sm:$0xff]  ;;  %v2442_v28 = vld [vmem:[%s14012_s4 + $0x18] sm:$0xff] }
 0x69d   :  { %2540 = vmatpush1.msra.mxu1 %v2445_v7  ;;  %v3853_v26 = vmul.f32 %v15402_v45, %v2220_v63  ;;  %v2440_v63 = vld [vmem:[%s14012_s4 + $0x8] sm:$0xff] }
 0x69e   :  { %5137 = vperm.xlu1 %8479, %v3848_v19   ;;  %v11726_v20 = vpop.permute.xlu1 %4951  ;;  %v11728_v53 = vpop.permute.xlu0 %4960  ;;  %v3850_v18 = vmul.f32 %v15401_v62, %v2217_v17  ;;  %2541 = vmatprep.subr.mxu1 %v2444_v56  ;;  %v2443_v19 = vld [vmem:[%s14012_s4 + $0x20] sm:$0xff]  ;;  %v2441_v17 = vld [vmem:[%s14012_s4 + $0x10] sm:$0xff]  ;;  %v15406_v56 = vld [vmem:[#allocation244_spill] sm:$0xff] }
 0x69f   :  { %15398 = vst [vmem:[#allocation201_spill] sm:$0xff] %v11726_v20  ;;  %15399 = vst [vmem:[#allocation202_spill] sm:$0xff] %v11728_v53  ;;  %5146 = vperm.xlu0 %8478, %v3851_v27   ;;  %2542 = vmatpush1.msra.mxu1 %v2443_v19  ;;  %v15403_v27 = vld [vmem:[#allocation243_spill] sm:$0xff]  ;;  %v2222_v62 = vmul.f32 0.0625, %v15406_v56  ;;  %v15407_v19 = vld [vmem:[#allocation436_spill] sm:$0xff] }
 0x6a0   :  { %v2219_v7 = vmul.f32 0.0625, %v15403_v27  ;;  %2543 = vmatprep.subr.mxu1 %v2442_v28  ;;  %v15408_v28 = vld [vmem:[#allocation441_spill] sm:$0xff]  ;;  %v2502_v56 = vld [vmem:[%s14012_s4 + $0x1f8] sm:$0xff] }
 0x6a1   :  { %2544 = vmatpush1.msra.mxu1 %v2441_v17  ;;  %v3855_v27 = vmul.f32 %v15408_v28, %v2222_v62  ;;  %v2500_v62 = vld [vmem:[%s14012_s4 + $0x1e8] sm:$0xff] }
 0x6a2   :  { %5143 = vperm.xlu1 %8479, %v3850_v18   ;;  %v11746_v53 = vpop.permute.xlu1 %4957  ;;  %v11748_v24 = vpop.permute.xlu0 %4966  ;;  %v3852_v45 = vmul.f32 %v15407_v19, %v2219_v7  ;;  %2545 = vmatprep.subr.mxu1 %v2440_v63  ;;  %v2439_v18 = vld [vmem:[%s14012_s4] sm:$0xff]  ;;  %v2501_v7 = vld [vmem:[%s14012_s4 + $0x1f0] sm:$0xff]  ;;  %v15412_v63 = vld [vmem:[#allocation246_spill] sm:$0xff] }
 0x6a3   :  { %15404 = vst [vmem:[#allocation394_spill] sm:$0xff] %v11746_v53  ;;  %15405 = vst [vmem:[#allocation399_spill] sm:$0xff] %v11748_v24  ;;  %5152 = vperm.xlu0 %8478, %v3853_v26   ;;  %2546 = vmatpush1.msra.mxu1 %v2439_v18  ;;  %v15409_v26 = vld [vmem:[#allocation245_spill] sm:$0xff]  ;;  %v2224_v19 = vmul.f32 0.0625, %v15412_v63  ;;  %v15413_v18 = vld [vmem:[#allocation438_spill] sm:$0xff] }
 0x6a4   :  { %v2221_v17 = vmul.f32 0.0625, %v15409_v26  ;;  %2547 = vmatprep.subr.mxu1 %v2502_v56  ;;  %v15414_v56 = vld [vmem:[#allocation443_spill] sm:$0xff]  ;;  %v2498_v63 = vld [vmem:[%s14012_s4 + $0x1d8] sm:$0xff] }
 0x6a5   :  { %2548 = vmatpush2.msra.mxu1 %v2501_v7  ;;  %v3857_v26 = vmul.f32 %v15414_v56, %v2224_v19  ;;  %v2496_v19 = vld [vmem:[%s14012_s4 + $0x1c8] sm:$0xff] }
 0x6a6   :  { %5149 = vperm.xlu1 %8479, %v3852_v45   ;;  %v11766_v24 = vpop.permute.xlu1 %4963  ;;  %v11768_v53 = vpop.permute.xlu0 %4972  ;;  %v3854_v28 = vmul.f32 %v15413_v18, %v2221_v17  ;;  %2549 = vmatprep.subr.mxu1 %v2500_v62  ;;  %v2499_v45 = vld [vmem:[%s14012_s4 + $0x1e0] sm:$0xff]  ;;  %v2497_v17 = vld [vmem:[%s14012_s4 + $0x1d0] sm:$0xff]  ;;  %v15418_v62 = vld [vmem:[#allocation248_spill] sm:$0xff] }
 0x6a7   :  { %15410 = vst [vmem:[#allocation203_spill] sm:$0xff] %v11766_v24  ;;  %15411 = vst [vmem:[#allocation204_spill] sm:$0xff] %v11768_v53  ;;  %5158 = vperm.xlu0 %8478, %v3855_v27   ;;  %2550 = vmatpush2.msra.mxu1 %v2499_v45  ;;  %v15415_v27 = vld [vmem:[#allocation247_spill] sm:$0xff]  ;;  %v2226_v18 = vmul.f32 0.0625, %v15418_v62  ;;  %v15419_v45 = vld [vmem:[#allocation440_spill] sm:$0xff] }
 0x6a8   :  { %v2223_v7 = vmul.f32 0.0625, %v15415_v27  ;;  %2551 = vmatprep.subr.mxu1 %v2498_v63  ;;  %v15420_v63 = vld [vmem:[#allocation445_spill] sm:$0xff]  ;;  %v2494_v62 = vld [vmem:[%s14012_s4 + $0x1b8] sm:$0xff] }
 0x6a9   :  { %2552 = vmatpush2.msra.mxu1 %v2497_v17  ;;  %v3859_v27 = vmul.f32 %v15420_v63, %v2226_v18  ;;  %v2492_v18 = vld [vmem:[%s14012_s4 + $0x1a8] sm:$0xff] }
 0x6aa   :  { %5155 = vperm.xlu1 %8479, %v3854_v28   ;;  %v11786_v53 = vpop.permute.xlu1 %4969  ;;  %v11788_v24 = vpop.permute.xlu0 %4978  ;;  %v3856_v56 = vmul.f32 %v15419_v45, %v2223_v7  ;;  %2553 = vmatprep.subr.mxu1 %v2496_v19  ;;  %v2495_v28 = vld [vmem:[%s14012_s4 + $0x1c0] sm:$0xff]  ;;  %v2493_v7 = vld [vmem:[%s14012_s4 + $0x1b0] sm:$0xff]  ;;  %v15424_v19 = vld [vmem:[#allocation250_spill] sm:$0xff] }
 0x6ab   :  { %15416 = vst [vmem:[#allocation396_spill] sm:$0xff] %v11786_v53  ;;  %15417 = vst [vmem:[#allocation401_spill] sm:$0xff] %v11788_v24  ;;  %5164 = vperm.xlu0 %8478, %v3857_v26   ;;  %2554 = vmatpush2.msra.mxu1 %v2495_v28  ;;  %v15421_v26 = vld [vmem:[#allocation249_spill] sm:$0xff]  ;;  %v2228_v45 = vmul.f32 0.0625, %v15424_v19  ;;  %v15425_v28 = vld [vmem:[#allocation442_spill] sm:$0xff] }
 0x6ac   :  { %v2225_v17 = vmul.f32 0.0625, %v15421_v26  ;;  %2555 = vmatprep.subr.mxu1 %v2494_v62  ;;  %v15426_v62 = vld [vmem:[#allocation447_spill] sm:$0xff]  ;;  %v2490_v19 = vld [vmem:[%s14012_s4 + $0x198] sm:$0xff] }
 0x6ad   :  { %2556 = vmatpush2.msra.mxu1 %v2493_v7  ;;  %v3861_v26 = vmul.f32 %v15426_v62, %v2228_v45  ;;  %v2488_v45 = vld [vmem:[%s14012_s4 + $0x188] sm:$0xff] }
 0x6ae   :  { %5161 = vperm.xlu1 %8479, %v3856_v56   ;;  %v11806_v24 = vpop.permute.xlu1 %4975  ;;  %v11808_v53 = vpop.permute.xlu0 %4984  ;;  %v3858_v63 = vmul.f32 %v15425_v28, %v2225_v17  ;;  %2557 = vmatprep.subr.mxu1 %v2492_v18  ;;  %v2491_v56 = vld [vmem:[%s14012_s4 + $0x1a0] sm:$0xff]  ;;  %v2489_v17 = vld [vmem:[%s14012_s4 + $0x190] sm:$0xff]  ;;  %v15430_v18 = vld [vmem:[#allocation252_spill] sm:$0xff] }
 0x6af   :  { %15422 = vst [vmem:[#allocation205_spill] sm:$0xff] %v11806_v24  ;;  %15423 = vst [vmem:[#allocation206_spill] sm:$0xff] %v11808_v53  ;;  %5170 = vperm.xlu0 %8478, %v3859_v27   ;;  %2558 = vmatpush2.msra.mxu1 %v2491_v56  ;;  %v15427_v27 = vld [vmem:[#allocation251_spill] sm:$0xff]  ;;  %v2230_v28 = vmul.f32 0.0625, %v15430_v18  ;;  %v15431_v56 = vld [vmem:[#allocation444_spill] sm:$0xff] }
 0x6b0   :  { %v2227_v7 = vmul.f32 0.0625, %v15427_v27  ;;  %2559 = vmatprep.subr.mxu1 %v2490_v19  ;;  %v15432_v19 = vld [vmem:[#allocation449_spill] sm:$0xff]  ;;  %v2486_v18 = vld [vmem:[%s14012_s4 + $0x178] sm:$0xff] }
 0x6b1   :  { %2560 = vmatpush2.msra.mxu1 %v2489_v17  ;;  %v3863_v27 = vmul.f32 %v15432_v19, %v2230_v28  ;;  %v2484_v28 = vld [vmem:[%s14012_s4 + $0x168] sm:$0xff] }
 0x6b2   :  { %5167 = vperm.xlu1 %8479, %v3858_v63   ;;  %v11826_v24 = vpop.permute.xlu1 %4981  ;;  %v11828_v55 = vpop.permute.xlu0 %4990  ;;  %v3860_v62 = vmul.f32 %v15431_v56, %v2227_v7  ;;  %2561 = vmatprep.subr.mxu1 %v2488_v45  ;;  %v2487_v63 = vld [vmem:[%s14012_s4 + $0x180] sm:$0xff]  ;;  %v2485_v7 = vld [vmem:[%s14012_s4 + $0x170] sm:$0xff]  ;;  %v15436_v45 = vld [vmem:[#allocation254_spill] sm:$0xff] }
 0x6b3   :  { %15428 = vst [vmem:[#allocation398_spill] sm:$0xff] %v11826_v24  ;;  %15429 = vst [vmem:[#allocation403_spill] sm:$0xff] %v11828_v55  ;;  %5176 = vperm.xlu0 %8478, %v3861_v26   ;;  %2562 = vmatpush2.msra.mxu1 %v2487_v63  ;;  %v15433_v26 = vld [vmem:[#allocation253_spill] sm:$0xff]  ;;  %v2232_v56 = vmul.f32 0.0625, %v15436_v45  ;;  %v15437_v63 = vld [vmem:[#allocation446_spill] sm:$0xff] }
 0x6b4   :  { %v2229_v17 = vmul.f32 0.0625, %v15433_v26  ;;  %2563 = vmatprep.subr.mxu1 %v2486_v18  ;;  %v15438_v18 = vld [vmem:[#allocation451_spill] sm:$0xff]  ;;  %v2482_v45 = vld [vmem:[%s14012_s4 + $0x158] sm:$0xff] }
 0x6b5   :  { %2564 = vmatpush2.msra.mxu1 %v2485_v7  ;;  %v3865_v26 = vmul.f32 %v15438_v18, %v2232_v56  ;;  %v2480_v56 = vld [vmem:[%s14012_s4 + $0x148] sm:$0xff]  ;;  %v15452_v24 = vld [vmem:[#allocation455_spill] sm:$0xff] }
 0x6b6   :  { %5173 = vperm.xlu1 %8479, %v3860_v62   ;;  %v11846_v55 = vpop.permute.xlu1 %4987  ;;  %v11848_v20 = vpop.permute.xlu0 %4996  ;;  %v3862_v19 = vmul.f32 %v15437_v63, %v2229_v17  ;;  %2565 = vmatprep.subr.mxu1 %v2484_v28  ;;  %v2483_v62 = vld [vmem:[%s14012_s4 + $0x160] sm:$0xff]  ;;  %v2481_v17 = vld [vmem:[%s14012_s4 + $0x150] sm:$0xff]  ;;  %v15442_v28 = vld [vmem:[#allocation256_spill] sm:$0xff] }
 0x6b7   :  { %15434 = vst [vmem:[#allocation207_spill] sm:$0xff] %v11846_v55  ;;  %15435 = vst [vmem:[#allocation208_spill] sm:$0xff] %v11848_v20  ;;  %5182 = vperm.xlu0 %8478, %v3863_v27   ;;  %2566 = vmatpush2.msra.mxu1 %v2483_v62  ;;  %v15439_v27 = vld [vmem:[#allocation255_spill] sm:$0xff]  ;;  %v2234_v63 = vmul.f32 0.0625, %v15442_v28  ;;  %v15443_v62 = vld [vmem:[#allocation448_spill] sm:$0xff] }
 0x6b8   :  { %v2231_v7 = vmul.f32 0.0625, %v15439_v27  ;;  %2567 = vmatprep.subr.mxu1 %v2482_v45  ;;  %v15444_v45 = vld [vmem:[#allocation453_spill] sm:$0xff]  ;;  %v2478_v28 = vld [vmem:[%s14012_s4 + $0x138] sm:$0xff]  ;;  %v15451_v55 = vld [vmem:[#allocation316_spill] sm:$0xff] }
 0x6b9   :  { %2568 = vmatpush2.msra.mxu1 %v2481_v17  ;;  %v3867_v27 = vmul.f32 %v15444_v45, %v2234_v63  ;;  %v2477_v63 = vld [vmem:[%s14012_s4 + $0x130] sm:$0xff] }
 0x6ba   :  { %5179 = vperm.xlu1 %8479, %v3862_v19   ;;  %v11866_v20 = vpop.permute.xlu1 %4993  ;;  %v11868_v53 = vpop.permute.xlu0 %5002  ;;  %v3864_v18 = vmul.f32 %v15443_v62, %v2231_v7  ;;  %2569 = vmatprep.subr.mxu1 %v2480_v56  ;;  %v2479_v19 = vld [vmem:[%s14012_s4 + $0x140] sm:$0xff]  ;;  %v15448_v56 = vld [vmem:[#allocation258_spill] sm:$0xff] }
 0x6bb   :  { %15440 = vst [vmem:[#allocation400_spill] sm:$0xff] %v11866_v20  ;;  %15441 = vst [vmem:[#allocation405_spill] sm:$0xff] %v11868_v53  ;;  %5188 = vperm.xlu0 %8478, %v3865_v26   ;;  %2570 = vmatpush2.msra.mxu1 %v2479_v19  ;;  %v15445_v26 = vld [vmem:[#allocation257_spill] sm:$0xff]  ;;  %v2350_v7 = vld [vmem:[%s14013_s3] sm:$0x3]  ;;  %v2236_v62 = vmul.f32 0.0625, %v15448_v56 }
 0x6bc   :  { %v2233_v17 = vmul.f32 0.0625, %v15445_v26  ;;  %2571 = vmatprep.subr.mxu1 %v2478_v28  ;;  %v15449_v19 = vld [vmem:[#allocation299_spill] sm:$0xff]  ;;  %v2359_v13 = vrot.slane %v2350_v7, %v15451_v55  ;;  %v15458_v55 = vld [vmem:[#allocation457_spill] sm:$0xff] }
 0x6bd   :  { %v2355_v45 = vrot.slane %v2350_v7, %v15449_v19  ;;  %v2432_v26 = vpop.f32.mrf.mxu0  ;;  %2572 = vmatpush2.msra.mxu1 %v2477_v63  ;;  %v2475_v28 = vld [vmem:[%s14012_s4 + $0x120] sm:$0xff]  ;;  %v3869_v56 = vmul.f32 %v15452_v24, %v2236_v62  ;;  %v2474_v63 = vld [vmem:[%s14012_s4 + $0x118] sm:$0xff]  ;;  %v2473_v7 = vld [vmem:[%s14012_s4 + $0x110] sm:$0xff] }
 0x6be   :  { %5185 = vperm.xlu1 %8479, %v3864_v18   ;;  %v11886_v53 = vpop.permute.xlu1 %4999  ;;  %v11888_v20 = vpop.permute.xlu0 %5008  ;;  %v2476_v18 = vld [vmem:[%s14012_s4 + $0x128] sm:$0xff]  ;;  %v15453_v19 = vld [vmem:[#allocation259_spill] sm:$0xff] }
 0x6bf   :  { %15446 = vst [vmem:[#allocation209_spill] sm:$0xff] %v11886_v53  ;;  %15447 = vst [vmem:[#allocation210_spill] sm:$0xff] %v11888_v20  ;;  %5194 = vperm.xlu0 %8478, %v3867_v27   ;;  %v15450_v20 = vld [vmem:[#allocation450_spill] sm:$0xff]  ;;  %2573 = vmatprep.subr.mxu1 %v2476_v18  ;;  %v2433_v27 = vadd.f32 %v2432_v26, %v2355_v45  ;;  %v2434_v57 = vpop.f32.mrf.mxu0  ;;  %v2235_v46 = vmul.f32 0.0625, %v15453_v19  ;;  %v15456_v62 = vld [vmem:[#allocation260_spill] sm:$0xff] }
 0x6c0   :  { %v3866_v53 = vmul.f32 %v15450_v20, %v2233_v17  ;;  %2574 = vmatpush2.msra.mxu1 %v2475_v28  ;;  %v2435_v24 = vadd.f32 %v2434_v57, %v2359_v13  ;;  %v2238_v45 = vmul.f32 0.0625, %v15456_v62  ;;  %v2472_v19 = vld [vmem:[%s14012_s4 + $0x108] sm:$0xff]  ;;  %v2471_v28 = vld [vmem:[%s14012_s4 + $0x100] sm:$0xff]  ;;  %v15459_v13 = vld [vmem:[#allocation261_spill] sm:$0xff] }
 0x6c1   :  { %2575 = vmatprep.subr.mxu1 %v2474_v63  ;;  %v2437_v26 = vmax.f32 %v2433_v27, 0.0  ;;  %v2237_v57 = vmul.f32 0.0625, %v15459_v13  ;;  %v15469_v13 = vld [vmem:[#allocation456_spill] sm:$0xff] }
 0x6c2   :  { %5191 = vperm.xlu1 %8479, %v3866_v53   ;;  %v11911_v20 = vpop.permute.xlu1 %5005  ;;  %v11913_v17 = vpop.permute.xlu0 %5014  ;;  %2576 = vmatpush2.msra.mxu1 %v2473_v7  ;;  %v15457_v53 = vld [vmem:[#allocation452_spill] sm:$0xff]  ;;  %v2438_v63 = vmax.f32 %v2435_v24, 0.0  ;;  %v15462_v7 = vld [vmem:[#allocation262_spill] sm:$0xff]  ;;  %v15465_v24 = vld [vmem:[#allocation263_spill] sm:$0xff] }
 0x6c3   :  { %15454 = vst [vmem:[#allocation402_spill] sm:$0xff] %v11911_v20  ;;  %15455 = vst [vmem:[#allocation407_spill] sm:$0xff] %v11913_v17  ;;  %5200 = vperm.xlu0 %8478, %v3869_v56   ;;  %v3868_v18 = vmul.f32 %v15457_v53, %v2235_v46  ;;  %2577 = vmatprep.subr.mxu1 %v2472_v19  ;;  %v3871_v17 = vmul.f32 %v15458_v55, %v2238_v45  ;;  %v2240_v62 = vmul.f32 0.0625, %v15462_v7  ;;  %v15463_v46 = vld [vmem:[#allocation454_spill] sm:$0xff]  ;;  %v15464_v53 = vld [vmem:[#allocation459_spill] sm:$0xff] }
 0x6c4   :  { %2578 = vmatpush2.msra.mxu1 %v2471_v28  ;;  %2579 = vmatprep.mubr.f32.mxu1 %v2438_v63  ;;  %v3870_v19 = vmul.f32 %v15463_v46, %v2237_v57  ;;  %v2239_v48 = vmul.f32 0.0625, %v15465_v24  ;;  %v15474_v46 = vld [vmem:[#allocation266_spill] sm:$0xff] }
 0x6c5   :  { %2580 = vmatmul.mubr.f32.vlgmr.msra.gmra.mxu1 %v2437_v26  ;;  %v3873_v20 = vmul.f32 %v15464_v53, %v2240_v62  ;;  %v15475_v53 = vld [vmem:[#allocation458_spill] sm:$0xff] }
 0x6c6   :  { %5197 = vperm.xlu1 %8479, %v3868_v18   ;;  %v11928_v56 = vpop.permute.xlu1 %5011  ;;  %v11930_v27 = vpop.permute.xlu0 %5020  ;;  %v15468_v18 = vld [vmem:[#allocation264_spill] sm:$0xff]  ;;  %v3872_v63 = vmul.f32 %v15469_v13, %v2239_v48 }
 0x6c7   :  { %15460 = vst [vmem:[#allocation211_spill] sm:$0xff] %v11928_v56  ;;  %15461 = vst [vmem:[#allocation212_spill] sm:$0xff] %v11930_v27  ;;  %5206 = vperm.xlu0 %8478, %v3871_v17   ;;  %v2242_v28 = vmul.f32 0.0625, %v15468_v18  ;;  %v15470_v27 = vld [vmem:[#allocation461_spill] sm:$0xff]  ;;  %v15477_v18 = vld [vmem:[#allocation267_spill] sm:$0xff] }
 0x6c8   :  { %v15471_v17 = vld [vmem:[#allocation265_spill] sm:$0xff] }
 0x6c9   :  { %v3875_v7 = vmul.f32 %v15470_v27, %v2242_v28  ;;  %v2241_v26 = vmul.f32 0.0625, %v15471_v17  ;;  %v15480_v28 = vld [vmem:[#allocation268_spill] sm:$0xff] }
 0x6ca   :  { %5203 = vperm.xlu1 %8479, %v3870_v19   ;;  %v11936_v55 = vpop.permute.xlu1 %5017  ;;  %v11938_v45 = vpop.permute.xlu0 %5026  ;;  %v2244_v19 = vmul.f32 0.0625, %v15474_v46  ;;  %v2246_v13 = vmul.f32 0.0625, %v15480_v28  ;;  %v15483_v46 = vld [vmem:[#allocation269_spill] sm:$0xff]  ;;  %v15489_v28 = vld [vmem:[#allocation271_spill] sm:$0xff] }
 0x6cb   :  { %15466 = vst [vmem:[#allocation404_spill] sm:$0xff] %v11936_v55  ;;  %15467 = vst [vmem:[#allocation409_spill] sm:$0xff] %v11938_v45  ;;  %5212 = vperm.xlu0 %8478, %v3873_v20   ;;  %v3874_v24 = vmul.f32 %v15475_v53, %v2241_v26  ;;  %v15476_v45 = vld [vmem:[#allocation463_spill] sm:$0xff]  ;;  %v2243_v20 = vmul.f32 0.0625, %v15477_v18 }
 0x6cc   :  { %v3877_v55 = vmul.f32 %v15476_v45, %v2244_v19  ;;  %v15486_v19 = vld [vmem:[#allocation270_spill] sm:$0xff] }
 0x6cd   :  { %v2248_v53 = vmul.f32 0.0625, %v15486_v19  ;;  %v15495_v19 = vld [vmem:[#allocation275_spill] sm:$0xff] }
 0x6ce   :  { %5209 = vperm.xlu1 %8479, %v3872_v63   ;;  %v11944_v57 = vpop.permute.xlu1 %5023  ;;  %v11946_v62 = vpop.permute.xlu0 %5032  ;;  %v15481_v63 = vld [vmem:[#allocation460_spill] sm:$0xff] }
 0x6cf   :  { %15472 = vst [vmem:[#allocation213_spill] sm:$0xff] %v11944_v57  ;;  %15473 = vst [vmem:[#allocation214_spill] sm:$0xff] %v11946_v62  ;;  %5218 = vperm.xlu0 %8478, %v3875_v7   ;;  %v3876_v17 = vmul.f32 %v15481_v63, %v2243_v20  ;;  %v15482_v57 = vld [vmem:[#allocation465_spill] sm:$0xff]  ;;  %v2245_v7 = vmul.f32 0.0625, %v15483_v46 }
 0x6d0   :  { %v3879_v56 = vmul.f32 %v15482_v57, %v2246_v13  ;;  %v15492_v13 = vld [vmem:[#allocation272_spill] sm:$0xff] }
 0x6d1   :  { %v2250_v63 = vmul.f32 0.0625, %v15492_v13 }
 0x6d2   :  { %5215 = vperm.xlu1 %8479, %v3874_v24   ;;  %v11952_v48 = vpop.permute.xlu1 %5029  ;;  %v11954_v27 = vpop.permute.xlu0 %5038  ;;  %v15487_v24 = vld [vmem:[#allocation462_spill] sm:$0xff] }
 0x6d3   :  { %15478 = vst [vmem:[#allocation406_spill] sm:$0xff] %v11952_v48  ;;  %15479 = vst [vmem:[#allocation411_spill] sm:$0xff] %v11954_v27  ;;  %5224 = vperm.xlu0 %8478, %v3877_v55   ;;  %v3878_v18 = vmul.f32 %v15487_v24, %v2245_v7  ;;  %v15488_v27 = vld [vmem:[#allocation467_spill] sm:$0xff]  ;;  %v2247_v55 = vmul.f32 0.0625, %v15489_v28  ;;  %v15496_v48 = vld [vmem:[#allocation276_spill] sm:$0xff] }
 0x6d4   :  { %v3881_v62 = vmul.f32 %v15488_v27, %v2248_v53  ;;  %v2254_v7 = vmul.f32 0.0625, %v15496_v48  ;;  %v15497_v24 = vld [vmem:[#allocation464_spill] sm:$0xff]  ;;  %v15498_v53 = vld [vmem:[#allocation277_spill] sm:$0xff]  ;;  %v15505_v48 = vld [vmem:[#allocation283_spill] sm:$0xff] }
 0x6d5   :  { %v3880_v27 = vmul.f32 %v15497_v24, %v2247_v55  ;;  %v2253_v28 = vmul.f32 0.0625, %v15498_v53  ;;  %v11994_v55 = vmul.f32 0.0625, %v15505_v48  ;;  %v15512_v48 = vld [vmem:[#allocation288_spill] sm:$0xff] }
 0x6d6   :  { %5221 = vperm.xlu1 %8479, %v3876_v17   ;;  %v11960_v26 = vpop.permute.xlu1 %5035  ;;  %v11962_v45 = vpop.permute.xlu0 %5044  ;;  %v15493_v17 = vld [vmem:[#allocation273_spill] sm:$0xff]  ;;  %v12013_v42 = vmul.f32 0.0625, %v15512_v48 }
 0x6d7   :  { %15484 = vst [vmem:[#allocation215_spill] sm:$0xff] %v11960_v26  ;;  %15485 = vst [vmem:[#allocation216_spill] sm:$0xff] %v11962_v45  ;;  %5230 = vperm.xlu0 %8478, %v3879_v56   ;;  %v2249_v46 = vmul.f32 0.0625, %v15493_v17  ;;  %v15494_v45 = vld [vmem:[#allocation274_spill] sm:$0xff]  ;;  %v2251_v56 = vmul.f32 0.0625, %v15495_v19  ;;  %v11985_v17 = vmul.f32 0.0625, %v15502_v5 }
 0x6d8   :  { %v2252_v26 = vmul.f32 0.0625, %v15494_v45  ;;  %v15504_v19 = vld [vmem:[#allocation282_spill] sm:$0xff] }
 0x6d9   :  { %v11991_v3 = vmul.f32 0.0625, %v15504_v19  ;;  %v12010_v19 = vmul.f32 0.0625, %v15511_v49  ;;  %v15518_v49 = vld [vmem:[#allocation293_spill] sm:$0xff] }
 0x6da   :  { %5227 = vperm.xlu1 %8479, %v3878_v18   ;;  %v11968_v20 = vpop.permute.xlu1 %5041  ;;  %v11970_v57 = vpop.permute.xlu0 %5050  ;;  %v15499_v18 = vld [vmem:[#allocation278_spill] sm:$0xff]  ;;  %v12029_v16 = vmul.f32 0.0625, %v15518_v49  ;;  %v15526_v49 = vld [vmem:[#allocation300_spill] sm:$0xff] }
 0x6db   :  { %15490 = vst [vmem:[#allocation408_spill] sm:$0xff] %v11968_v20  ;;  %15491 = vst [vmem:[#allocation413_spill] sm:$0xff] %v11970_v57  ;;  %5236 = vperm.xlu0 %8478, %v3881_v62   ;;  %v2256_v31 = vmul.f32 0.0625, %v15499_v18  ;;  %v15500_v20 = vld [vmem:[#allocation279_spill] sm:$0xff]  ;;  %v15501_v57 = vld [vmem:[#allocation469_spill] sm:$0xff]  ;;  %v12049_v10 = vmul.f32 0.0625, %v15526_v49 }
 0x6dc   :  { %v11981_v33 = vmul.f32 0.0625, %v15500_v20  ;;  %v3883_v13 = vmul.f32 %v15501_v57, %v2250_v63  ;;  %v15503_v62 = vld [vmem:[#allocation281_spill] sm:$0xff]  ;;  %v15508_v20 = vld [vmem:[#allocation284_spill] sm:$0xff]  ;;  %v15510_v63 = vld [vmem:[#allocation286_spill] sm:$0xff] }
 0x6dd   :  { %v11988_v45 = vmul.f32 0.0625, %v15503_v62  ;;  %v12001_v18 = vmul.f32 0.0625, %v15508_v20  ;;  %v15509_v57 = vld [vmem:[#allocation285_spill] sm:$0xff]  ;;  %v12007_v62 = vmul.f32 0.0625, %v15510_v63  ;;  %v15515_v20 = vld [vmem:[#allocation466_spill] sm:$0xff]  ;;  %v15517_v63 = vld [vmem:[#allocation292_spill] sm:$0xff] }
 0x6de   :  { %5233 = vperm.xlu1 %8479, %v3880_v27   ;;  %v11996_v24 = vpop.permute.xlu1 %5047  ;;  %v11998_v53 = vpop.permute.xlu0 %5056  ;;  %v12004_v5 = vmul.f32 0.0625, %v15509_v57  ;;  %v15513_v27 = vld [vmem:[#allocation289_spill] sm:$0xff]  ;;  %v3882_v25 = vmul.f32 %v15515_v20, %v2249_v46  ;;  %v15516_v57 = vld [vmem:[#allocation291_spill] sm:$0xff]  ;;  %v12026_v54 = vmul.f32 0.0625, %v15517_v63  ;;  %v15523_v46 = vld [vmem:[#allocation298_spill] sm:$0xff] }
 0x6df   :  { %15506 = vst [vmem:[#allocation217_spill] sm:$0xff] %v11996_v24  ;;  %15507 = vst [vmem:[#allocation218_spill] sm:$0xff] %v11998_v53  ;;  %5242 = vperm.xlu0 %8478, %v3883_v13   ;;  %v12016_v24 = vmul.f32 0.0625, %v15513_v27  ;;  %v15514_v53 = vld [vmem:[#allocation290_spill] sm:$0xff]  ;;  %v12023_v23 = vmul.f32 0.0625, %v15516_v57  ;;  %v15519_v13 = vld [vmem:[#allocation471_spill] sm:$0xff] }
 0x6e0   :  { %v12019_v30 = vmul.f32 0.0625, %v15514_v53  ;;  %v3885_v48 = vmul.f32 %v15519_v13, %v2252_v26  ;;  %v15521_v27 = vld [vmem:[#allocation295_spill] sm:$0xff]  ;;  %v15522_v53 = vld [vmem:[#allocation297_spill] sm:$0xff]  ;;  %v12042_v20 = vmul.f32 0.0625, %v15523_v46  ;;  %v15528_v13 = vld [vmem:[#allocation302_spill] sm:$0xff] }
 0x6e1   :  { %v12036_v21 = vmul.f32 0.0625, %v15521_v27  ;;  %v12039_v50 = vmul.f32 0.0625, %v15522_v53  ;;  %v15527_v26 = vld [vmem:[#allocation301_spill] sm:$0xff]  ;;  %v12055_v27 = vmul.f32 0.0625, %v15528_v13  ;;  %v12058_v53 = vmul.f32 0.0625, %v15529_v43  ;;  %v15530_v46 = vld [vmem:[#allocation304_spill] sm:$0xff] }
 0x6e2   :  { %5239 = vperm.xlu1 %8479, %v3882_v25   ;;  %v12044_v57 = vpop.permute.xlu1 %5053  ;;  %v12046_v63 = vpop.permute.xlu0 %5062  ;;  %v12052_v34 = vmul.f32 0.0625, %v15527_v26  ;;  %v12061_v9 = vmul.f32 0.0625, %v15530_v46  ;;  %v15531_v25 = vld [vmem:[#allocation305_spill] sm:$0xff]  ;;  %v15533_v49 = vld [vmem:[#allocation468_spill] sm:$0xff]  ;;  %v15534_v26 = vld [vmem:[#allocation307_spill] sm:$0xff] }
 0x6e3   :  { %15524 = vst [vmem:[#allocation410_spill] sm:$0xff] %v12044_v57  ;;  %15525 = vst [vmem:[#allocation415_spill] sm:$0xff] %v12046_v63  ;;  %5248 = vperm.xlu0 %8478, %v3885_v48   ;;  %v12064_v57 = vmul.f32 0.0625, %v15531_v25  ;;  %v15532_v63 = vld [vmem:[#allocation306_spill] sm:$0xff]  ;;  %v3884_v2 = vmul.f32 %v15533_v49, %v2251_v56  ;;  %v12071_v29 = vmul.f32 0.0625, %v15534_v26  ;;  %v15535_v13 = vld [vmem:[#allocation308_spill] sm:$0xff] }
 0x6e4   :  { %v12067_v36 = vmul.f32 0.0625, %v15532_v63  ;;  %v12074_v51 = vmul.f32 0.0625, %v15535_v13  ;;  %v15536_v43 = vld [vmem:[#allocation309_spill] sm:$0xff]  ;;  %v15539_v25 = vld [vmem:[#allocation311_spill] sm:$0xff]  ;;  %v15540_v63 = vld [vmem:[#allocation312_spill] sm:$0xff] }
 0x6e5   :  { %v12077_v22 = vmul.f32 0.0625, %v15536_v43  ;;  %v15537_v48 = vld [vmem:[#allocation473_spill] sm:$0xff]  ;;  %v12084_v60 = vmul.f32 0.0625, %v15539_v25  ;;  %v12087_v8 = vmul.f32 0.0625, %v15540_v63  ;;  %v15545_v43 = vld [vmem:[#allocation314_spill] sm:$0xff]  ;;  %v12106_v63 = vmul.f32 0.0625, %v15551_v1 }
 0x6e6   :  { %v3887_v46 = vmul.f32 %v15537_v48, %v2254_v7  ;;  %v15542_v56 = vld [vmem:[#allocation313_spill] sm:$0xff]  ;;  %5245 = vperm.xlu1 %8479, %v3884_v2   ;;  %v12092_v26 = vpop.permute.xlu1 %5059  ;;  %v12094_v13 = vpop.permute.xlu0 %5068  ;;  %v12097_v35 = vmul.f32 0.0625, %v15545_v43  ;;  %v15547_v7 = vld [vmem:[#allocation315_spill] sm:$0xff]  ;;  %v15555_v2 = vld [vmem:[#allocation320_spill] sm:$0xff]  ;;  %v3886_v43 = vmul.f32 %v14978_v12, %v2253_v28 }
 0x6e7   :  { %15541 = vst [vmem:[#allocation219_spill] sm:$0xff] %v12087_v8  ;;  %v12090_v49 = vmul.f32 0.0625, %v15542_v56  ;;  %15543 = vst [vmem:[#allocation220_spill] sm:$0xff] %v12092_v26  ;;  %v12100_v59 = vmul.f32 0.0625, %v15547_v7  ;;  %v15549_v48 = vld [vmem:[#allocation317_spill] sm:$0xff]  ;;  %v15553_v56 = vld [vmem:[#allocation319_spill] sm:$0xff] }
 0x6e8   :  { %15544 = vst [vmem:[#allocation412_spill] sm:$0xff] %v12094_v13  ;;  %15546 = vst [vmem:[#allocation417_spill] sm:$0xff] %v12097_v35  ;;  %v12103_v25 = vmul.f32 0.0625, %v15549_v48  ;;  %5254 = vperm.xlu0 %8478, %v3887_v46   ;;  %v12109_v8 = vmul.f32 0.0625, %v15553_v56  ;;  %v12112_v26 = vmul.f32 0.0625, %v15555_v2  ;;  %v15557_v13 = vld [vmem:[#allocation321_spill] sm:$0xff] }
 0x6e9   :  { %15548 = vst [vmem:[#allocation221_spill] sm:$0xff] %v12100_v59  ;;  %15552 = vst [vmem:[#allocation414_spill] sm:$0xff] %v12106_v63  ;;  %v12115_v40 = vmul.f32 0.0625, %v15557_v13  ;;  %v15559_v7 = vld [vmem:[#allocation322_spill] sm:$0xff]  ;;  %v15560_v48 = vld [vmem:[#allocation323_spill] sm:$0xff] }
 0x6ea   :  { %15550 = vst [vmem:[#allocation222_spill] sm:$0xff] %v12103_v25  ;;  %15554 = vst [vmem:[#allocation419_spill] sm:$0xff] %v12109_v8  ;;  %v12119_v35 = vmul.f32 0.0625, %v15559_v7  ;;  %v12122_v25 = vmul.f32 0.0625, %v15560_v48  ;;  %v15562_v1 = vld [vmem:[#allocation324_spill] sm:$0xff]  ;;  %v15563_v46 = vld [vmem:[#allocation475_spill] sm:$0xff]  ;;  %5251 = vperm.xlu1 %8479, %v3886_v43   ;;  %v12140_v7 = vpop.permute.xlu1 %5065  ;;  %v12142_v48 = vpop.permute.xlu0 %5074 }
 0x6eb   :  { %15556 = vst [vmem:[#allocation223_spill] sm:$0xff] %v12112_v26  ;;  %15558 = vst [vmem:[#allocation224_spill] sm:$0xff] %v12115_v40  ;;  %v12125_v63 = vmul.f32 0.0625, %v15562_v1  ;;  %v3889_v56 = vmul.f32 %v15563_v46, %v2256_v31  ;;  %v15564_v8 = vld [vmem:[#allocation325_spill] sm:$0xff]  ;;  %v15566_v2 = vld [vmem:[#allocation326_spill] sm:$0xff] }
 0x6ec   :  { %15561 = vst [vmem:[#allocation416_spill] sm:$0xff] %v12122_v25  ;;  %v12129_v59 = vmul.f32 0.0625, %v15564_v8  ;;  %v12132_v26 = vmul.f32 0.0625, %v15566_v2  ;;  %v15567_v13 = vld [vmem:[#allocation327_spill] sm:$0xff]  ;;  %v15569_v12 = vld [vmem:[#allocation328_spill] sm:$0xff]  ;;  %15571 = vst [vmem:[#allocation418_spill] sm:$0xff] %v12140_v7 }
 0x6ed   :  { %v12135_v40 = vmul.f32 0.0625, %v15567_v13  ;;  %v12138_v28 = vmul.f32 0.0625, %v15569_v12  ;;  %15572 = vst [vmem:[#allocation423_spill] sm:$0xff] %v12142_v48  ;;  %v15573_v1 = vld [vmem:[#allocation329_spill] sm:$0xff]  ;;  %v15575_v31 = vld [vmem:[#allocation330_spill] sm:$0xff]  ;;  %v15577_v46 = vld [vmem:[#allocation331_spill] sm:$0xff]  ;;  %5260 = vperm.xlu0 %8478, %v3889_v56  }
 0x6ee   :  { %15565 = vst [vmem:[#allocation421_spill] sm:$0xff] %v12129_v59  ;;  %v12145_v25 = vmul.f32 0.0625, %v15573_v1  ;;  %v12148_v8 = vmul.f32 0.0625, %v15575_v31  ;;  %v12151_v2 = vmul.f32 0.0625, %v15577_v46  ;;  %v15579_v59 = vld [vmem:[#allocation332_spill] sm:$0xff]  ;;  %v15581_v12 = vld [vmem:[#allocation333_spill] sm:$0xff] }
 0x6ef   :  { %15568 = vst [vmem:[#allocation225_spill] sm:$0xff] %v12135_v40  ;;  %15570 = vst [vmem:[#allocation226_spill] sm:$0xff] %v12138_v28  ;;  %v12154_v13 = vmul.f32 0.0625, %v15579_v59  ;;  %v12157_v40 = vmul.f32 0.0625, %v15581_v12  ;;  %v15583_v43 = vld [vmem:[#allocation334_spill] sm:$0xff]  ;;  %v15585_v48 = vld [vmem:[#allocation335_spill] sm:$0xff] }
 0x6f0   :  { %15574 = vst [vmem:[#allocation227_spill] sm:$0xff] %v12145_v25  ;;  %15576 = vst [vmem:[#allocation228_spill] sm:$0xff] %v12148_v8  ;;  %v12160_v7 = vmul.f32 0.0625, %v15583_v43  ;;  %v12163_v28 = vmul.f32 0.0625, %v15585_v48  ;;  %v15587_v1 = vld [vmem:[#allocation472_spill] sm:$0xff]  ;;  %v15589_v46 = vld [vmem:[#allocation337_spill] sm:$0xff] }
 0x6f1   :  { %15578 = vst [vmem:[#allocation420_spill] sm:$0xff] %v12151_v2  ;;  %15580 = vst [vmem:[#allocation425_spill] sm:$0xff] %v12154_v13  ;;  %v3888_v31 = vmul.f32 %v15587_v1, %v11981_v33  ;;  %v15588_v25 = vld [vmem:[#allocation336_spill] sm:$0xff]  ;;  %v12171_v2 = vmul.f32 0.0625, %v15589_v46  ;;  %v15591_v59 = vld [vmem:[#allocation338_spill] sm:$0xff]  ;;  %v12190_v46 = vpop.permute.xlu1 %5071 }
 0x6f2   :  { %15582 = vst [vmem:[#allocation229_spill] sm:$0xff] %v12157_v40  ;;  %15584 = vst [vmem:[#allocation230_spill] sm:$0xff] %v12160_v7  ;;  %v12168_v8 = vmul.f32 0.0625, %v15588_v25  ;;  %v12174_v56 = vmul.f32 0.0625, %v15591_v59  ;;  %v15593_v12 = vld [vmem:[#allocation477_spill] sm:$0xff]  ;;  %v15594_v43 = vld [vmem:[#allocation339_spill] sm:$0xff]  ;;  %v12192_v59 = vpop.permute.xlu0 %5080 }
 0x6f3   :  { %15586 = vst [vmem:[#allocation422_spill] sm:$0xff] %v12163_v28  ;;  %15590 = vst [vmem:[#allocation427_spill] sm:$0xff] %v12171_v2  ;;  %v3891_v40 = vmul.f32 %v15593_v12, %v11985_v17  ;;  %v12179_v7 = vmul.f32 0.0625, %v15594_v43  ;;  %v15596_v48 = vld [vmem:[#allocation340_spill] sm:$0xff]  ;;  %v15597_v13 = vld [vmem:[#allocation341_spill] sm:$0xff]  ;;  %5257 = vperm.xlu1 %8479, %v3888_v31  }
 0x6f4   :  { %15592 = vst [vmem:[#allocation231_spill] sm:$0xff] %v12174_v56  ;;  %v12182_v28 = vmul.f32 0.0625, %v15596_v48  ;;  %v12185_v33 = vmul.f32 0.0625, %v15597_v13  ;;  %v15599_v25 = vld [vmem:[#allocation342_spill] sm:$0xff]  ;;  %15601 = vst [vmem:[#allocation233_spill] sm:$0xff] %v12190_v46  ;;  %v15603_v2 = vld [vmem:[#allocation343_spill] sm:$0xff] }
 0x6f5   :  { %15595 = vst [vmem:[#allocation232_spill] sm:$0xff] %v12179_v7  ;;  %v12188_v1 = vmul.f32 0.0625, %v15599_v25  ;;  %15602 = vst [vmem:[#allocation234_spill] sm:$0xff] %v12192_v59  ;;  %v12195_v56 = vmul.f32 0.0625, %v15603_v2  ;;  %v15605_v17 = vld [vmem:[#allocation344_spill] sm:$0xff]  ;;  %v15607_v43 = vld [vmem:[#allocation345_spill] sm:$0xff]  ;;  %5266 = vperm.xlu0 %8478, %v3891_v40  }
 0x6f6   :  { %15598 = vst [vmem:[#allocation424_spill] sm:$0xff] %v12185_v33  ;;  %v12198_v12 = vmul.f32 0.0625, %v15605_v17  ;;  %v12201_v48 = vmul.f32 0.0625, %v15607_v43  ;;  %v15609_v7 = vld [vmem:[#allocation346_spill] sm:$0xff]  ;;  %v15611_v25 = vld [vmem:[#allocation347_spill] sm:$0xff]  ;;  %v15613_v31 = vld [vmem:[#allocation348_spill] sm:$0xff] }
 0x6f7   :  { %15600 = vst [vmem:[#allocation429_spill] sm:$0xff] %v12188_v1  ;;  %15604 = vst [vmem:[#allocation426_spill] sm:$0xff] %v12195_v56  ;;  %v12204_v13 = vmul.f32 0.0625, %v15609_v7  ;;  %v12207_v33 = vmul.f32 0.0625, %v15611_v25  ;;  %v12210_v46 = vmul.f32 0.0625, %v15613_v31  ;;  %v15615_v59 = vld [vmem:[#allocation349_spill] sm:$0xff] }
 0x6f8   :  { %15606 = vst [vmem:[#allocation431_spill] sm:$0xff] %v12198_v12  ;;  %15608 = vst [vmem:[#allocation235_spill] sm:$0xff] %v12201_v48  ;;  %v12213_v1 = vmul.f32 0.0625, %v15615_v59  ;;  %v15617_v2 = vld [vmem:[#allocation474_spill] sm:$0xff]  ;;  %v15619_v43 = vld [vmem:[#allocation351_spill] sm:$0xff] }
 0x6f9   :  { %15610 = vst [vmem:[#allocation236_spill] sm:$0xff] %v12204_v13  ;;  %15612 = vst [vmem:[#allocation428_spill] sm:$0xff] %v12207_v33  ;;  %v3890_v17 = vmul.f32 %v15617_v2, %v11988_v45  ;;  %v15618_v56 = vld [vmem:[#allocation350_spill] sm:$0xff]  ;;  %v12221_v48 = vmul.f32 0.0625, %v15619_v43  ;;  %v15621_v7 = vld [vmem:[#allocation352_spill] sm:$0xff]  ;;  %v12240_v43 = vpop.permute.xlu1 %5077 }
 0x6fa   :  { %15614 = vst [vmem:[#allocation433_spill] sm:$0xff] %v12210_v46  ;;  %15616 = vst [vmem:[#allocation237_spill] sm:$0xff] %v12213_v1  ;;  %v12218_v12 = vmul.f32 0.0625, %v15618_v56  ;;  %v12224_v40 = vmul.f32 0.0625, %v15621_v7  ;;  %v15623_v25 = vld [vmem:[#allocation479_spill] sm:$0xff]  ;;  %v15624_v31 = vld [vmem:[#allocation353_spill] sm:$0xff]  ;;  %v12242_v7 = vpop.permute.xlu0 %5086 }
 0x6fb   :  { %15620 = vst [vmem:[#allocation238_spill] sm:$0xff] %v12221_v48  ;;  %v3893_v33 = vmul.f32 %v15623_v25, %v11991_v3  ;;  %v12229_v46 = vmul.f32 0.0625, %v15624_v31  ;;  %v15626_v59 = vld [vmem:[#allocation354_spill] sm:$0xff]  ;;  %v15627_v13 = vld [vmem:[#allocation355_spill] sm:$0xff]  ;;  %v15629_v56 = vld [vmem:[#allocation356_spill] sm:$0xff]  ;;  %5263 = vperm.xlu1 %8479, %v3890_v17  }
 0x6fc   :  { %15622 = vst [vmem:[#allocation435_spill] sm:$0xff] %v12224_v40  ;;  %v12232_v1 = vmul.f32 0.0625, %v15626_v59  ;;  %v12235_v45 = vmul.f32 0.0625, %v15627_v13  ;;  %v12238_v2 = vmul.f32 0.0625, %v15629_v56  ;;  %15631 = vst [vmem:[#allocation437_spill] sm:$0xff] %v12240_v43  ;;  %v15633_v48 = vld [vmem:[#allocation357_spill] sm:$0xff] }
 0x6fd   :  { %15625 = vst [vmem:[#allocation239_spill] sm:$0xff] %v12229_v46  ;;  %15632 = vst [vmem:[#allocation241_spill] sm:$0xff] %v12242_v7  ;;  %v12245_v40 = vmul.f32 0.0625, %v15633_v48  ;;  %v15635_v3 = vld [vmem:[#allocation358_spill] sm:$0xff]  ;;  %v15636_v31 = vld [vmem:[#allocation359_spill] sm:$0xff]  ;;  %5272 = vperm.xlu0 %8478, %v3893_v33  }
 0x6fe   :  { %15628 = vst [vmem:[#allocation240_spill] sm:$0xff] %v12235_v45  ;;  %15630 = vst [vmem:[#allocation432_spill] sm:$0xff] %v12238_v2  ;;  %v12248_v25 = vmul.f32 0.0625, %v15635_v3  ;;  %v12251_v59 = vmul.f32 0.0625, %v15636_v31  ;;  %v15638_v46 = vld [vmem:[#allocation360_spill] sm:$0xff]  ;;  %v15640_v56 = vld [vmem:[#allocation361_spill] sm:$0xff] }
 0x6ff   :  { %15634 = vst [vmem:[#allocation242_spill] sm:$0xff] %v12245_v40  ;;  %v12254_v13 = vmul.f32 0.0625, %v15638_v46  ;;  %v12257_v45 = vmul.f32 0.0625, %v15640_v56  ;;  %v15642_v17 = vld [vmem:[#allocation362_spill] sm:$0xff]  ;;  %v15644_v7 = vld [vmem:[#allocation363_spill] sm:$0xff]  ;;  %v15646_v48 = vld [vmem:[#allocation476_spill] sm:$0xff]  ;;  %v15650_v56 = vlaneseq }
 0x700   :  { %15637 = vst [vmem:[#allocation434_spill] sm:$0xff] %v12251_v59  ;;  %v12260_v43 = vmul.f32 0.0625, %v15642_v17  ;;  %v12263_v2 = vmul.f32 0.0625, %v15644_v7  ;;  %v3892_v3 = vmul.f32 %v15646_v48, %v11994_v55  ;;  %v15647_v40 = vld [vmem:[#allocation478_spill] sm:$0xff]  ;;  %v15648_v59 = vld [vmem:[#allocation480_spill] sm:$0xff]  ;;  %v15649_v33 = vld [vmem:[#allocation481_spill] sm:$0xff] }
 0x701   :  { %15639 = vst [vmem:[#allocation439_spill] sm:$0xff] %v12254_v13  ;;  %15641 = vst [vmem:[#allocation243_spill] sm:$0xff] %v12257_v45  ;;  %v3894_v31 = vmul.f32 %v15647_v40, %v12004_v5  ;;  %v3896_v46 = vmul.f32 %v15648_v59, %v12010_v19  ;;  %v3895_v13 = vmul.f32 %v15649_v33, %v12001_v18  ;;  %v5509_v45 = vand.u32 127, %v15650_v56  ;;  %v15651_v17 = vld [vmem:[#allocation482_spill] sm:$0xff]  ;;  %v15652_v7 = vld [vmem:[#allocation483_spill] sm:$0xff]  ;;  %v12286_v19 = vpop.permute.xlu1 %5083  ;;  %v12288_v18 = vpop.permute.xlu0 %5092 }
 0x702   :  { %15643 = vst [vmem:[#allocation244_spill] sm:$0xff] %v12260_v43  ;;  %15645 = vst [vmem:[#allocation436_spill] sm:$0xff] %v12263_v2  ;;  %v12276_v43 = vmul.f32 %v15651_v17, %v12016_v24  ;;  %v3897_v2 = vmul.f32 %v15652_v7, %v12007_v62  ;;  %v15653_v55 = vld [vmem:[#allocation484_spill] sm:$0xff]  ;;  %v15654_v5 = vld [vmem:[#allocation485_spill] sm:$0xff]  ;;  %5269 = vperm.xlu1 %8479, %v3892_v3   ;;  %v12292_v59 = vmul.f32 %v15025_v11, %v12029_v16 }
 0x703   :  { %v12282_v48 = vmul.f32 %v15653_v55, %v12023_v23  ;;  %v3899_v40 = vmul.f32 %v15654_v5, %v12013_v42  ;;  %15655 = vst [vmem:[#allocation441_spill] sm:$0xff] %v12286_v19  ;;  %15656 = vst [vmem:[#allocation245_spill] sm:$0xff] %v12288_v18  ;;  %v15657_v24 = vld [vmem:[#allocation487_spill] sm:$0xff]  ;;  %v5514_v62 = vadd.s32 4294967288, %v5509_v45  ;;  %v5528_v56 = vadd.s32 4294967272, %v5509_v45  ;;  %5278 = vperm.xlu0 %8478, %v3895_v13   ;;  %v15658_v42 = vld [vmem:[#allocation489_spill] sm:$0xff] }
 0x704   :  { %v12296_v33 = vmul.f32 %v15657_v24, %v12019_v30  ;;  %v12300_v23 = vmul.f32 %v15031_v6, %v12036_v21  ;;  %v12304_v3 = vmul.f32 %v15658_v42, %v12026_v54  ;;  %v5521_v17 = vadd.s32 4294967280, %v5509_v45  ;;  %v15659_v30 = vld [vmem:[#allocation491_spill] sm:$0xff]  ;;  %v15660_v21 = vld [vmem:[#allocation296_spill] sm:$0xff]  ;;  %v15661_v54 = vld [vmem:[#allocation493_spill] sm:$0xff] }
 0x705   :  { %v5542_v7 = vadd.s32 4294967256, %v5509_v45  ;;  %v12308_v16 = vmul.f32 %v15037_v4, %v12042_v20  ;;  %v12312_v11 = vmul.f32 %v15659_v30, %v12033_v61  ;;  %v12316_v13 = vmul.f32 %v15042_v37, %v12052_v34  ;;  %v12329_v61 = vpop.permute.xlu1 %5089  ;;  %v12331_v24 = vpop.permute.xlu0 %5098  ;;  %v15664_v37 = vld [vmem:[#allocation495_spill] sm:$0xff]  ;;  %v15681_v18 = vld [vmem:[#allocation501_spill] sm:$0xff]  ;;  %v15689_v19 = vld [vmem:[#allocation504_spill] sm:$0xff] }
 0x706   :  { %v12319_v6 = vsub.s32 %v5509_v45, %v15660_v21  ;;  %v12323_v55 = vmul.f32 %v15661_v54, %v12039_v50  ;;  %v12327_v5 = vmul.f32 %v15047_v44, %v12058_v53  ;;  %v5535_v4 = vadd.s32 4294967264, %v5509_v45  ;;  %5275 = vperm.xlu1 %8479, %v3894_v31   ;;  %15662 = vst [vmem:[#allocation246_spill] sm:$0xff] %v12329_v61 }
 0x707   :  { %v5556_v20 = vadd.s32 4294967240, %v5509_v45  ;;  %15663 = vst [vmem:[#allocation438_spill] sm:$0xff] %v12331_v24  ;;  %v12335_v34 = vmul.f32 %v15664_v37, %v12049_v10  ;;  %v12339_v42 = vmul.f32 %v10574_v0, %v12064_v57  ;;  %v12342_v50 = vsub.s32 %v5514_v62, %v15660_v21  ;;  %5284 = vperm.xlu0 %8478, %v3897_v2  }
 0x708   :  { %v12345_v44 = vsub.s32 %v5528_v56, %v15660_v21  ;;  %v12348_v53 = vsub.s32 %v5521_v17, %v15660_v21  ;;  %v12351_v31 = vsub.s32 %v5542_v7, %v15660_v21  ;;  %v5549_v10 = vadd.s32 4294967248, %v5509_v45 }
 0x709   :  { %v5570_v30 = vadd.s32 4294967224, %v5509_v45  ;;  %v12355_v0 = vmul.f32 %v10580_v52, %v12055_v27  ;;  %v12359_v57 = vmul.f32 %v10582_v41, %v12071_v29  ;;  %v5563_v62 = vadd.s32 4294967232, %v5509_v45  ;;  %v12367_v37 = vpop.permute.xlu1 %5095  ;;  %v12369_v52 = vpop.permute.xlu0 %5104 }
 0x70a   :  { %v5584_v2 = vadd.s32 4294967208, %v5509_v45  ;;  %v12362_v56 = vsub.s32 %v5535_v4, %v15660_v21  ;;  %v12365_v17 = vsub.s32 %v5556_v20, %v15660_v21  ;;  %v5577_v7 = vadd.s32 4294967216, %v5509_v45  ;;  %5281 = vperm.xlu1 %8479, %v3896_v46   ;;  %15665 = vst [vmem:[#allocation443_spill] sm:$0xff] %v12367_v37  ;;  %15666 = vst [vmem:[#allocation247_spill] sm:$0xff] %v12369_v52 }
 0x70b   :  { %v5598_v54 = vadd.s32 4294967192, %v5509_v45  ;;  %v12373_v41 = vmul.f32 %v10588_v39, %v12061_v9  ;;  %v12377_v29 = vmul.f32 %v10590_v38, %v12077_v22  ;;  %v5591_v27 = vadd.s32 4294967200, %v5509_v45  ;;  %5290 = vperm.xlu0 %8478, %v3899_v40  }
 0x70c   :  { %v5612_v4 = vadd.s32 4294967176, %v5509_v45  ;;  %v12381_v20 = vmul.f32 %v10596_v32, %v12067_v36  ;;  %v12384_v46 = vsub.s32 %v5549_v10, %v15660_v21  ;;  %v12387_v52 = vsub.s32 %v5570_v30, %v15660_v21  ;;  %v15670_v10 = vld [vmem:[#allocation221_spill] sm:$0xff] }
 0x70d   :  { %v5605_v39 = vadd.s32 4294967184, %v5509_v45  ;;  %v12391_v9 = vmul.f32 %v10598_v47, %v12084_v60  ;;  %v12395_v38 = vmul.f32 %v10604_v14, %v12074_v51  ;;  %v12398_v32 = vsub.s32 %v5563_v62, %v15660_v21  ;;  %v15667_v45 = vld [vmem:[#allocation496_spill] sm:$0xff]  ;;  %v12418_v60 = vpop.permute.xlu1 %5101  ;;  %v12420_v51 = vpop.permute.xlu0 %5110  ;;  %v15671_v30 = vld [vmem:[#allocation497_spill] sm:$0xff] }
 0x70e   :  { %v12401_v22 = vsub.s32 %v5584_v2, %v15660_v21  ;;  %v12405_v36 = vmul.f32 %v10606_v58, %v12090_v49  ;;  %v12409_v40 = vmul.f32 %v15667_v45, %v12081_v15  ;;  %v12412_v47 = vsub.s32 %v5577_v7, %v15660_v21  ;;  %5287 = vperm.xlu1 %8479, %v12276_v43   ;;  %v15672_v49 = vld [vmem:[#allocation41_spill] sm:$0xff]  ;;  %v15673_v43 = vld [vmem:[#allocation219_spill] sm:$0xff]  ;;  %v15674_v7 = vld [vmem:[#allocation498_spill] sm:$0xff] }
 0x70f   :  { %v12415_v14 = vsub.s32 %v5598_v54, %v15660_v21  ;;  %15668 = vst [vmem:[#allocation248_spill] sm:$0xff] %v12418_v60  ;;  %15669 = vst [vmem:[#allocation440_spill] sm:$0xff] %v12420_v51  ;;  %v12424_v58 = vmul.f32 %v15671_v30, %v15670_v10  ;;  %v5518_v15 = vrot.slane %v15672_v49, %v12342_v50  ;;  %5296 = vperm.xlu0 %8478, %v12296_v33   ;;  %v15675_v45 = vld [vmem:[#allocation414_spill] sm:$0xff]  ;;  %v15676_v51 = vld [vmem:[#allocation499_spill] sm:$0xff] }
 0x710   :  { %v12429_v62 = vsub.s32 %v5591_v27, %v15660_v21  ;;  %v12432_v2 = vsub.s32 %v5612_v4, %v15660_v21  ;;  %v12437_v54 = vmul.f32 %v15674_v7, %v15673_v43  ;;  %v12441_v24 = vmul.f32 %v15676_v51, %v15675_v45  ;;  %v15677_v10 = vld [vmem:[#allocation43_spill] sm:$0xff]  ;;  %v15678_v49 = vld [vmem:[#allocation417_spill] sm:$0xff]  ;;  %v15679_v4 = vld [vmem:[#allocation500_spill] sm:$0xff] }
 0x711   :  { %v5525_v30 = vrot.slane %v15677_v10, %v12348_v53  ;;  %v12446_v27 = vsub.s32 %v5605_v39, %v15660_v21  ;;  %v12450_v60 = vmul.f32 %v15679_v4, %v15678_v49  ;;  %v15680_v33 = vld [vmem:[#allocation223_spill] sm:$0xff]  ;;  %v15683_v43 = vld [vmem:[#allocation222_spill] sm:$0xff]  ;;  %v15685_v51 = vld [vmem:[#allocation40_spill] sm:$0xff] }
 0x712   :  { %v12454_v37 = vmul.f32 %v15681_v18, %v15680_v33  ;;  %v15684_v7 = vld [vmem:[#allocation502_spill] sm:$0xff]  ;;  %v5513_v45 = vrot.slane %v15685_v51, %v12319_v6  ;;  %v15686_v10 = vld [vmem:[#allocation503_spill] sm:$0xff]  ;;  %v15690_v4 = vld [vmem:[#allocation505_spill] sm:$0xff]  ;;  %5293 = vperm.xlu1 %8479, %v12282_v48   ;;  %v12481_v51 = vpop.permute.xlu0 %5116 }
 0x713   :  { %v12458_v61 = vmul.f32 %v15684_v7, %v15683_v43  ;;  %v12464_v21 = vmul.f32 %v15686_v10, %v12119_v35  ;;  %v15688_v39 = vld [vmem:[#allocation419_spill] sm:$0xff]  ;;  %v12472_v18 = vmul.f32 %v15690_v4, %v12125_v63  ;;  %v15692_v33 = vld [vmem:[#allocation224_spill] sm:$0xff]  ;;  %v12479_v7 = vpop.permute.xlu1 %5107  ;;  %15696 = vst [vmem:[#allocation251_spill] sm:$0xff] %v12481_v51  ;;  %v15702_v63 = vld [vmem:[#allocation226_spill] sm:$0xff]  ;;  %5302 = vperm.xlu0 %8478, %v12304_v3  }
 0x714   :  { %15682 = vst [vmem:[#allocation445_spill] sm:$0xff] %v12454_v37  ;;  %v12468_v49 = vmul.f32 %v15689_v19, %v15688_v39  ;;  %v15693_v37 = vld [vmem:[#allocation506_spill] sm:$0xff]  ;;  %15695 = vst [vmem:[#allocation447_spill] sm:$0xff] %v12479_v7  ;;  %v15697_v35 = vld [vmem:[#allocation507_spill] sm:$0xff] }
 0x715   :  { %15687 = vst [vmem:[#allocation249_spill] sm:$0xff] %v12464_v21  ;;  %15691 = vst [vmem:[#allocation250_spill] sm:$0xff] %v12472_v18  ;;  %v12476_v43 = vmul.f32 %v15693_v37, %v15692_v33  ;;  %v12485_v10 = vmul.f32 %v15697_v35, %v12132_v26  ;;  %v15699_v19 = vld [vmem:[#allocation416_spill] sm:$0xff]  ;;  %v15703_v4 = vld [vmem:[#allocation509_spill] sm:$0xff]  ;;  %v5520_v37 = vsel %vm5519_vm2, %v5518_v15, %v5513_v45 }
 0x716   :  { %v15700_v39 = vld [vmem:[#allocation508_spill] sm:$0xff]  ;;  %v12493_v18 = vmul.f32 %v15703_v4, %v15702_v63  ;;  %v15705_v48 = vld [vmem:[#allocation421_spill] sm:$0xff]  ;;  %v15706_v33 = vld [vmem:[#allocation3_spill] sm:$0xff]  ;;  %v5527_v51 = vsel %vm14220_vm3, %v5525_v30, %v5520_v37  ;;  %5299 = vperm.xlu1 %8479, %v12292_v59  }
 0x717   :  { %15694 = vst [vmem:[#allocation442_spill] sm:$0xff] %v12476_v43  ;;  %15698 = vst [vmem:[#allocation252_spill] sm:$0xff] %v12485_v10  ;;  %v12489_v21 = vmul.f32 %v15700_v39, %v15699_v19  ;;  %v12499_v7 = vmul.f32 %v15706_v33, %v15705_v48  ;;  %v15708_v26 = vld [vmem:[#allocation45_spill] sm:$0xff]  ;;  %v15709_v19 = vld [vmem:[#allocation56_spill] sm:$0xff]  ;;  %5308 = vperm.xlu0 %8478, %v12312_v11  }
 0x718   :  { %15704 = vst [vmem:[#allocation449_spill] sm:$0xff] %v12493_v18  ;;  %v5539_v35 = vrot.slane %v15708_v26, %v12362_v56  ;;  %v5622_v39 = vrot.slane %v15709_v19, %v12319_v6  ;;  %v15710_v10 = vld [vmem:[#allocation228_spill] sm:$0xff]  ;;  %v15711_v63 = vld [vmem:[#allocation510_spill] sm:$0xff]  ;;  %v15713_v15 = vld [vmem:[#allocation225_spill] sm:$0xff] }
 0x719   :  { %15701 = vst [vmem:[#allocation444_spill] sm:$0xff] %v12489_v21  ;;  %15707 = vst [vmem:[#allocation253_spill] sm:$0xff] %v12499_v7  ;;  %v12508_v4 = vmul.f32 %v15711_v63, %v15710_v10  ;;  %v15714_v45 = vld [vmem:[#allocation4_spill] sm:$0xff]  ;;  %v15716_v48 = vld [vmem:[#allocation42_spill] sm:$0xff] }
 0x71a   :  { %v12512_v3 = vmul.f32 %v15714_v45, %v15713_v15  ;;  %v5532_v33 = vrot.slane %v15716_v48, %v12345_v44  ;;  %v15717_v30 = vld [vmem:[#allocation58_spill] sm:$0xff]  ;;  %v15718_v26 = vld [vmem:[#allocation425_spill] sm:$0xff]  ;;  %v15721_v19 = vld [vmem:[#allocation227_spill] sm:$0xff]  ;;  %v12533_v48 = vpop.permute.xlu1 %5113  ;;  %5305 = vperm.xlu1 %8479, %v12300_v23  }
 0x71b   :  { %15712 = vst [vmem:[#allocation254_spill] sm:$0xff] %v12508_v4  ;;  %v5631_v37 = vrot.slane %v15717_v30, %v12348_v53  ;;  %v15719_v18 = vld [vmem:[#allocation5_spill] sm:$0xff]  ;;  %v15722_v21 = vld [vmem:[#allocation6_spill] sm:$0xff]  ;;  %v15725_v63 = vld [vmem:[#allocation7_spill] sm:$0xff]  ;;  %v12535_v30 = vpop.permute.xlu0 %5122  ;;  %5314 = vperm.xlu0 %8478, %v12323_v55  }
 0x71c   :  { %15715 = vst [vmem:[#allocation446_spill] sm:$0xff] %v12512_v3  ;;  %v12520_v7 = vmul.f32 %v15719_v18, %v15718_v26  ;;  %v12524_v43 = vmul.f32 %v15722_v21, %v15721_v19  ;;  %v15724_v10 = vld [vmem:[#allocation230_spill] sm:$0xff]  ;;  %v15726_v15 = vld [vmem:[#allocation55_spill] sm:$0xff]  ;;  %15727 = vst [vmem:[#allocation256_spill] sm:$0xff] %v12533_v48 }
 0x71d   :  { %v12528_v4 = vmul.f32 %v15725_v63, %v15724_v10  ;;  %v5626_v45 = vrot.slane %v15726_v15, %v12342_v50  ;;  %15728 = vst [vmem:[#allocation448_spill] sm:$0xff] %v12535_v30  ;;  %v15729_v3 = vld [vmem:[#allocation420_spill] sm:$0xff]  ;;  %v15732_v21 = vld [vmem:[#allocation9_spill] sm:$0xff]  ;;  %v15734_v10 = vld [vmem:[#allocation10_spill] sm:$0xff]  ;;  %v5534_v15 = vsel %vm14221_vm4, %v5532_v33, %v5527_v51 }
 0x71e   :  { %15720 = vst [vmem:[#allocation451_spill] sm:$0xff] %v12520_v7  ;;  %15723 = vst [vmem:[#allocation255_spill] sm:$0xff] %v12524_v43  ;;  %v15730_v18 = vld [vmem:[#allocation8_spill] sm:$0xff]  ;;  %v12543_v19 = vmul.f32 %v15732_v21, %v12168_v8  ;;  %v15733_v7 = vld [vmem:[#allocation229_spill] sm:$0xff]  ;;  %v5541_v30 = vsel %vm5540_vm5, %v5539_v35, %v5534_v15  ;;  %5311 = vperm.xlu1 %8479, %v12308_v16  }
 0x71f   :  { %v12539_v26 = vmul.f32 %v15730_v18, %v15729_v3  ;;  %v12547_v63 = vmul.f32 %v15734_v10, %v15733_v7  ;;  %v15735_v59 = vld [vmem:[#allocation231_spill] sm:$0xff]  ;;  %v15738_v3 = vld [vmem:[#allocation430_spill] sm:$0xff]  ;;  %v5627_v8 = vsel %vm5519_vm2, %v5626_v45, %v5622_v39  ;;  %v15741_v51 = vld [vmem:[#allocation44_spill] sm:$0xff]  ;;  %5320 = vperm.xlu0 %8478, %v12335_v34  }
 0x720   :  { %v15736_v48 = vld [vmem:[#allocation11_spill] sm:$0xff]  ;;  %v5553_v18 = vrot.slane %v15738_v3, %v12384_v46  ;;  %v15739_v21 = vld [vmem:[#allocation422_spill] sm:$0xff]  ;;  %v5546_v33 = vrot.slane %v15741_v51, %v12351_v31  ;;  %v5632_v11 = vsel %vm14220_vm3, %v5631_v37, %v5627_v8  ;;  %v15743_v35 = vld [vmem:[#allocation13_spill] sm:$0xff]  ;;  %v12583_v37 = vpop.permute.xlu1 %5119  ;;  %v12585_v8 = vpop.permute.xlu0 %5128 }
 0x721   :  { %15731 = vst [vmem:[#allocation453_spill] sm:$0xff] %v12539_v26  ;;  %v12553_v43 = vmul.f32 %v15736_v48, %v15735_v59  ;;  %v15740_v26 = vld [vmem:[#allocation12_spill] sm:$0xff]  ;;  %v12570_v15 = vmul.f32 %v15743_v35, %v12182_v28  ;;  %v15745_v59 = vld [vmem:[#allocation427_spill] sm:$0xff]  ;;  %v15746_v3 = vld [vmem:[#allocation14_spill] sm:$0xff] }
 0x722   :  { %v12561_v7 = vmul.f32 %v15740_v26, %v15739_v21  ;;  %v15742_v48 = vld [vmem:[#allocation60_spill] sm:$0xff]  ;;  %v12574_v39 = vmul.f32 %v15746_v3, %v15745_v59  ;;  %v15748_v45 = vld [vmem:[#allocation429_spill] sm:$0xff]  ;;  %v15749_v26 = vld [vmem:[#allocation15_spill] sm:$0xff]  ;;  %15752 = vst [vmem:[#allocation259_spill] sm:$0xff] %v12583_v37  ;;  %5317 = vperm.xlu1 %8479, %v12316_v13  }
 0x723   :  { %15737 = vst [vmem:[#allocation257_spill] sm:$0xff] %v12553_v43  ;;  %v5641_v10 = vrot.slane %v15742_v48, %v12362_v56  ;;  %15744 = vst [vmem:[#allocation258_spill] sm:$0xff] %v12570_v15  ;;  %v12578_v21 = vmul.f32 %v15749_v26, %v15748_v45  ;;  %v15751_v51 = vld [vmem:[#allocation57_spill] sm:$0xff]  ;;  %v15754_v48 = vld [vmem:[#allocation232_spill] sm:$0xff]  ;;  %5326 = vperm.xlu0 %8478, %v12355_v0  }
 0x724   :  { %15747 = vst [vmem:[#allocation450_spill] sm:$0xff] %v12574_v39  ;;  %v5636_v43 = vrot.slane %v15751_v51, %v12345_v44  ;;  %15753 = vst [vmem:[#allocation260_spill] sm:$0xff] %v12585_v8  ;;  %v15755_v28 = vld [vmem:[#allocation16_spill] sm:$0xff]  ;;  %v15757_v15 = vld [vmem:[#allocation431_spill] sm:$0xff]  ;;  %v5548_v51 = vsel %vm14219_vm6, %v5546_v33, %v5541_v30 }
 0x725   :  { %15750 = vst [vmem:[#allocation455_spill] sm:$0xff] %v12578_v21  ;;  %v12589_v35 = vmul.f32 %v15755_v28, %v15754_v48  ;;  %v15758_v59 = vld [vmem:[#allocation17_spill] sm:$0xff]  ;;  %v15760_v39 = vld [vmem:[#allocation424_spill] sm:$0xff]  ;;  %v15761_v45 = vld [vmem:[#allocation18_spill] sm:$0xff]  ;;  %v5555_v8 = vsel %vm5554_vm7, %v5553_v18, %v5548_v51 }
 0x726   :  { %v12593_v3 = vmul.f32 %v15758_v59, %v15757_v15  ;;  %v12597_v26 = vmul.f32 %v15761_v45, %v15760_v39  ;;  %v15763_v23 = vld [vmem:[#allocation236_spill] sm:$0xff]  ;;  %v15764_v37 = vld [vmem:[#allocation19_spill] sm:$0xff]  ;;  %v5637_v15 = vsel %vm14221_vm4, %v5636_v43, %v5632_v11  ;;  %v15767_v59 = vld [vmem:[#allocation426_spill] sm:$0xff]  ;;  %5323 = vperm.xlu1 %8479, %v12327_v5  }
 0x727   :  { %15756 = vst [vmem:[#allocation452_spill] sm:$0xff] %v12589_v35  ;;  %v12603_v21 = vmul.f32 %v15764_v37, %v15763_v23  ;;  %v15766_v48 = vld [vmem:[#allocation48_spill] sm:$0xff]  ;;  %v15770_v39 = vld [vmem:[#allocation46_spill] sm:$0xff]  ;;  %v5642_v55 = vsel %vm5540_vm5, %v5641_v10, %v5637_v15  ;;  %v15772_v45 = vld [vmem:[#allocation433_spill] sm:$0xff]  ;;  %v12633_v10 = vpop.permute.xlu1 %5125  ;;  %v12635_v15 = vpop.permute.xlu0 %5134  ;;  %5332 = vperm.xlu0 %8478, %v12373_v41  }
 0x728   :  { %15759 = vst [vmem:[#allocation457_spill] sm:$0xff] %v12593_v3  ;;  %15762 = vst [vmem:[#allocation261_spill] sm:$0xff] %v12597_v26  ;;  %v5567_v28 = vrot.slane %v15766_v48, %v12398_v32  ;;  %v15768_v3 = vld [vmem:[#allocation20_spill] sm:$0xff]  ;;  %v5560_v30 = vrot.slane %v15770_v39, %v12365_v17  ;;  %v15771_v33 = vld [vmem:[#allocation62_spill] sm:$0xff] }
 0x729   :  { %15765 = vst [vmem:[#allocation262_spill] sm:$0xff] %v12603_v21  ;;  %v12611_v35 = vmul.f32 %v15768_v3, %v15767_v59  ;;  %v5651_v37 = vrot.slane %v15771_v33, %v12384_v46  ;;  %v15773_v18 = vld [vmem:[#allocation21_spill] sm:$0xff]  ;;  %v15775_v23 = vld [vmem:[#allocation235_spill] sm:$0xff]  ;;  %v15776_v48 = vld [vmem:[#allocation22_spill] sm:$0xff] }
 0x72a   :  { %v12620_v51 = vmul.f32 %v15773_v18, %v15772_v45  ;;  %v12624_v43 = vmul.f32 %v15776_v48, %v15775_v23  ;;  %v15778_v11 = vld [vmem:[#allocation23_spill] sm:$0xff]  ;;  %15780 = vst [vmem:[#allocation264_spill] sm:$0xff] %v12633_v10  ;;  %15781 = vst [vmem:[#allocation456_spill] sm:$0xff] %v12635_v15  ;;  %v15782_v33 = vld [vmem:[#allocation428_spill] sm:$0xff]  ;;  %5329 = vperm.xlu1 %8479, %v12339_v42  }
 0x72b   :  { %15769 = vst [vmem:[#allocation454_spill] sm:$0xff] %v12611_v35  ;;  %v12628_v3 = vmul.f32 %v15778_v11, %v12218_v12  ;;  %v15779_v59 = vld [vmem:[#allocation59_spill] sm:$0xff]  ;;  %v15783_v45 = vld [vmem:[#allocation24_spill] sm:$0xff]  ;;  %v15786_v48 = vld [vmem:[#allocation25_spill] sm:$0xff]  ;;  %5338 = vperm.xlu0 %8478, %v12381_v20  }
 0x72c   :  { %15774 = vst [vmem:[#allocation459_spill] sm:$0xff] %v12620_v51  ;;  %15777 = vst [vmem:[#allocation263_spill] sm:$0xff] %v12624_v43  ;;  %v5646_v39 = vrot.slane %v15779_v59, %v12351_v31  ;;  %v12639_v18 = vmul.f32 %v15783_v45, %v15782_v33  ;;  %v15785_v23 = vld [vmem:[#allocation435_spill] sm:$0xff]  ;;  %v15787_v12 = vld [vmem:[#allocation237_spill] sm:$0xff]  ;;  %v5562_v59 = vsel %vm5561_vm8, %v5560_v30, %v5555_v8 }
 0x72d   :  { %v12643_v51 = vmul.f32 %v15786_v48, %v15785_v23  ;;  %v15788_v11 = vld [vmem:[#allocation26_spill] sm:$0xff]  ;;  %v15789_v16 = vld [vmem:[#allocation27_spill] sm:$0xff]  ;;  %v5569_v35 = vsel %vm5568_vm9, %v5567_v28, %v5562_v59  ;;  %v15793_v8 = vld [vmem:[#allocation64_spill] sm:$0xff] }
 0x72e   :  { %15784 = vst [vmem:[#allocation461_spill] sm:$0xff] %v12639_v18  ;;  %v12647_v43 = vmul.f32 %v15788_v11, %v15787_v12  ;;  %v12653_v21 = vmul.f32 %v15789_v16, %v12232_v1  ;;  %v15791_v33 = vld [vmem:[#allocation50_spill] sm:$0xff]  ;;  %v5647_v23 = vsel %vm14219_vm6, %v5646_v39, %v5642_v55  ;;  %v15792_v48 = vld [vmem:[#allocation47_spill] sm:$0xff]  ;;  %v5661_v34 = vrot.slane %v15793_v8, %v12398_v32  ;;  %v15794_v30 = vld [vmem:[#allocation72_spill] sm:$0xff]  ;;  %v12681_v8 = vpop.permute.xlu0 %5140 }
 0x72f   :  { %v5581_v45 = vrot.slane %v15791_v33, %v12412_v47  ;;  %v5574_v18 = vrot.slane %v15792_v48, %v12387_v52  ;;  %v5652_v12 = vsel %vm5554_vm7, %v5651_v37, %v5647_v23  ;;  %v5701_v1 = vrot.slane %v15794_v30, %v12319_v6  ;;  %v15795_v11 = vld [vmem:[#allocation238_spill] sm:$0xff]  ;;  %v15796_v16 = vld [vmem:[#allocation28_spill] sm:$0xff]  ;;  %v15798_v33 = vld [vmem:[#allocation29_spill] sm:$0xff]  ;;  %v12679_v48 = vpop.permute.xlu1 %5131  ;;  %15803 = vst [vmem:[#allocation463_spill] sm:$0xff] %v12681_v8 }
 0x730   :  { %15790 = vst [vmem:[#allocation265_spill] sm:$0xff] %v12653_v21  ;;  %v12668_v28 = vmul.f32 %v15796_v16, %v15795_v11  ;;  %v15797_v59 = vld [vmem:[#allocation432_spill] sm:$0xff]  ;;  %v15800_v55 = vld [vmem:[#allocation61_spill] sm:$0xff]  ;;  %v15801_v37 = vld [vmem:[#allocation74_spill] sm:$0xff]  ;;  %5335 = vperm.xlu1 %8479, %v12359_v57   ;;  %5344 = vperm.xlu0 %8478, %v12395_v38  }
 0x731   :  { %v12672_v15 = vmul.f32 %v15798_v33, %v15797_v59  ;;  %v5656_v39 = vrot.slane %v15800_v55, %v12365_v17  ;;  %v5710_v23 = vrot.slane %v15801_v37, %v12348_v53  ;;  %15802 = vst [vmem:[#allocation458_spill] sm:$0xff] %v12679_v48  ;;  %v15804_v30 = vld [vmem:[#allocation239_spill] sm:$0xff]  ;;  %v15805_v11 = vld [vmem:[#allocation30_spill] sm:$0xff]  ;;  %v15809_v13 = vld [vmem:[#allocation240_spill] sm:$0xff] }
 0x732   :  { %v12685_v16 = vmul.f32 %v15805_v11, %v15804_v30  ;;  %v15806_v59 = vld [vmem:[#allocation31_spill] sm:$0xff]  ;;  %v15810_v37 = vld [vmem:[#allocation32_spill] sm:$0xff]  ;;  %v15813_v21 = vld [vmem:[#allocation33_spill] sm:$0xff] }
 0x733   :  { %15799 = vst [vmem:[#allocation266_spill] sm:$0xff] %v12672_v15  ;;  %v12689_v33 = vmul.f32 %v15806_v59, %v12248_v25  ;;  %v5576_v15 = vsel %vm5575_vm10, %v5574_v18, %v5569_v35  ;;  %v15808_v55 = vld [vmem:[#allocation71_spill] sm:$0xff]  ;;  %v12697_v48 = vmul.f32 %v15810_v37, %v15809_v13  ;;  %v5657_v25 = vsel %vm5561_vm8, %v5656_v39, %v5652_v12  ;;  %v15815_v11 = vld [vmem:[#allocation52_spill] sm:$0xff]  ;;  %v15816_v59 = vld [vmem:[#allocation66_spill] sm:$0xff]  ;;  %v12721_v39 = vpop.permute.xlu0 %5146 }
 0x734   :  { %v5705_v26 = vrot.slane %v15808_v55, %v12342_v50  ;;  %v15812_v8 = vld [vmem:[#allocation439_spill] sm:$0xff]  ;;  %v5583_v30 = vsel %vm5582_vm11, %v5581_v45, %v5576_v15  ;;  %v5595_v35 = vrot.slane %v15815_v11, %v12429_v62  ;;  %v5662_v18 = vsel %vm5568_vm9, %v5661_v34, %v5657_v25  ;;  %v15817_v13 = vld [vmem:[#allocation49_spill] sm:$0xff]  ;;  %v15819_v45 = vld [vmem:[#allocation76_spill] sm:$0xff]  ;;  %v12719_v34 = vpop.permute.xlu1 %5137  ;;  %15820 = vst [vmem:[#allocation465_spill] sm:$0xff] %v12721_v39 }
 0x735   :  { %15807 = vst [vmem:[#allocation267_spill] sm:$0xff] %v12689_v33  ;;  %15811 = vst [vmem:[#allocation268_spill] sm:$0xff] %v12697_v48  ;;  %v12701_v10 = vmul.f32 %v15813_v21, %v15812_v8  ;;  %v5671_v0 = vrot.slane %v15816_v59, %v12412_v47  ;;  %v5588_v37 = vrot.slane %v15817_v13, %v12401_v22  ;;  %v15818_v21 = vld [vmem:[#allocation63_spill] sm:$0xff]  ;;  %v15821_v25 = vld [vmem:[#allocation242_spill] sm:$0xff]  ;;  %5341 = vperm.xlu1 %8479, %v12377_v29  }
 0x736   :  { %v5706_v55 = vsel %vm5519_vm2, %v5705_v26, %v5701_v1  ;;  %v5666_v8 = vrot.slane %v15818_v21, %v12387_v52  ;;  %v5720_v12 = vrot.slane %v15819_v45, %v12362_v56  ;;  %v15822_v26 = vld [vmem:[#allocation34_spill] sm:$0xff]  ;;  %v15824_v11 = vld [vmem:[#allocation244_spill] sm:$0xff]  ;;  %v15825_v59 = vld [vmem:[#allocation35_spill] sm:$0xff]  ;;  %5350 = vperm.xlu0 %8478, %v12409_v40  }
 0x737   :  { %15814 = vst [vmem:[#allocation460_spill] sm:$0xff] %v12701_v10  ;;  %v5711_v15 = vsel %vm14220_vm3, %v5710_v23, %v5706_v55  ;;  %v12725_v1 = vmul.f32 %v15822_v26, %v15821_v25  ;;  %v12729_v13 = vmul.f32 %v15825_v59, %v15824_v11  ;;  %v15827_v21 = vld [vmem:[#allocation434_spill] sm:$0xff]  ;;  %v15828_v10 = vld [vmem:[#allocation36_spill] sm:$0xff]  ;;  %v15830_v55 = vld [vmem:[#allocation73_spill] sm:$0xff] }
 0x738   :  { %v12733_v23 = vmul.f32 %v15828_v10, %v15827_v21  ;;  %v5715_v45 = vrot.slane %v15830_v55, %v12345_v44  ;;  %v15831_v5 = vld [vmem:[#allocation243_spill] sm:$0xff]  ;;  %v15832_v33 = vld [vmem:[#allocation38_spill] sm:$0xff]  ;;  %v5667_v11 = vsel %vm5575_vm10, %v5666_v8, %v5662_v18  ;;  %v15845_v42 = vld [vmem:[#allocation53_spill] sm:$0xff] }
 0x739   :  { %15823 = vst [vmem:[#allocation269_spill] sm:$0xff] %v12725_v1  ;;  %15826 = vst [vmem:[#allocation270_spill] sm:$0xff] %v12729_v13  ;;  %v12740_v39 = vmul.f32 %v15832_v33, %v15831_v5  ;;  %v15834_v25 = vld [vmem:[#allocation51_spill] sm:$0xff]  ;;  %v5590_v1 = vsel %vm5589_vm12, %v5588_v37, %v5583_v30  ;;  %v15835_v10 = vld [vmem:[#allocation54_spill] sm:$0xff]  ;;  %v5672_v55 = vsel %vm5582_vm11, %v5671_v0, %v5667_v11  ;;  %v12761_v37 = vpop.permute.xlu0 %5152  ;;  %5347 = vperm.xlu1 %8479, %v12391_v9  }
 0x73a   :  { %15829 = vst [vmem:[#allocation462_spill] sm:$0xff] %v12733_v23  ;;  %v5602_v26 = vrot.slane %v15834_v25, %v12415_v14  ;;  %v5597_v59 = vsel %vm5596_vm13, %v5595_v35, %v5590_v1  ;;  %v5609_v21 = vrot.slane %v15835_v10, %v12446_v27  ;;  %v5716_v41 = vsel %vm14221_vm4, %v5715_v45, %v5711_v15  ;;  %v15836_v13 = vld [vmem:[#allocation68_spill] sm:$0xff]  ;;  %v15837_v25 = vld [vmem:[#allocation78_spill] sm:$0xff]  ;;  %v15838_v30 = vld [vmem:[#allocation87_spill] sm:$0xff]  ;;  %v12759_v35 = vpop.permute.xlu1 %5143 }
 0x73b   :  { %15833 = vst [vmem:[#allocation467_spill] sm:$0xff] %v12740_v39  ;;  %v5681_v33 = vrot.slane %v15836_v13, %v12429_v62  ;;  %v5721_v5 = vsel %vm5540_vm5, %v5720_v12, %v5716_v41  ;;  %v5730_v39 = vrot.slane %v15837_v25, %v12384_v46  ;;  %v5780_v18 = vrot.slane %v15838_v30, %v12319_v6  ;;  %v15841_v0 = vld [vmem:[#allocation65_spill] sm:$0xff]  ;;  %v15842_v15 = vld [vmem:[#allocation75_spill] sm:$0xff]  ;;  %v15844_v45 = vld [vmem:[#allocation486_spill] sm:$0xff] }
 0x73c   :  { %15839 = vst [vmem:[#allocation271_spill] sm:$0xff] %v12759_v35  ;;  %15840 = vst [vmem:[#allocation272_spill] sm:$0xff] %v12761_v37  ;;  %v5676_v8 = vrot.slane %v15841_v0, %v12401_v22  ;;  %v5725_v1 = vrot.slane %v15842_v15, %v12351_v31  ;;  %v15843_v12 = vld [vmem:[#allocation89_spill] sm:$0xff]  ;;  %v5859_v11 = vrot.slane %v15844_v45, %v12319_v6  ;;  %v15846_v25 = vld [vmem:[#allocation470_spill] sm:$0xff]  ;;  %5356 = vperm.xlu0 %8478, %v12437_v54  }
 0x73d   :  { %v5789_v13 = vrot.slane %v15843_v12, %v12348_v53  ;;  %v5616_v10 = vrot.slane %v15845_v42, %v12432_v2  ;;  %v5604_v41 = vsel %vm5603_vm14, %v5602_v26, %v5597_v59  ;;  %v5784_v30 = vrot.slane %v15846_v25, %v12342_v50  ;;  %v15847_v0 = vld [vmem:[#allocation104_spill] sm:$0xff]  ;;  %v15848_v45 = vld [vmem:[#allocation102_spill] sm:$0xff]  ;;  %v15859_v38 = vld [vmem:[#allocation103_spill] sm:$0xff]  ;;  %5353 = vperm.xlu1 %8479, %v12405_v36  }
 0x73e   :  { %v5868_v23 = vrot.slane %v15847_v0, %v12348_v53  ;;  %v5611_v15 = vsel %vm5610_vm15, %v5609_v21, %v5604_v41  ;;  %v5677_v12 = vsel %vm5589_vm12, %v5676_v8, %v5672_v55  ;;  %v5726_v37 = vsel %vm14219_vm6, %v5725_v1, %v5721_v5  ;;  %v15849_v26 = vld [vmem:[#allocation80_spill] sm:$0xff]  ;;  %v12790_v0 = vpop.permute.xlu1 %5149  ;;  %v12792_v21 = vpop.permute.xlu0 %5158  ;;  %v15852_v55 = vld [vmem:[#allocation77_spill] sm:$0xff]  ;;  %v15880_v54 = vld [vmem:[#allocation118_spill] sm:$0xff] }
 0x73f   :  { %v5863_v20 = vrot.slane %v15848_v45, %v12342_v50  ;;  %v5682_v48 = vsel %vm5596_vm13, %v5681_v33, %v5677_v12  ;;  %v5731_v42 = vsel %vm5554_vm7, %v5730_v39, %v5726_v37  ;;  %v5740_v59 = vrot.slane %v15849_v26, %v12398_v32  ;;  %15850 = vst [vmem:[#allocation273_spill] sm:$0xff] %v12790_v0  ;;  %v15853_v33 = vld [vmem:[#allocation91_spill] sm:$0xff]  ;;  %v15855_v57 = vld [vmem:[#allocation88_spill] sm:$0xff]  ;;  %v15856_v12 = vld [vmem:[#allocation105_spill] sm:$0xff] }
 0x740   :  { %v5785_v25 = vsel %vm5519_vm2, %v5784_v30, %v5780_v18  ;;  %15851 = vst [vmem:[#allocation274_spill] sm:$0xff] %v12792_v21  ;;  %v5735_v5 = vrot.slane %v15852_v55, %v12365_v17  ;;  %v5799_v1 = vrot.slane %v15853_v33, %v12362_v56  ;;  %v15854_v18 = vld [vmem:[#allocation67_spill] sm:$0xff]  ;;  %v5794_v41 = vrot.slane %v15855_v57, %v12345_v44  ;;  %v15858_v26 = vld [vmem:[#allocation70_spill] sm:$0xff]  ;;  %v15870_v40 = vld [vmem:[#allocation116_spill] sm:$0xff] }
 0x741   :  { %v5790_v8 = vsel %vm14220_vm3, %v5789_v13, %v5785_v25  ;;  %v5864_v39 = vsel %vm5519_vm2, %v5863_v20, %v5859_v11  ;;  %v5686_v37 = vrot.slane %v15854_v18, %v12415_v14  ;;  %v5878_v45 = vrot.slane %v15856_v12, %v12362_v56  ;;  %v15860_v33 = vld [vmem:[#allocation79_spill] sm:$0xff]  ;;  %5362 = vperm.xlu0 %8478, %v12450_v60   ;;  %v15930_v21 = vld [vmem:[#allocation145_spill] sm:$0xff] }
 0x742   :  { %v5869_v30 = vsel %vm14220_vm3, %v5868_v23, %v5864_v39  ;;  %v12809_v13 = vsel %vm5617_vm0, %v5616_v10, %v5611_v15  ;;  %v5691_v25 = vrot.slane %v15858_v26, %v12446_v27  ;;  %v5736_v11 = vsel %vm5561_vm8, %v5735_v5, %v5731_v42  ;;  %v12822_v10 = vpop.permute.xlu1 %5155  ;;  %v12824_v15 = vpop.permute.xlu0 %5164  ;;  %v15863_v42 = vld [vmem:[#allocation82_spill] sm:$0xff]  ;;  %5359 = vperm.xlu1 %8479, %v12424_v58   ;;  %v15896_v58 = vld [vmem:[#allocation99_spill] sm:$0xff] }
 0x743   :  { %15857 = vst [vmem:[#allocation275_spill] sm:$0xff] %v12809_v13  ;;  %v5873_v20 = vrot.slane %v15859_v38, %v12345_v44  ;;  %v5687_v55 = vsel %vm5603_vm14, %v5686_v37, %v5682_v48  ;;  %v5745_v18 = vrot.slane %v15860_v33, %v12387_v52  ;;  %v5741_v23 = vsel %vm5568_vm9, %v5740_v59, %v5736_v11  ;;  %v15864_v48 = vld [vmem:[#allocation93_spill] sm:$0xff]  ;;  %v15865_v59 = vld [vmem:[#allocation90_spill] sm:$0xff] }
 0x744   :  { %v5795_v39 = vsel %vm14221_vm4, %v5794_v41, %v5790_v8  ;;  %15861 = vst [vmem:[#allocation276_spill] sm:$0xff] %v12822_v10  ;;  %15862 = vst [vmem:[#allocation464_spill] sm:$0xff] %v12824_v15  ;;  %v5750_v5 = vrot.slane %v15863_v42, %v12412_v47  ;;  %v5809_v37 = vrot.slane %v15864_v48, %v12384_v46  ;;  %v15866_v41 = vld [vmem:[#allocation490_spill] sm:$0xff]  ;;  %v15871_v48 = vld [vmem:[#allocation81_spill] sm:$0xff] }
 0x745   :  { %v5800_v57 = vsel %vm5540_vm5, %v5799_v1, %v5795_v39  ;;  %v5874_v12 = vsel %vm14221_vm4, %v5873_v20, %v5869_v30  ;;  %v5804_v8 = vrot.slane %v15865_v59, %v12351_v31  ;;  %v5888_v26 = vrot.slane %v15866_v41, %v12384_v46  ;;  %v15867_v11 = vld [vmem:[#allocation114_spill] sm:$0xff]  ;;  %v15868_v1 = vld [vmem:[#allocation69_spill] sm:$0xff]  ;;  %v15869_v30 = vld [vmem:[#allocation488_spill] sm:$0xff]  ;;  %5368 = vperm.xlu0 %8478, %v12458_v61  }
 0x746   :  { %v5879_v29 = vsel %vm5540_vm5, %v5878_v45, %v5874_v12  ;;  %v5938_v38 = vrot.slane %v15867_v11, %v12319_v6  ;;  %v5696_v33 = vrot.slane %v15868_v1, %v12432_v2  ;;  %v5692_v39 = vsel %vm5610_vm15, %v5691_v25, %v5687_v55  ;;  %v15872_v41 = vld [vmem:[#allocation113_spill] sm:$0xff]  ;;  %v12854_v1 = vpop.permute.xlu1 %5161  ;;  %v12856_v25 = vpop.permute.xlu0 %5170  ;;  %v15898_v61 = vld [vmem:[#allocation494_spill] sm:$0xff]  ;;  %5365 = vperm.xlu1 %8479, %v12441_v24  }
 0x747   :  { %v5883_v20 = vrot.slane %v15869_v30, %v12351_v31  ;;  %v5947_v42 = vrot.slane %v15870_v40, %v12348_v53  ;;  %v5755_v45 = vrot.slane %v15871_v48, %v12401_v22  ;;  %v5746_v12 = vsel %vm5575_vm10, %v5745_v18, %v5741_v23  ;;  %15873 = vst [vmem:[#allocation277_spill] sm:$0xff] %v12854_v1  ;;  %v15875_v30 = vld [vmem:[#allocation84_spill] sm:$0xff]  ;;  %v15876_v23 = vld [vmem:[#allocation95_spill] sm:$0xff] }
 0x748   :  { %v5805_v59 = vsel %vm14219_vm6, %v5804_v8, %v5800_v57  ;;  %v5942_v11 = vrot.slane %v15872_v41, %v12342_v50  ;;  %15874 = vst [vmem:[#allocation278_spill] sm:$0xff] %v12856_v25  ;;  %v5751_v55 = vsel %vm5582_vm11, %v5750_v5, %v5746_v12  ;;  %v5760_v40 = vrot.slane %v15875_v30, %v12429_v62  ;;  %v15877_v8 = vld [vmem:[#allocation108_spill] sm:$0xff]  ;;  %v15879_v30 = vld [vmem:[#allocation106_spill] sm:$0xff]  ;;  %v15931_v1 = vld [vmem:[#allocation199_spill] sm:$0xff] }
 0x749   :  { %v5810_v48 = vsel %vm5554_vm7, %v5809_v37, %v5805_v59  ;;  %v5884_v18 = vsel %vm14219_vm6, %v5883_v20, %v5879_v29  ;;  %v5819_v57 = vrot.slane %v15876_v23, %v12398_v32  ;;  %v5898_v41 = vrot.slane %v15877_v8, %v12398_v32  ;;  %v15878_v5 = vld [vmem:[#allocation92_spill] sm:$0xff]  ;;  %5374 = vperm.xlu0 %8478, %v12468_v49  }
 0x74a   :  { %v5889_v9 = vsel %vm5554_vm7, %v5888_v26, %v5884_v18  ;;  %v5943_v13 = vsel %vm5519_vm2, %v5942_v11, %v5938_v38  ;;  %v5814_v12 = vrot.slane %v15878_v5, %v12365_v17  ;;  %v5893_v37 = vrot.slane %v15879_v30, %v12365_v17  ;;  %v15882_v26 = vld [vmem:[#allocation83_spill] sm:$0xff]  ;;  %v12886_v8 = vpop.permute.xlu1 %5167  ;;  %v12888_v5 = vpop.permute.xlu0 %5176 }
 0x74b   :  { %v5948_v29 = vsel %vm14220_vm3, %v5947_v42, %v5943_v13  ;;  %v5957_v20 = vrot.slane %v15880_v54, %v12362_v56  ;;  %v12878_v59 = vsel %vm5617_vm0, %v5696_v33, %v5692_v39  ;;  %v5765_v18 = vrot.slane %v15882_v26, %v12415_v14  ;;  %v15883_v38 = vld [vmem:[#allocation115_spill] sm:$0xff]  ;;  %15884 = vst [vmem:[#allocation469_spill] sm:$0xff] %v12886_v8  ;;  %v15885_v42 = vld [vmem:[#allocation94_spill] sm:$0xff] }
 0x74c   :  { %15881 = vst [vmem:[#allocation279_spill] sm:$0xff] %v12878_v59  ;;  %v5756_v23 = vsel %vm5589_vm12, %v5755_v45, %v5751_v55  ;;  %v5952_v11 = vrot.slane %v15883_v38, %v12345_v44  ;;  %v5824_v33 = vrot.slane %v15885_v42, %v12387_v52  ;;  %v5815_v39 = vsel %vm5561_vm8, %v5814_v12, %v5810_v48  ;;  %v15886_v55 = vld [vmem:[#allocation97_spill] sm:$0xff]  ;;  %v15888_v48 = vld [vmem:[#allocation120_spill] sm:$0xff]  ;;  %v15891_v42 = vld [vmem:[#allocation107_spill] sm:$0xff] }
 0x74d   :  { %v5761_v13 = vsel %vm5596_vm13, %v5760_v40, %v5756_v23  ;;  %v5894_v30 = vsel %vm5561_vm8, %v5893_v37, %v5889_v9  ;;  %v5820_v45 = vsel %vm5568_vm9, %v5819_v57, %v5815_v39  ;;  %v5829_v36 = vrot.slane %v15886_v55, %v12412_v47  ;;  %v15887_v40 = vld [vmem:[#allocation109_spill] sm:$0xff]  ;;  %v15889_v9 = vld [vmem:[#allocation130_spill] sm:$0xff] }
 0x74e   :  { %v5899_v54 = vsel %vm5568_vm9, %v5898_v41, %v5894_v30  ;;  %v5953_v26 = vsel %vm14221_vm4, %v5952_v11, %v5948_v29  ;;  %v5908_v23 = vrot.slane %v15887_v40, %v12412_v47  ;;  %v5967_v12 = vrot.slane %v15888_v48, %v12384_v46  ;;  %v15890_v57 = vld [vmem:[#allocation85_spill] sm:$0xff]  ;;  %v15893_v11 = vld [vmem:[#allocation132_spill] sm:$0xff]  ;;  %v12919_v55 = vpop.permute.xlu0 %5182 }
 0x74f   :  { %v5958_v38 = vsel %vm5540_vm5, %v5957_v20, %v5953_v26  ;;  %v6017_v60 = vrot.slane %v15889_v9, %v12319_v6  ;;  %v5903_v39 = vrot.slane %v15891_v42, %v12387_v52  ;;  %v15892_v41 = vld [vmem:[#allocation117_spill] sm:$0xff]  ;;  %v6026_v30 = vrot.slane %v15893_v11, %v12348_v53  ;;  %v12917_v20 = vpop.permute.xlu1 %5173  ;;  %v15894_v40 = vld [vmem:[#allocation96_spill] sm:$0xff] }
 0x750   :  { %v5962_v29 = vrot.slane %v15892_v41, %v12351_v31  ;;  %v5766_v26 = vsel %vm5603_vm14, %v5765_v18, %v5761_v13  ;;  %v5834_v48 = vrot.slane %v15894_v40, %v12401_v22  ;;  %v5825_v9 = vsel %vm5575_vm10, %v5824_v33, %v5820_v45  ;;  %v15895_v42 = vld [vmem:[#allocation129_spill] sm:$0xff]  ;;  %v15897_v33 = vld [vmem:[#allocation122_spill] sm:$0xff] }
 0x751   :  { %v6021_v37 = vrot.slane %v15895_v42, %v12342_v50  ;;  %v5830_v41 = vsel %vm5582_vm11, %v5829_v36, %v5825_v9  ;;  %v5839_v11 = vrot.slane %v15896_v58, %v12429_v62  ;;  %v5904_v25 = vsel %vm5575_vm10, %v5903_v39, %v5899_v54  ;;  %v15899_v36 = vld [vmem:[#allocation119_spill] sm:$0xff]  ;;  %v15900_v54 = vld [vmem:[#allocation134_spill] sm:$0xff] }
 0x752   :  { %v5963_v59 = vsel %vm14219_vm6, %v5962_v29, %v5958_v38  ;;  %v5909_v18 = vsel %vm5582_vm11, %v5908_v23, %v5904_v25  ;;  %v5977_v45 = vrot.slane %v15897_v33, %v12398_v32  ;;  %v5918_v42 = vrot.slane %v15898_v61, %v12429_v62  ;;  %v15902_v23 = vld [vmem:[#allocation86_spill] sm:$0xff]  ;;  %v15904_v29 = vld [vmem:[#allocation131_spill] sm:$0xff]  ;;  %v15906_v61 = vld [vmem:[#allocation101_spill] sm:$0xff] }
 0x753   :  { %v5968_v13 = vsel %vm5554_vm7, %v5967_v12, %v5963_v59  ;;  %v6022_v40 = vsel %vm5519_vm2, %v6021_v37, %v6017_v60  ;;  %v5972_v9 = vrot.slane %v15899_v36, %v12365_v17  ;;  %v6036_v38 = vrot.slane %v15900_v54, %v12362_v56  ;;  %v12946_v25 = vpop.permute.xlu1 %5179  ;;  %v12948_v59 = vpop.permute.xlu0 %5188  ;;  %v15903_v37 = vld [vmem:[#allocation492_spill] sm:$0xff]  ;;  %v15905_v33 = vld [vmem:[#allocation98_spill] sm:$0xff] }
 0x754   :  { %v6027_v58 = vsel %vm14220_vm3, %v6026_v30, %v6022_v40  ;;  %15901 = vst [vmem:[#allocation280_spill] sm:$0xff] %v12948_v59  ;;  %v5770_v12 = vrot.slane %v15902_v23, %v12446_v27  ;;  %v5835_v60 = vsel %vm5589_vm12, %v5834_v48, %v5830_v41  ;;  %v5913_v39 = vrot.slane %v15903_v37, %v12401_v22  ;;  %v15907_v23 = vld [vmem:[#allocation124_spill] sm:$0xff] }
 0x755   :  { %v6031_v30 = vrot.slane %v15904_v29, %v12345_v44  ;;  %v5844_v24 = vrot.slane %v15905_v33, %v12415_v14  ;;  %v5840_v40 = vsel %vm5596_vm13, %v5839_v11, %v5835_v60  ;;  %v5849_v36 = vrot.slane %v15906_v61, %v12446_v27  ;;  %v15908_v33 = vld [vmem:[#allocation121_spill] sm:$0xff]  ;;  %v15909_v60 = vld [vmem:[#allocation136_spill] sm:$0xff] }
 0x756   :  { %v5973_v54 = vsel %vm5561_vm8, %v5972_v9, %v5968_v13  ;;  %v5914_v48 = vsel %vm5589_vm12, %v5913_v39, %v5909_v18  ;;  %v5987_v37 = vrot.slane %v15907_v23, %v12412_v47  ;;  %v5982_v15 = vrot.slane %v15908_v33, %v12387_v52  ;;  %v15910_v13 = vld [vmem:[#allocation445_spill] sm:$0xff]  ;;  %v15916_v33 = vld [vmem:[#allocation112_spill] sm:$0xff] }
 0x757   :  { %v5978_v41 = vsel %vm5568_vm9, %v5977_v45, %v5973_v54  ;;  %v6032_v29 = vsel %vm14221_vm4, %v6031_v30, %v6027_v58  ;;  %v5919_v49 = vsel %vm5596_vm13, %v5918_v42, %v5914_v48  ;;  %v6046_v61 = vrot.slane %v15909_v60, %v12384_v46  ;;  %5371 = vperm.xlu1 %8479, %v15910_v13   ;;  %v12976_v18 = vpop.permute.xlu1 %5185  ;;  %v12978_v45 = vpop.permute.xlu0 %5194  ;;  %v15912_v42 = vld [vmem:[#allocation110_spill] sm:$0xff]  ;;  %v15913_v30 = vld [vmem:[#allocation133_spill] sm:$0xff]  ;;  %v15915_v48 = vld [vmem:[#allocation100_spill] sm:$0xff] }
 0x758   :  { %v6037_v11 = vsel %vm5540_vm5, %v6036_v38, %v6032_v29  ;;  %15911 = vst [vmem:[#allocation281_spill] sm:$0xff] %v12978_v45  ;;  %v12981_v9 = vsel %vm5610_vm15, %v5770_v12, %v5766_v26  ;;  %v5845_v58 = vsel %vm5603_vm14, %v5844_v24, %v5840_v40  ;;  %v5923_v39 = vrot.slane %v15912_v42, %v12415_v14  ;;  %v15914_v54 = vld [vmem:[#allocation442_spill] sm:$0xff]  ;;  %v15917_v24 = vld [vmem:[#allocation111_spill] sm:$0xff]  ;;  %v15934_v45 = vld [vmem:[#allocation140_spill] sm:$0xff] }
 0x759   :  { %v6041_v38 = vrot.slane %v15913_v30, %v12351_v31  ;;  %5380 = vperm.xlu0 %8478, %v15914_v54   ;;  %v12992_v29 = vsel %vm5610_vm15, %v5849_v36, %v5845_v58  ;;  %v5928_v26 = vrot.slane %v15916_v33, %v12446_v27  ;;  %v5983_v12 = vsel %vm5575_vm10, %v5982_v15, %v5978_v41  ;;  %v15918_v30 = vld [vmem:[#allocation126_spill] sm:$0xff]  ;;  %v15921_v41 = vld [vmem:[#allocation249_spill] sm:$0xff] }
 0x75a   :  { %v5924_v60 = vsel %vm5603_vm14, %v5923_v39, %v5919_v49  ;;  %v5988_v13 = vsel %vm5582_vm11, %v5987_v37, %v5983_v12  ;;  %v5997_v54 = vrot.slane %v15918_v30, %v12429_v62  ;;  %v15919_v58 = vld [vmem:[#allocation138_spill] sm:$0xff]  ;;  %v15924_v37 = vld [vmem:[#allocation123_spill] sm:$0xff] }
 0x75b   :  { %v6042_v42 = vsel %vm14219_vm6, %v6041_v38, %v6037_v11  ;;  %v6056_v23 = vrot.slane %v15919_v58, %v12398_v32  ;;  %v15920_v33 = vld [vmem:[#allocation146_spill] sm:$0xff]  ;;  %5377 = vperm.xlu1 %8479, %v15921_v41   ;;  %v13010_v40 = vpop.permute.xlu1 %5191  ;;  %v13012_v49 = vpop.permute.xlu0 %5200  ;;  %v5992_v11 = vrot.slane %v15924_v37, %v12401_v22  ;;  %v15925_v39 = vld [vmem:[#allocation135_spill] sm:$0xff]  ;;  %v15928_v58 = vld [vmem:[#allocation444_spill] sm:$0xff]  ;;  %v6100_v37 = vrot.slane %v15930_v21, %v12342_v50 }
 0x75c   :  { %v6047_v36 = vsel %vm5554_vm7, %v6046_v61, %v6042_v42  ;;  %v6096_v15 = vrot.slane %v15920_v33, %v12319_v6  ;;  %15922 = vst [vmem:[#allocation282_spill] sm:$0xff] %v13010_v40  ;;  %15923 = vst [vmem:[#allocation283_spill] sm:$0xff] %v13012_v49  ;;  %v6051_v38 = vrot.slane %v15925_v39, %v12365_v17  ;;  %v15926_v61 = vld [vmem:[#allocation148_spill] sm:$0xff]  ;;  %v15927_v42 = vld [vmem:[#allocation390_spill] sm:$0xff] }
 0x75d   :  { %v6105_v12 = vrot.slane %v15926_v61, %v12348_v53  ;;  %v6491_v30 = vrot.slane %v15927_v42, %v12319_v6  ;;  %5386 = vperm.xlu0 %8478, %v15928_v58   ;;  %v13024_v33 = vsel %vm5610_vm15, %v5928_v26, %v5924_v60  ;;  %v15929_v41 = vld [vmem:[#allocation125_spill] sm:$0xff]  ;;  %v6500_v39 = vrot.slane %v15931_v1, %v12348_v53  ;;  %v15932_v61 = vld [vmem:[#allocation127_spill] sm:$0xff]  ;;  %v15933_v58 = vld [vmem:[#allocation198_spill] sm:$0xff] }
 0x75e   :  { %v6002_v8 = vrot.slane %v15929_v41, %v12415_v14  ;;  %v5993_v49 = vsel %vm5589_vm12, %v5992_v11, %v5988_v13  ;;  %v6052_v42 = vsel %vm5561_vm8, %v6051_v38, %v6047_v36  ;;  %v6495_v26 = vrot.slane %v15933_v58, %v12342_v50  ;;  %v15935_v1 = vld [vmem:[#allocation250_spill] sm:$0xff]  ;;  %v15938_v36 = vld [vmem:[#allocation137_spill] sm:$0xff]  ;;  %v15949_v40 = vld [vmem:[#allocation252_spill] sm:$0xff] }
 0x75f   :  { %v5998_v60 = vsel %vm5596_vm13, %v5997_v54, %v5993_v49  ;;  %v6057_v41 = vsel %vm5568_vm9, %v6056_v23, %v6052_v42  ;;  %v6066_v21 = vrot.slane %v15934_v45, %v12412_v47  ;;  %v6101_v0 = vsel %vm5519_vm2, %v6100_v37, %v6096_v15  ;;  %5383 = vperm.xlu1 %8479, %v15935_v1   ;;  %v13044_v13 = vpop.permute.xlu1 %5197  ;;  %v13046_v11 = vpop.permute.xlu0 %5206  ;;  %v15939_v54 = vld [vmem:[#allocation150_spill] sm:$0xff]  ;;  %v15940_v42 = vld [vmem:[#allocation253_spill] sm:$0xff]  ;;  %v15941_v45 = vld [vmem:[#allocation147_spill] sm:$0xff] }
 0x760   :  { %15936 = vst [vmem:[#allocation284_spill] sm:$0xff] %v13044_v13  ;;  %15937 = vst [vmem:[#allocation285_spill] sm:$0xff] %v13046_v11  ;;  %v6061_v38 = vrot.slane %v15938_v36, %v12387_v52  ;;  %v6106_v58 = vsel %vm14220_vm3, %v6105_v12, %v6101_v0  ;;  %v6115_v49 = vrot.slane %v15939_v54, %v12362_v56  ;;  %v15942_v1 = vld [vmem:[#allocation392_spill] sm:$0xff]  ;;  %v15943_v11 = vld [vmem:[#allocation398_spill] sm:$0xff] }
 0x761   :  { %v6496_v23 = vsel %vm5519_vm2, %v6495_v26, %v6491_v30  ;;  %5392 = vperm.xlu0 %8478, %v15940_v42   ;;  %v6110_v15 = vrot.slane %v15941_v45, %v12345_v44  ;;  %v6510_v10 = vrot.slane %v15942_v1, %v12362_v56  ;;  %v6570_v36 = vrot.slane %v15943_v11, %v12319_v6  ;;  %v15944_v0 = vld [vmem:[#allocation128_spill] sm:$0xff]  ;;  %v15945_v30 = vld [vmem:[#allocation395_spill] sm:$0xff]  ;;  %v15948_v11 = vld [vmem:[#allocation206_spill] sm:$0xff] }
 0x762   :  { %v6501_v37 = vsel %vm14220_vm3, %v6500_v39, %v6496_v23  ;;  %v6007_v12 = vrot.slane %v15944_v0, %v12446_v27  ;;  %v6062_v54 = vsel %vm5575_vm10, %v6061_v38, %v6057_v41  ;;  %v6505_v26 = vrot.slane %v15945_v30, %v12345_v44  ;;  %v15946_v42 = vld [vmem:[#allocation207_spill] sm:$0xff]  ;;  %v15952_v38 = vld [vmem:[#allocation142_spill] sm:$0xff] }
 0x763   :  { %v6579_v13 = vrot.slane %v15946_v42, %v12348_v53  ;;  %v15947_v45 = vld [vmem:[#allocation139_spill] sm:$0xff]  ;;  %v6067_v23 = vsel %vm5582_vm11, %v6066_v21, %v6062_v54  ;;  %v6111_v1 = vsel %vm14221_vm4, %v6110_v15, %v6106_v58  ;;  %v6574_v59 = vrot.slane %v15948_v11, %v12342_v50  ;;  %5389 = vperm.xlu1 %8479, %v15949_v40   ;;  %v13076_v0 = vpop.permute.xlu1 %5203  ;;  %v13078_v41 = vpop.permute.xlu0 %5212  ;;  %v15954_v58 = vld [vmem:[#allocation446_spill] sm:$0xff]  ;;  %v15955_v15 = vld [vmem:[#allocation149_spill] sm:$0xff] }
 0x764   :  { %v6071_v39 = vrot.slane %v15947_v45, %v12401_v22  ;;  %15950 = vst [vmem:[#allocation286_spill] sm:$0xff] %v13076_v0  ;;  %15951 = vst [vmem:[#allocation287_spill] sm:$0xff] %v13078_v41  ;;  %v6076_v30 = vrot.slane %v15952_v38, %v12429_v62  ;;  %v6116_v42 = vsel %vm5540_vm5, %v6115_v49, %v6111_v1  ;;  %v15953_v45 = vld [vmem:[#allocation152_spill] sm:$0xff]  ;;  %v15956_v11 = vld [vmem:[#allocation201_spill] sm:$0xff] }
 0x765   :  { %v6125_v35 = vrot.slane %v15953_v45, %v12384_v46  ;;  %v6506_v21 = vsel %vm14221_vm4, %v6505_v26, %v6501_v37  ;;  %5398 = vperm.xlu0 %8478, %v15954_v58   ;;  %v6120_v54 = vrot.slane %v15955_v15, %v12351_v31  ;;  %v6520_v41 = vrot.slane %v15956_v11, %v12384_v46  ;;  %v15957_v49 = vld [vmem:[#allocation200_spill] sm:$0xff] }
 0x766   :  { %v6511_v40 = vsel %vm5540_vm5, %v6510_v10, %v6506_v21  ;;  %v6575_v0 = vsel %vm5519_vm2, %v6574_v59, %v6570_v36  ;;  %v6003_v38 = vsel %vm5603_vm14, %v6002_v8, %v5998_v60  ;;  %v6515_v1 = vrot.slane %v15957_v49, %v12351_v31  ;;  %v15958_v37 = vld [vmem:[#allocation400_spill] sm:$0xff]  ;;  %v15959_v21 = vld [vmem:[#allocation403_spill] sm:$0xff]  ;;  %v15960_v59 = vld [vmem:[#allocation449_spill] sm:$0xff] }
 0x767   :  { %v6580_v45 = vsel %vm14220_vm3, %v6579_v13, %v6575_v0  ;;  %v6589_v26 = vrot.slane %v15958_v37, %v12362_v56  ;;  %v6008_v58 = vsel %vm5610_vm15, %v6007_v12, %v6003_v38  ;;  %v6072_v15 = vsel %vm5589_vm12, %v6071_v39, %v6067_v23  ;;  %5395 = vperm.xlu1 %8479, %v15960_v59   ;;  %v13105_v8 = vpop.permute.xlu1 %5209  ;;  %v13107_v60 = vpop.permute.xlu0 %5218  ;;  %v15961_v13 = vld [vmem:[#allocation141_spill] sm:$0xff]  ;;  %v15962_v23 = vld [vmem:[#allocation154_spill] sm:$0xff] }
 0x768   :  { %v6121_v10 = vsel %vm14219_vm6, %v6120_v54, %v6116_v42  ;;  %v6584_v11 = vrot.slane %v15959_v21, %v12345_v44  ;;  %v6081_v36 = vrot.slane %v15961_v13, %v12415_v14  ;;  %v6077_v0 = vsel %vm5596_vm13, %v6076_v30, %v6072_v15  ;;  %v15963_v38 = vld [vmem:[#allocation394_spill] sm:$0xff]  ;;  %v15964_v21 = vld [vmem:[#allocation151_spill] sm:$0xff]  ;;  %v15965_v30 = vld [vmem:[#allocation397_spill] sm:$0xff] }
 0x769   :  { %v6126_v12 = vsel %vm5554_vm7, %v6125_v35, %v6121_v10  ;;  %v6516_v39 = vsel %vm14219_vm6, %v6515_v1, %v6511_v40  ;;  %5413 = vperm.xlu0 %8478, %v12528_v4   ;;  %v6135_v42 = vrot.slane %v15962_v23, %v12398_v32  ;;  %v6530_v49 = vrot.slane %v15963_v38, %v12398_v32  ;;  %v15966_v4 = vld [vmem:[#allocation209_spill] sm:$0xff]  ;;  %v15970_v13 = vld [vmem:[#allocation208_spill] sm:$0xff] }
 0x76a   :  { %v6521_v54 = vsel %vm5554_vm7, %v6520_v41, %v6516_v39  ;;  %v6585_v37 = vsel %vm14221_vm4, %v6584_v11, %v6580_v45  ;;  %v6130_v59 = vrot.slane %v15964_v21, %v12365_v17  ;;  %v6525_v35 = vrot.slane %v15965_v30, %v12365_v17  ;;  %v15971_v39 = vld [vmem:[#allocation254_spill] sm:$0xff]  ;;  %v15973_v30 = vld [vmem:[#allocation203_spill] sm:$0xff] }
 0x76b   :  { %v6590_v40 = vsel %vm5540_vm5, %v6589_v26, %v6585_v37  ;;  %v6599_v1 = vrot.slane %v15966_v4, %v12384_v46  ;;  %v15967_v41 = vrot.slane %v15890_v57, %v12432_v2  ;;  %v15968_v45 = vrot.slane %v15915_v48, %v12432_v2  ;;  %5401 = vperm.xlu1 %8479, %v15971_v39   ;;  %v5225_v23 = vpop.permute.xlu0 %5224 }
 0x76c   :  { %v15969_v26 = vrot.slane %v15917_v24, %v12432_v2  ;;  %v6594_v57 = vrot.slane %v15970_v13, %v12351_v31  ;;  %v15972_v48 = vrot.slane %v15932_v61, %v12432_v2  ;;  %v13161_v38 = vsel %vm5603_vm14, %v6081_v36, %v6077_v0  ;;  %v15975_v0 = vld [vmem:[#allocation402_spill] sm:$0xff] }
 0x76d   :  { %v13133_v15 = vsel %vm5617_vm0, %v15967_v41, %v12981_v9  ;;  %v13140_v10 = vsel %vm5617_vm0, %v15968_v45, %v12992_v29  ;;  %v13152_v9 = vpop.permute.xlu1 %5215  ;;  %v6131_v24 = vsel %vm5561_vm8, %v6130_v59, %v6126_v12  ;;  %5419 = vperm.xlu0 %8478, %v12543_v19   ;;  %v6540_v4 = vrot.slane %v15973_v30, %v12412_v47  ;;  %v15979_v45 = vld [vmem:[#allocation405_spill] sm:$0xff] }
 0x76e   :  { %v13147_v11 = vsel %vm5617_vm0, %v15969_v26, %v13024_v33  ;;  %v13158_v29 = vsel %vm5617_vm0, %v15972_v48, %v6008_v58  ;;  %v6526_v33 = vsel %vm5561_vm8, %v6525_v35, %v6521_v54  ;;  %v6136_v37 = vsel %vm5568_vm9, %v6135_v42, %v6131_v24  ;;  %v15974_v58 = vld [vmem:[#allocation202_spill] sm:$0xff]  ;;  %v15977_v42 = vld [vmem:[#allocation153_spill] sm:$0xff]  ;;  %v15980_v26 = vld [vmem:[#allocation215_spill] sm:$0xff] }
 0x76f   :  { %v6531_v21 = vsel %vm5568_vm9, %v6530_v49, %v6526_v33  ;;  %v6595_v61 = vsel %vm14219_vm6, %v6594_v57, %v6590_v40  ;;  %v6535_v41 = vrot.slane %v15974_v58, %v12387_v52  ;;  %v6609_v12 = vrot.slane %v15975_v0, %v12398_v32  ;;  %v15976_v54 = vld [vmem:[#allocation406_spill] sm:$0xff]  ;;  %v15978_v49 = vld [vmem:[#allocation156_spill] sm:$0xff]  ;;  %5416 = vperm.xlu1 %8479, %v12547_v63   ;;  %v5231_v57 = vpop.permute.xlu0 %5230 }
 0x770   :  { %v6600_v36 = vsel %vm5554_vm7, %v6599_v1, %v6595_v61  ;;  %v6649_v19 = vrot.slane %v15976_v54, %v12319_v6  ;;  %v6140_v59 = vrot.slane %v15977_v42, %v12387_v52  ;;  %v6145_v35 = vrot.slane %v15978_v49, %v12412_v47  ;;  %v15981_v48 = vld [vmem:[#allocation214_spill] sm:$0xff]  ;;  %v15982_v61 = vld [vmem:[#allocation144_spill] sm:$0xff] }
 0x771   :  { %v6604_v40 = vrot.slane %v15979_v45, %v12365_v17  ;;  %v6658_v13 = vrot.slane %v15980_v26, %v12348_v53  ;;  %v5222_v1 = vpop.permute.xlu1 %5221  ;;  %v6536_v39 = vsel %vm5575_vm10, %v6535_v41, %v6531_v21  ;;  %v6653_v24 = vrot.slane %v15981_v48, %v12342_v50  ;;  %5461 = vperm.xlu0 %8478, %v12628_v3   ;;  %v15983_v41 = vld [vmem:[#allocation211_spill] sm:$0xff]  ;;  %v15985_v26 = vld [vmem:[#allocation210_spill] sm:$0xff] }
 0x772   :  { %v6969_v33 = vrot.slane %v5225_v23, %v12342_v50  ;;  %v6965_v30 = vrot.slane %v5222_v1, %v12319_v6  ;;  %v6086_v58 = vrot.slane %v15982_v61, %v12446_v27  ;;  %v6141_v0 = vsel %vm5575_vm10, %v6140_v59, %v6136_v37  ;;  %v15984_v3 = vld [vmem:[#allocation399_spill] sm:$0xff] }
 0x773   :  { %v6541_v63 = vsel %vm5582_vm11, %v6540_v4, %v6536_v39  ;;  %v6605_v54 = vsel %vm5561_vm8, %v6604_v40, %v6600_v36  ;;  %v6619_v42 = vrot.slane %v15983_v41, %v12412_v47  ;;  %v6654_v23 = vsel %vm5519_vm2, %v6653_v24, %v6649_v19  ;;  %v15986_v4 = vld [vmem:[#allocation408_spill] sm:$0xff]  ;;  %5422 = vperm.xlu1 %8479, %v12561_v7   ;;  %v5237_v59 = vpop.permute.xlu0 %5236  ;;  %v15988_v48 = vld [vmem:[#allocation411_spill] sm:$0xff] }
 0x774   :  { %v6610_v21 = vsel %vm5568_vm9, %v6609_v12, %v6605_v54  ;;  %v6970_v49 = vsel %vm5519_vm2, %v6969_v33, %v6965_v30  ;;  %v6545_v45 = vrot.slane %v15984_v3, %v12401_v22  ;;  %v6614_v1 = vrot.slane %v15985_v26, %v12387_v52  ;;  %v15987_v19 = vld [vmem:[#allocation396_spill] sm:$0xff]  ;;  %v15989_v30 = vld [vmem:[#allocation257_spill] sm:$0xff] }
 0x775   :  { %v6659_v37 = vsel %vm14220_vm3, %v6658_v13, %v6654_v23  ;;  %v6668_v36 = vrot.slane %v15986_v4, %v12362_v56  ;;  %v5228_v12 = vpop.permute.xlu1 %5227  ;;  %v13212_v40 = vsel %vm5582_vm11, %v6145_v35, %v6141_v0  ;;  %v6550_v39 = vrot.slane %v15987_v19, %v12429_v62  ;;  %5425 = vperm.xlu0 %8478, %v15989_v30   ;;  %v15990_v13 = vld [vmem:[#allocation204_spill] sm:$0xff] }
 0x776   :  { %v6663_v24 = vrot.slane %v15988_v48, %v12345_v44  ;;  %v6974_v33 = vrot.slane %v5228_v12, %v12348_v53  ;;  %v6555_v54 = vrot.slane %v15990_v13, %v12415_v14  ;;  %v6546_v7 = vsel %vm5589_vm12, %v6545_v45, %v6541_v63  ;;  %v15991_v23 = vld [vmem:[#allocation404_spill] sm:$0xff]  ;;  %v15992_v12 = vld [vmem:[#allocation407_spill] sm:$0xff]  ;;  %v15993_v63 = vld [vmem:[#allocation217_spill] sm:$0xff] }
 0x777   :  { %v6615_v41 = vsel %vm5575_vm10, %v6614_v1, %v6610_v21  ;;  %v6979_v35 = vrot.slane %v5231_v57, %v12345_v44  ;;  %v6629_v3 = vrot.slane %v15991_v23, %v12429_v62  ;;  %v6624_v19 = vrot.slane %v15992_v12, %v12401_v22  ;;  %5464 = vperm.xlu1 %8479, %v12647_v43   ;;  %v15997_v13 = vld [vmem:[#allocation205_spill] sm:$0xff]  ;;  %v15998_v43 = vld [vmem:[#allocation212_spill] sm:$0xff] }
 0x778   :  { %v6620_v0 = vsel %vm5582_vm11, %v6619_v42, %v6615_v41  ;;  %v6664_v26 = vsel %vm14221_vm4, %v6663_v24, %v6659_v37  ;;  %v6975_v4 = vsel %vm14220_vm3, %v6974_v33, %v6970_v49  ;;  %v6678_v45 = vrot.slane %v15993_v63, %v12384_v46  ;;  %v5243_v42 = vpop.permute.xlu0 %5242  ;;  %v15994_v37 = vld [vmem:[#allocation401_spill] sm:$0xff]  ;;  %v15995_v49 = vld [vmem:[#allocation216_spill] sm:$0xff] }
 0x779   :  { %v6669_v48 = vsel %vm5540_vm5, %v6668_v36, %v6664_v26  ;;  %v5234_v57 = vpop.permute.xlu1 %5233  ;;  %v6980_v21 = vsel %vm14221_vm4, %v6979_v35, %v6975_v4  ;;  %v6551_v1 = vsel %vm5596_vm13, %v6550_v39, %v6546_v7  ;;  %v6565_v24 = vrot.slane %v15994_v37, %v12432_v2  ;;  %v15996_v36 = vld [vmem:[#allocation450_spill] sm:$0xff]  ;;  %v15999_v26 = vld [vmem:[#allocation213_spill] sm:$0xff] }
 0x77a   :  { %v6673_v33 = vrot.slane %v15995_v49, %v12351_v31  ;;  %v6984_v30 = vrot.slane %v5234_v57, %v12362_v56  ;;  %5428 = vperm.xlu0 %8478, %v15996_v36   ;;  %v6560_v41 = vrot.slane %v15997_v13, %v12446_v27  ;;  %v6634_v23 = vrot.slane %v15998_v43, %v12415_v14  ;;  %v16000_v37 = vld [vmem:[#allocation410_spill] sm:$0xff]  ;;  %v16001_v36 = vld [vmem:[#allocation437_spill] sm:$0xff] }
 0x77b   :  { %v6625_v35 = vsel %vm5589_vm12, %v6624_v19, %v6620_v0  ;;  %v6989_v39 = vrot.slane %v5237_v59, %v12351_v31  ;;  %v6639_v4 = vrot.slane %v15999_v26, %v12446_v27  ;;  %v6688_v49 = vrot.slane %v16000_v37, %v12398_v32  ;;  %5467 = vperm.xlu1 %8479, %v12643_v51   ;;  %v16004_v43 = vld [vmem:[#allocation258_spill] sm:$0xff] }
 0x77c   :  { %v6630_v7 = vsel %vm5596_vm13, %v6629_v3, %v6625_v35  ;;  %v6674_v12 = vsel %vm14219_vm6, %v6673_v33, %v6669_v48  ;;  %v6985_v63 = vsel %vm5540_vm5, %v6984_v30, %v6980_v21  ;;  %v6728_v13 = vrot.slane %v16001_v36, %v12319_v6  ;;  %v5249_v3 = vpop.permute.xlu0 %5248  ;;  %v16002_v48 = vld [vmem:[#allocation413_spill] sm:$0xff]  ;;  %v16005_v26 = vld [vmem:[#allocation234_spill] sm:$0xff] }
 0x77d   :  { %v6679_v57 = vsel %vm5554_vm7, %v6678_v45, %v6674_v12  ;;  %v5240_v59 = vpop.permute.xlu1 %5239  ;;  %v6990_v0 = vsel %vm14219_vm6, %v6989_v39, %v6985_v63  ;;  %v6556_v19 = vsel %vm5603_vm14, %v6555_v54, %v6551_v1  ;;  %v6683_v33 = vrot.slane %v16002_v48, %v12365_v17  ;;  %v16003_v21 = vld [vmem:[#allocation441_spill] sm:$0xff] }
 0x77e   :  { %v6737_v45 = vrot.slane %v16003_v21, %v12348_v53  ;;  %v6994_v30 = vrot.slane %v5240_v59, %v12384_v46  ;;  %5431 = vperm.xlu0 %8478, %v16004_v43   ;;  %v6561_v35 = vsel %vm5610_vm15, %v6560_v41, %v6556_v19  ;;  %v6635_v51 = vsel %vm5603_vm14, %v6634_v23, %v6630_v7  ;;  %v16006_v54 = vld [vmem:[#allocation409_spill] sm:$0xff]  ;;  %v16007_v41 = vld [vmem:[#allocation220_spill] sm:$0xff]  ;;  %v16008_v21 = vld [vmem:[#allocation218_spill] sm:$0xff] }
 0x77f   :  { %v6732_v39 = vrot.slane %v16005_v26, %v12342_v50  ;;  %v6999_v12 = vrot.slane %v5243_v42, %v12365_v17  ;;  %v6644_v1 = vrot.slane %v16006_v54, %v12432_v2  ;;  %v6640_v63 = vsel %vm5610_vm15, %v6639_v4, %v6635_v51  ;;  %5470 = vperm.xlu1 %8479, %v12668_v28   ;;  %v16012_v51 = vld [vmem:[#allocation241_spill] sm:$0xff] }
 0x780   :  { %v6684_v37 = vsel %vm5561_vm8, %v6683_v33, %v6679_v57  ;;  %v6995_v36 = vsel %vm5554_vm7, %v6994_v30, %v6990_v0  ;;  %v6698_v19 = vrot.slane %v16007_v41, %v12412_v47  ;;  %v5255_v48 = vpop.permute.xlu0 %5254  ;;  %v6693_v4 = vrot.slane %v16008_v21, %v12387_v52  ;;  %v16009_v0 = vld [vmem:[#allocation246_spill] sm:$0xff]  ;;  %v16010_v30 = vld [vmem:[#allocation452_spill] sm:$0xff] }
 0x781   :  { %v6689_v59 = vsel %vm5568_vm9, %v6688_v49, %v6684_v37  ;;  %v6733_v23 = vsel %vm5519_vm2, %v6732_v39, %v6728_v13  ;;  %v5246_v7 = vpop.permute.xlu1 %5245  ;;  %v7000_v42 = vsel %vm5561_vm8, %v6999_v12, %v6995_v36  ;;  %v6747_v33 = vrot.slane %v16009_v0, %v12362_v56  ;;  %v16011_v13 = vld [vmem:[#allocation158_spill] sm:$0xff]  ;;  %v16013_v12 = vld [vmem:[#allocation415_spill] sm:$0xff]  ;;  %v16016_v21 = vld [vmem:[#allocation412_spill] sm:$0xff] }
 0x782   :  { %v6738_v57 = vsel %vm14220_vm3, %v6737_v45, %v6733_v23  ;;  %v7004_v49 = vrot.slane %v5246_v7, %v12398_v32  ;;  %5434 = vperm.xlu0 %8478, %v16010_v30   ;;  %v6155_v43 = vrot.slane %v16011_v13, %v12429_v62  ;;  %v13295_v28 = vsel %vm5617_vm0, %v6565_v24, %v6561_v35  ;;  %v16014_v35 = vld [vmem:[#allocation264_spill] sm:$0xff]  ;;  %v16015_v7 = vld [vmem:[#allocation265_spill] sm:$0xff]  ;;  %v16075_v13 = vld [vmem:[#allocation467_spill] sm:$0xff] }
 0x783   :  { %v6742_v26 = vrot.slane %v16012_v51, %v12345_v44  ;;  %v7009_v39 = vrot.slane %v5249_v3, %v12387_v52  ;;  %v13301_v45 = vsel %vm5617_vm0, %v6644_v1, %v6640_v63  ;;  %v6703_v54 = vrot.slane %v16013_v12, %v12401_v22  ;;  %5473 = vperm.xlu1 %8479, %v16015_v7   ;;  %v16020_v51 = vld [vmem:[#allocation260_spill] sm:$0xff]  ;;  %v16022_v7 = vld [vmem:[#allocation418_spill] sm:$0xff] }
 0x784   :  { %v6694_v37 = vsel %vm5575_vm10, %v6693_v4, %v6689_v59  ;;  %v7005_v36 = vsel %vm5568_vm9, %v7004_v49, %v7000_v42  ;;  %v6807_v23 = vrot.slane %v16014_v35, %v12319_v6  ;;  %v5261_v63 = vpop.permute.xlu0 %5260  ;;  %v6713_v0 = vrot.slane %v16016_v21, %v12415_v14  ;;  %v16017_v42 = vld [vmem:[#allocation458_spill] sm:$0xff]  ;;  %v16019_v49 = vld [vmem:[#allocation443_spill] sm:$0xff] }
 0x785   :  { %v6699_v41 = vsel %vm5582_vm11, %v6698_v19, %v6694_v37  ;;  %v6743_v24 = vsel %vm14221_vm4, %v6742_v26, %v6738_v57  ;;  %v5252_v3 = vpop.permute.xlu1 %5251  ;;  %v7010_v1 = vsel %vm5575_vm10, %v7009_v39, %v7005_v36  ;;  %v6816_v4 = vrot.slane %v16017_v42, %v12348_v53  ;;  %v16018_v57 = vld [vmem:[#allocation455_spill] sm:$0xff]  ;;  %v16021_v37 = vld [vmem:[#allocation245_spill] sm:$0xff] }
 0x786   :  { %v6748_v59 = vsel %vm5540_vm5, %v6747_v33, %v6743_v24  ;;  %v7014_v19 = vrot.slane %v5252_v3, %v12412_v47  ;;  %5437 = vperm.xlu0 %8478, %v16018_v57   ;;  %v6757_v30 = vrot.slane %v16019_v49, %v12384_v46  ;;  %v6811_v26 = vrot.slane %v16020_v51, %v12342_v50  ;;  %v16023_v49 = vld [vmem:[#allocation261_spill] sm:$0xff]  ;;  %v16043_v21 = vld [vmem:[#allocation267_spill] sm:$0xff] }
 0x787   :  { %v6886_v39 = vrot.slane %v12917_v20, %v12319_v6  ;;  %v7019_v12 = vrot.slane %v5255_v48, %v12401_v22  ;;  %v6704_v33 = vsel %vm5589_vm12, %v6703_v54, %v6699_v41  ;;  %v6752_v36 = vrot.slane %v16021_v37, %v12351_v31  ;;  %5476 = vperm.xlu1 %8479, %v12685_v16  }
 0x788   :  { %v6895_v24 = vrot.slane %v12946_v25, %v12348_v53  ;;  %v7015_v35 = vsel %vm5582_vm11, %v7014_v19, %v7010_v1  ;;  %v6708_v3 = vrot.slane %v16022_v7, %v12429_v62  ;;  %v6812_v42 = vsel %vm5519_vm2, %v6811_v26, %v6807_v23  ;;  %v5267_v41 = vpop.permute.xlu0 %5266  ;;  %v16027_v7 = vld [vmem:[#allocation266_spill] sm:$0xff] }
 0x789   :  { %v6890_v20 = vrot.slane %v12888_v5, %v12342_v50  ;;  %v5258_v48 = vpop.permute.xlu1 %5257  ;;  %v7020_v54 = vsel %vm5589_vm12, %v7019_v12, %v7015_v35  ;;  %v6753_v57 = vsel %vm14219_vm6, %v6752_v36, %v6748_v59  ;;  %v6817_v25 = vsel %vm14220_vm3, %v6816_v4, %v6812_v42  ;;  %v16024_v5 = vld [vmem:[#allocation456_spill] sm:$0xff]  ;;  %v16026_v36 = vld [vmem:[#allocation438_spill] sm:$0xff] }
 0x78a   :  { %v6826_v1 = vrot.slane %v12719_v34, %v12362_v56  ;;  %v7024_v19 = vrot.slane %v5258_v48, %v12429_v62  ;;  %5440 = vperm.xlu0 %8478, %v16023_v49   ;;  %v6758_v23 = vsel %vm5554_vm7, %v6757_v30, %v6753_v57  ;;  %v6821_v16 = vrot.slane %v16024_v5, %v12345_v44  ;;  %v16025_v59 = vld [vmem:[#allocation248_spill] sm:$0xff]  ;;  %v16028_v48 = vld [vmem:[#allocation271_spill] sm:$0xff] }
 0x78b   :  { %v6891_v51 = vsel %vm5519_vm2, %v6890_v20, %v6886_v39  ;;  %v7029_v26 = vrot.slane %v5261_v63, %v12415_v14  ;;  %v6767_v12 = vrot.slane %v16025_v59, %v12398_v32  ;;  %v6905_v34 = vrot.slane %v12976_v18, %v12362_v56  ;;  %5479 = vperm.xlu1 %8479, %v16027_v7   ;;  %v16032_v59 = vld [vmem:[#allocation447_spill] sm:$0xff] }
 0x78c   :  { %v6896_v4 = vsel %vm14220_vm3, %v6895_v24, %v6891_v51  ;;  %v7025_v37 = vsel %vm5596_vm13, %v7024_v19, %v7020_v54  ;;  %v6762_v30 = vrot.slane %v16026_v36, %v12365_v17  ;;  %v6822_v35 = vsel %vm14221_vm4, %v6821_v16, %v6817_v25  ;;  %v5273_v20 = vpop.permute.xlu0 %5272  ;;  %v16029_v19 = vld [vmem:[#allocation457_spill] sm:$0xff]  ;;  %v16033_v36 = vld [vmem:[#allocation280_spill] sm:$0xff] }
 0x78d   :  { %v6900_v39 = vrot.slane %v12919_v55, %v12345_v44  ;;  %v5264_v63 = vpop.permute.xlu1 %5263  ;;  %v7030_v42 = vsel %vm5603_vm14, %v7029_v26, %v7025_v37  ;;  %v6709_v24 = vsel %vm5596_vm13, %v6708_v3, %v6704_v33  ;;  %v6827_v18 = vsel %vm5540_vm5, %v6826_v1, %v6822_v35  ;;  %v16030_v55 = vld [vmem:[#allocation463_spill] sm:$0xff]  ;;  %v16031_v1 = vld [vmem:[#allocation282_spill] sm:$0xff] }
 0x78e   :  { %v6836_v54 = vrot.slane %v16028_v48, %v12384_v46  ;;  %v7034_v57 = vrot.slane %v5264_v63, %v12446_v27  ;;  %5443 = vperm.xlu0 %8478, %v16029_v19   ;;  %v6763_v25 = vsel %vm5561_vm8, %v6762_v30, %v6758_v23  ;;  %v6831_v49 = vrot.slane %v16030_v55, %v12351_v31  ;;  %v16037_v48 = vld [vmem:[#allocation423_spill] sm:$0xff]  ;;  %v16039_v55 = vld [vmem:[#allocation465_spill] sm:$0xff] }
 0x78f   :  { %v6901_v5 = vsel %vm14221_vm4, %v6900_v39, %v6896_v4  ;;  %v7039_v16 = vrot.slane %v5267_v41, %v12432_v2  ;;  %v6768_v33 = vsel %vm5568_vm9, %v6767_v12, %v6763_v25  ;;  %v6915_v51 = vrot.slane %v16031_v1, %v12384_v46  ;;  %v16034_v41 = vld [vmem:[#allocation268_spill] sm:$0xff]  ;;  %v16035_v39 = vld [vmem:[#allocation273_spill] sm:$0xff]  ;;  %v16038_v19 = vld [vmem:[#allocation247_spill] sm:$0xff] }
 0x790   :  { %v6906_v3 = vsel %vm5540_vm5, %v6905_v34, %v6901_v5  ;;  %v7035_v26 = vsel %vm5610_vm15, %v7034_v57, %v7030_v42  ;;  %v6777_v37 = vrot.slane %v16032_v59, %v12412_v47  ;;  %v6832_v23 = vsel %vm14219_vm6, %v6831_v49, %v6827_v18  ;;  %5482 = vperm.xlu1 %8479, %v16034_v41   ;;  %v5279_v34 = vpop.permute.xlu0 %5278  ;;  %v16036_v18 = vld [vmem:[#allocation255_spill] sm:$0xff]  ;;  %v16041_v59 = vld [vmem:[#allocation233_spill] sm:$0xff] }
 0x791   :  { %v6910_v30 = vrot.slane %v16033_v36, %v12351_v31  ;;  %v13386_v4 = vsel %vm5617_vm0, %v7039_v16, %v7035_v26  ;;  %v5270_v12 = vpop.permute.xlu1 %5269  ;;  %v6837_v35 = vsel %vm5554_vm7, %v6836_v54, %v6832_v23  ;;  %v6846_v7 = vrot.slane %v16035_v39, %v12398_v32  ;;  %v16040_v16 = vld [vmem:[#allocation284_spill] sm:$0xff] }
 0x792   :  { %v7048_v63 = vrot.slane %v5273_v20, %v12342_v50  ;;  %v7044_v42 = vrot.slane %v5270_v12, %v12319_v6  ;;  %5404 = vperm.xlu0 %8478, %v16036_v18   ;;  %v6723_v57 = vrot.slane %v16037_v48, %v12432_v2  ;;  %v6772_v25 = vrot.slane %v16038_v19, %v12387_v52  ;;  %v16044_v39 = vld [vmem:[#allocation276_spill] sm:$0xff]  ;;  %v16045_v18 = vld [vmem:[#allocation269_spill] sm:$0xff] }
 0x793   :  { %v6841_v49 = vrot.slane %v16039_v55, %v12365_v17  ;;  %v6911_v54 = vsel %vm14219_vm6, %v6910_v30, %v6906_v3  ;;  %v6714_v20 = vsel %vm5603_vm14, %v6713_v0, %v6709_v24  ;;  %v6925_v1 = vrot.slane %v16040_v16, %v12398_v32  ;;  %v16042_v3 = vld [vmem:[#allocation281_spill] sm:$0xff]  ;;  %v16047_v48 = vld [vmem:[#allocation272_spill] sm:$0xff] }
 0x794   :  { %v6916_v5 = vsel %vm5554_vm7, %v6915_v51, %v6911_v54  ;;  %v7049_v26 = vsel %vm5519_vm2, %v7048_v63, %v7044_v42  ;;  %v6718_v23 = vrot.slane %v16041_v59, %v12446_v27  ;;  %v6773_v36 = vsel %vm5575_vm10, %v6772_v25, %v6768_v33  ;;  %5485 = vperm.xlu1 %8479, %v16043_v21   ;;  %v5285_v24 = vpop.permute.xlu0 %5284  ;;  %v16046_v33 = vld [vmem:[#allocation256_spill] sm:$0xff]  ;;  %v16049_v54 = vld [vmem:[#allocation286_spill] sm:$0xff] }
 0x795   :  { %v6842_v41 = vsel %vm5561_vm8, %v6841_v49, %v6837_v35  ;;  %v6920_v30 = vrot.slane %v16042_v3, %v12365_v17  ;;  %v5276_v0 = vpop.permute.xlu1 %5275  ;;  %v6778_v51 = vsel %vm5582_vm11, %v6777_v37, %v6773_v36  ;;  %v6856_v63 = vrot.slane %v16044_v39, %v12412_v47  ;;  %v16048_v37 = vld [vmem:[#allocation440_spill] sm:$0xff]  ;;  %v16050_v3 = vld [vmem:[#allocation283_spill] sm:$0xff] }
 0x796   :  { %v6847_v12 = vsel %vm5568_vm9, %v6846_v7, %v6842_v41  ;;  %v7053_v42 = vrot.slane %v5276_v0, %v12348_v53  ;;  %5488 = vperm.xlu0 %8478, %v16045_v18   ;;  %v6787_v35 = vrot.slane %v16046_v33, %v12429_v62  ;;  %v6851_v19 = vrot.slane %v16047_v48, %v12387_v52  ;;  %v16054_v18 = vld [vmem:[#allocation274_spill] sm:$0xff] }
 0x797   :  { %v6921_v25 = vsel %vm5561_vm8, %v6920_v30, %v6916_v5  ;;  %v7058_v55 = vrot.slane %v5279_v34, %v12345_v44  ;;  %v6782_v7 = vrot.slane %v16048_v37, %v12401_v22  ;;  %v6935_v16 = vrot.slane %v16049_v54, %v12412_v47  ;;  %v16051_v30 = vld [vmem:[#allocation454_spill] sm:$0xff] }
 0x798   :  { %v6926_v49 = vsel %vm5568_vm9, %v6925_v1, %v6921_v25  ;;  %v7054_v59 = vsel %vm14220_vm3, %v7053_v42, %v7049_v26  ;;  %v6719_v36 = vsel %vm5610_vm15, %v6718_v23, %v6714_v20  ;;  %v6852_v41 = vsel %vm5575_vm10, %v6851_v19, %v6847_v12  ;;  %5446 = vperm.xlu1 %8479, %v16051_v30   ;;  %v5291_v0 = vpop.permute.xlu0 %5290  ;;  %v16052_v26 = vld [vmem:[#allocation277_spill] sm:$0xff]  ;;  %v16053_v23 = vld [vmem:[#allocation262_spill] sm:$0xff] }
 0x799   :  { %v6930_v5 = vrot.slane %v16050_v3, %v12387_v52  ;;  %v5282_v34 = vpop.permute.xlu1 %5281  ;;  %v7059_v21 = vsel %vm14221_vm4, %v7058_v55, %v7054_v59  ;;  %v6783_v1 = vsel %vm5589_vm12, %v6782_v7, %v6778_v51  ;;  %v6857_v39 = vsel %vm5582_vm11, %v6856_v63, %v6852_v41  ;;  %v16055_v51 = vld [vmem:[#allocation259_spill] sm:$0xff]  ;;  %v16057_v59 = vld [vmem:[#allocation285_spill] sm:$0xff] }
 0x79a   :  { %v6866_v42 = vrot.slane %v16052_v26, %v12429_v62  ;;  %v7063_v20 = vrot.slane %v5282_v34, %v12362_v56  ;;  %5449 = vperm.xlu0 %8478, %v16053_v23   ;;  %v6788_v12 = vsel %vm5596_vm13, %v6787_v35, %v6783_v1  ;;  %v6861_v33 = vrot.slane %v16054_v18, %v12401_v22  ;;  %v16056_v7 = vld [vmem:[#allocation251_spill] sm:$0xff]  ;;  %v16059_v30 = vld [vmem:[#allocation469_spill] sm:$0xff]  ;;  %v16061_v26 = vld [vmem:[#allocation464_spill] sm:$0xff] }
 0x79b   :  { %v6931_v48 = vsel %vm5575_vm10, %v6930_v5, %v6926_v49  ;;  %v7068_v19 = vrot.slane %v5285_v24, %v12351_v31  ;;  %v6797_v25 = vrot.slane %v16055_v51, %v12446_v27  ;;  %v6945_v55 = vrot.slane %v13105_v8, %v12429_v62  ;;  %v16058_v41 = vld [vmem:[#allocation451_spill] sm:$0xff]  ;;  %v16060_v1 = vld [vmem:[#allocation453_spill] sm:$0xff] }
 0x79c   :  { %v6936_v63 = vsel %vm5582_vm11, %v6935_v16, %v6931_v48  ;;  %v7064_v37 = vsel %vm5540_vm5, %v7063_v20, %v7059_v21  ;;  %v6792_v35 = vrot.slane %v16056_v7, %v12415_v14  ;;  %v6862_v54 = vsel %vm5589_vm12, %v6861_v33, %v6857_v39  ;;  %5407 = vperm.xlu1 %8479, %v16058_v41   ;;  %v5297_v5 = vpop.permute.xlu0 %5296  ;;  %v16062_v48 = vld [vmem:[#allocation448_spill] sm:$0xff]  ;;  %v16063_v51 = vld [vmem:[#allocation287_spill] sm:$0xff]  ;;  %v16067_v41 = vld [vmem:[#allocation278_spill] sm:$0xff] }
 0x79d   :  { %v6940_v49 = vrot.slane %v16057_v59, %v12401_v22  ;;  %v5288_v24 = vpop.permute.xlu1 %5287  ;;  %v7069_v3 = vsel %vm14219_vm6, %v7068_v19, %v7064_v37  ;;  %v6724_v16 = vsel %vm5617_vm0, %v6723_v57, %v6719_v36  ;;  %v6867_v8 = vsel %vm5596_vm13, %v6866_v42, %v6862_v54  ;;  %v16066_v59 = vld [vmem:[#allocation462_spill] sm:$0xff] }
 0x79e   :  { %v6876_v34 = vrot.slane %v16059_v30, %v12446_v27  ;;  %v7073_v21 = vrot.slane %v5288_v24, %v12384_v46  ;;  %5410 = vperm.xlu0 %8478, %v16060_v1   ;;  %v6793_v39 = vsel %vm5603_vm14, %v6792_v35, %v6788_v12  ;;  %v6871_v20 = vrot.slane %v16061_v26, %v12415_v14  ;;  %v16068_v30 = vld [vmem:[#allocation275_spill] sm:$0xff] }
 0x79f   :  { %v6941_v23 = vsel %vm5589_vm12, %v6940_v49, %v6936_v63  ;;  %v7078_v18 = vrot.slane %v5291_v0, %v12365_v17  ;;  %v6798_v57 = vsel %vm5610_vm15, %v6797_v25, %v6793_v39  ;;  %v6955_v42 = vrot.slane %v13152_v9, %v12446_v27  ;;  %v16064_v63 = vld [vmem:[#allocation460_spill] sm:$0xff] }
 0x7a0   :  { %v6946_v36 = vsel %vm5596_vm13, %v6945_v55, %v6941_v23  ;;  %v7074_v33 = vsel %vm5554_vm7, %v7073_v21, %v7069_v3  ;;  %v6802_v19 = vrot.slane %v16062_v48, %v12432_v2  ;;  %v6872_v12 = vsel %vm5603_vm14, %v6871_v20, %v6867_v8  ;;  %5491 = vperm.xlu1 %8479, %v16064_v63   ;;  %v5303_v7 = vpop.permute.xlu0 %5302  ;;  %v16065_v55 = vld [vmem:[#allocation279_spill] sm:$0xff] }
 0x7a1   :  { %v6950_v37 = vrot.slane %v16063_v51, %v12415_v14  ;;  %v5294_v0 = vpop.permute.xlu1 %5293  ;;  %v7079_v25 = vsel %vm5561_vm8, %v7078_v18, %v7074_v33  ;;  %vm14222_vm6 = vcmask 1041408   ;;  %v7438_v9 = vsel %vm7436_vm1, %v13301_v45, %v16065_v55  ;;  %v16069_v23 = vld [vmem:[#allocation263_spill] sm:$0xff] }
 0x7a2   :  { %v6877_v35 = vsel %vm5610_vm15, %v6876_v34, %v6872_v12  ;;  %v7083_v54 = vrot.slane %v5294_v0, %v12398_v32  ;;  %5494 = vperm.xlu0 %8478, %v16066_v59   ;;  %v6803_v49 = vsel %vm5617_vm0, %v6802_v19, %v6798_v57  ;;  %v6881_v24 = vrot.slane %v16067_v41, %v12432_v2  ;;  %v16072_v51 = vld [vmem:[#allocation143_spill] sm:$0xff] }
 0x7a3   :  { %v6951_v3 = vsel %vm5603_vm14, %v6950_v37, %v6946_v36  ;;  %v7088_v8 = vrot.slane %v5297_v5, %v12387_v52  ;;  %v7437_v21 = vsel %vm7436_vm1, %v13295_v28, %v16068_v30  ;;  %v7439_v45 = vsel %vm7436_vm1, %v6724_v16, %v13133_v15  ;;  %v16070_v16 = vld [vmem:[#allocation155_spill] sm:$0xff] }
 0x7a4   :  { %v6956_v34 = vsel %vm5610_vm15, %v6955_v42, %v6951_v3  ;;  %v7084_v1 = vsel %vm5568_vm9, %v7083_v54, %v7079_v25  ;;  %v7463_v39 = vsel %vm14222_vm6, %v7438_v9, 0.0  ;;  %v6882_v26 = vsel %vm5617_vm0, %v6881_v24, %v6877_v35  ;;  %5452 = vperm.xlu1 %8479, %v16069_v23   ;;  %v5309_v28 = vpop.permute.xlu0 %5308  ;;  %v16071_v42 = vld [vmem:[#allocation270_spill] sm:$0xff]  ;;  %v16073_v25 = vld [vmem:[#allocation459_spill] sm:$0xff]  ;;  %v16080_v23 = vld [vmem:[#allocation461_spill] sm:$0xff] }
 0x7a5   :  { %v6960_v20 = vrot.slane %v13107_v60, %v12432_v2  ;;  %v5300_v5 = vpop.permute.xlu1 %5299  ;;  %v7089_v18 = vsel %vm5575_vm10, %v7088_v8, %v7084_v1  ;;  %v6087_v15 = vsel %vm5610_vm15, %v6086_v58, %v13161_v38  ;;  %v6150_v57 = vrot.slane %v16070_v16, %v12401_v22  ;;  %v16077_v8 = vld [vmem:[#allocation436_spill] sm:$0xff]  ;;  %v16078_v30 = vld [vmem:[#allocation39_spill] sm:$0xff] }
 0x7a6   :  { %v7440_v36 = vsel %vm7436_vm1, %v6803_v49, %v13140_v10  ;;  %v7093_v60 = vrot.slane %v5300_v5, %v12412_v47  ;;  %5497 = vperm.xlu0 %8478, %v16071_v42   ;;  %v7462_v33 = vsel %vm14222_vm6, %v7437_v21, 0.0  ;;  %v7465_v48 = vsel %vm14222_vm6, %v7439_v45, 0.0  ;;  %v16076_v49 = vld [vmem:[#allocation157_spill] sm:$0xff]  ;;  %v16079_v1 = vld [vmem:[#allocation364_spill] sm:$0xff] }
 0x7a7   :  { %v6961_v19 = vsel %vm5617_vm0, %v6960_v20, %v6956_v34  ;;  %v7098_v61 = vrot.slane %v5303_v7, %v12401_v22  ;;  %v6151_v38 = vsel %vm5589_vm12, %v6150_v57, %v13212_v40  ;;  %v7464_v58 = vadd.f32 %v7463_v39, %v7462_v33 }
 0x7a8   :  { %v7441_v12 = vsel %vm7436_vm1, %v6882_v26, %v13147_v11  ;;  %v7094_v10 = vsel %vm5582_vm11, %v7093_v60, %v7089_v18  ;;  %v6091_v37 = vrot.slane %v16072_v51, %v12432_v2  ;;  %v6156_v63 = vsel %vm5596_vm13, %v6155_v43, %v6151_v38  ;;  %5455 = vperm.xlu1 %8479, %v16073_v25   ;;  %v5315_v55 = vpop.permute.xlu0 %5314  ;;  %v16074_v11 = vld [vmem:[#allocation160_spill] sm:$0xff]  ;;  %v16082_v60 = vld [vmem:[#allocation159_spill] sm:$0xff] }
 0x7a9   :  { %v7467_v0 = vsel %vm14222_vm6, %v7440_v36, 0.0  ;;  %v5306_v7 = vpop.permute.xlu1 %5305  ;;  %v7099_v40 = vsel %vm5589_vm12, %v7098_v61, %v7094_v10  ;;  %v6165_v9 = vrot.slane %v16074_v11, %v12446_v27  ;;  %v7466_v35 = vadd.f32 %v7465_v48, %v7464_v58  ;;  %v16084_v10 = vld [vmem:[#allocation161_spill] sm:$0xff] }
 0x7aa   :  { %v7442_v54 = vsel %vm7436_vm1, %v6961_v19, %v13158_v29  ;;  %v7103_v59 = vrot.slane %v5306_v7, %v12429_v62  ;;  %5500 = vperm.xlu0 %8478, %v16075_v13   ;;  %v6092_v43 = vsel %vm5617_vm0, %v6091_v37, %v6087_v15  ;;  %v6160_v41 = vrot.slane %v16076_v49, %v12415_v14  ;;  %v16083_v19 = vld [vmem:[#allocation162_spill] sm:$0xff]  ;;  %v16085_v37 = vld [vmem:[#allocation164_spill] sm:$0xff] }
 0x7ab   :  { %v7469_v24 = vsel %vm14222_vm6, %v7441_v12, 0.0  ;;  %v7108_v3 = vrot.slane %v5309_v28, %v12415_v14  ;;  %v3971_v21 = vmul.f32 %v16078_v30, %v16077_v8  ;;  %v7468_v45 = vadd.f32 %v7467_v0, %v7466_v35 }
 0x7ac   :  { %v7443_v29 = vsel %vm7436_vm1, %v13386_v4, %v6092_v43  ;;  %v7104_v34 = vsel %vm5596_vm13, %v7103_v59, %v7099_v40  ;;  %v2337_v39 = vmul.f32 0.0625, %v16079_v1  ;;  %v6161_v26 = vsel %vm5603_vm14, %v6160_v41, %v6156_v63  ;;  %5458 = vperm.xlu1 %8479, %v16080_v23   ;;  %v5321_v28 = vpop.permute.xlu0 %5320  ;;  %v16081_v4 = vld [vmem:[#allocation37_spill] sm:$0xff]  ;;  %v2581_v59 = vpop.f32.mrf.mxu1 }
 0x7ad   :  { %v7471_v20 = vsel %vm14222_vm6, %v7442_v54, 0.0  ;;  %v5312_v5 = vpop.permute.xlu1 %5311  ;;  %v7109_v18 = vsel %vm5603_vm14, %v7108_v3, %v7104_v34  ;;  %v6166_v15 = vsel %vm5610_vm15, %v6165_v9, %v6161_v26  ;;  %v7470_v16 = vadd.f32 %v7469_v24, %v7468_v45  ;;  %v2503_v54 = vld [vmem:[%s14014_s5] sm:$0x3]  ;;  %v16086_v24 = vld [vmem:[#allocation166_spill] sm:$0xff] }
 0x7ae   :  { %v7113_v57 = vrot.slane %v5312_v5, %v12446_v27  ;;  %5506 = vperm.xlu0 %8478, %v3971_v21   ;;  %v3970_v36 = vmul.f32 %v16081_v4, %v2337_v39  ;;  %v6170_v42 = vrot.slane %v16082_v60, %v12432_v2  ;;  %v7473_v33 = vsel %vm14222_vm6, %v7443_v29, 0.0  ;;  %v16087_v21 = vld [vmem:[#allocation163_spill] sm:$0xff]  ;;  %v16089_v39 = vld [vmem:[#allocation316_spill] sm:$0xff]  ;;  %v2583_v23 = vpop.f32.mrf.mxu1  ;;  %v16091_v60 = vld [vmem:[#allocation165_spill] sm:$0xff] }
 0x7af   :  { %v7118_v48 = vrot.slane %v5315_v55, %v12432_v2  ;;  %v6175_v61 = vrot.slane %v16083_v19, %v12319_v6  ;;  %v7472_v38 = vadd.f32 %v7471_v20, %v7470_v16  ;;  %v6179_v51 = vrot.slane %v16084_v10, %v12342_v50  ;;  %v16088_v34 = vld [vmem:[#allocation299_spill] sm:$0xff] }
 0x7b0   :  { %v7114_v58 = vsel %vm5610_vm15, %v7113_v57, %v7109_v18  ;;  %v6171_v12 = vsel %vm5617_vm0, %v6170_v42, %v6166_v15  ;;  %v6184_v63 = vrot.slane %v16085_v37, %v12348_v53  ;;  %5503 = vperm.xlu1 %8479, %v3970_v36   ;;  %v5327_v7 = vpop.permute.xlu0 %5326  ;;  %v7127_v11 = vrot.slane %v5321_v28, %v12342_v50  ;;  %v16090_v15 = vld [vmem:[#allocation168_spill] sm:$0xff]  ;;  %v7487_v19 = vld [vmem:[%s14015_s7] sm:$0x3] }
 0x7b1   :  { %v7119_v0 = vsel %vm5617_vm0, %v7118_v48, %v7114_v58  ;;  %v5318_v25 = vpop.permute.xlu1 %5317  ;;  %v7474_v40 = vadd.f32 %v7473_v33, %v7472_v38  ;;  %v6180_v13 = vsel %vm5519_vm2, %v6179_v51, %v6175_v61  ;;  %v6194_v3 = vrot.slane %v16086_v24, %v12362_v56  ;;  %v16092_v58 = vld [vmem:[#allocation167_spill] sm:$0xff] }
 0x7b2   :  { %v7444_v55 = vsel %vm7436_vm1, %v7119_v0, %v6171_v12  ;;  %v7123_v9 = vrot.slane %v5318_v25, %v12319_v6  ;;  %v6185_v41 = vsel %vm14220_vm3, %v6184_v63, %v6180_v13  ;;  %v6189_v45 = vrot.slane %v16087_v21, %v12345_v44  ;;  %v16094_v63 = vld [vmem:[#allocation170_spill] sm:$0xff]  ;;  %v16096_v24 = vld [vmem:[#allocation171_spill] sm:$0xff] }
 0x7b3   :  { %v7475_v35 = vsel %vm14222_vm6, %v7444_v55, 0.0  ;;  %v2508_v1 = vrot.slane %v2503_v54, %v16088_v34  ;;  %v2512_v26 = vrot.slane %v2503_v54, %v16089_v39  ;;  %v7137_v20 = vrot.slane %v5327_v7, %v12345_v44 }
 0x7b4   :  { %v13586_v43 = vadd.f32 %v7475_v35, %v7474_v40  ;;  %v7128_v49 = vsel %vm5519_vm2, %v7127_v11, %v7123_v9  ;;  %v5333_v30 = vpop.permute.xlu0 %5332  ;;  %v6190_v5 = vsel %vm14221_vm4, %v6189_v45, %v6185_v41  ;;  %v6204_v16 = vrot.slane %v16090_v15, %v12384_v46  ;;  %v16097_v45 = vld [vmem:[#allocation169_spill] sm:$0xff] }
 0x7b5   :  { %v5324_v8 = vpop.permute.xlu1 %5323  ;;  %v6195_v28 = vsel %vm5540_vm5, %v6194_v3, %v6190_v5  ;;  %v6199_v42 = vrot.slane %v16091_v60, %v12351_v31  ;;  %v2582_v48 = vadd.f32 %v2581_v59, %v2508_v1  ;;  %v2584_v61 = vadd.f32 %v2583_v23, %v2512_v26 }
 0x7b6   :  { %v7132_v29 = vrot.slane %v5324_v8, %v12348_v53  ;;  %v7147_v38 = vrot.slane %v5333_v30, %v12351_v31  ;;  %v6209_v12 = vrot.slane %v16092_v58, %v12365_v17  ;;  %v6214_v0 = vrot.slane %v16094_v63, %v12398_v32 }
 0x7b7   :  { %v7492_v55 = vrot.slane %v7487_v19, %v16088_v34  ;;  %v2586_v9 = vmax.f32 %v2582_v48, 0.0  ;;  %v2587_v35 = vmax.f32 %v2584_v61, 0.0  ;;  %v7496_v54 = vrot.slane %v7487_v19, %v16089_v39 }
 0x7b8   :  { %v7133_v18 = vsel %vm14220_vm3, %v7132_v29, %v7128_v49  ;;  %v5339_v36 = vpop.permute.xlu0 %5338  ;;  %vm16093_vm3 = vcmask 392512   ;;  %v6224_v3 = vrot.slane %v16096_v24, %v12412_v47  ;;  %v6219_v29 = vrot.slane %v16097_v45, %v12387_v52 }
 0x7b9   :  { %v5330_v57 = vpop.permute.xlu1 %5329  ;;  %v7138_v4 = vsel %vm14221_vm4, %v7137_v20, %v7133_v18  ;;  %v6200_v10 = vsel %vm16093_vm3, %v6199_v42, %v6195_v28  ;;  %vm16095_vm4 = vmmov %vm16093_vm3  ;;  %v7157_v59 = vrot.slane %v5339_v36, %v12365_v17  ;;  %v7499_v1 = vmul.f32 %v7492_v55, %v2586_v9  ;;  %v16099_v42 = vld [vmem:[#allocation365_spill] sm:$0xff] }
 0x7ba   :  { %v7142_v33 = vrot.slane %v5330_v57, %v12362_v56  ;;  %v6205_v37 = vsel %vm5554_vm7, %v6204_v16, %v6200_v10  ;;  %v7500_v39 = vmul.f32 %v7496_v54, %v2587_v35  ;;  %v16098_v16 = vld [vmem:[#allocation366_spill] sm:$0xff]  ;;  %vm16103_vm3 = vcmask 195712  }
 0x7bb   :  { %v6210_v13 = vsel %vm5561_vm8, %v6209_v12, %v6205_v37  ;;  %v6234_v57 = vrot.slane %v16098_v16, %v12429_v62  ;;  %v7501_v36 = vsel %vm14222_vm6, %v7499_v1, 0.0  ;;  %v16100_v37 = vld [vmem:[#allocation173_spill] sm:$0xff] }
 0x7bc   :  { %v7143_v51 = vsel %vm5540_vm5, %v7142_v33, %v7138_v4  ;;  %v5345_v40 = vpop.permute.xlu0 %5344  ;;  %v6215_v41 = vsel %vm5568_vm9, %v6214_v0, %v6210_v13  ;;  %v7502_v60 = vsel %vm14222_vm6, %v7500_v39, 0.0  ;;  %v6229_v33 = vrot.slane %v16099_v42, %v12401_v22 }
 0x7bd   :  { %v5336_v25 = vpop.permute.xlu1 %5335  ;;  %v7148_v7 = vsel %vm16095_vm4, %v7147_v38, %v7143_v51  ;;  %v7167_v26 = vrot.slane %v5345_v40, %v12387_v52  ;;  %v6220_v20 = vsel %vm5575_vm10, %v6219_v29, %v6215_v41  ;;  %v7503_v10 = vadd.f32 %v7502_v60, %v7501_v36 }
 0x7be   :  { %v7152_v11 = vrot.slane %v5336_v25, %v12384_v46  ;;  %v6225_v5 = vsel %vm5582_vm11, %v6224_v3, %v6220_v20  ;;  %v6244_v63 = vrot.slane %v16100_v37, %v12446_v27  ;;  %v16101_v25 = vld [vmem:[#allocation172_spill] sm:$0xff]  ;;  %vm16104_vm4 = vcmask 261312  }
 0x7bf   :  { %v6230_v61 = vsel %vm5589_vm12, %v6229_v33, %v6225_v5 }
 0x7c0   :  { %v7153_v49 = vsel %vm5554_vm7, %v7152_v11, %v7148_v7  ;;  %v5351_v21 = vpop.permute.xlu0 %5350  ;;  %v6235_v51 = vsel %vm5596_vm13, %v6234_v57, %v6230_v61  ;;  %v6239_v7 = vrot.slane %v16101_v25, %v12415_v14 }
 0x7c1   :  { %v5342_v8 = vpop.permute.xlu1 %5341  ;;  %v7158_v30 = vsel %vm5561_vm8, %v7157_v59, %v7153_v49  ;;  %v7177_v48 = vrot.slane %v5351_v21, %v12401_v22  ;;  %v16102_v49 = vld [vmem:[#allocation369_spill] sm:$0xff] }
 0x7c2   :  { %v7162_v34 = vrot.slane %v5342_v8, %v12398_v32  ;;  %v6240_v11 = vsel %vm5603_vm14, %v6239_v7, %v6235_v51  ;;  %v6249_v41 = vrot.slane %v16102_v49, %v12432_v2 }
 0x7c3   :  { %v6245_v59 = vsel %vm5610_vm15, %v6244_v63, %v6240_v11 }
 0x7c4   :  { %v7163_v23 = vsel %vm5568_vm9, %v7162_v34, %v7158_v30  ;;  %v5357_v15 = vpop.permute.xlu0 %5356  ;;  %v6250_v8 = vsel %vm5617_vm0, %v6249_v41, %v6245_v59 }
 0x7c5   :  { %v5348_v18 = vpop.permute.xlu1 %5347  ;;  %v7168_v28 = vsel %vm5575_vm10, %v7167_v26, %v7163_v23  ;;  %v7187_v40 = vrot.slane %v5357_v15, %v12415_v14 }
 0x7c6   :  { %v7172_v4 = vrot.slane %v5348_v18, %v12412_v47 }
 0x7c8   :  { %v7173_v19 = vsel %vm5582_vm11, %v7172_v4, %v7168_v28  ;;  %v5363_v12 = vpop.permute.xlu0 %5362 }
 0x7c9   :  { %v5354_v38 = vpop.permute.xlu1 %5353  ;;  %v7178_v58 = vsel %vm5589_vm12, %v7177_v48, %v7173_v19  ;;  %v7197_v24 = vrot.slane %v5363_v12, %v12432_v2 }
 0x7ca   :  { %v7182_v0 = vrot.slane %v5354_v38, %v12429_v62 }
 0x7cc   :  { %v7183_v55 = vsel %vm5596_vm13, %v7182_v0, %v7178_v58  ;;  %v5369_v54 = vpop.permute.xlu0 %5368 }
 0x7cd   :  { %v5360_v9 = vpop.permute.xlu1 %5359  ;;  %v7188_v35 = vsel %vm5603_vm14, %v7187_v40, %v7183_v55  ;;  %7504 = vadd.xlane.f32.xlu0 %v7503_v10  ;;  %v7206_v34 = vrot.slane %v5369_v54, %v12342_v50 }
 0x7ce   :  { %v7192_v13 = vrot.slane %v5360_v9, %v12446_v27 }
 0x7d0   :  { %v7193_v3 = vsel %vm5610_vm15, %v7192_v13, %v7188_v35  ;;  %v5375_v45 = vpop.permute.xlu0 %5374 }
 0x7d1   :  { %v7198_v30 = vsel %vm5617_vm0, %v7197_v24, %v7193_v3  ;;  %v5366_v21 = vpop.permute.xlu1 %5365  ;;  %v7216_v28 = vrot.slane %v5375_v45, %v12345_v44 }
 0x7d2   :  { %v7445_v29 = vsel %vm7436_vm1, %v7198_v30, %v6250_v8  ;;  %v7202_v1 = vrot.slane %v5366_v21, %v12319_v6  ;;  %v16106_v8 = vld [vmem:[#allocation367_spill] sm:$0xff] }
 0x7d3   :  { %v7477_v39 = vsel %vm14222_vm6, %v7445_v29, 0.0  ;;  %vm16105_vm6 = vcmask 392512   ;;  %v6254_v30 = vrot.slane %v16106_v8, %v12319_v6  ;;  %v16107_v21 = vld [vmem:[#allocation175_spill] sm:$0xff] }
 0x7d4   :  { %v7207_v26 = vsel %vm5519_vm2, %v7206_v34, %v7202_v1  ;;  %v13672_v20 = vadd.f32 %v7477_v39, %v13586_v43  ;;  %v5381_v5 = vpop.permute.xlu0 %5380  ;;  %v6263_v45 = vrot.slane %v16107_v21, %v12348_v53  ;;  %v16108_v1 = vld [vmem:[#allocation174_spill] sm:$0xff] }
 0x7d5   :  { %v5372_v23 = vpop.permute.xlu1 %5371  ;;  %v7226_v60 = vrot.slane %v5381_v5, %v12351_v31  ;;  %v6258_v39 = vrot.slane %v16108_v1, %v12342_v50  ;;  %v16110_v5 = vld [vmem:[#allocation368_spill] sm:$0xff] }
 0x7d6   :  { %v7211_v18 = vrot.slane %v5372_v23, %v12348_v53 }
 0x7d8   :  { %v7212_v15 = vsel %vm16103_vm3, %v7211_v18, %v7207_v26  ;;  %v5387_v4 = vpop.permute.xlu0 %5386  ;;  %v6259_v26 = vsel %vm5519_vm2, %v6258_v39, %v6254_v30  ;;  %v6273_v18 = vrot.slane %v16110_v5, %v12362_v56  ;;  %v16122_v30 = vld [vmem:[#allocation370_spill] sm:$0xff]  ;;  %v16123_v39 = vld [vmem:[#allocation373_spill] sm:$0xff] }
 0x7d9   :  { %v5378_v16 = vpop.permute.xlu1 %5377  ;;  %v7217_v57 = vsel %vm16104_vm4, %v7216_v28, %v7212_v15  ;;  %v7236_v61 = vrot.slane %v5387_v4, %v12365_v17  ;;  %v16112_v4 = vld [vmem:[#allocation374_spill] sm:$0xff]  ;;  %v6293_v21 = vrot.slane %v16122_v30, %v12398_v32  ;;  %v16133_v30 = vld [vmem:[#allocation381_spill] sm:$0xff] }
 0x7da   :  { %v7221_v36 = vrot.slane %v5378_v16, %v12362_v56  ;;  %v16111_v16 = vld [vmem:[#allocation371_spill] sm:$0xff] }
 0x7dc   :  { %v7222_v42 = vsel %vm5540_vm5, %v7221_v36, %v7217_v57  ;;  %v5393_v48 = vpop.permute.xlu0 %5392  ;;  %v6268_v57 = vrot.slane %v16111_v16, %v12345_v44  ;;  %v6333_v36 = vrot.slane %v16112_v4, %v12319_v6  ;;  %v16125_v4 = vld [vmem:[#allocation184_spill] sm:$0xff] }
 0x7dd   :  { %v5384_v43 = vpop.permute.xlu1 %5383  ;;  %v7227_v33 = vsel %vm16105_vm6, %v7226_v60, %v7222_v42  ;;  %v7246_v37 = vrot.slane %v5393_v48, %v12387_v52  ;;  %vm16109_vm6 = vmmov %vm16103_vm3  ;;  %v16113_v60 = vld [vmem:[#allocation183_spill] sm:$0xff] }
 0x7de   :  { %v7231_v19 = vrot.slane %v5384_v43, %v12384_v46  ;;  %v6264_v23 = vsel %vm16109_vm6, %v6263_v45, %v6259_v26  ;;  %v6342_v42 = vrot.slane %v16113_v60, %v12348_v53  ;;  %vm16114_vm3 = vmmov %vm16104_vm4  ;;  %v6288_v26 = vrot.slane %v16123_v39, %v12365_v17 }
 0x7df   :  { %v6269_v43 = vsel %vm16114_vm3, %v6268_v57, %v6264_v23  ;;  %vm16118_vm4 = vmmov %vm16109_vm6  ;;  %vm16120_vm6 = vcmask 392512  }
 0x7e0   :  { %v7232_v38 = vsel %vm5554_vm7, %v7231_v19, %v7227_v33  ;;  %v5399_v10 = vpop.permute.xlu0 %5398  ;;  %v16115_v33 = vld [vmem:[#allocation182_spill] sm:$0xff]  ;;  %v6274_v19 = vsel %vm5540_vm5, %v6273_v18, %v6269_v43  ;;  %v16124_v18 = vld [vmem:[#allocation185_spill] sm:$0xff] }
 0x7e1   :  { %v5390_v58 = vpop.permute.xlu1 %5389  ;;  %v7237_v12 = vsel %vm5561_vm8, %v7236_v61, %v7232_v38  ;;  %v7256_v55 = vrot.slane %v5399_v10, %v12401_v22  ;;  %v6337_v48 = vrot.slane %v16115_v33, %v12342_v50  ;;  %v16116_v61 = vld [vmem:[#allocation177_spill] sm:$0xff]  ;;  %v16117_v10 = vld [vmem:[#allocation176_spill] sm:$0xff]  ;;  %v6362_v16 = vrot.slane %v16124_v18, %v12384_v46  ;;  %v16127_v33 = vld [vmem:[#allocation382_spill] sm:$0xff] }
 0x7e2   :  { %v7241_v51 = vrot.slane %v5390_v58, %v12398_v32  ;;  %v6283_v38 = vrot.slane %v16116_v61, %v12384_v46 }
 0x7e4   :  { %v7242_v63 = vsel %vm5568_vm9, %v7241_v51, %v7237_v12  ;;  %v13690_v7 = vpop.permute.xlu0 %5413  ;;  %v6278_v51 = vrot.slane %v16117_v10, %v12351_v31 }
 0x7e5   :  { %v5396_v0 = vpop.permute.xlu1 %5395  ;;  %v7247_v25 = vsel %vm5575_vm10, %v7246_v37, %v7242_v63  ;;  %v6338_v37 = vsel %vm5519_vm2, %v6337_v48, %v6333_v36  ;;  %v6357_v36 = vrot.slane %v16125_v4, %v12351_v31  ;;  %v6412_v48 = vrot.slane %v16127_v33, %v12319_v6 }
 0x7e6   :  { %v7251_v40 = vrot.slane %v5396_v0, %v12412_v47  ;;  %v6343_v63 = vsel %vm16118_vm4, %v6342_v42, %v6338_v37  ;;  %v16119_v0 = vld [vmem:[#allocation376_spill] sm:$0xff]  ;;  %v16126_v42 = vld [vmem:[#allocation179_spill] sm:$0xff]  ;;  %vm16129_vm4 = vmmov %vm16120_vm6 }
 0x7e7   :  { %v6303_v43 = vrot.slane %v16126_v42, %v12412_v47  ;;  %v16130_v37 = vld [vmem:[#allocation191_spill] sm:$0xff]  ;;  %v16137_v42 = vld [vmem:[#allocation384_spill] sm:$0xff] }
 0x7e8   :  { %v7252_v11 = vsel %vm5582_vm11, %v7251_v40, %v7247_v25  ;;  %v13700_v54 = vpop.permute.xlu0 %5419  ;;  %v6352_v25 = vrot.slane %v16119_v0, %v12362_v56  ;;  %v6279_v40 = vsel %vm16120_vm6, %v6278_v51, %v6274_v19  ;;  %vm16136_vm6 = vcmask 195712  }
 0x7e9   :  { %v13695_v9 = vpop.permute.xlu1 %5401  ;;  %v13698_v35 = vsel %vm5589_vm12, %v7256_v55, %v7252_v11  ;;  %v16121_v55 = vld [vmem:[#allocation379_spill] sm:$0xff]  ;;  %v6284_v8 = vsel %vm5554_vm7, %v6283_v38, %v6279_v40  ;;  %v16128_v38 = vld [vmem:[#allocation178_spill] sm:$0xff]  ;;  %v6431_v33 = vrot.slane %v16137_v42, %v12362_v56  ;;  %v16144_v42 = vld [vmem:[#allocation192_spill] sm:$0xff] }
 0x7ea   :  { %v6347_v11 = vrot.slane %v16121_v55, %v12345_v44  ;;  %v6289_v57 = vsel %vm5561_vm8, %v6288_v26, %v6284_v8  ;;  %v6298_v10 = vrot.slane %v16128_v38, %v12387_v52  ;;  %v16132_v55 = vld [vmem:[#allocation190_spill] sm:$0xff]  ;;  %v16134_v26 = vld [vmem:[#allocation372_spill] sm:$0xff]  ;;  %v16138_v38 = vld [vmem:[#allocation187_spill] sm:$0xff] }
 0x7eb   :  { %v6294_v60 = vsel %vm5568_vm9, %v6293_v21, %v6289_v57  ;;  %v6367_v21 = vrot.slane %v16133_v30, %v12365_v17  ;;  %v16135_v57 = vld [vmem:[#allocation375_spill] sm:$0xff] }
 0x7ec   :  { %v13704_v13 = vpop.permute.xlu0 %5461  ;;  %v6348_v23 = vsel %vm16114_vm3, %v6347_v11, %v6343_v63  ;;  %v6421_v63 = vrot.slane %v16130_v37, %v12348_v53  ;;  %v6416_v11 = vrot.slane %v16132_v55, %v12342_v50  ;;  %v6299_v8 = vsel %vm5575_vm10, %v6298_v10, %v6294_v60 }
 0x7ed   :  { %v13702_v59 = vpop.permute.xlu1 %5416  ;;  %v6353_v5 = vsel %vm5540_vm5, %v6352_v25, %v6348_v23  ;;  %v16131_v25 = vld [vmem:[#allocation378_spill] sm:$0xff]  ;;  %v6304_v39 = vsel %vm5582_vm11, %v6303_v43, %v6299_v8  ;;  %v6313_v23 = vrot.slane %v16134_v26, %v12429_v62  ;;  %v6308_v4 = vrot.slane %v16135_v57, %v12401_v22  ;;  %v16142_v8 = vld [vmem:[#allocation181_spill] sm:$0xff] }
 0x7ee   :  { %v6358_v51 = vsel %vm16129_vm4, %v6357_v36, %v6353_v5  ;;  %v6372_v40 = vrot.slane %v16131_v25, %v12398_v32  ;;  %v6417_v5 = vsel %vm5519_vm2, %v6416_v11, %v6412_v48  ;;  %v6382_v10 = vrot.slane %v16138_v38, %v12412_v47  ;;  %v16139_v48 = vld [vmem:[#allocation387_spill] sm:$0xff]  ;;  %v16140_v25 = vld [vmem:[#allocation186_spill] sm:$0xff]  ;;  %v16143_v57 = vld [vmem:[#allocation193_spill] sm:$0xff] }
 0x7ef   :  { %v6363_v0 = vsel %vm5554_vm7, %v6362_v16, %v6358_v51  ;;  %v6422_v60 = vsel %vm16136_vm6, %v6421_v63, %v6417_v5  ;;  %v6426_v51 = vrot.slane %v16139_v48, %v12345_v44  ;;  %v6309_v37 = vsel %vm5589_vm12, %v6308_v4, %v6304_v39  ;;  %v16145_v48 = vld [vmem:[#allocation383_spill] sm:$0xff] }
 0x7f0   :  { %v13708_v41 = vpop.permute.xlu0 %5425  ;;  %v6368_v36 = vsel %vm5561_vm8, %v6367_v21, %v6363_v0  ;;  %v6377_v55 = vrot.slane %v16140_v25, %v12387_v52  ;;  %v16141_v0 = vld [vmem:[#allocation180_spill] sm:$0xff]  ;;  %v6314_v63 = vsel %vm5596_vm13, %v6313_v23, %v6309_v37  ;;  %v6323_v30 = vrot.slane %v16142_v8, %v12446_v27  ;;  %v16147_v25 = vld [vmem:[#allocation377_spill] sm:$0xff] }
 0x7f1   :  { %v13706_v49 = vpop.permute.xlu1 %5422  ;;  %v6373_v43 = vsel %vm5568_vm9, %v6372_v40, %v6368_v36  ;;  %v6318_v11 = vrot.slane %v16141_v0, %v12415_v14  ;;  %v6427_v40 = vsel %vm16114_vm3, %v6426_v51, %v6422_v60  ;;  %v6441_v4 = vrot.slane %v16143_v57, %v12384_v46 }
 0x7f2   :  { %v6378_v5 = vsel %vm5575_vm10, %v6377_v55, %v6373_v43  ;;  %v6432_v39 = vsel %vm5540_vm5, %v6431_v33, %v6427_v40  ;;  %v7285_v36 = vrot.slane %v13702_v59, %v12342_v50  ;;  %v6436_v38 = vrot.slane %v16144_v42, %v12351_v31  ;;  %v16146_v43 = vld [vmem:[#allocation380_spill] sm:$0xff] }
 0x7f3   :  { %v6383_v23 = vsel %vm5582_vm11, %v6382_v10, %v6378_v5  ;;  %v6319_v60 = vsel %vm5603_vm14, %v6318_v11, %v6314_v63  ;;  %v6387_v51 = vrot.slane %v16145_v48, %v12401_v22  ;;  %v6392_v37 = vrot.slane %v16146_v43, %v12429_v62 }
 0x7f4   :  { %v7281_v33 = vrot.slane %v13690_v7, %v12319_v6  ;;  %v6328_v55 = vrot.slane %v16147_v25, %v12432_v2  ;;  %v6324_v59 = vsel %vm5610_vm15, %v6323_v30, %v6319_v60  ;;  %v6437_v10 = vsel %vm16129_vm4, %v6436_v38, %v6432_v39  ;;  %v16148_v30 = vld [vmem:[#allocation389_spill] sm:$0xff]  ;;  %v16149_v39 = vld [vmem:[#allocation386_spill] sm:$0xff] }
 0x7f5   :  { %v13710_v24 = vpop.permute.xlu1 %5464  ;;  %v13712_v3 = vpop.permute.xlu0 %5428  ;;  %v7261_v0 = vrot.slane %v13695_v9, %v12429_v62  ;;  %v6388_v8 = vsel %vm5589_vm12, %v6387_v51, %v6383_v23  ;;  %v6442_v40 = vsel %vm5554_vm7, %v6441_v4, %v6437_v10  ;;  %v7295_v5 = vrot.slane %v13706_v49, %v12345_v44  ;;  %v16150_v4 = vld [vmem:[#allocation188_spill] sm:$0xff]  ;;  %v16151_v49 = vld [vmem:[#allocation189_spill] sm:$0xff] }
 0x7f6   :  { %v7286_v7 = vsel %vm5519_vm2, %v7285_v36, %v7281_v33  ;;  %v6446_v57 = vrot.slane %v16148_v30, %v12365_v17  ;;  %v6451_v42 = vrot.slane %v16149_v39, %v12398_v32  ;;  %v7290_v9 = vrot.slane %v13700_v54, %v12348_v53 }
 0x7f7   :  { %v6329_v23 = vsel %vm5617_vm0, %v6328_v55, %v6324_v59  ;;  %v6397_v60 = vrot.slane %v16150_v4, %v12415_v14  ;;  %v13867_v36 = vsel %vm5596_vm13, %v6392_v37, %v6388_v8  ;;  %v6402_v48 = vrot.slane %v16151_v49, %v12446_v27  ;;  %v16152_v8 = vld [vmem:[#allocation194_spill] sm:$0xff] }
 0x7f8   :  { %v6447_v51 = vsel %vm5561_vm8, %v6446_v57, %v6442_v40  ;;  %v7262_v43 = vsel %vm5596_vm13, %v7261_v0, %v13698_v35  ;;  %v7291_v54 = vsel %vm16136_vm6, %v7290_v9, %v7286_v7  ;;  %v7364_v37 = vrot.slane %v13710_v24, %v12342_v50  ;;  %v16153_v7 = vld [vmem:[#allocation195_spill] sm:$0xff] }
 0x7f9   :  { %v13718_v29 = vpop.permute.xlu1 %5467  ;;  %v13720_v34 = vpop.permute.xlu0 %5431  ;;  %v7296_v55 = vsel %vm16114_vm3, %v7295_v5, %v7291_v54  ;;  %v6456_v40 = vrot.slane %v16152_v8, %v12387_v52  ;;  %v6452_v35 = vsel %vm5568_vm9, %v6451_v42, %v6447_v51  ;;  %v7305_v0 = vrot.slane %v13712_v3, %v12351_v31 }
 0x7fa   :  { %v6461_v5 = vrot.slane %v16153_v7, %v12412_v47  ;;  %v7360_v50 = vrot.slane %v13704_v13, %v12319_v6  ;;  %v7369_v24 = vrot.slane %v13718_v29, %v12348_v53  ;;  %v7310_v39 = vrot.slane %v13720_v34, %v12384_v46 }
 0x7fb   :  { %vm16154_vm6 = vcmask 1041408   ;;  %vm16155_vm3 = vcmask 195712  }
 0x7fc   :  { %v7365_v6 = vsel %vm5519_vm2, %v7364_v37, %v7360_v50  ;;  %vm16156_vm2 = vcmask 261312   ;;  %v16158_v37 = vld [vmem:[#allocation388_spill] sm:$0xff] }
 0x7fd   :  { %v13728_v28 = vpop.permute.xlu1 %5470  ;;  %v13730_v15 = vpop.permute.xlu0 %5434 }
 0x7fe   :  { %v7374_v3 = vrot.slane %v13728_v28, %v12345_v44  ;;  %v7315_v53 = vrot.slane %v13730_v15, %v12365_v17 }
 0x801   :  { %v13744_v58 = vpop.permute.xlu1 %5473  ;;  %v13746_v12 = vpop.permute.xlu0 %5437 }
 0x802   :  { %v7379_v13 = vrot.slane %v13744_v58, %v12362_v56  ;;  %v7320_v44 = vrot.slane %v13746_v12, %v12398_v32 }
 0x805   :  { %v13760_v45 = vpop.permute.xlu1 %5476  ;;  %v13762_v1 = vpop.permute.xlu0 %5440 }
 0x806   :  { %v7384_v28 = vrot.slane %v13760_v45, %v12351_v31  ;;  %v7325_v15 = vrot.slane %v13762_v1, %v12387_v52 }
 0x809   :  { %v13778_v19 = vpop.permute.xlu1 %5479  ;;  %v13780_v61 = vpop.permute.xlu0 %5443 }
 0x80a   :  { %v7330_v31 = vrot.slane %v13780_v61, %v12412_v47  ;;  %v6457_v61 = vsel %vm5575_vm10, %v6456_v40, %v6452_v35 }
 0x80d   :  { %v13799_v18 = vpop.permute.xlu1 %5482  ;;  %v5405_v16 = vpop.permute.xlu0 %5404 }
 0x80e   :  { %v7266_v38 = vrot.slane %v5405_v16, %v12415_v14  ;;  %v7300_v16 = vrot.slane %v13708_v41, %v12362_v56  ;;  %v7389_v56 = vrot.slane %v13778_v19, %v12384_v46  ;;  %v7394_v45 = vrot.slane %v13799_v18, %v12365_v17  ;;  %v16157_v19 = vld [vmem:[#allocation391_spill] sm:$0xff] }
 0x80f   :  { %v6462_v18 = vsel %vm5582_vm11, %v6461_v5, %v6457_v61 }
 0x810   :  { %v7267_v41 = vsel %vm5603_vm14, %v7266_v38, %v7262_v43  ;;  %v7301_v57 = vsel %vm5540_vm5, %v7300_v16, %v7296_v55  ;;  %v7370_v43 = vsel %vm16155_vm3, %v7369_v24, %v7365_v6  ;;  %v6398_v24 = vsel %vm5603_vm14, %v6397_v60, %v13867_v36 }
 0x811   :  { %v13821_v21 = vpop.permute.xlu1 %5485  ;;  %v13823_v26 = vpop.permute.xlu0 %5488  ;;  %v7306_v34 = vsel %vm16129_vm4, %v7305_v0, %v7301_v57  ;;  %v7375_v12 = vsel %vm16156_vm2, %v7374_v3, %v7370_v43 }
 0x812   :  { %v7399_v46 = vrot.slane %v13821_v21, %v12398_v32  ;;  %v7404_v8 = vrot.slane %v13823_v26, %v12387_v52 }
 0x815   :  { %v13847_v11 = vpop.permute.xlu1 %5446  ;;  %v13849_v63 = vpop.permute.xlu0 %5449 }
 0x816   :  { %v7340_v40 = vrot.slane %v13849_v63, %v12429_v62  ;;  %v16159_v63 = vld [vmem:[#allocation385_spill] sm:$0xff] }
 0x819   :  { %v5408_v33 = vpop.permute.xlu1 %5407  ;;  %v5411_v25 = vpop.permute.xlu0 %5410 }
 0x81a   :  { %v7271_v59 = vrot.slane %v5408_v33, %v12446_v27  ;;  %v7276_v10 = vrot.slane %v5411_v25, %v12432_v2  ;;  %v7380_v33 = vsel %vm5540_vm5, %v7379_v13, %v7375_v12  ;;  %v6466_v25 = vrot.slane %v16157_v19, %v12401_v22  ;;  %vm16163_vm5 = vmmov %vm16154_vm6 }
 0x81b   :  { %v7385_v17 = vsel %vm16129_vm4, %v7384_v28, %v7380_v33 }
 0x81c   :  { %v7272_v30 = vsel %vm5610_vm15, %v7271_v59, %v7267_v41  ;;  %v6471_v59 = vrot.slane %v16158_v37, %v12429_v62  ;;  %v7390_v32 = vsel %vm5554_vm7, %v7389_v56, %v7385_v17  ;;  %v6467_v52 = vsel %vm5589_vm12, %v6466_v25, %v6462_v18 }
 0x81d   :  { %v7277_v42 = vsel %vm5617_vm0, %v7276_v10, %v7272_v30  ;;  %v5492_v9 = vpop.permute.xlu1 %5491  ;;  %v13901_v38 = vpop.permute.xlu0 %5494  ;;  %v6407_v30 = vrot.slane %v16159_v63, %v12432_v2 }
 0x81e   :  { %v7446_v29 = vsel %vm7436_vm1, %v7277_v42, %v6329_v23  ;;  %v7311_v23 = vsel %vm5554_vm7, %v7310_v39, %v7306_v34  ;;  %v7409_v7 = vrot.slane %v5492_v9, %v12412_v47  ;;  %v6403_v47 = vsel %vm5610_vm15, %v6402_v48, %v6398_v24  ;;  %v16160_v39 = vld [vmem:[#allocation197_spill] sm:$0xff]  ;;  %vm16164_vm7 = vmmov %vm16163_vm5 }
 0x81f   :  { %v7479_v51 = vsel %vm16154_vm6, %v7446_v29, 0.0  ;;  %v7316_v1 = vsel %vm5561_vm8, %v7315_v53, %v7311_v23  ;;  %v6472_v57 = vsel %vm5596_vm13, %v6471_v59, %v6467_v52  ;;  %v6481_v3 = vrot.slane %v16160_v39, %v12446_v27  ;;  %v16161_v53 = vld [vmem:[#allocation196_spill] sm:$0xff] }
 0x820   :  { %v13921_v58 = vadd.f32 %v7479_v51, %v13672_v20  ;;  %v7335_v20 = vrot.slane %v13847_v11, %v12401_v22  ;;  %v7321_v55 = vsel %vm5568_vm9, %v7320_v44, %v7316_v1  ;;  %v7395_v11 = vsel %vm5561_vm8, %v7394_v45, %v7390_v32 }
 0x821   :  { %v5453_v54 = vpop.permute.xlu1 %5452  ;;  %v5498_v16 = vpop.permute.xlu0 %5497  ;;  %v7326_v10 = vsel %vm5575_vm10, %v7325_v15, %v7321_v55  ;;  %v7400_v0 = vsel %vm5568_vm9, %v7399_v46, %v7395_v11  ;;  %v7414_v36 = vrot.slane %v13901_v38, %v12401_v22  ;;  %v6476_v13 = vrot.slane %v16161_v53, %v12415_v14 }
 0x822   :  { %v7331_v21 = vsel %vm5582_vm11, %v7330_v31, %v7326_v10  ;;  %v7345_v5 = vrot.slane %v5453_v54, %v12415_v14  ;;  %v7405_v4 = vsel %vm5575_vm10, %v7404_v8, %v7400_v0  ;;  %v7419_v49 = vrot.slane %v5498_v16, %v12429_v62 }
 0x823   :  { %v7336_v41 = vsel %vm5589_vm12, %v7335_v20, %v7331_v21  ;;  %v7410_v9 = vsel %vm5582_vm11, %v7409_v7, %v7405_v4  ;;  %v6408_v44 = vsel %vm5617_vm0, %v6407_v30, %v6403_v47  ;;  %v6477_v28 = vsel %vm5603_vm14, %v6476_v13, %v6472_v57 }
 0x824   :  { %v7341_v60 = vsel %vm5596_vm13, %v7340_v40, %v7336_v41  ;;  %v7415_v51 = vsel %vm5589_vm12, %v7414_v36, %v7410_v9  ;;  %v6482_v15 = vsel %vm5610_vm15, %v6481_v3, %v6477_v28  ;;  %vm7510_vm8 = vcmask 1024  }
 0x825   :  { %v5456_v35 = vpop.permute.xlu1 %5455  ;;  %v5501_v50 = vpop.permute.xlu0 %5500  ;;  %v7346_v6 = vsel %vm5603_vm14, %v7345_v5, %v7341_v60  ;;  %v7420_v56 = vsel %vm5596_vm13, %v7419_v49, %v7415_v51 }
 0x826   :  { %v7350_v26 = vrot.slane %v5456_v35, %v12446_v27  ;;  %v7424_v34 = vrot.slane %v5501_v50, %v12415_v14  ;;  %v16162_v14 = vld [vmem:[#allocation393_spill] sm:$0xff] }
 0x827   :  { %v6486_v12 = vrot.slane %v16162_v14, %v12432_v2 }
 0x828   :  { %v7351_v29 = vsel %vm5610_vm15, %v7350_v26, %v7346_v6  ;;  %v7425_v31 = vsel %vm5603_vm14, %v7424_v34, %v7420_v56 }
 0x829   :  { %v5459_v42 = vpop.permute.xlu1 %5458  ;;  %v5507_v38 = vpop.permute.xlu0 %5506  ;;  %v6487_v33 = vsel %vm5617_vm0, %v6486_v12, %v6482_v15 }
 0x82a   :  { %v7355_v48 = vrot.slane %v5459_v42, %v12432_v2  ;;  %v7434_v45 = vrot.slane %v5507_v38, %v12432_v2  ;;  %v7508_v2 = vstv %s14016_s8 }
 0x82c   :  { %v7356_v22 = vsel %vm5617_vm0, %v7355_v48, %v7351_v29 }
 0x82d   :  { %v7447_v62 = vsel %vm7436_vm1, %v7356_v22, %v6408_v44  ;;  %v5504_v43 = vpop.permute.xlu1 %5503 }
 0x82e   :  { %v7429_v23 = vrot.slane %v5504_v43, %v12446_v27  ;;  %v7481_v54 = vsel %vm16163_vm5, %v7447_v62, 0.0 }
 0x82f   :  { %v7482_v20 = vadd.f32 %v7481_v54, %v13921_v58 }
 0x830   :  { %v7430_v16 = vsel %vm5610_vm15, %v7429_v23, %v7425_v31 }
 0x831   :  { %v7435_v1 = vsel %vm5617_vm0, %v7434_v45, %v7430_v16 }
 0x832   :  { %v7448_v46 = vsel %vm7436_vm1, %v7435_v1, %v6487_v33 }
 0x833   :  { %v7483_v27 = vsel %vm16164_vm7, %v7448_v46, 0.0 }
 0x834   :  { %v7484_v19 = vadd.f32 %v7483_v27, %v7482_v20 }
 0x836   :  { %7485 = vadd.xlane.f32.xlu1 %v7484_v19 }
 0x856   :  { %v7505_v25 = vpop.xlane.xlu0 %7504 }
 0x8bf   :  { %v7486_v61 = vpop.xlane.xlu1 %7485 }
 0x8c0   :  { %v7506_v55 = vadd.f32 %v7505_v25, %v7486_v61 }
 0x8c2   :  { %v7509_v17 = vadd.f32 %v7508_v2, %v7506_v55 }
 0x8c4   :  { %7511 = vst.msk [vmem:[%s14017_s9] sm:$0x3] %vm7510_vm8, %v7509_v17 }

</bundles_post_ra>
